<compile_context>
chip_gen: v6e
topology: v6e:2x2x1
jax: 0.10.0
libtpu: 0.0.40
codegen_flags: <defaults>
</compile_context>

<pallas_src>
import jax
import jax.numpy as jnp
from jax.experimental import pallas as pl
from jax.experimental.pallas import tpu as pltpu

_BN_EPS = 1e-5
_VMEM_LIMIT = 48 * 1024 * 1024     # safe on v5e/v6e (128 MiB) and v7x (64 MiB)
_TN_TARGET = 512                   # per-point-tile rows (multiple of 8)


# ----------------------------------------------------------------------------
# small helpers
# ----------------------------------------------------------------------------
def _round_up(x, m):
    return ((x + m - 1) // m) * m


def _pick_tile(n, target=_TN_TARGET):
    """Largest multiple-of-8 divisor of n that is <= target (else n itself)."""
    if n <= target:
        return n
    t = (target // 8) * 8
    while t >= 8:
        if n % t == 0:
            return t
        t -= 8
    return n  # TODO(synk): ragged N falls back to a single full-N tile


def _full_spec(a):
    """Full-array block, constant block index (kept resident across the grid)."""
    return pl.BlockSpec(a.shape, lambda *_, n=a.ndim: (0,) * n)


def _gridded_params(sem):
    return pltpu.CompilerParams(dimension_semantics=sem,
                                vmem_limit_bytes=_VMEM_LIMIT)


# ----------------------------------------------------------------------------
# kernel bodies
# ----------------------------------------------------------------------------
def _layer(x, w, b, relu=True):
    """y = relu?(x @ w + b): bf16 MXU operands, f32 accumulation + f32 elementwise."""
    y = jnp.dot(x.astype(jnp.bfloat16), w, preferred_element_type=jnp.float32) + b
    return jnp.maximum(y, 0.0) if relu else y


def _mlp3(x, w1, b1, w2, b2, w3, b3):
    h = _layer(x, w1[...], b1[...])
    h = _layer(h, w2[...], b2[...])
    return _layer(h, w3[...], b3[...], relu=False)


def _stn_point_kernel(x_ref, w1, b1, w2, b2, w3, b3, gmax_ref):
    """STN3d conv1..3 (+ReLU each) fused with max over points (resident accumulator)."""
    t = pl.program_id(1)
    h = _layer(x_ref[0], w1[...], b1[...])
    h = _layer(h, w2[...], b2[...])
    h = _layer(h, w3[...], b3[...])                      # STN conv3 has ReLU
    tile_max = jnp.max(h, axis=0, keepdims=True)         # (1, 1024)

    @pl.when(t == 0)
    def _():
        gmax_ref[0] = tile_max

    @pl.when(t != 0)
    def _():
        gmax_ref[0] = jnp.maximum(gmax_ref[0], tile_max)


def _enc_point_kernel(x_ref, w1_ref, b1, w2, b2, w3, b3, pw_ref, gmax_ref):
    """Encoder conv1..3 (conv3: BN only) fused with max-pool; also emits per-point features."""
    t = pl.program_id(1)
    h = _layer(x_ref[0], w1_ref[0], b1[...])             # w1 carries the folded STN transform
    h = _layer(h, w2[...], b2[...])
    h = _layer(h, w3[...], b3[...], relu=False)          # bn3, no ReLU
    pw_ref[0] = h.astype(pw_ref.dtype)                   # bf16 point-wise features
    tile_max = jnp.max(h, axis=0, keepdims=True)

    @pl.when(t == 0)
    def _():
        gmax_ref[0] = tile_max

    @pl.when(t != 0)
    def _():
        gmax_ref[0] = jnp.maximum(gmax_ref[0], tile_max)


def _stn_fc_kernel(g_ref, w1, b1, w2, b2, w3, b3, o_ref):
    o_ref[...] = _mlp3(g_ref[...], w1, b1, w2, b2, w3, b3).astype(o_ref.dtype)


def _heads_kernel(g_ref,
                  cw1, cb1, cw2, cb2, cw3, cb3,
                  mw1, mb1, mw2, mb2, mw3, mb3,
                  aw1, ab1, aw2, ab2, aw3, ab3,
                  swg, sb1,
                  cls_ref, ma_ref, abo_ref, sg_ref):
    """cls / main_axis / ab heads + seg-conv1 global term in one launch."""
    g = g_ref[...]
    cls_ref[...] = _mlp3(g, cw1, cb1, cw2, cb2, cw3, cb3).astype(cls_ref.dtype)
    ma_ref[...] = _mlp3(g, mw1, mb1, mw2, mb2, mw3, mb3).astype(ma_ref.dtype)
    abo_ref[...] = _mlp3(g, aw1, ab1, aw2, ab2, aw3, ab3).astype(abo_ref.dtype)
    sg = jnp.dot(g.astype(jnp.bfloat16), swg[...],
                 preferred_element_type=jnp.float32) + sb1[...]
    sg_ref[...] = sg.astype(sg_ref.dtype)                # (B, 512), no ReLU here


def _seg_point_kernel(pw_ref, sg_ref, wpw, w2, b2, w3, b3, o_ref):
    """seg conv1..3 fused; conv1 = pw @ W_pw + (g @ W_g + b1) (global term precomputed)."""
    s = jnp.dot(pw_ref[0], wpw[...], preferred_element_type=jnp.float32) + sg_ref[0]
    s = jnp.maximum(s, 0.0)
    s = _layer(s, w2[...], b2[...])
    s = _layer(s, w3[...], b3[...], relu=False)
    o_ref[0] = s.astype(o_ref.dtype)


# ----------------------------------------------------------------------------
# pallas_call wrappers
# ----------------------------------------------------------------------------
def stn_point_maxpool(x_pad, prm):
    B, N, CP = x_pad.shape
    tn = _pick_tile(N)
    w1, b1 = prm["c1"]
    w2, b2 = prm["c2"]
    w3, b3 = prm["c3"]
    gmax = pl.pallas_call(
        _stn_point_kernel,
        out_shape=jax.ShapeDtypeStruct((B, 1, 1024), jnp.float32),
        grid=(B, N // tn),
        in_specs=[pl.BlockSpec((1, tn, CP), lambda b, t: (b, t, 0)),
                  _full_spec(w1), _full_spec(b1),
                  _full_spec(w2), _full_spec(b2),
                  _full_spec(w3), _full_spec(b3)],
        out_specs=pl.BlockSpec((1, 1, 1024), lambda b, t: (b, 0, 0)),
        compiler_params=_gridded_params(("parallel", "arbitrary")),
    )(x_pad, w1, b1, w2, b2, w3, b3)
    return gmax[:, 0, :]                                  # [B, 1024]


def stn_fc(g, prm):
    B = g.shape[0]
    w1, b1 = prm["f1"]
    w2, b2 = prm["f2"]
    w3, b3 = prm["f3"]
    args = (g, w1, b1, w2, b2, w3, b3)
    return pl.pallas_call(
        _stn_fc_kernel,
        out_shape=jax.ShapeDtypeStruct((B, 9), jnp.float32),
        in_specs=[_full_spec(a) for a in args],
        out_specs=pl.BlockSpec((B, 9), lambda: (0, 0)),
    )(*args)


def enc_point_maxpool(x_pad, w1_eff, prm):
    B, N, CP = x_pad.shape
    tn = _pick_tile(N)
    b1 = prm["c1_b"]
    w2, b2 = prm["c2"]
    w3, b3 = prm["c3"]
    pw, gmax = pl.pallas_call(
        _enc_point_kernel,
        out_shape=(jax.ShapeDtypeStruct((B, N, 1024), jnp.bfloat16),
                   jax.ShapeDtypeStruct((B, 1, 1024), jnp.float32)),
        grid=(B, N // tn),
        in_specs=[pl.BlockSpec((1, tn, CP), lambda b, t: (b, t, 0)),
                  pl.BlockSpec((1, CP, 64), lambda b, t: (b, 0, 0)),
                  _full_spec(b1),
                  _full_spec(w2), _full_spec(b2),
                  _full_spec(w3), _full_spec(b3)],
        out_specs=[pl.BlockSpec((1, tn, 1024), lambda b, t: (b, t, 0)),
                   pl.BlockSpec((1, 1, 1024), lambda b, t: (b, 0, 0))],
        compiler_params=_gridded_params(("parallel", "arbitrary")),
    )(x_pad, w1_eff, b1, w2, b2, w3, b3)
    return pw, gmax[:, 0, :]                              # [B,N,1024] bf16, [B,1024] f32


def global_heads(g, params):
    B = g.shape[0]
    cls_p, ma_p, ab_p, seg_p = params["cls"], params["main_axis"], params["ab"], params["seg"]
    num_cls = cls_p["l3"][0].shape[1]
    args = (g,
            *cls_p["l1"], *cls_p["l2"], *cls_p["l3"],
            *ma_p["l1"], *ma_p["l2"], *ma_p["l3"],
            *ab_p["l1"], *ab_p["l2"], *ab_p["l3"],
            seg_p["wg"], seg_p["b1"])
    return pl.pallas_call(
        _heads_kernel,
        out_shape=(jax.ShapeDtypeStruct((B, num_cls), jnp.float32),
                   jax.ShapeDtypeStruct((B, 3), jnp.float32),
                   jax.ShapeDtypeStruct((B, 2), jnp.float32),
                   jax.ShapeDtypeStruct((B, 512), jnp.float32)),
        in_specs=[_full_spec(a) for a in args],
        out_specs=[pl.BlockSpec((B, num_cls), lambda: (0, 0)),
                   pl.BlockSpec((B, 3), lambda: (0, 0)),
                   pl.BlockSpec((B, 2), lambda: (0, 0)),
                   pl.BlockSpec((B, 512), lambda: (0, 0))],
    )(*args)


def seg_head(pw, seg_global, prm):
    B, N, _ = pw.shape
    tn = _pick_tile(N)
    wpw = prm["wpw"]
    w2, b2 = prm["c2"]
    w3, b3 = prm["c3"]
    sg3 = seg_global.reshape(B, 1, 512)
    return pl.pallas_call(
        _seg_point_kernel,
        out_shape=jax.ShapeDtypeStruct((B, N, 6), jnp.float32),
        grid=(B, N // tn),
        in_specs=[pl.BlockSpec((1, tn, 1024), lambda b, t: (b, t, 0)),
                  pl.BlockSpec((1, 1, 512), lambda b, t: (b, 0, 0)),
                  _full_spec(wpw),
                  _full_spec(w2), _full_spec(b2),
                  _full_spec(w3), _full_spec(b3)],
        out_specs=pl.BlockSpec((1, tn, 6), lambda b, t: (b, t, 0)),
        compiler_params=_gridded_params(("parallel", "parallel")),
    )(pw, sg3, wpw, w2, b2, w3, b3)                       # [B, N, 6]


# ----------------------------------------------------------------------------
# deterministic synthetic parameters (eval-mode BatchNorm folded in)
# ----------------------------------------------------------------------------
def _init_linear(key, in_dim, out_dim):
    k1, k2 = jax.random.split(key)
    w = 0.05 * jax.random.normal(k1, (in_dim, out_dim), jnp.float32)
    b = 0.05 * jax.random.normal(k2, (out_dim,), jnp.float32)
    return w, b


def _init_bn(key, dim):
    k1, k2 = jax.random.split(key)
    gamma = 1.0 + 0.1 * jax.random.normal(k1, (dim,), jnp.float32)
    beta = 0.1 * jax.random.normal(k2, (dim,), jnp.float32)
    return gamma, beta, jnp.zeros((dim,), jnp.float32), jnp.ones((dim,), jnp.float32)


def _fold_bn(wb, bn):
    w, b = wb
    gamma, beta, mean, var = bn
    s = gamma / jnp.sqrt(var + _BN_EPS)
    return w * s[None, :], (b - mean) * s + beta


def _lin_bn(key, in_dim, out_dim):
    k1, k2 = jax.random.split(key)
    return _fold_bn(_init_linear(k1, in_dim, out_dim), _init_bn(k2, out_dim))


def _pack(w, b):
    """bf16 weight for the MXU, f32 (1, out) bias row."""
    return w.astype(jnp.bfloat16), b.reshape(1, -1).astype(jnp.float32)


def init_params(seed=0, channel=3, num_cls=10):
    key = jax.random.PRNGKey(seed)
    ks = list(jax.random.split(key, 32))
    cp = _round_up(max(channel, 8), 8)                    # pad K=3 -> 8 for the first layer
    p = {"channel": channel, "cp": cp}

    # STN3d (c1 weight zero-padded channel -> cp)
    w, b = _lin_bn(ks[0], channel, 64)
    w = jnp.pad(w, ((0, cp - channel), (0, 0)))
    p["stn"] = {
        "c1": _pack(w, b),
        "c2": _pack(*_lin_bn(ks[1], 64, 128)),
        "c3": _pack(*_lin_bn(ks[2], 128, 1024)),
        "f1": _pack(*_lin_bn(ks[3], 1024, 512)),
        "f2": _pack(*_lin_bn(ks[4], 512, 256)),
        "f3": _pack(*_init_linear(ks[5], 256, 9)),
    }

    # Encoder — conv1 kept f32 / un-padded so the STN transform can be folded per batch
    w1, b1 = _lin_bn(ks[6], channel, 64)
    p["enc"] = {
        "c1_w": w1,                                       # [channel, 64] f32
        "c1_b": b1.reshape(1, -1).astype(jnp.float32),
        "c2": _pack(*_lin_bn(ks[7], 64, 128)),
        "c3": _pack(*_lin_bn(ks[8], 128, 1024)),
    }

    p["cls"] = {
        "l1": _pack(*_lin_bn(ks[9], 1024, 512)),
        "l2": _pack(*_lin_bn(ks[10], 512, 256)),
        "l3": _pack(*_init_linear(ks[11], 256, num_cls)),
    }

    # seg conv1 [2048, 512]: split into global half (rows 0..1023) and point half (1024..2047)
    wseg, bseg = _lin_bn(ks[12], 2048, 512)
    p["seg"] = {
        "wg": wseg[:1024].astype(jnp.bfloat16),
        "wpw": wseg[1024:].astype(jnp.bfloat16),
        "b1": bseg.reshape(1, -1).astype(jnp.float32),
        "c2": _pack(*_lin_bn(ks[13], 512, 256)),
        "c3": _pack(*_init_linear(ks[14], 256, 6)),
    }

    p["main_axis"] = {
        "l1": _pack(*_lin_bn(ks[15], 1024, 512)),
        "l2": _pack(*_lin_bn(ks[16], 512, 256)),
        "l3": _pack(*_init_linear(ks[17], 256, 3)),
    }
    p["ab"] = {
        "l1": _pack(*_lin_bn(ks[18], 1024, 512)),
        "l2": _pack(*_lin_bn(ks[19], 512, 256)),
        "l3": _pack(*_init_linear(ks[20], 256, 2)),
    }
    return p


# ----------------------------------------------------------------------------
# forward pass
# ----------------------------------------------------------------------------
def encoder_forward(points_bcn, params):
    B, C, N = points_bcn.shape
    cp = params["cp"]
    x = jnp.transpose(points_bcn, (0, 2, 1))              # [B, N, C] channels-last
    x_pad = jnp.pad(x, ((0, 0), (0, 0), (0, cp - C))).astype(jnp.float32)

    # STN3d: fused per-point convs + max-pool, then the small FC head
    g_stn = stn_point_maxpool(x_pad, params["stn"])       # [B, 1024]
    t9 = stn_fc(g_stn, params["stn"])                     # [B, 9]
    trans = t9.reshape(B, 3, 3) + jnp.eye(3, dtype=jnp.float32)[None]

    # Fold the STN transform into conv1:  (x[:, :, :3] @ T) @ W1[:3] == x[:, :, :3] @ (T @ W1[:3])
    w1 = params["enc"]["c1_w"]                            # [C, 64] f32
    w1_eff = jnp.einsum("bij,jk->bik", trans, w1[:3])     # [B, 3, 64]
    if C > 3:                                             # torch split/cat path: extra feats untransformed
        w1_eff = jnp.concatenate(
            [w1_eff, jnp.broadcast_to(w1[3:][None], (B, C - 3, 64))], axis=1)
    w1_eff = jnp.pad(w1_eff, ((0, 0), (0, cp - C), (0, 0))).astype(jnp.bfloat16)

    pw_feat, global_feat = enc_point_maxpool(x_pad, w1_eff, params["enc"])
    return global_feat, trans, None, pw_feat              # trans_feat = None


def pointnet_cls_seg_forward(points_bcn, params):
    global_feat, _, trans_feat, pw_feat = encoder_forward(points_bcn, params)

    # cls / main_axis / ab heads + seg-conv1 global term, one launch (Dropout = identity)
    cls, main_axis, ab, seg_global = global_heads(global_feat, params)

    # fused seg head (conv1 point-half + conv2 + conv3), only the 6-wide result hits HBM
    seg_bnc = seg_head(pw_feat, seg_global, params["seg"])     # [B, N, 6]
    seg = jnp.transpose(seg_bnc, (0, 2, 1))                    # [B, 6, N] torch layout

    scale = None
    return cls, trans_feat, seg, main_axis, scale, ab


# ----------------------------------------------------------------------------
if __name__ == "__main__":
    B, C, N = 2, 3, 16
    key = jax.random.PRNGKey(0)
    points = jax.random.normal(key, (B, C, N), jnp.float32)    # torch layout [B, C, N]

    params = init_params(seed=0, channel=C, num_cls=10)

    fwd = jax.jit(lambda pts: pointnet_cls_seg_forward(pts, params))
    cls, trans_feat, seg, main_axis, scale, ab = fwd(points)

    jax.block_until_ready((cls, seg, main_axis, ab))
    assert cls.shape == (B, 10)
    assert trans_feat is None
    assert seg.shape == (B, 6, N)
    assert main_axis.shape == (B, 3)
    assert scale is None
    assert ab.shape == (B, 2)
    print("KERNEL_OK")
</pallas_src>

<mosaic_0001>
module attributes {stable_mosaic.version = 11 : i64} {
  func.func @_stn_point_kernel(%arg0: i32, %arg1: i32, %arg2: memref<1x16x8xf32, #tpu.memory_space<vmem>>, %arg3: memref<8x64xbf16, #tpu.memory_space<vmem>>, %arg4: memref<1x64xf32, #tpu.memory_space<vmem>>, %arg5: memref<64x128xbf16, #tpu.memory_space<vmem>>, %arg6: memref<1x128xf32, #tpu.memory_space<vmem>>, %arg7: memref<128x1024xbf16, #tpu.memory_space<vmem>>, %arg8: memref<1x1024xf32, #tpu.memory_space<vmem>>, %arg9: memref<1x1x1024xf32, #tpu.memory_space<vmem>>) attributes {dimension_semantics = [#tpu.dimension_semantics<parallel>, #tpu.dimension_semantics<arbitrary>], iteration_bounds = array<i64: 2, 1>, scalar_prefetch = 0 : i64, scratch_operands = 0 : i64, tpu.core_type = #tpu.core_type<tc>, window_params = [{transform_indices = @transform_0, window_bounds = array<i64: 1, 16, 8>}, {pipeline_mode = #tpu.pipeline_mode<synchronous>, transform_indices = @transform_1, window_bounds = array<i64: 8, 64>}, {pipeline_mode = #tpu.pipeline_mode<synchronous>, transform_indices = @transform_2, window_bounds = array<i64: 1, 64>}, {pipeline_mode = #tpu.pipeline_mode<synchronous>, transform_indices = @transform_3, window_bounds = array<i64: 64, 128>}, {pipeline_mode = #tpu.pipeline_mode<synchronous>, transform_indices = @transform_4, window_bounds = array<i64: 1, 128>}, {pipeline_mode = #tpu.pipeline_mode<synchronous>, transform_indices = @transform_5, window_bounds = array<i64: 128, 1024>}, {pipeline_mode = #tpu.pipeline_mode<synchronous>, transform_indices = @transform_6, window_bounds = array<i64: 1, 1024>}, {transform_indices = @transform_7, window_bounds = array<i64: 1, 1, 1024>}]} {
    %c0 = arith.constant 0 : index
    %c0_0 = arith.constant 0 : index
    %c0_1 = arith.constant 0 : index
    %0 = vector.load %arg2[%c0, %c0_0, %c0_1] : memref<1x16x8xf32, #tpu.memory_space<vmem>>, vector<1x16x8xf32>
    %1 = vector.shape_cast %0 : vector<1x16x8xf32> to vector<16x8xf32>
    %c0_2 = arith.constant 0 : index
    %c0_3 = arith.constant 0 : index
    %2 = vector.load %arg3[%c0_2, %c0_3] : memref<8x64xbf16, #tpu.memory_space<vmem>>, vector<8x64xbf16>
    %c0_4 = arith.constant 0 : index
    %c0_5 = arith.constant 0 : index
    %3 = vector.load %arg4[%c0_4, %c0_5] : memref<1x64xf32, #tpu.memory_space<vmem>>, vector<1x64xf32>
    %4 = arith.truncf %1 : vector<16x8xf32> to vector<16x8xbf16>
    %cst = arith.constant dense<0.000000e+00> : vector<16x64xf32>
    %5 = tpu.matmul %4, %2, %cst {dimension_numbers = #tpu.dot_dimension_numbers<[1], [0], [0], [1], [0, 0, 1, 1], [], []>} : vector<16x8xbf16>, vector<8x64xbf16>, vector<16x64xf32> -> vector<16x64xf32>
    %6 = vector.broadcast %3 : vector<1x64xf32> to vector<16x64xf32>
    %7 = arith.addf %5, %6 : vector<16x64xf32>
    %cst_6 = arith.constant 0.000000e+00 : f32
    %8 = vector.broadcast %cst_6 : f32 to vector<16x64xf32>
    %9 = arith.maximumf %7, %8 : vector<16x64xf32>
    %c0_7 = arith.constant 0 : index
    %c0_8 = arith.constant 0 : index
    %10 = vector.load %arg5[%c0_7, %c0_8] : memref<64x128xbf16, #tpu.memory_space<vmem>>, vector<64x128xbf16>
    %c0_9 = arith.constant 0 : index
    %c0_10 = arith.constant 0 : index
    %11 = vector.load %arg6[%c0_9, %c0_10] : memref<1x128xf32, #tpu.memory_space<vmem>>, vector<1x128xf32>
    %12 = arith.truncf %9 : vector<16x64xf32> to vector<16x64xbf16>
    %cst_11 = arith.constant dense<0.000000e+00> : vector<16x128xf32>
    %13 = tpu.matmul %12, %10, %cst_11 {dimension_numbers = #tpu.dot_dimension_numbers<[1], [0], [0], [1], [0, 0, 1, 1], [], []>} : vector<16x64xbf16>, vector<64x128xbf16>, vector<16x128xf32> -> vector<16x128xf32>
    %14 = vector.broadcast %11 : vector<1x128xf32> to vector<16x128xf32>
    %15 = arith.addf %13, %14 : vector<16x128xf32>
    %cst_12 = arith.constant 0.000000e+00 : f32
    %16 = vector.broadcast %cst_12 : f32 to vector<16x128xf32>
    %17 = arith.maximumf %15, %16 : vector<16x128xf32>
    %c0_13 = arith.constant 0 : index
    %c0_14 = arith.constant 0 : index
    %18 = vector.load %arg7[%c0_13, %c0_14] : memref<128x1024xbf16, #tpu.memory_space<vmem>>, vector<128x1024xbf16>
    %c0_15 = arith.constant 0 : index
    %c0_16 = arith.constant 0 : index
    %19 = vector.load %arg8[%c0_15, %c0_16] : memref<1x1024xf32, #tpu.memory_space<vmem>>, vector<1x1024xf32>
    %20 = arith.truncf %17 : vector<16x128xf32> to vector<16x128xbf16>
    %cst_17 = arith.constant dense<0.000000e+00> : vector<16x1024xf32>
    %21 = tpu.matmul %20, %18, %cst_17 {dimension_numbers = #tpu.dot_dimension_numbers<[1], [0], [0], [1], [0, 0, 1, 1], [], []>} : vector<16x128xbf16>, vector<128x1024xbf16>, vector<16x1024xf32> -> vector<16x1024xf32>
    %22 = vector.broadcast %19 : vector<1x1024xf32> to vector<16x1024xf32>
    %23 = arith.addf %21, %22 : vector<16x1024xf32>
    %cst_18 = arith.constant 0.000000e+00 : f32
    %24 = vector.broadcast %cst_18 : f32 to vector<16x1024xf32>
    %25 = arith.maximumf %23, %24 : vector<16x1024xf32>
    %cst_19 = arith.constant dense<0xFF800000> : vector<1024xf32>
    %26 = vector.multi_reduction <maximumf>, %25, %cst_19 [0] : vector<16x1024xf32> to vector<1024xf32>
    %27 = vector.shape_cast %26 : vector<1024xf32> to vector<1x1024xf32>
    %c0_i32 = arith.constant 0 : i32
    %28 = arith.cmpi eq, %arg1, %c0_i32 : i32
    %29 = arith.extui %28 : i1 to i32
    %c0_i32_20 = arith.constant 0 : i32
    %30 = arith.cmpi ne, %29, %c0_i32_20 : i32
    scf.if %30 {
      %c0_23 = arith.constant 0 : index
      %c0_24 = arith.constant 0 : index
      %c0_25 = arith.constant 0 : index
      %34 = vector.load %arg9[%c0_23, %c0_24, %c0_25] : memref<1x1x1024xf32, #tpu.memory_space<vmem>>, vector<1x1x1024xf32>
      %35 = vector.shape_cast %34 : vector<1x1x1024xf32> to vector<1x1024xf32>
      %36 = vector.shape_cast %27 : vector<1x1024xf32> to vector<1x1x1024xf32>
      tpu.vector_store %arg9[%c0_23, %c0_24, %c0_25], %36 {strides = array<i32>} : memref<1x1x1024xf32, #tpu.memory_space<vmem>>, vector<1x1x1024xf32>,
    } else {
    }
    %c0_i32_21 = arith.constant 0 : i32
    %31 = arith.cmpi ne, %arg1, %c0_i32_21 : i32
    %32 = arith.extui %31 : i1 to i32
    %c0_i32_22 = arith.constant 0 : i32
    %33 = arith.cmpi ne, %32, %c0_i32_22 : i32
    scf.if %33 {
      %c0_23 = arith.constant 0 : index
      %c0_24 = arith.constant 0 : index
      %c0_25 = arith.constant 0 : index
      %34 = vector.load %arg9[%c0_23, %c0_24, %c0_25] : memref<1x1x1024xf32, #tpu.memory_space<vmem>>, vector<1x1x1024xf32>
      %35 = vector.shape_cast %34 : vector<1x1x1024xf32> to vector<1x1024xf32>
      %36 = arith.maximumf %35, %27 : vector<1x1024xf32>
      %c0_26 = arith.constant 0 : index
      %c0_27 = arith.constant 0 : index
      %c0_28 = arith.constant 0 : index
      %37 = vector.load %arg9[%c0_26, %c0_27, %c0_28] : memref<1x1x1024xf32, #tpu.memory_space<vmem>>, vector<1x1x1024xf32>
      %38 = vector.shape_cast %37 : vector<1x1x1024xf32> to vector<1x1024xf32>
      %39 = vector.shape_cast %36 : vector<1x1024xf32> to vector<1x1x1024xf32>
      tpu.vector_store %arg9[%c0_26, %c0_27, %c0_28], %39 {strides = array<i32>} : memref<1x1x1024xf32, #tpu.memory_space<vmem>>, vector<1x1x1024xf32>,
    } else {
    }
    return
  }
  func.func @transform_0(%arg0: i32, %arg1: i32) -> (i32, i32, i32) {
    %c0_i32 = arith.constant 0 : i32
    %c0_i32_0 = arith.constant 0 : i32
    return %arg0, %arg1, %c0_i32 : i32, i32, i32
  }
  func.func @transform_1(%arg0: i32, %arg1: i32) -> (i32, i32) {
    %c0_i32 = arith.constant 0 : i32
    %c0_i32_0 = arith.constant 0 : i32
    %c0_i32_1 = arith.constant 0 : i32
    return %c0_i32, %c0_i32_0 : i32, i32
  }
  func.func @transform_2(%arg0: i32, %arg1: i32) -> (i32, i32) {
    %c0_i32 = arith.constant 0 : i32
    %c0_i32_0 = arith.constant 0 : i32
    %c0_i32_1 = arith.constant 0 : i32
    return %c0_i32, %c0_i32_0 : i32, i32
  }
  func.func @transform_3(%arg0: i32, %arg1: i32) -> (i32, i32) {
    %c0_i32 = arith.constant 0 : i32
    %c0_i32_0 = arith.constant 0 : i32
    %c0_i32_1 = arith.constant 0 : i32
    return %c0_i32, %c0_i32_0 : i32, i32
  }
  func.func @transform_4(%arg0: i32, %arg1: i32) -> (i32, i32) {
    %c0_i32 = arith.constant 0 : i32
    %c0_i32_0 = arith.constant 0 : i32
    %c0_i32_1 = arith.constant 0 : i32
    return %c0_i32, %c0_i32_0 : i32, i32
  }
  func.func @transform_5(%arg0: i32, %arg1: i32) -> (i32, i32) {
    %c0_i32 = arith.constant 0 : i32
    %c0_i32_0 = arith.constant 0 : i32
    %c0_i32_1 = arith.constant 0 : i32
    return %c0_i32, %c0_i32_0 : i32, i32
  }
  func.func @transform_6(%arg0: i32, %arg1: i32) -> (i32, i32) {
    %c0_i32 = arith.constant 0 : i32
    %c0_i32_0 = arith.constant 0 : i32
    %c0_i32_1 = arith.constant 0 : i32
    return %c0_i32, %c0_i32_0 : i32, i32
  }
  func.func @transform_7(%arg0: i32, %arg1: i32) -> (i32, i32, i32) {
    %c0_i32 = arith.constant 0 : i32
    %c0_i32_0 = arith.constant 0 : i32
    %c0_i32_1 = arith.constant 0 : i32
    return %arg0, %c0_i32, %c0_i32_0 : i32, i32, i32
  }
}

module attributes {stable_mosaic.version = 11 : i64} {
  func.func @_enc_point_kernel(%arg0: i32, %arg1: i32, %arg2: memref<1x16x8xf32, #tpu.memory_space<vmem>>, %arg3: memref<1x8x64xbf16, #tpu.memory_space<vmem>>, %arg4: memref<1x64xf32, #tpu.memory_space<vmem>>, %arg5: memref<64x128xbf16, #tpu.memory_space<vmem>>, %arg6: memref<1x128xf32, #tpu.memory_space<vmem>>, %arg7: memref<128x1024xbf16, #tpu.memory_space<vmem>>, %arg8: memref<1x1024xf32, #tpu.memory_space<vmem>>, %arg9: memref<1x16x1024xbf16, #tpu.memory_space<vmem>>, %arg10: memref<1x1x1024xf32, #tpu.memory_space<vmem>>) attributes {dimension_semantics = [#tpu.dimension_semantics<parallel>, #tpu.dimension_semantics<arbitrary>], iteration_bounds = array<i64: 2, 1>, scalar_prefetch = 0 : i64, scratch_operands = 0 : i64, tpu.core_type = #tpu.core_type<tc>, window_params = [{transform_indices = @transform_0, window_bounds = array<i64: 1, 16, 8>}, {transform_indices = @transform_1, window_bounds = array<i64: 1, 8, 64>}, {pipeline_mode = #tpu.pipeline_mode<synchronous>, transform_indices = @transform_2, window_bounds = array<i64: 1, 64>}, {pipeline_mode = #tpu.pipeline_mode<synchronous>, transform_indices = @transform_3, window_bounds = array<i64: 64, 128>}, {pipeline_mode = #tpu.pipeline_mode<synchronous>, transform_indices = @transform_4, window_bounds = array<i64: 1, 128>}, {pipeline_mode = #tpu.pipeline_mode<synchronous>, transform_indices = @transform_5, window_bounds = array<i64: 128, 1024>}, {pipeline_mode = #tpu.pipeline_mode<synchronous>, transform_indices = @transform_6, window_bounds = array<i64: 1, 1024>}, {transform_indices = @transform_7, window_bounds = array<i64: 1, 16, 1024>}, {transform_indices = @transform_8, window_bounds = array<i64: 1, 1, 1024>}]} {
    %c0 = arith.constant 0 : index
    %c0_0 = arith.constant 0 : index
    %c0_1 = arith.constant 0 : index
    %0 = vector.load %arg2[%c0, %c0_0, %c0_1] : memref<1x16x8xf32, #tpu.memory_space<vmem>>, vector<1x16x8xf32>
    %1 = vector.shape_cast %0 : vector<1x16x8xf32> to vector<16x8xf32>
    %c0_2 = arith.constant 0 : index
    %c0_3 = arith.constant 0 : index
    %c0_4 = arith.constant 0 : index
    %2 = vector.load %arg3[%c0_2, %c0_3, %c0_4] : memref<1x8x64xbf16, #tpu.memory_space<vmem>>, vector<1x8x64xbf16>
    %3 = vector.shape_cast %2 : vector<1x8x64xbf16> to vector<8x64xbf16>
    %c0_5 = arith.constant 0 : index
    %c0_6 = arith.constant 0 : index
    %4 = vector.load %arg4[%c0_5, %c0_6] : memref<1x64xf32, #tpu.memory_space<vmem>>, vector<1x64xf32>
    %5 = arith.truncf %1 : vector<16x8xf32> to vector<16x8xbf16>
    %cst = arith.constant dense<0.000000e+00> : vector<16x64xf32>
    %6 = tpu.matmul %5, %3, %cst {dimension_numbers = #tpu.dot_dimension_numbers<[1], [0], [0], [1], [0, 0, 1, 1], [], []>} : vector<16x8xbf16>, vector<8x64xbf16>, vector<16x64xf32> -> vector<16x64xf32>
    %7 = vector.broadcast %4 : vector<1x64xf32> to vector<16x64xf32>
    %8 = arith.addf %6, %7 : vector<16x64xf32>
    %cst_7 = arith.constant 0.000000e+00 : f32
    %9 = vector.broadcast %cst_7 : f32 to vector<16x64xf32>
    %10 = arith.maximumf %8, %9 : vector<16x64xf32>
    %c0_8 = arith.constant 0 : index
    %c0_9 = arith.constant 0 : index
    %11 = vector.load %arg5[%c0_8, %c0_9] : memref<64x128xbf16, #tpu.memory_space<vmem>>, vector<64x128xbf16>
    %c0_10 = arith.constant 0 : index
    %c0_11 = arith.constant 0 : index
    %12 = vector.load %arg6[%c0_10, %c0_11] : memref<1x128xf32, #tpu.memory_space<vmem>>, vector<1x128xf32>
    %13 = arith.truncf %10 : vector<16x64xf32> to vector<16x64xbf16>
    %cst_12 = arith.constant dense<0.000000e+00> : vector<16x128xf32>
    %14 = tpu.matmul %13, %11, %cst_12 {dimension_numbers = #tpu.dot_dimension_numbers<[1], [0], [0], [1], [0, 0, 1, 1], [], []>} : vector<16x64xbf16>, vector<64x128xbf16>, vector<16x128xf32> -> vector<16x128xf32>
    %15 = vector.broadcast %12 : vector<1x128xf32> to vector<16x128xf32>
    %16 = arith.addf %14, %15 : vector<16x128xf32>
    %cst_13 = arith.constant 0.000000e+00 : f32
    %17 = vector.broadcast %cst_13 : f32 to vector<16x128xf32>
    %18 = arith.maximumf %16, %17 : vector<16x128xf32>
    %c0_14 = arith.constant 0 : index
    %c0_15 = arith.constant 0 : index
    %19 = vector.load %arg7[%c0_14, %c0_15] : memref<128x1024xbf16, #tpu.memory_space<vmem>>, vector<128x1024xbf16>
    %c0_16 = arith.constant 0 : index
    %c0_17 = arith.constant 0 : index
    %20 = vector.load %arg8[%c0_16, %c0_17] : memref<1x1024xf32, #tpu.memory_space<vmem>>, vector<1x1024xf32>
    %21 = arith.truncf %18 : vector<16x128xf32> to vector<16x128xbf16>
    %cst_18 = arith.constant dense<0.000000e+00> : vector<16x1024xf32>
    %22 = tpu.matmul %21, %19, %cst_18 {dimension_numbers = #tpu.dot_dimension_numbers<[1], [0], [0], [1], [0, 0, 1, 1], [], []>} : vector<16x128xbf16>, vector<128x1024xbf16>, vector<16x1024xf32> -> vector<16x1024xf32>
    %23 = vector.broadcast %20 : vector<1x1024xf32> to vector<16x1024xf32>
    %24 = arith.addf %22, %23 : vector<16x1024xf32>
    %25 = arith.truncf %24 : vector<16x1024xf32> to vector<16x1024xbf16>
    %c0_19 = arith.constant 0 : index
    %c0_20 = arith.constant 0 : index
    %c0_21 = arith.constant 0 : index
    %26 = vector.load %arg9[%c0_19, %c0_20, %c0_21] : memref<1x16x1024xbf16, #tpu.memory_space<vmem>>, vector<1x16x1024xbf16>
    %27 = vector.shape_cast %26 : vector<1x16x1024xbf16> to vector<16x1024xbf16>
    %28 = vector.shape_cast %25 : vector<16x1024xbf16> to vector<1x16x1024xbf16>
    tpu.vector_store %arg9[%c0_19, %c0_20, %c0_21], %28 {strides = array<i32>} : memref<1x16x1024xbf16, #tpu.memory_space<vmem>>, vector<1x16x1024xbf16>,
    %cst_22 = arith.constant dense<0xFF800000> : vector<1024xf32>
    %29 = vector.multi_reduction <maximumf>, %24, %cst_22 [0] : vector<16x1024xf32> to vector<1024xf32>
    %30 = vector.shape_cast %29 : vector<1024xf32> to vector<1x1024xf32>
    %c0_i32 = arith.constant 0 : i32
    %31 = arith.cmpi eq, %arg1, %c0_i32 : i32
    %32 = arith.extui %31 : i1 to i32
    %c0_i32_23 = arith.constant 0 : i32
    %33 = arith.cmpi ne, %32, %c0_i32_23 : i32
    scf.if %33 {
      %c0_26 = arith.constant 0 : index
      %c0_27 = arith.constant 0 : index
      %c0_28 = arith.constant 0 : index
      %37 = vector.load %arg10[%c0_26, %c0_27, %c0_28] : memref<1x1x1024xf32, #tpu.memory_space<vmem>>, vector<1x1x1024xf32>
      %38 = vector.shape_cast %37 : vector<1x1x1024xf32> to vector<1x1024xf32>
      %39 = vector.shape_cast %30 : vector<1x1024xf32> to vector<1x1x1024xf32>
      tpu.vector_store %arg10[%c0_26, %c0_27, %c0_28], %39 {strides = array<i32>} : memref<1x1x1024xf32, #tpu.memory_space<vmem>>, vector<1x1x1024xf32>,
    } else {
    }
    %c0_i32_24 = arith.constant 0 : i32
    %34 = arith.cmpi ne, %arg1, %c0_i32_24 : i32
    %35 = arith.extui %34 : i1 to i32
    %c0_i32_25 = arith.constant 0 : i32
    %36 = arith.cmpi ne, %35, %c0_i32_25 : i32
    scf.if %36 {
      %c0_26 = arith.constant 0 : index
      %c0_27 = arith.constant 0 : index
      %c0_28 = arith.constant 0 : index
      %37 = vector.load %arg10[%c0_26, %c0_27, %c0_28] : memref<1x1x1024xf32, #tpu.memory_space<vmem>>, vector<1x1x1024xf32>
      %38 = vector.shape_cast %37 : vector<1x1x1024xf32> to vector<1x1024xf32>
      %39 = arith.maximumf %38, %30 : vector<1x1024xf32>
      %c0_29 = arith.constant 0 : index
      %c0_30 = arith.constant 0 : index
      %c0_31 = arith.constant 0 : index
      %40 = vector.load %arg10[%c0_29, %c0_30, %c0_31] : memref<1x1x1024xf32, #tpu.memory_space<vmem>>, vector<1x1x1024xf32>
      %41 = vector.shape_cast %40 : vector<1x1x1024xf32> to vector<1x1024xf32>
      %42 = vector.shape_cast %39 : vector<1x1024xf32> to vector<1x1x1024xf32>
      tpu.vector_store %arg10[%c0_29, %c0_30, %c0_31], %42 {strides = array<i32>} : memref<1x1x1024xf32, #tpu.memory_space<vmem>>, vector<1x1x1024xf32>,
    } else {
    }
    return
  }
  func.func @transform_0(%arg0: i32, %arg1: i32) -> (i32, i32, i32) {
    %c0_i32 = arith.constant 0 : i32
    %c0_i32_0 = arith.constant 0 : i32
    return %arg0, %arg1, %c0_i32 : i32, i32, i32
  }
  func.func @transform_1(%arg0: i32, %arg1: i32) -> (i32, i32, i32) {
    %c0_i32 = arith.constant 0 : i32
    %c0_i32_0 = arith.constant 0 : i32
    %c0_i32_1 = arith.constant 0 : i32
    return %arg0, %c0_i32, %c0_i32_0 : i32, i32, i32
  }
  func.func @transform_2(%arg0: i32, %arg1: i32) -> (i32, i32) {
    %c0_i32 = arith.constant 0 : i32
    %c0_i32_0 = arith.constant 0 : i32
    %c0_i32_1 = arith.constant 0 : i32
    return %c0_i32, %c0_i32_0 : i32, i32
  }
  func.func @transform_3(%arg0: i32, %arg1: i32) -> (i32, i32) {
    %c0_i32 = arith.constant 0 : i32
    %c0_i32_0 = arith.constant 0 : i32
    %c0_i32_1 = arith.constant 0 : i32
    return %c0_i32, %c0_i32_0 : i32, i32
  }
  func.func @transform_4(%arg0: i32, %arg1: i32) -> (i32, i32) {
    %c0_i32 = arith.constant 0 : i32
    %c0_i32_0 = arith.constant 0 : i32
    %c0_i32_1 = arith.constant 0 : i32
    return %c0_i32, %c0_i32_0 : i32, i32
  }
  func.func @transform_5(%arg0: i32, %arg1: i32) -> (i32, i32) {
    %c0_i32 = arith.constant 0 : i32
    %c0_i32_0 = arith.constant 0 : i32
    %c0_i32_1 = arith.constant 0 : i32
    return %c0_i32, %c0_i32_0 : i32, i32
  }
  func.func @transform_6(%arg0: i32, %arg1: i32) -> (i32, i32) {
    %c0_i32 = arith.constant 0 : i32
    %c0_i32_0 = arith.constant 0 : i32
    %c0_i32_1 = arith.constant 0 : i32
    return %c0_i32, %c0_i32_0 : i32, i32
  }
  func.func @transform_7(%arg0: i32, %arg1: i32) -> (i32, i32, i32) {
    %c0_i32 = arith.constant 0 : i32
    %c0_i32_0 = arith.constant 0 : i32
    return %arg0, %arg1, %c0_i32 : i32, i32, i32
  }
  func.func @transform_8(%arg0: i32, %arg1: i32) -> (i32, i32, i32) {
    %c0_i32 = arith.constant 0 : i32
    %c0_i32_0 = arith.constant 0 : i32
    %c0_i32_1 = arith.constant 0 : i32
    return %arg0, %c0_i32, %c0_i32_0 : i32, i32, i32
  }
}

module attributes {stable_mosaic.version = 11 : i64} {
  func.func @_heads_kernel(%arg0: memref<2x1024xf32, #tpu.memory_space<vmem>>, %arg1: memref<1024x512xbf16, #tpu.memory_space<vmem>>, %arg2: memref<1x512xf32, #tpu.memory_space<vmem>>, %arg3: memref<512x256xbf16, #tpu.memory_space<vmem>>, %arg4: memref<1x256xf32, #tpu.memory_space<vmem>>, %arg5: memref<256x10xbf16, #tpu.memory_space<vmem>>, %arg6: memref<1x10xf32, #tpu.memory_space<vmem>>, %arg7: memref<1024x512xbf16, #tpu.memory_space<vmem>>, %arg8: memref<1x512xf32, #tpu.memory_space<vmem>>, %arg9: memref<512x256xbf16, #tpu.memory_space<vmem>>, %arg10: memref<1x256xf32, #tpu.memory_space<vmem>>, %arg11: memref<256x3xbf16, #tpu.memory_space<vmem>>, %arg12: memref<1x3xf32, #tpu.memory_space<vmem>>, %arg13: memref<1024x512xbf16, #tpu.memory_space<vmem>>, %arg14: memref<1x512xf32, #tpu.memory_space<vmem>>, %arg15: memref<512x256xbf16, #tpu.memory_space<vmem>>, %arg16: memref<1x256xf32, #tpu.memory_space<vmem>>, %arg17: memref<256x2xbf16, #tpu.memory_space<vmem>>, %arg18: memref<1x2xf32, #tpu.memory_space<vmem>>, %arg19: memref<1024x512xbf16, #tpu.memory_space<vmem>>, %arg20: memref<1x512xf32, #tpu.memory_space<vmem>>, %arg21: memref<2x10xf32, #tpu.memory_space<vmem>>, %arg22: memref<2x3xf32, #tpu.memory_space<vmem>>, %arg23: memref<2x2xf32, #tpu.memory_space<vmem>>, %arg24: memref<2x512xf32, #tpu.memory_space<vmem>>) attributes {dimension_semantics = [], scalar_prefetch = 0 : i64, scratch_operands = 0 : i64, tpu.core_type = #tpu.core_type<tc>} {
    %c0 = arith.constant 0 : index
    %c0_0 = arith.constant 0 : index
    %0 = vector.load %arg0[%c0, %c0_0] : memref<2x1024xf32, #tpu.memory_space<vmem>>, vector<2x1024xf32>
    %c0_1 = arith.constant 0 : index
    %c0_2 = arith.constant 0 : index
    %1 = vector.load %arg1[%c0_1, %c0_2] : memref<1024x512xbf16, #tpu.memory_space<vmem>>, vector<1024x512xbf16>
    %c0_3 = arith.constant 0 : index
    %c0_4 = arith.constant 0 : index
    %2 = vector.load %arg2[%c0_3, %c0_4] : memref<1x512xf32, #tpu.memory_space<vmem>>, vector<1x512xf32>
    %3 = arith.truncf %0 : vector<2x1024xf32> to vector<2x1024xbf16>
    %cst = arith.constant dense<0.000000e+00> : vector<2x512xf32>
    %4 = tpu.matmul %3, %1, %cst {dimension_numbers = #tpu.dot_dimension_numbers<[1], [0], [0], [1], [0, 0, 1, 1], [], []>} : vector<2x1024xbf16>, vector<1024x512xbf16>, vector<2x512xf32> -> vector<2x512xf32>
    %5 = vector.broadcast %2 : vector<1x512xf32> to vector<2x512xf32>
    %6 = arith.addf %4, %5 : vector<2x512xf32>
    %cst_5 = arith.constant 0.000000e+00 : f32
    %7 = vector.broadcast %cst_5 : f32 to vector<2x512xf32>
    %8 = arith.maximumf %6, %7 : vector<2x512xf32>
    %c0_6 = arith.constant 0 : index
    %c0_7 = arith.constant 0 : index
    %9 = vector.load %arg3[%c0_6, %c0_7] : memref<512x256xbf16, #tpu.memory_space<vmem>>, vector<512x256xbf16>
    %c0_8 = arith.constant 0 : index
    %c0_9 = arith.constant 0 : index
    %10 = vector.load %arg4[%c0_8, %c0_9] : memref<1x256xf32, #tpu.memory_space<vmem>>, vector<1x256xf32>
    %11 = arith.truncf %8 : vector<2x512xf32> to vector<2x512xbf16>
    %cst_10 = arith.constant dense<0.000000e+00> : vector<2x256xf32>
    %12 = tpu.matmul %11, %9, %cst_10 {dimension_numbers = #tpu.dot_dimension_numbers<[1], [0], [0], [1], [0, 0, 1, 1], [], []>} : vector<2x512xbf16>, vector<512x256xbf16>, vector<2x256xf32> -> vector<2x256xf32>
    %13 = vector.broadcast %10 : vector<1x256xf32> to vector<2x256xf32>
    %14 = arith.addf %12, %13 : vector<2x256xf32>
    %cst_11 = arith.constant 0.000000e+00 : f32
    %15 = vector.broadcast %cst_11 : f32 to vector<2x256xf32>
    %16 = arith.maximumf %14, %15 : vector<2x256xf32>
    %c0_12 = arith.constant 0 : index
    %c0_13 = arith.constant 0 : index
    %17 = vector.load %arg5[%c0_12, %c0_13] : memref<256x10xbf16, #tpu.memory_space<vmem>>, vector<256x10xbf16>
    %c0_14 = arith.constant 0 : index
    %c0_15 = arith.constant 0 : index
    %18 = vector.load %arg6[%c0_14, %c0_15] : memref<1x10xf32, #tpu.memory_space<vmem>>, vector<1x10xf32>
    %19 = arith.truncf %16 : vector<2x256xf32> to vector<2x256xbf16>
    %cst_16 = arith.constant dense<0.000000e+00> : vector<2x10xf32>
    %20 = tpu.matmul %19, %17, %cst_16 {dimension_numbers = #tpu.dot_dimension_numbers<[1], [0], [0], [1], [0, 0, 1, 1], [], []>} : vector<2x256xbf16>, vector<256x10xbf16>, vector<2x10xf32> -> vector<2x10xf32>
    %21 = vector.broadcast %18 : vector<1x10xf32> to vector<2x10xf32>
    %22 = arith.addf %20, %21 : vector<2x10xf32>
    %c0_17 = arith.constant 0 : index
    %c0_18 = arith.constant 0 : index
    %23 = vector.load %arg21[%c0_17, %c0_18] : memref<2x10xf32, #tpu.memory_space<vmem>>, vector<2x10xf32>
    tpu.vector_store %arg21[%c0_17, %c0_18], %22 {strides = array<i32>} : memref<2x10xf32, #tpu.memory_space<vmem>>, vector<2x10xf32>,
    %c0_19 = arith.constant 0 : index
    %c0_20 = arith.constant 0 : index
    %24 = vector.load %arg7[%c0_19, %c0_20] : memref<1024x512xbf16, #tpu.memory_space<vmem>>, vector<1024x512xbf16>
    %c0_21 = arith.constant 0 : index
    %c0_22 = arith.constant 0 : index
    %25 = vector.load %arg8[%c0_21, %c0_22] : memref<1x512xf32, #tpu.memory_space<vmem>>, vector<1x512xf32>
    %26 = arith.truncf %0 : vector<2x1024xf32> to vector<2x1024xbf16>
    %cst_23 = arith.constant dense<0.000000e+00> : vector<2x512xf32>
    %27 = tpu.matmul %26, %24, %cst_23 {dimension_numbers = #tpu.dot_dimension_numbers<[1], [0], [0], [1], [0, 0, 1, 1], [], []>} : vector<2x1024xbf16>, vector<1024x512xbf16>, vector<2x512xf32> -> vector<2x512xf32>
    %28 = vector.broadcast %25 : vector<1x512xf32> to vector<2x512xf32>
    %29 = arith.addf %27, %28 : vector<2x512xf32>
    %cst_24 = arith.constant 0.000000e+00 : f32
    %30 = vector.broadcast %cst_24 : f32 to vector<2x512xf32>
    %31 = arith.maximumf %29, %30 : vector<2x512xf32>
    %c0_25 = arith.constant 0 : index
    %c0_26 = arith.constant 0 : index
    %32 = vector.load %arg9[%c0_25, %c0_26] : memref<512x256xbf16, #tpu.memory_space<vmem>>, vector<512x256xbf16>
    %c0_27 = arith.constant 0 : index
    %c0_28 = arith.constant 0 : index
    %33 = vector.load %arg10[%c0_27, %c0_28] : memref<1x256xf32, #tpu.memory_space<vmem>>, vector<1x256xf32>
    %34 = arith.truncf %31 : vector<2x512xf32> to vector<2x512xbf16>
    %cst_29 = arith.constant dense<0.000000e+00> : vector<2x256xf32>
    %35 = tpu.matmul %34, %32, %cst_29 {dimension_numbers = #tpu.dot_dimension_numbers<[1], [0], [0], [1], [0, 0, 1, 1], [], []>} : vector<2x512xbf16>, vector<512x256xbf16>, vector<2x256xf32> -> vector<2x256xf32>
    %36 = vector.broadcast %33 : vector<1x256xf32> to vector<2x256xf32>
    %37 = arith.addf %35, %36 : vector<2x256xf32>
    %cst_30 = arith.constant 0.000000e+00 : f32
    %38 = vector.broadcast %cst_30 : f32 to vector<2x256xf32>
    %39 = arith.maximumf %37, %38 : vector<2x256xf32>
    %c0_31 = arith.constant 0 : index
    %c0_32 = arith.constant 0 : index
    %40 = vector.load %arg11[%c0_31, %c0_32] : memref<256x3xbf16, #tpu.memory_space<vmem>>, vector<256x3xbf16>
    %c0_33 = arith.constant 0 : index
    %c0_34 = arith.constant 0 : index
    %41 = vector.load %arg12[%c0_33, %c0_34] : memref<1x3xf32, #tpu.memory_space<vmem>>, vector<1x3xf32>
    %42 = arith.truncf %39 : vector<2x256xf32> to vector<2x256xbf16>
    %cst_35 = arith.constant dense<0.000000e+00> : vector<2x3xf32>
    %43 = tpu.matmul %42, %40, %cst_35 {dimension_numbers = #tpu.dot_dimension_numbers<[1], [0], [0], [1], [0, 0, 1, 1], [], []>} : vector<2x256xbf16>, vector<256x3xbf16>, vector<2x3xf32> -> vector<2x3xf32>
    %44 = vector.broadcast %41 : vector<1x3xf32> to vector<2x3xf32>
    %45 = arith.addf %43, %44 : vector<2x3xf32>
    %c0_36 = arith.constant 0 : index
    %c0_37 = arith.constant 0 : index
    %46 = vector.load %arg22[%c0_36, %c0_37] : memref<2x3xf32, #tpu.memory_space<vmem>>, vector<2x3xf32>
    tpu.vector_store %arg22[%c0_36, %c0_37], %45 {strides = array<i32>} : memref<2x3xf32, #tpu.memory_space<vmem>>, vector<2x3xf32>,
    %c0_38 = arith.constant 0 : index
    %c0_39 = arith.constant 0 : index
    %47 = vector.load %arg13[%c0_38, %c0_39] : memref<1024x512xbf16, #tpu.memory_space<vmem>>, vector<1024x512xbf16>
    %c0_40 = arith.constant 0 : index
    %c0_41 = arith.constant 0 : index
    %48 = vector.load %arg14[%c0_40, %c0_41] : memref<1x512xf32, #tpu.memory_space<vmem>>, vector<1x512xf32>
    %49 = arith.truncf %0 : vector<2x1024xf32> to vector<2x1024xbf16>
    %cst_42 = arith.constant dense<0.000000e+00> : vector<2x512xf32>
    %50 = tpu.matmul %49, %47, %cst_42 {dimension_numbers = #tpu.dot_dimension_numbers<[1], [0], [0], [1], [0, 0, 1, 1], [], []>} : vector<2x1024xbf16>, vector<1024x512xbf16>, vector<2x512xf32> -> vector<2x512xf32>
    %51 = vector.broadcast %48 : vector<1x512xf32> to vector<2x512xf32>
    %52 = arith.addf %50, %51 : vector<2x512xf32>
    %cst_43 = arith.constant 0.000000e+00 : f32
    %53 = vector.broadcast %cst_43 : f32 to vector<2x512xf32>
    %54 = arith.maximumf %52, %53 : vector<2x512xf32>
    %c0_44 = arith.constant 0 : index
    %c0_45 = arith.constant 0 : index
    %55 = vector.load %arg15[%c0_44, %c0_45] : memref<512x256xbf16, #tpu.memory_space<vmem>>, vector<512x256xbf16>
    %c0_46 = arith.constant 0 : index
    %c0_47 = arith.constant 0 : index
    %56 = vector.load %arg16[%c0_46, %c0_47] : memref<1x256xf32, #tpu.memory_space<vmem>>, vector<1x256xf32>
    %57 = arith.truncf %54 : vector<2x512xf32> to vector<2x512xbf16>
    %cst_48 = arith.constant dense<0.000000e+00> : vector<2x256xf32>
    %58 = tpu.matmul %57, %55, %cst_48 {dimension_numbers = #tpu.dot_dimension_numbers<[1], [0], [0], [1], [0, 0, 1, 1], [], []>} : vector<2x512xbf16>, vector<512x256xbf16>, vector<2x256xf32> -> vector<2x256xf32>
    %59 = vector.broadcast %56 : vector<1x256xf32> to vector<2x256xf32>
    %60 = arith.addf %58, %59 : vector<2x256xf32>
    %cst_49 = arith.constant 0.000000e+00 : f32
    %61 = vector.broadcast %cst_49 : f32 to vector<2x256xf32>
    %62 = arith.maximumf %60, %61 : vector<2x256xf32>
    %c0_50 = arith.constant 0 : index
    %c0_51 = arith.constant 0 : index
    %63 = vector.load %arg17[%c0_50, %c0_51] : memref<256x2xbf16, #tpu.memory_space<vmem>>, vector<256x2xbf16>
    %c0_52 = arith.constant 0 : index
    %c0_53 = arith.constant 0 : index
    %64 = vector.load %arg18[%c0_52, %c0_53] : memref<1x2xf32, #tpu.memory_space<vmem>>, vector<1x2xf32>
    %65 = arith.truncf %62 : vector<2x256xf32> to vector<2x256xbf16>
    %cst_54 = arith.constant dense<0.000000e+00> : vector<2x2xf32>
    %66 = tpu.matmul %65, %63, %cst_54 {dimension_numbers = #tpu.dot_dimension_numbers<[1], [0], [0], [1], [0, 0, 1, 1], [], []>} : vector<2x256xbf16>, vector<256x2xbf16>, vector<2x2xf32> -> vector<2x2xf32>
    %67 = vector.broadcast %64 : vector<1x2xf32> to vector<2x2xf32>
    %68 = arith.addf %66, %67 : vector<2x2xf32>
    %c0_55 = arith.constant 0 : index
    %c0_56 = arith.constant 0 : index
    %69 = vector.load %arg23[%c0_55, %c0_56] : memref<2x2xf32, #tpu.memory_space<vmem>>, vector<2x2xf32>
    tpu.vector_store %arg23[%c0_55, %c0_56], %68 {strides = array<i32>} : memref<2x2xf32, #tpu.memory_space<vmem>>, vector<2x2xf32>,
    %70 = arith.truncf %0 : vector<2x1024xf32> to vector<2x1024xbf16>
    %c0_57 = arith.constant 0 : index
    %c0_58 = arith.constant 0 : index
    %71 = vector.load %arg19[%c0_57, %c0_58] : memref<1024x512xbf16, #tpu.memory_space<vmem>>, vector<1024x512xbf16>
    %cst_59 = arith.constant dense<0.000000e+00> : vector<2x512xf32>
    %72 = tpu.matmul %70, %71, %cst_59 {dimension_numbers = #tpu.dot_dimension_numbers<[1], [0], [0], [1], [0, 0, 1, 1], [], []>} : vector<2x1024xbf16>, vector<1024x512xbf16>, vector<2x512xf32> -> vector<2x512xf32>
    %c0_60 = arith.constant 0 : index
    %c0_61 = arith.constant 0 : index
    %73 = vector.load %arg20[%c0_60, %c0_61] : memref<1x512xf32, #tpu.memory_space<vmem>>, vector<1x512xf32>
    %74 = vector.broadcast %73 : vector<1x512xf32> to vector<2x512xf32>
    %75 = arith.addf %72, %74 : vector<2x512xf32>
    %c0_62 = arith.constant 0 : index
    %c0_63 = arith.constant 0 : index
    %76 = vector.load %arg24[%c0_62, %c0_63] : memref<2x512xf32, #tpu.memory_space<vmem>>, vector<2x512xf32>
    tpu.vector_store %arg24[%c0_62, %c0_63], %75 {strides = array<i32>} : memref<2x512xf32, #tpu.memory_space<vmem>>, vector<2x512xf32>,
    return
  }
}

module attributes {stable_mosaic.version = 11 : i64} {
  func.func @_stn_fc_kernel(%arg0: memref<2x1024xf32, #tpu.memory_space<vmem>>, %arg1: memref<1024x512xbf16, #tpu.memory_space<vmem>>, %arg2: memref<1x512xf32, #tpu.memory_space<vmem>>, %arg3: memref<512x256xbf16, #tpu.memory_space<vmem>>, %arg4: memref<1x256xf32, #tpu.memory_space<vmem>>, %arg5: memref<256x9xbf16, #tpu.memory_space<vmem>>, %arg6: memref<1x9xf32, #tpu.memory_space<vmem>>, %arg7: memref<2x9xf32, #tpu.memory_space<vmem>>) attributes {dimension_semantics = [], scalar_prefetch = 0 : i64, scratch_operands = 0 : i64, tpu.core_type = #tpu.core_type<tc>} {
    %c0 = arith.constant 0 : index
    %c0_0 = arith.constant 0 : index
    %0 = vector.load %arg0[%c0, %c0_0] : memref<2x1024xf32, #tpu.memory_space<vmem>>, vector<2x1024xf32>
    %c0_1 = arith.constant 0 : index
    %c0_2 = arith.constant 0 : index
    %1 = vector.load %arg1[%c0_1, %c0_2] : memref<1024x512xbf16, #tpu.memory_space<vmem>>, vector<1024x512xbf16>
    %c0_3 = arith.constant 0 : index
    %c0_4 = arith.constant 0 : index
    %2 = vector.load %arg2[%c0_3, %c0_4] : memref<1x512xf32, #tpu.memory_space<vmem>>, vector<1x512xf32>
    %3 = arith.truncf %0 : vector<2x1024xf32> to vector<2x1024xbf16>
    %cst = arith.constant dense<0.000000e+00> : vector<2x512xf32>
    %4 = tpu.matmul %3, %1, %cst {dimension_numbers = #tpu.dot_dimension_numbers<[1], [0], [0], [1], [0, 0, 1, 1], [], []>} : vector<2x1024xbf16>, vector<1024x512xbf16>, vector<2x512xf32> -> vector<2x512xf32>
    %5 = vector.broadcast %2 : vector<1x512xf32> to vector<2x512xf32>
    %6 = arith.addf %4, %5 : vector<2x512xf32>
    %cst_5 = arith.constant 0.000000e+00 : f32
    %7 = vector.broadcast %cst_5 : f32 to vector<2x512xf32>
    %8 = arith.maximumf %6, %7 : vector<2x512xf32>
    %c0_6 = arith.constant 0 : index
    %c0_7 = arith.constant 0 : index
    %9 = vector.load %arg3[%c0_6, %c0_7] : memref<512x256xbf16, #tpu.memory_space<vmem>>, vector<512x256xbf16>
    %c0_8 = arith.constant 0 : index
    %c0_9 = arith.constant 0 : index
    %10 = vector.load %arg4[%c0_8, %c0_9] : memref<1x256xf32, #tpu.memory_space<vmem>>, vector<1x256xf32>
    %11 = arith.truncf %8 : vector<2x512xf32> to vector<2x512xbf16>
    %cst_10 = arith.constant dense<0.000000e+00> : vector<2x256xf32>
    %12 = tpu.matmul %11, %9, %cst_10 {dimension_numbers = #tpu.dot_dimension_numbers<[1], [0], [0], [1], [0, 0, 1, 1], [], []>} : vector<2x512xbf16>, vector<512x256xbf16>, vector<2x256xf32> -> vector<2x256xf32>
    %13 = vector.broadcast %10 : vector<1x256xf32> to vector<2x256xf32>
    %14 = arith.addf %12, %13 : vector<2x256xf32>
    %cst_11 = arith.constant 0.000000e+00 : f32
    %15 = vector.broadcast %cst_11 : f32 to vector<2x256xf32>
    %16 = arith.maximumf %14, %15 : vector<2x256xf32>
    %c0_12 = arith.constant 0 : index
    %c0_13 = arith.constant 0 : index
    %17 = vector.load %arg5[%c0_12, %c0_13] : memref<256x9xbf16, #tpu.memory_space<vmem>>, vector<256x9xbf16>
    %c0_14 = arith.constant 0 : index
    %c0_15 = arith.constant 0 : index
    %18 = vector.load %arg6[%c0_14, %c0_15] : memref<1x9xf32, #tpu.memory_space<vmem>>, vector<1x9xf32>
    %19 = arith.truncf %16 : vector<2x256xf32> to vector<2x256xbf16>
    %cst_16 = arith.constant dense<0.000000e+00> : vector<2x9xf32>
    %20 = tpu.matmul %19, %17, %cst_16 {dimension_numbers = #tpu.dot_dimension_numbers<[1], [0], [0], [1], [0, 0, 1, 1], [], []>} : vector<2x256xbf16>, vector<256x9xbf16>, vector<2x9xf32> -> vector<2x9xf32>
    %21 = vector.broadcast %18 : vector<1x9xf32> to vector<2x9xf32>
    %22 = arith.addf %20, %21 : vector<2x9xf32>
    %c0_17 = arith.constant 0 : index
    %c0_18 = arith.constant 0 : index
    %23 = vector.load %arg7[%c0_17, %c0_18] : memref<2x9xf32, #tpu.memory_space<vmem>>, vector<2x9xf32>
    tpu.vector_store %arg7[%c0_17, %c0_18], %22 {strides = array<i32>} : memref<2x9xf32, #tpu.memory_space<vmem>>, vector<2x9xf32>,
    return
  }
}

module attributes {stable_mosaic.version = 11 : i64} {
  func.func @_seg_point_kernel(%arg0: i32, %arg1: i32, %arg2: memref<1x16x1024xbf16, #tpu.memory_space<vmem>>, %arg3: memref<1x1x512xf32, #tpu.memory_space<vmem>>, %arg4: memref<1024x512xbf16, #tpu.memory_space<vmem>>, %arg5: memref<512x256xbf16, #tpu.memory_space<vmem>>, %arg6: memref<1x256xf32, #tpu.memory_space<vmem>>, %arg7: memref<256x6xbf16, #tpu.memory_space<vmem>>, %arg8: memref<1x6xf32, #tpu.memory_space<vmem>>, %arg9: memref<1x16x6xf32, #tpu.memory_space<vmem>>) attributes {dimension_semantics = [#tpu.dimension_semantics<parallel>, #tpu.dimension_semantics<parallel>], iteration_bounds = array<i64: 2, 1>, scalar_prefetch = 0 : i64, scratch_operands = 0 : i64, tpu.core_type = #tpu.core_type<tc>, window_params = [{transform_indices = @transform_0, window_bounds = array<i64: 1, 16, 1024>}, {transform_indices = @transform_1, window_bounds = array<i64: 1, 1, 512>}, {pipeline_mode = #tpu.pipeline_mode<synchronous>, transform_indices = @transform_2, window_bounds = array<i64: 1024, 512>}, {pipeline_mode = #tpu.pipeline_mode<synchronous>, transform_indices = @transform_3, window_bounds = array<i64: 512, 256>}, {pipeline_mode = #tpu.pipeline_mode<synchronous>, transform_indices = @transform_4, window_bounds = array<i64: 1, 256>}, {pipeline_mode = #tpu.pipeline_mode<synchronous>, transform_indices = @transform_5, window_bounds = array<i64: 256, 6>}, {pipeline_mode = #tpu.pipeline_mode<synchronous>, transform_indices = @transform_6, window_bounds = array<i64: 1, 6>}, {transform_indices = @transform_7, window_bounds = array<i64: 1, 16, 6>}]} {
    %c0 = arith.constant 0 : index
    %c0_0 = arith.constant 0 : index
    %c0_1 = arith.constant 0 : index
    %0 = vector.load %arg2[%c0, %c0_0, %c0_1] : memref<1x16x1024xbf16, #tpu.memory_space<vmem>>, vector<1x16x1024xbf16>
    %1 = vector.shape_cast %0 : vector<1x16x1024xbf16> to vector<16x1024xbf16>
    %c0_2 = arith.constant 0 : index
    %c0_3 = arith.constant 0 : index
    %2 = vector.load %arg4[%c0_2, %c0_3] : memref<1024x512xbf16, #tpu.memory_space<vmem>>, vector<1024x512xbf16>
    %cst = arith.constant dense<0.000000e+00> : vector<16x512xf32>
    %3 = tpu.matmul %1, %2, %cst {dimension_numbers = #tpu.dot_dimension_numbers<[1], [0], [0], [1], [0, 0, 1, 1], [], []>} : vector<16x1024xbf16>, vector<1024x512xbf16>, vector<16x512xf32> -> vector<16x512xf32>
    %c0_4 = arith.constant 0 : index
    %c0_5 = arith.constant 0 : index
    %c0_6 = arith.constant 0 : index
    %4 = vector.load %arg3[%c0_4, %c0_5, %c0_6] : memref<1x1x512xf32, #tpu.memory_space<vmem>>, vector<1x1x512xf32>
    %5 = vector.shape_cast %4 : vector<1x1x512xf32> to vector<1x512xf32>
    %6 = vector.broadcast %5 : vector<1x512xf32> to vector<16x512xf32>
    %7 = arith.addf %3, %6 : vector<16x512xf32>
    %cst_7 = arith.constant 0.000000e+00 : f32
    %8 = vector.broadcast %cst_7 : f32 to vector<16x512xf32>
    %9 = arith.maximumf %7, %8 : vector<16x512xf32>
    %c0_8 = arith.constant 0 : index
    %c0_9 = arith.constant 0 : index
    %10 = vector.load %arg5[%c0_8, %c0_9] : memref<512x256xbf16, #tpu.memory_space<vmem>>, vector<512x256xbf16>
    %c0_10 = arith.constant 0 : index
    %c0_11 = arith.constant 0 : index
    %11 = vector.load %arg6[%c0_10, %c0_11] : memref<1x256xf32, #tpu.memory_space<vmem>>, vector<1x256xf32>
    %12 = arith.truncf %9 : vector<16x512xf32> to vector<16x512xbf16>
    %cst_12 = arith.constant dense<0.000000e+00> : vector<16x256xf32>
    %13 = tpu.matmul %12, %10, %cst_12 {dimension_numbers = #tpu.dot_dimension_numbers<[1], [0], [0], [1], [0, 0, 1, 1], [], []>} : vector<16x512xbf16>, vector<512x256xbf16>, vector<16x256xf32> -> vector<16x256xf32>
    %14 = vector.broadcast %11 : vector<1x256xf32> to vector<16x256xf32>
    %15 = arith.addf %13, %14 : vector<16x256xf32>
    %cst_13 = arith.constant 0.000000e+00 : f32
    %16 = vector.broadcast %cst_13 : f32 to vector<16x256xf32>
    %17 = arith.maximumf %15, %16 : vector<16x256xf32>
    %c0_14 = arith.constant 0 : index
    %c0_15 = arith.constant 0 : index
    %18 = vector.load %arg7[%c0_14, %c0_15] : memref<256x6xbf16, #tpu.memory_space<vmem>>, vector<256x6xbf16>
    %c0_16 = arith.constant 0 : index
    %c0_17 = arith.constant 0 : index
    %19 = vector.load %arg8[%c0_16, %c0_17] : memref<1x6xf32, #tpu.memory_space<vmem>>, vector<1x6xf32>
    %20 = arith.truncf %17 : vector<16x256xf32> to vector<16x256xbf16>
    %cst_18 = arith.constant dense<0.000000e+00> : vector<16x6xf32>
    %21 = tpu.matmul %20, %18, %cst_18 {dimension_numbers = #tpu.dot_dimension_numbers<[1], [0], [0], [1], [0, 0, 1, 1], [], []>} : vector<16x256xbf16>, vector<256x6xbf16>, vector<16x6xf32> -> vector<16x6xf32>
    %22 = vector.broadcast %19 : vector<1x6xf32> to vector<16x6xf32>
    %23 = arith.addf %21, %22 : vector<16x6xf32>
    %c0_19 = arith.constant 0 : index
    %c0_20 = arith.constant 0 : index
    %c0_21 = arith.constant 0 : index
    %24 = vector.load %arg9[%c0_19, %c0_20, %c0_21] : memref<1x16x6xf32, #tpu.memory_space<vmem>>, vector<1x16x6xf32>
    %25 = vector.shape_cast %24 : vector<1x16x6xf32> to vector<16x6xf32>
    %26 = vector.shape_cast %23 : vector<16x6xf32> to vector<1x16x6xf32>
    tpu.vector_store %arg9[%c0_19, %c0_20, %c0_21], %26 {strides = array<i32>} : memref<1x16x6xf32, #tpu.memory_space<vmem>>, vector<1x16x6xf32>,
    return
  }
  func.func @transform_0(%arg0: i32, %arg1: i32) -> (i32, i32, i32) {
    %c0_i32 = arith.constant 0 : i32
    %c0_i32_0 = arith.constant 0 : i32
    return %arg0, %arg1, %c0_i32 : i32, i32, i32
  }
  func.func @transform_1(%arg0: i32, %arg1: i32) -> (i32, i32, i32) {
    %c0_i32 = arith.constant 0 : i32
    %c0_i32_0 = arith.constant 0 : i32
    %c0_i32_1 = arith.constant 0 : i32
    return %arg0, %c0_i32, %c0_i32_0 : i32, i32, i32
  }
  func.func @transform_2(%arg0: i32, %arg1: i32) -> (i32, i32) {
    %c0_i32 = arith.constant 0 : i32
    %c0_i32_0 = arith.constant 0 : i32
    %c0_i32_1 = arith.constant 0 : i32
    return %c0_i32, %c0_i32_0 : i32, i32
  }
  func.func @transform_3(%arg0: i32, %arg1: i32) -> (i32, i32) {
    %c0_i32 = arith.constant 0 : i32
    %c0_i32_0 = arith.constant 0 : i32
    %c0_i32_1 = arith.constant 0 : i32
    return %c0_i32, %c0_i32_0 : i32, i32
  }
  func.func @transform_4(%arg0: i32, %arg1: i32) -> (i32, i32) {
    %c0_i32 = arith.constant 0 : i32
    %c0_i32_0 = arith.constant 0 : i32
    %c0_i32_1 = arith.constant 0 : i32
    return %c0_i32, %c0_i32_0 : i32, i32
  }
  func.func @transform_5(%arg0: i32, %arg1: i32) -> (i32, i32) {
    %c0_i32 = arith.constant 0 : i32
    %c0_i32_0 = arith.constant 0 : i32
    %c0_i32_1 = arith.constant 0 : i32
    return %c0_i32, %c0_i32_0 : i32, i32
  }
  func.func @transform_6(%arg0: i32, %arg1: i32) -> (i32, i32) {
    %c0_i32 = arith.constant 0 : i32
    %c0_i32_0 = arith.constant 0 : i32
    %c0_i32_1 = arith.constant 0 : i32
    return %c0_i32, %c0_i32_0 : i32, i32
  }
  func.func @transform_7(%arg0: i32, %arg1: i32) -> (i32, i32, i32) {
    %c0_i32 = arith.constant 0 : i32
    %c0_i32_0 = arith.constant 0 : i32
    return %arg0, %arg1, %c0_i32 : i32, i32, i32
  }
}

</mosaic_0001>

<bundles_post_ra>
// kernel: _lambda_.5
= control target key start
LH: loop header
LB: loop body
LE: loop exit
PB: predicated region body
PF: predicated region fallthrough
CT: control target
= control target key end

     0   :  { %12 = vsyncpa [#allocation3], 0  ;;  %s1605_s24 = smov 0   ;;  %s1607_s25 = smov 0   ;;  %s1709_s0 = inlined_call_operand.vmem [shape: f32[2,16,8], index: 0, kind: input, shape index: {}]   ;;  %s1710_s1 = inlined_call_operand.vmem [shape: bf16[8,64], index: 1, kind: input, shape index: {}]   ;;  %s1711_s2 = inlined_call_operand.vmem [shape: f32[1,64], index: 2, kind: input, shape index: {}]   ;;  %s1712_s3 = inlined_call_operand.vmem [shape: bf16[64,128], index: 3, kind: input, shape index: {}]   ;;  %s1713_s4 = inlined_call_operand.vmem [shape: f32[1,128], index: 4, kind: input, shape index: {}]   ;;  %s1714_s5 = inlined_call_operand.hbm [shape: bf16[128,1024], index: 5, kind: input, shape index: {}]   ;;  %s1715_s6 = inlined_call_operand.vmem [shape: f32[1,1024], index: 6, kind: input, shape index: {}]   ;;  %s1716_s7 = inlined_call_operand.vmem [shape: f32[2,1,1024], index: 7, kind: output, shape index: {}]  }
   0x1   :  { %s1609_s26 = smov 0  }
   0x2 LB: > { %s1349_s27 = sadd.s32 4294967295, %s1556_s26   ;;  %s30_s28 = sadd.s32 1, %s1552_s25  ;;  %s1556_s26 = sphi %s1609_s26, %s18_s26   ;;  %s1552_s25 = sphi %s1607_s25, %s1720_s25   ;;  %s1548_s24 = sphi %s1605_s24, %s1719_s24  }
   0x3   : > { %p32_p0 = scmp.ge.s32.totalorder %s30_s28, 2  ;;  %p1351_p1 = scmp.ge.s32.totalorder %s1556_s26, 1 }
   0x4   : > { %p215_p2 = scmp.lt.s32.totalorder %s1556_s26, 3  ;;  %p1630_p4 = scmp.eq.s32.totalorder %s1349_s27, 0 }
   0x5   : > { %s1722_s28 = smov (%p32_p0, %s30_s28), 0  ;;  %s1558_s8 = smov [#allocation2]  }
   0x6   : > { %p1626_p3 = pnand %p1351_p1, %p215_p2  ;;  %s239_s9 = sshll.u32 %s1558_s8, 4  ;;  %s240_s9 = int_to_ptr.vmem [resolvable:$true] %s239_s9 }
   0x7   : > { %s1515_s10 = scalar_lea.vmem %s240_s9, 8192  ;;  %p1523_p11 = scmp.lt.s32.totalorder %s240_s9, %s240_s9 }
   0x8   : > { %p1463_p5 = pneg %p1626_p3  ;;  %p1516_p8 = scmp.ne.s32.totalorder %s240_s9, %s1515_s10 }
   0x9   : > { %p1524_p12 = scmp.lt.s32.totalorder %s1515_s10, %s1515_s10 }
   0xa   : > { %p1464_p6 = pnand %p1630_p4, %p1463_p5 }
   0xb   : > { %p1525_p13 = por %p1524_p12, %p1523_p11 }
   0xc   : > { %p1506_p7 = pneg %p1464_p6 }
   0xe   : > { %p1518_p9 = pnand %p1516_p8, %p1506_p7 }
  0x10   : > { %p1519_p10 = pneg %p1518_p9 }
  0x12   : > { %p1526_p0 = pnand %p1525_p13, %p1519_p10 }
  0x14   : > { %1529 = shalt.err (!%p1526_p0)
}
  0x15   : > { %s1559_s11 = smov 512   ;;  %s1560_s12 = smov 32  }
  0x16   : > { %1466 = dma.hbm_to_vmem [thread:$0]  (!%p1464_p6), %s1714_s5, 8192, %s240_s9, [#allocation3], %s1559_s11, %s1559_s11, %s1560_s12  }
  0x17   : > { %271 = sbr.rel (%p1626_p3) target bundleno = 703 (0x2bf), region = 48 }
  0x1c   : > { %1543 = dma.done.wait (%p1630_p4), [#allocation3], 8192  }
  0x1d   : > { %1545 = vsyncadd (%p1630_p4), [#allocation3], 4294959104  ;;  %p307_p1 = scmp.lt.s32.totalorder %s1548_s24, 1  ;;  %v1561_v0 = vmov 0.0   ;;  %vm1562_vm0 = vmmov 0   ;;  %vm336_vm1 = vcmask 1043456  }
  0x1e   : > { %1441 = vmatprep.subr.bf16.mxu0 %v1561_v0  ;;  %1443 = vmatprep.mubr.msk.bf16.mxu0 %vm1562_vm0, %v1561_v0  ;;  %v323_v1 = vld [vmem:[%s1710_s1] sm:$0xf]  ;;  %v1500_v6 = vld [vmem:[%s1712_s3 + $0x18] sm:$0xff]   ;;  %vm332_vm2 = vcmask 64512   ;;  %v1501_v7 = vld [vmem:[%s1712_s3 + $0x10] sm:$0xff]   ;;  %vm423_vm3 = vcmask 523264  }
  0x1f   : > { %s1724_s24 = smov (!%p307_p1, %s1548_s24), 1  ;;  %1447 = vmatprep.subr.bf16.mxu1 %v1561_v0  ;;  %1455 = vmatprep.mubr.msk.bf16.mxu1 %vm1562_vm0, %v1561_v0  ;;  %v338_v4 = vsel %vm336_vm1, %v323_v1, 0  ;;  %v1502_v8 = vld [vmem:[%s1712_s3 + $0x8] sm:$0xff]   ;;  %v1503_v9 = vld [vmem:[%s1712_s3] sm:$0xff]  }
  0x20   : > { %s1433_s15 = sshll.u32 %s1724_s24, 4  ;;  %1442 = vmatpush3.bf16.msra.mxu0 %v338_v4  ;;  %1448 = vmatpush3.bf16.msra.mxu1 %v1500_v6  ;;  %v526_v10 = vld [vmem:[#allocation2 + $0x1c0] sm:$0xff]  ;;  %v527_v12 = vld [vmem:[#allocation2 + $0x1c8] sm:$0xff]  ;;  %s1358_s16 = sshll.u32 %s1724_s24, 3 }
  0x21   : > { %s314_s18 = scalar_lea.vmem %s1709_s0, %s1433_s15  ;;  %1449 = vmatprep.subr.bf16.mxu1 %v1561_v0  ;;  %v530_v11 = vld [vmem:[#allocation2 + $0x1e0] sm:$0xff]  ;;  %v531_v15 = vld [vmem:[#allocation2 + $0x1e8] sm:$0xff]  ;;  %s319_s19 = scalar_lea.vmem %s1716_s7, %s1358_s16 }
  0x22   : > { %v321_v2 = vld [vmem:[%s314_s18] sm:$0xff]  ;;  %v322_v3 = vld [vmem:[%s314_s18 + $0x8] sm:$0xff]  ;;  %v1423_v13 = vcombine.low %v526_v10, %v530_v11  ;;  %v1424_v14 = vcombine.high %v526_v10, %v530_v11  ;;  %v1425_v18 = vcombine.low %v527_v12, %v531_v15  ;;  %v1426_v19 = vcombine.high %v527_v12, %v531_v15 }
  0x23   : > { %v325_v5 = vpack.c.bf16 %v322_v3, %v321_v2  ;;  %v518_v16 = vld [vmem:[#allocation2 + $0x180] sm:$0xff]  ;;  %v519_v45 = vld [vmem:[#allocation2 + $0x188] sm:$0xff] }
  0x24   : > { %1450 = vmatpush3.bf16.msra.mxu1 %v1501_v7  ;;  %v522_v17 = vld [vmem:[#allocation2 + $0x1a0] sm:$0xff]  ;;  %897 = vmatprep.subr.bf16.mxu0 %v1424_v14  ;;  %v523_v46 = vld [vmem:[#allocation2 + $0x1a8] sm:$0xff] }
  0x25   : > { %1444 = vmatmul.mubr.msk.bf16.vlgmr.msra.gmra.mxu0 %vm332_vm2, %v325_v5  ;;  %1451 = vmatprep.subr.bf16.mxu1 %v1561_v0  ;;  %v1416_v20 = vcombine.high %v518_v16, %v522_v17  ;;  %v1415_v21 = vcombine.low %v518_v16, %v522_v17  ;;  %v510_v22 = vld [vmem:[#allocation2 + $0x140] sm:$0xff]  ;;  %v1418_v50 = vcombine.high %v519_v45, %v523_v46  ;;  %v511_v51 = vld [vmem:[#allocation2 + $0x148] sm:$0xff] }
  0x26   : > { %898 = vmatpush1.bf16.msra.mxu0 %v1423_v13  ;;  %v514_v23 = vld [vmem:[#allocation2 + $0x160] sm:$0xff]  ;;  %v515_v52 = vld [vmem:[#allocation2 + $0x168] sm:$0xff]  ;;  %v1417_v53 = vcombine.low %v519_v45, %v523_v46  ;;  %v512_v45 = vld [vmem:[#allocation2 + $0x150] sm:$0xff] }
  0x27   : > { %899 = vmatprep.subr.bf16.mxu0 %v1416_v20  ;;  %v1408_v24 = vcombine.high %v510_v22, %v514_v23  ;;  %v1407_v25 = vcombine.low %v510_v22, %v514_v23  ;;  %v502_v26 = vld [vmem:[#allocation2 + $0x100] sm:$0xff]  ;;  %v1410_v54 = vcombine.high %v511_v51, %v515_v52  ;;  %v503_v55 = vld [vmem:[#allocation2 + $0x108] sm:$0xff]  ;;  %v1409_v57 = vcombine.low %v511_v51, %v515_v52  ;;  %v528_v20 = vld [vmem:[#allocation2 + $0x1d0] sm:$0xff] }
  0x28   : > { %1452 = vmatpush3.bf16.msra.mxu1 %v1502_v8  ;;  %v506_v27 = vld [vmem:[#allocation2 + $0x120] sm:$0xff]  ;;  %v507_v56 = vld [vmem:[#allocation2 + $0x128] sm:$0xff]  ;;  %v529_v22 = vld [vmem:[#allocation2 + $0x1d8] sm:$0xff] }
  0x29   : > { %1453 = vmatprep.subr.bf16.mxu1 %v1561_v0  ;;  %v1400_v28 = vcombine.high %v502_v26, %v506_v27  ;;  %v1399_v29 = vcombine.low %v502_v26, %v506_v27  ;;  %v494_v30 = vld [vmem:[#allocation2 + $0xc0] sm:$0xff]  ;;  %v1402_v58 = vcombine.high %v503_v55, %v507_v56  ;;  %v495_v59 = vld [vmem:[#allocation2 + $0xc8] sm:$0xff]  ;;  %v1401_v61 = vcombine.low %v503_v55, %v507_v56  ;;  %v516_v46 = vld [vmem:[#allocation2 + $0x170] sm:$0xff] }
  0x2a   : > { %900 = vmatpush1.bf16.msra.mxu0 %v1415_v21  ;;  %v498_v31 = vld [vmem:[#allocation2 + $0xe0] sm:$0xff]  ;;  %v499_v60 = vld [vmem:[#allocation2 + $0xe8] sm:$0xff]  ;;  %v532_v21 = vld [vmem:[#allocation2 + $0x1f0] sm:$0xff]  ;;  %v1412_v51 = vcombine.high %v512_v45, %v516_v46 }
  0x2b   : > { %901 = vmatprep.subr.bf16.mxu0 %v1408_v24  ;;  %v1392_v32 = vcombine.high %v494_v30, %v498_v31  ;;  %v1391_v33 = vcombine.low %v494_v30, %v498_v31  ;;  %v486_v34 = vld [vmem:[#allocation2 + $0x80] sm:$0xff]  ;;  %v1394_v62 = vcombine.high %v495_v59, %v499_v60  ;;  %v487_v63 = vld [vmem:[#allocation2 + $0x88] sm:$0xff]  ;;  %v1393_v1 = vcombine.low %v495_v59, %v499_v60  ;;  %v533_v24 = vld [vmem:[#allocation2 + $0x1f8] sm:$0xff] }
  0x2c   : > { %1454 = vmatpush3.bf16.msra.mxu1 %v1503_v9  ;;  %v490_v35 = vld [vmem:[#allocation2 + $0xa0] sm:$0xff]  ;;  %v491_v0 = vld [vmem:[#allocation2 + $0xa8] sm:$0xff]  ;;  %v1428_v23 = vcombine.high %v528_v20, %v532_v21  ;;  %v1429_v26 = vcombine.low %v529_v22, %v533_v24  ;;  %v1430_v27 = vcombine.high %v529_v22, %v533_v24  ;;  %v505_v55 = vld [vmem:[#allocation2 + $0x118] sm:$0xff] }
  0x2d   : > { %940 = vmatprep.subr.bf16.mxu1 %v1426_v19  ;;  %v1384_v36 = vcombine.high %v486_v34, %v490_v35  ;;  %v1383_v37 = vcombine.low %v486_v34, %v490_v35  ;;  %v1359_v38 = vld [vmem:[%s1711_s2] ss:$0 sm:$0xff]  ;;  %v1386_v2 = vcombine.high %v487_v63, %v491_v0  ;;  %v1385_v3 = vcombine.low %v487_v63, %v491_v0  ;;  %v479_v6 = vld [vmem:[#allocation2 + $0x48] sm:$0xff]  ;;  %v520_v35 = vld [vmem:[#allocation2 + $0x190] sm:$0xff] }
  0x2e   : > { %902 = vmatpush1.bf16.msra.mxu0 %v1407_v25  ;;  %v478_v4 = vld [vmem:[#allocation2 + $0x40] sm:$0xff]  ;;  %v483_v8 = vld [vmem:[#allocation2 + $0x68] sm:$0xff]  ;;  %v1427_v25 = vcombine.low %v528_v20, %v532_v21  ;;  %v509_v56 = vld [vmem:[#allocation2 + $0x138] sm:$0xff] }
  0x2f   : > { %903 = vmatprep.subr.bf16.mxu0 %v1400_v28  ;;  %v482_v5 = vld [vmem:[#allocation2 + $0x60] sm:$0xff]  ;;  %v1377_v10 = vcombine.low %v479_v6, %v483_v8  ;;  %v1378_v11 = vcombine.high %v479_v6, %v483_v8  ;;  %v471_v14 = vld [vmem:[#allocation2 + $0x8] sm:$0xff]  ;;  %v1563_v28 = vmov 0   ;;  %v1406_v60 = vcombine.high %v505_v55, %v509_v56  ;;  %v497_v63 = vld [vmem:[#allocation2 + $0xd8] sm:$0xff] }
  0x30   : > { %v1376_v7 = vcombine.high %v478_v4, %v482_v5  ;;  %v1375_v9 = vcombine.low %v478_v4, %v482_v5  ;;  %v470_v12 = vld [vmem:[#allocation2] sm:$0xff]  ;;  %v475_v16 = vld [vmem:[#allocation2 + $0x28] sm:$0xff]  ;;  %929 = vmatprep.mubr.bf16.mxu0 %v1563_v28  ;;  %v501_v0 = vld [vmem:[#allocation2 + $0xf8] sm:$0xff] }
  0x31   : > { %v474_v13 = vld [vmem:[#allocation2 + $0x20] sm:$0xff]  ;;  %v1370_v19 = vcombine.high %v471_v14, %v475_v16  ;;  %v1398_v4 = vcombine.high %v497_v63, %v501_v0  ;;  %v488_v5 = vld [vmem:[#allocation2 + $0x90] sm:$0xff]  ;;  %v493_v8 = vld [vmem:[#allocation2 + $0xb8] sm:$0xff] }
  0x32   : > { %904 = vmatpush1.bf16.msra.mxu0 %v1399_v29  ;;  %v1368_v15 = vcombine.high %v470_v12, %v474_v13  ;;  %v1367_v17 = vcombine.low %v470_v12, %v474_v13  ;;  %v1361_v29 = vld [vmem:[%s1713_s4] ss:$0 sm:$0xff]  ;;  %v492_v6 = vld [vmem:[#allocation2 + $0xb0] sm:$0xff]  ;;  %v477_v24 = vld [vmem:[#allocation2 + $0x38] sm:$0xff] }
  0x33   : > { %905 = vmatprep.subr.bf16.mxu0 %v1392_v32  ;;  %v480_v13 = vld [vmem:[#allocation2 + $0x50] sm:$0xff] }
  0x34   : > { %v472_v21 = vld [vmem:[#allocation2 + $0x10] sm:$0xff] }
  0x35   : > { %v476_v22 = vld [vmem:[#allocation2 + $0x30] sm:$0xff] }
  0x36   : > { %906 = vmatpush1.bf16.msra.mxu0 %v1391_v33 }
  0x37   : > { %907 = vmatprep.subr.bf16.mxu0 %v1384_v36 }
  0x3a   : > { %908 = vmatpush1.bf16.msra.mxu0 %v1383_v37  ;;  %v524_v37 = vld [vmem:[#allocation2 + $0x1b0] sm:$0xff] }
  0x3b   : > { %909 = vmatprep.subr.bf16.mxu0 %v1376_v7  ;;  %v489_v7 = vld [vmem:[#allocation2 + $0x98] sm:$0xff] }
  0x3c   : > { %v1390_v12 = vcombine.high %v489_v7, %v493_v8 }
  0x3e   : > { %910 = vmatpush1.bf16.msra.mxu0 %v1375_v9 }
  0x3f   : > { %911 = vmatprep.subr.bf16.mxu0 %v1368_v15  ;;  %v481_v15 = vld [vmem:[#allocation2 + $0x58] sm:$0xff] }
  0x42   : > { %912 = vmatpush1.bf16.msra.mxu0 %v1367_v17  ;;  %v1387_v17 = vcombine.low %v488_v5, %v492_v6 }
  0x43   : > { %983 = vmatprep.subr.bf16.mxu0 %v1428_v23  ;;  %v473_v23 = vld [vmem:[#allocation2 + $0x18] sm:$0xff] }
  0xe5   : > { %v374_v39 = vpop.f32.mrf.mxu0 }
  0xe6   : > { %v375_v41 = vadd.f32 %v1359_v38, %v374_v39  ;;  %v525_v39 = vld [vmem:[#allocation2 + $0x1b8] sm:$0xff] }
  0xe7   : > { %v1445_v40 = vpop.f32.mrf.mxu0 }
  0xe8   : > { %v381_v47 = vmax.f32 %v375_v41, 0.0 }
  0xe9   : > { %v377_v42 = vpop.f32.mrf.mxu0 }
  0xea   : > { %v378_v43 = vadd.f32 %v1359_v38, %v377_v42  ;;  %v521_v38 = vld [vmem:[#allocation2 + $0x198] sm:$0xff] }
  0xeb   : > { %v1446_v44 = vpop.f32.mrf.mxu0 }
  0xec   : > { %v382_v48 = vmax.f32 %v378_v43, 0.0  ;;  %v1420_v43 = vcombine.high %v520_v35, %v524_v37  ;;  %v1422_v44 = vcombine.high %v521_v38, %v525_v39 }
  0xee   : > { %v392_v49 = vpack.c.bf16 %v382_v48, %v381_v47  ;;  %v513_v47 = vld [vmem:[#allocation2 + $0x158] sm:$0xff] }
  0xef   : > { %v517_v48 = vld [vmem:[#allocation2 + $0x178] sm:$0xff] }
  0xf0   : > { %1456 = vmatmul.mubr.msk.bf16.vlgmr.msra.gmra.mxu1 %vm423_vm3, %v392_v49  ;;  %v1419_v49 = vcombine.low %v520_v35, %v524_v37  ;;  %v1414_v52 = vcombine.high %v513_v47, %v517_v48 }
  0xf1   : > { %941 = vmatpush1.bf16.msra.mxu1 %v1425_v18  ;;  %v1369_v18 = vcombine.low %v471_v14, %v475_v16  ;;  %972 = vmatprep.mubr.bf16.mxu1 %v1563_v28  ;;  %v484_v14 = vld [vmem:[#allocation2 + $0x70] sm:$0xff]  ;;  %v485_v16 = vld [vmem:[#allocation2 + $0x78] sm:$0xff] }
  0xf2   : > { %942 = vmatprep.subr.bf16.mxu1 %v1418_v50  ;;  %v1421_v50 = vcombine.low %v521_v38, %v525_v39  ;;  %v1382_v20 = vcombine.high %v481_v15, %v485_v16 }
  0xf5   : > { %943 = vmatpush1.bf16.msra.mxu1 %v1417_v53  ;;  %v504_v53 = vld [vmem:[#allocation2 + $0x110] sm:$0xff] }
  0xf6   : > { %944 = vmatprep.subr.bf16.mxu1 %v1410_v54  ;;  %v508_v54 = vld [vmem:[#allocation2 + $0x130] sm:$0xff] }
  0xf7   : > { %v1404_v59 = vcombine.high %v504_v53, %v508_v54 }
  0xf9   : > { %945 = vmatpush1.bf16.msra.mxu1 %v1409_v57  ;;  %v1411_v57 = vcombine.low %v512_v45, %v516_v46 }
  0xfa   : > { %946 = vmatprep.subr.bf16.mxu1 %v1402_v58  ;;  %v1413_v58 = vcombine.low %v513_v47, %v517_v48 }
  0xfd   : > { %947 = vmatpush1.bf16.msra.mxu1 %v1401_v61  ;;  %v496_v61 = vld [vmem:[#allocation2 + $0xd0] sm:$0xff] }
  0xfe   : > { %948 = vmatprep.subr.bf16.mxu1 %v1394_v62  ;;  %v500_v62 = vld [vmem:[#allocation2 + $0xf0] sm:$0xff] }
  0xff   : > { %v1395_v9 = vcombine.low %v496_v61, %v500_v62 }
 0x101   : > { %949 = vmatpush1.bf16.msra.mxu1 %v1393_v1  ;;  %v1403_v1 = vcombine.low %v504_v53, %v508_v54 }
 0x102   : > { %950 = vmatprep.subr.bf16.mxu1 %v1386_v2  ;;  %v1405_v2 = vcombine.low %v505_v55, %v509_v56 }
 0x105   : > { %951 = vmatpush1.bf16.msra.mxu1 %v1385_v3  ;;  %v1396_v3 = vcombine.high %v496_v61, %v500_v62 }
 0x106   : > { %952 = vmatprep.subr.bf16.mxu1 %v1378_v11  ;;  %v1388_v11 = vcombine.high %v488_v5, %v492_v6 }
 0x109   : > { %953 = vmatpush1.bf16.msra.mxu1 %v1377_v10  ;;  %v1397_v10 = vcombine.low %v497_v63, %v501_v0 }
 0x10a   : > { %954 = vmatprep.subr.bf16.mxu1 %v1370_v19  ;;  %v1380_v19 = vcombine.high %v480_v13, %v484_v14 }
 0x10d   : > { %955 = vmatpush1.bf16.msra.mxu1 %v1369_v18  ;;  %v1389_v18 = vcombine.low %v489_v7, %v493_v8 }
 0x10e   : > { %1026 = vmatprep.subr.bf16.mxu1 %v1430_v27  ;;  %v1372_v27 = vcombine.high %v472_v21, %v476_v22 }
 0x1b0   : > { %v461_v30 = vpop.f32.mrf.mxu1 }
 0x1b1   : > { %v462_v32 = vadd.f32 %v1361_v29, %v461_v30  ;;  %v1373_v30 = vcombine.low %v473_v23, %v477_v24 }
 0x1b2   : > { %v1457_v31 = vpop.f32.mrf.mxu1 }
 0x1b3   : > { %v468_v40 = vmax.f32 %v462_v32, 0.0 }
 0x1b4   : > { %v464_v33 = vpop.f32.mrf.mxu1 }
 0x1b5   : > { %v465_v34 = vadd.f32 %v1361_v29, %v464_v33  ;;  %v1371_v29 = vcombine.low %v472_v21, %v476_v22  ;;  %v537_v33 = vlaneseq }
 0x1b6   : > { %v1458_v36 = vpop.f32.mrf.mxu1 }
 0x1b7   : > { %v469_v41 = vmax.f32 %v465_v34, 0.0  ;;  %v1682_v36 = vshrl.u32 %v537_v33, 7 }
 0x1b9   : > { %v1676_v42 = vpack.c.bf16 %v469_v41, %v468_v40  ;;  %v543_v39 = vsub.s32 1, %v1682_v36  ;;  %v551_v40 = vsub.s32 3, %v1682_v36  ;;  %v539_v41 = vsub.s32 0, %v1682_v36 }
 0x1ba   : > { %v555_v8 = vsub.s32 4, %v1682_v36 }
 0x1bb   : > { %930 = vmatmul.mubr.bf16.vlgmr.msra.gmra.mxu0 %v1676_v42  ;;  %973 = vmatmul.mubr.bf16.vlgmr.msra.gmra.mxu1 %v1676_v42 }
 0x1bc   : > { %984 = vmatpush1.bf16.msra.mxu0 %v1427_v25  ;;  %1027 = vmatpush1.bf16.msra.mxu1 %v1429_v26  ;;  %v1379_v25 = vcombine.low %v480_v13, %v484_v14  ;;  %v1381_v26 = vcombine.low %v481_v15, %v485_v16  ;;  %v567_v13 = vsub.s32 7, %v1682_v36 }
 0x1bd   : > { %985 = vmatprep.subr.bf16.mxu0 %v1420_v43  ;;  %1028 = vmatprep.subr.bf16.mxu1 %v1422_v44  ;;  %v547_v43 = vsub.s32 2, %v1682_v36 }
 0x1be   : > { %1015 = vmatprep.mubr.bf16.mxu0 %v1563_v28  ;;  %1058 = vmatprep.mubr.bf16.mxu1 %v1563_v28  ;;  %v1374_v28 = vcombine.high %v473_v23, %v477_v24 }
 0x1c0   : > { %986 = vmatpush1.bf16.msra.mxu0 %v1419_v49  ;;  %1029 = vmatpush1.bf16.msra.mxu1 %v1421_v50 }
 0x1c1   : > { %987 = vmatprep.subr.bf16.mxu0 %v1412_v51  ;;  %1030 = vmatprep.subr.bf16.mxu1 %v1414_v52 }
 0x1c4   : > { %988 = vmatpush1.bf16.msra.mxu0 %v1411_v57  ;;  %1031 = vmatpush1.bf16.msra.mxu1 %v1413_v58 }
 0x1c5   : > { %989 = vmatprep.subr.bf16.mxu0 %v1404_v59  ;;  %1032 = vmatprep.subr.bf16.mxu1 %v1406_v60 }
 0x1c8   : > { %990 = vmatpush1.bf16.msra.mxu0 %v1403_v1  ;;  %1033 = vmatpush1.bf16.msra.mxu1 %v1405_v2 }
 0x1c9   : > { %991 = vmatprep.subr.bf16.mxu0 %v1396_v3  ;;  %1034 = vmatprep.subr.bf16.mxu1 %v1398_v4 }
 0x1cc   : > { %992 = vmatpush1.bf16.msra.mxu0 %v1395_v9  ;;  %1035 = vmatpush1.bf16.msra.mxu1 %v1397_v10  ;;  %v563_v9 = vsub.s32 6, %v1682_v36 }
 0x1cd   : > { %993 = vmatprep.subr.bf16.mxu0 %v1388_v11  ;;  %1036 = vmatprep.subr.bf16.mxu1 %v1390_v12  ;;  %v559_v12 = vsub.s32 5, %v1682_v36 }
 0x1d0   : > { %994 = vmatpush1.bf16.msra.mxu0 %v1387_v17  ;;  %1037 = vmatpush1.bf16.msra.mxu1 %v1389_v18 }
 0x1d1   : > { %995 = vmatprep.subr.bf16.mxu0 %v1380_v19  ;;  %1038 = vmatprep.subr.bf16.mxu1 %v1382_v20 }
 0x1d4   : > { %996 = vmatpush1.bf16.msra.mxu0 %v1379_v25  ;;  %1039 = vmatpush1.bf16.msra.mxu1 %v1381_v26 }
 0x1d5   : > { %997 = vmatprep.subr.bf16.mxu0 %v1372_v27  ;;  %1040 = vmatprep.subr.bf16.mxu1 %v1374_v28 }
 0x1d8   : > { %998 = vmatpush1.bf16.msra.mxu0 %v1371_v29  ;;  %1041 = vmatpush1.bf16.msra.mxu1 %v1373_v30 }
 0x1db   : > { %1016 = vmatmul.mubr.bf16.vlgmr.msra.gmra.mxu0 %v1676_v42  ;;  %1059 = vmatmul.mubr.bf16.vlgmr.msra.gmra.mxu1 %v1676_v42  ;;  %v534_v42 = vld [vmem:[%s1715_s6] sm:$0xff] }
 0x1dc   : > { %v544_v46 = vrot.slane %v534_v42, %v543_v39  ;;  %v552_v47 = vrot.slane %v534_v42, %v551_v40  ;;  %v540_v48 = vrot.slane %v534_v42, %v539_v41  ;;  %v548_v49 = vrot.slane %v534_v42, %v547_v43 }
 0x1dd   : > { %v556_v16 = vrot.slane %v534_v42, %v555_v8  ;;  %v564_v17 = vrot.slane %v534_v42, %v563_v9  ;;  %v560_v22 = vrot.slane %v534_v42, %v559_v12  ;;  %v568_v23 = vrot.slane %v534_v42, %v567_v13 }
 0x27b   : > { %v931_v31 = vpop.f32.mrf.mxu0  ;;  %v974_v32 = vpop.f32.mrf.mxu1 }
 0x27c   : > { %v932_v56 = vadd.f32 %v931_v31, %v540_v48  ;;  %v975_v57 = vadd.f32 %v974_v32, %v548_v49 }
 0x27d   : > { %v933_v34 = vpop.f32.mrf.mxu0  ;;  %v976_v35 = vpop.f32.mrf.mxu1 }
 0x27e   : > { %v934_v52 = vadd.f32 %v933_v34, %v544_v46  ;;  %v977_v53 = vadd.f32 %v976_v35, %v552_v47  ;;  %v1069_v0 = vmax.f32 %v932_v56, 0.0  ;;  %v1071_v1 = vmax.f32 %v975_v57, 0.0 }
 0x27f   : > { %v935_v37 = vpop.f32.mrf.mxu0  ;;  %v978_v38 = vpop.f32.mrf.mxu1 }
 0x280   : > { %v936_v54 = vadd.f32 %v935_v37, %v540_v48  ;;  %v979_v55 = vadd.f32 %v978_v38, %v548_v49  ;;  %v1070_v60 = vmax.f32 %v934_v52, 0.0  ;;  %v1072_v61 = vmax.f32 %v977_v53, 0.0 }
 0x281   : > { %v937_v44 = vpop.f32.mrf.mxu0  ;;  %v980_v45 = vpop.f32.mrf.mxu1 }
 0x282   : > { %v938_v50 = vadd.f32 %v937_v44, %v544_v46  ;;  %v981_v51 = vadd.f32 %v980_v45, %v552_v47  ;;  %v1077_v62 = vmax.f32 %v936_v54, 0.0  ;;  %v1079_v63 = vmax.f32 %v979_v55, 0.0 }
 0x284   : > { %v1078_v58 = vmax.f32 %v938_v50, 0.0  ;;  %v1080_v59 = vmax.f32 %v981_v51, 0.0  ;;  %v1085_v4 = vmax.f32 %v1069_v0, %v1077_v62  ;;  %v1099_v5 = vmax.f32 %v1071_v1, %v1079_v63 }
 0x286   : > { %v1092_v2 = vmax.f32 %v1070_v60, %v1078_v58  ;;  %v1106_v3 = vmax.f32 %v1072_v61, %v1080_v59  ;;  %v1086_v10 = vrot.slane %v1085_v4, 4  ;;  %v1100_v11 = vrot.slane %v1099_v5, 4 }
 0x287   : > { %v1564_v58 = vmov 1966171168  }
 0x288   : > { %v1093_v6 = vrot.slane %v1092_v2, 4  ;;  %v1107_v7 = vrot.slane %v1106_v3, 4  ;;  %v1087_v18 = vmax.f32 %v1085_v4, %v1086_v10  ;;  %v1101_v19 = vmax.f32 %v1099_v5, %v1100_v11 }
 0x289   : > { %v1158_v59 = vunpack.c.l.s4 %v1564_v58 }
 0x28a   : > { %v1094_v14 = vmax.f32 %v1092_v2, %v1093_v6  ;;  %v1108_v15 = vmax.f32 %v1106_v3, %v1107_v7  ;;  %v1088_v30 = vrot.slane %v1087_v18, 2  ;;  %v1102_v31 = vrot.slane %v1101_v19, 2 }
 0x28b   : > { %v1159_v8 = vunpack.c.0.s8 %v1158_v59 }
 0x28c   : > { %v1095_v24 = vrot.slane %v1094_v14, 2  ;;  %v1109_v25 = vrot.slane %v1108_v15, 2  ;;  %v1089_v49 = vmax.f32 %v1087_v18, %v1088_v30  ;;  %v1103_v50 = vmax.f32 %v1101_v19, %v1102_v31 }
 0x28e   : > { %v1096_v39 = vmax.f32 %v1094_v14, %v1095_v24  ;;  %v1110_v40 = vmax.f32 %v1108_v15, %v1109_v25  ;;  %v1090_v1 = vrot.slane %v1089_v49, 1  ;;  %v1104_v2 = vrot.slane %v1103_v50, 1 }
 0x290   : > { %v1097_v57 = vrot.slane %v1096_v39, 1  ;;  %v1111_v60 = vrot.slane %v1110_v40, 1  ;;  %v1091_v14 = vmax.f32 %v1089_v49, %v1090_v1  ;;  %v1105_v15 = vmax.f32 %v1103_v50, %v1104_v2 }
 0x292   : > { %v1098_v7 = vmax.f32 %v1096_v39, %v1097_v57  ;;  %v1112_v9 = vmax.f32 %v1110_v40, %v1111_v60 }
 0x29b   : > { %v1017_v20 = vpop.f32.mrf.mxu0  ;;  %v1060_v21 = vpop.f32.mrf.mxu1 }
 0x29c   : > { %v1018_v26 = vadd.f32 %v1017_v20, %v556_v16  ;;  %v1061_v27 = vadd.f32 %v1060_v21, %v564_v17  ;;  %v1153_v20 = vcombine.low %v1091_v14, %v1098_v7  ;;  %v1162_v21 = vsub.s32 %v1159_v8, %v1682_v36 }
 0x29d   : > { %v1019_v28 = vpop.f32.mrf.mxu0  ;;  %v1062_v29 = vpop.f32.mrf.mxu1 }
 0x29e   : > { %v1020_v32 = vadd.f32 %v1019_v28, %v560_v22  ;;  %v1063_v33 = vadd.f32 %v1062_v29, %v568_v23  ;;  %v1073_v41 = vmax.f32 %v1018_v26, 0.0  ;;  %v1075_v43 = vmax.f32 %v1061_v27, 0.0 }
 0x29f   : > { %v1021_v34 = vpop.f32.mrf.mxu0  ;;  %v1064_v35 = vpop.f32.mrf.mxu1  ;;  %v1163_v29 = vrot.slane %v1153_v20, %v1162_v21 }
 0x2a0   : > { %v1022_v37 = vadd.f32 %v1021_v34, %v556_v16  ;;  %v1065_v38 = vadd.f32 %v1064_v35, %v564_v17  ;;  %v1074_v51 = vmax.f32 %v1020_v32, 0.0  ;;  %v1076_v52 = vmax.f32 %v1063_v33, 0.0 }
 0x2a1   : > { %v1023_v44 = vpop.f32.mrf.mxu0  ;;  %v1066_v42 = vpop.f32.mrf.mxu1 }
 0x2a2   : > { %v1081_v45 = vmax.f32 %v1022_v37, 0.0  ;;  %v1083_v46 = vmax.f32 %v1065_v38, 0.0  ;;  %v1024_v47 = vadd.f32 %v1023_v44, %v560_v22  ;;  %v1067_v48 = vadd.f32 %v1066_v42, %v568_v23 }
 0x2a3   : > { %v1154_v22 = vcombine.low %v1105_v15, %v1112_v9 }
 0x2a4   : > { %v1113_v53 = vmax.f32 %v1073_v41, %v1081_v45  ;;  %v1127_v54 = vmax.f32 %v1075_v43, %v1083_v46  ;;  %v1082_v55 = vmax.f32 %v1024_v47, 0.0  ;;  %v1084_v56 = vmax.f32 %v1067_v48, 0.0 }
 0x2a5   : > { %v1170_v30 = vrot.slane %v1154_v22, %v1162_v21 }
 0x2a6   : > { %v1114_v61 = vrot.slane %v1113_v53, 4  ;;  %v1128_v62 = vrot.slane %v1127_v54, 4  ;;  %v1120_v63 = vmax.f32 %v1074_v51, %v1082_v55  ;;  %v1134_v0 = vmax.f32 %v1076_v52, %v1084_v56 }
 0x2a7   : > { %v1185_v38 = vcombine.low %v1163_v29, %v1170_v30 }
 0x2a8   : > { %v1115_v3 = vmax.f32 %v1113_v53, %v1114_v61  ;;  %v1129_v4 = vmax.f32 %v1127_v54, %v1128_v62  ;;  %v1121_v5 = vrot.slane %v1120_v63, 4  ;;  %v1135_v6 = vrot.slane %v1134_v0, 4 }
 0x2a9   : > { %v1193_v41 = vrot.slane %v1185_v38, %v1162_v21 }
 0x2aa   : > { %v1116_v10 = vrot.slane %v1115_v3, 2  ;;  %v1130_v11 = vrot.slane %v1129_v4, 2  ;;  %v1122_v12 = vmax.f32 %v1120_v63, %v1121_v5  ;;  %v1136_v13 = vmax.f32 %v1134_v0, %v1135_v6 }
 0x2ac   : > { %v1117_v16 = vmax.f32 %v1115_v3, %v1116_v10  ;;  %v1131_v17 = vmax.f32 %v1129_v4, %v1130_v11  ;;  %v1123_v18 = vrot.slane %v1122_v12, 2  ;;  %v1137_v19 = vrot.slane %v1136_v13, 2 }
 0x2ae   : > { %v1118_v23 = vrot.slane %v1117_v16, 1  ;;  %v1132_v24 = vrot.slane %v1131_v17, 1  ;;  %v1124_v25 = vmax.f32 %v1122_v12, %v1123_v18  ;;  %v1138_v26 = vmax.f32 %v1136_v13, %v1137_v19 }
 0x2b0   : > { %v1125_v27 = vrot.slane %v1124_v25, 1  ;;  %v1139_v28 = vrot.slane %v1138_v26, 1  ;;  %v1119_v31 = vmax.f32 %v1117_v16, %v1118_v23  ;;  %v1133_v32 = vmax.f32 %v1131_v17, %v1132_v24 }
 0x2b2   : > { %v1126_v33 = vmax.f32 %v1124_v25, %v1125_v27  ;;  %v1140_v34 = vmax.f32 %v1138_v26, %v1139_v28 }
 0x2b4   : > { %v1155_v35 = vcombine.low %v1119_v31, %v1126_v33  ;;  %v1156_v37 = vcombine.low %v1133_v32, %v1140_v34 }
 0x2b6   : > { %v1177_v39 = vrot.slane %v1155_v35, %v1162_v21  ;;  %v1184_v40 = vrot.slane %v1156_v37, %v1162_v21 }
 0x2b8   : > { %v1186_v36 = vcombine.low %v1177_v39, %v1184_v40 }
 0x2ba   : > { %v1200_v43 = vrot.slane %v1186_v36, %v1162_v21 }
 0x2bc   : > { %v1201_v44 = vcombine.low %v1193_v41, %v1200_v43 }
 0x2be   : > { %1203 = vst [vmem:[%s319_s19] sm:$0xff] %v1201_v44 }
 0x2bf PF: > { %s18_s26 = sadd.s32 1, %s1556_s26   ;;  %s1719_s24 = smov %s1552_s25 }
 0x2c0   : > { %p15_p2 = scmp.ge.s32.totalorder %s18_s26, 4   ;;  %s1720_s25 = smov %s1722_s28 }
 0x2c2   :  { %17 = sbr.rel (!%p15_p2) target bundleno = 2 (0x2), region = 91 }
 0x2c7   :  { %1288 = vsyncpa [#allocation3], 1 }
 0x2c8   :  { %1290 = vsyncpa [#allocation3 + $0x1], 1 }

// kernel: _lambda_.7
= control target key start
LH: loop header
LB: loop body
LE: loop exit
PB: predicated region body
PF: predicated region fallthrough
CT: control target
= control target key end

     0   :  { %14 = vsyncpa [#allocation3], 0  ;;  %s2159_s0 = inlined_call_operand.vmem [shape: f32[2,16,8], index: 0, kind: input, shape index: {}]   ;;  %s2160_s1 = inlined_call_operand.vmem [shape: bf16[2,8,64], index: 1, kind: input, shape index: {}]   ;;  %s2161_s2 = inlined_call_operand.hbm [shape: f32[1,64], index: 2, kind: input, shape index: {}]   ;;  %s2162_s3 = inlined_call_operand.vmem [shape: bf16[64,128], index: 3, kind: input, shape index: {}]   ;;  %s2163_s4 = inlined_call_operand.hbm [shape: f32[1,128], index: 4, kind: input, shape index: {}]   ;;  %s2164_s5 = inlined_call_operand.hbm [shape: bf16[128,1024], index: 5, kind: input, shape index: {}]   ;;  %s2165_s6 = inlined_call_operand.hbm [shape: f32[1,1024], index: 6, kind: input, shape index: {}]   ;;  %s2166_s7 = inlined_call_operand.vmem [shape: bf16[2,16,1024], index: 7, kind: output, shape index: {0}]   ;;  %s2167_s8 = inlined_call_operand.vmem [shape: f32[2,1,1024], index: 8, kind: output, shape index: {1}]  }
   0x1   :  { %15 = vsyncpa [#allocation5], 0 }
   0x2   :  { %16 = vsyncpa [#allocation8], 0  ;;  %s2000_s27 = smov 0   ;;  %s2002_s28 = smov 0  }
   0x3   :  { %s2004_s29 = smov 0  }
   0x4 LB: > { %s1945_s30 = smov [#allocation4]   ;;  %s1594_s10 = sadd.s32 4294967295, %s1943_s29   ;;  %s1943_s29 = sphi %s2004_s29, %s22_s29   ;;  %s1939_s28 = sphi %s2002_s28, %s2173_s28   ;;  %s1935_s27 = sphi %s2000_s27, %s2172_s27  }
   0x5   : > { %s279_s9 = sshll.u32 %s1945_s30, 4  ;;  %p1596_p0 = scmp.ge.s32.totalorder %s1943_s29, 1  ;;  %s280_s9 = int_to_ptr.vmem [resolvable:$true] %s279_s9 }
   0x6   : > { %p252_p1 = scmp.lt.s32.totalorder %s1943_s29, 3  ;;  %p2018_p2 = scmp.eq.s32.totalorder %s1594_s10, 0 }
   0x7   : > { %s34_s13 = sadd.s32 1, %s1939_s28  ;;  %s1946_s16 = smov [#allocation2]  }
   0x8   : > { %p2022_p3 = pnand %p1596_p0, %p252_p1  ;;  %p2035_p6 = scmp.ge.s32.totalorder %s34_s13, 2 }
   0x9   : > { %s265_s17 = sshll.u32 %s1946_s16, 4  ;;  %s1816_s18 = scalar_lea.vmem %s280_s9, 16  ;;  %s266_s17 = int_to_ptr.vmem [resolvable:$true] %s265_s17 }
   0xa   : > { %p1746_p4 = pneg %p2022_p3  ;;  %p1817_p8 = scmp.ne.s32.totalorder %s280_s9, %s1816_s18 }
   0xb   : > { %s1823_s19 = scalar_lea.vmem %s280_s9, 32  ;;  %p1824_p11 = scmp.lt.s32.totalorder %s280_s9, %s280_s9 }
   0xc   : > { %p2031_p5 = pnand %p2018_p2, %p1746_p4  ;;  %p1825_p12 = scmp.lt.s32.totalorder %s1823_s19, %s1816_s18 }
   0xe   : > { %p1807_p7 = pneg %p2031_p5  ;;  %p1826_p13 = por %p1825_p12, %p1824_p11 }
  0x10   : > { %p1819_p9 = pnand %p1817_p8, %p1807_p7 }
  0x12   : > { %p1820_p10 = pneg %p1819_p9 }
  0x14   : > { %p1827_p0 = pnand %p1826_p13, %p1820_p10 }
  0x16   : > { %1830 = shalt.err (!%p1827_p0)
}
  0x17   : > { %1752 = dma.hbm_to_vmem [thread:$0]  (!%p2031_p5), %s2163_s4, 16, %s280_s9, [#allocation5]  }
  0x18   : > { %s2175_s13 = smov (%p2035_p6, %s34_s13), 0  ;;  %s1842_s22 = scalar_lea.vmem %s266_s17, 16 }
  0x19   : > { %p1843_p1 = scmp.ne.s32.totalorder %s266_s17, %s1842_s22  ;;  %s1849_s23 = scalar_lea.vmem %s266_s17, 32 }
  0x1a   : > { %p1850_p9 = scmp.lt.s32.totalorder %s266_s17, %s266_s17  ;;  %p1851_p10 = scmp.lt.s32.totalorder %s1849_s23, %s1842_s22 }
  0x1b   : > { %p1845_p4 = pnand %p1843_p1, %p1807_p7 }
  0x1c   : > { %p1852_p11 = por %p1851_p10, %p1850_p9 }
  0x1d   : > { %p1846_p8 = pneg %p1845_p4 }
  0x1f   : > { %p1853_p12 = pnand %p1852_p11, %p1846_p8 }
  0x21   : > { %1856 = shalt.err (!%p1853_p12)
}
  0x22   : > { %1749 = dma.hbm_to_vmem [thread:$0]  (!%p2031_p5), %s2161_s2, 16, %s266_s17, [#allocation3]  }
  0x23   : > { %s1947_s26 = smov [#allocation6]  }
  0x24   : > { %s289_s30 = sshll.u32 %s1947_s26, 4  ;;  %s290_s30 = int_to_ptr.vmem [resolvable:$true] %s289_s30 }
  0x25   : > { %s1868_s9 = scalar_lea.vmem %s290_s30, 8192  ;;  %p1876_p1 = scmp.lt.s32.totalorder %s290_s30, %s290_s30 }
  0x26   : > { %p1869_p6 = scmp.ne.s32.totalorder %s290_s30, %s1868_s9  ;;  %p1877_p4 = scmp.lt.s32.totalorder %s1868_s9, %s1868_s9 }
  0x28   : > { %p1871_p13 = pnand %p1869_p6, %p1807_p7  ;;  %p1878_p8 = por %p1877_p4, %p1876_p1 }
  0x2a   : > { %p1872_p0 = pneg %p1871_p13 }
  0x2c   : > { %p1879_p9 = pnand %p1878_p8, %p1872_p0 }
  0x2e   : > { %1882 = shalt.err (!%p1879_p9)
}
  0x2f   : > { %s1948_s10 = smov 512   ;;  %s1949_s15 = smov 32  }
  0x30   : > { %1755 = dma.hbm_to_vmem [thread:$0]  (!%p2031_p5), %s2164_s5, 8192, %s290_s30, [#allocation5], %s1948_s10, %s1948_s10, %s1949_s15  }
  0x31   : > { %s1950_s18 = smov [#allocation7]  }
  0x32   : > { %s303_s19 = sshll.u32 %s1950_s18, 4  ;;  %s304_s19 = int_to_ptr.vmem [resolvable:$true] %s303_s19 }
  0x33   : > { %s1894_s20 = scalar_lea.vmem %s304_s19, 128  ;;  %p1902_p6 = scmp.lt.s32.totalorder %s304_s19, %s304_s19 }
  0x34   : > { %p1895_p10 = scmp.ne.s32.totalorder %s304_s19, %s1894_s20  ;;  %p1903_p13 = scmp.lt.s32.totalorder %s1894_s20, %s1894_s20 }
  0x36   : > { %p1897_p11 = pnand %p1895_p10, %p1807_p7  ;;  %p1904_p0 = por %p1903_p13, %p1902_p6 }
  0x38   : > { %p1898_p12 = pneg %p1897_p11 }
  0x3a   : > { %p1905_p1 = pnand %p1904_p0, %p1898_p12 }
  0x3c   : > { %1908 = shalt.err (!%p1905_p1)
}
  0x3d   : > { %1758 = dma.hbm_to_vmem [thread:$0]  (!%p2031_p5), %s2165_s6, 128, %s304_s19, [#allocation8]  }
  0x3e   : > { %336 = sbr.rel (%p2022_p3) target bundleno = 747 (0x2eb), region = 48 }
  0x43   : > { %1922 = dma.done.wait (%p2018_p2), [#allocation3], 16  }
  0x44   : > { %1924 = vsyncadd (%p2018_p2), [#allocation3], 4294967280 }
  0x45   : > { %1926 = dma.done.wait (%p2018_p2), [#allocation5], 8208  }
  0x46   : > { %1928 = vsyncadd (%p2018_p2), [#allocation5], 4294959088 }
  0x47   : > { %1930 = dma.done.wait (%p2018_p2), [#allocation8], 128  }
  0x48   : > { %1932 = vsyncadd (%p2018_p2), [#allocation8], 4294967168  ;;  %p400_p3 = scmp.lt.s32.totalorder %s1935_s27, 1  ;;  %v1951_v0 = vmov 0.0   ;;  %vm1952_vm0 = vmmov 0   ;;  %vm444_vm1 = vcmask 1043456  }
  0x49   : > { %1712 = vmatprep.subr.bf16.mxu0 %v1951_v0  ;;  %1714 = vmatprep.mubr.msk.bf16.mxu0 %vm1952_vm0, %v1951_v0  ;;  %v1801_v5 = vld [vmem:[%s2162_s3 + $0x18] sm:$0xff]   ;;  %vm440_vm2 = vcmask 64512   ;;  %v1802_v7 = vld [vmem:[%s2162_s3 + $0x10] sm:$0xff]   ;;  %v1803_v8 = vld [vmem:[%s2162_s3 + $0x8] sm:$0xff]   ;;  %vm531_vm3 = vcmask 523264  }
  0x4a   : > { %s2177_s27 = smov (!%p400_p3, %s1935_s27), 1  ;;  %1718 = vmatprep.subr.bf16.mxu1 %v1951_v0  ;;  %1726 = vmatprep.mubr.msk.bf16.mxu1 %vm1952_vm0, %v1951_v0  ;;  %v1804_v9 = vld [vmem:[%s2162_s3] sm:$0xff]   ;;  %v635_v12 = vld [vmem:[#allocation6 + $0x1c8] sm:$0xff] }
  0x4b   : > { %s1609_s12 = sshll.u32 %s2177_s27, 2  ;;  %s1695_s11 = sshll.u32 %s2177_s27, 4  ;;  %1719 = vmatpush3.bf16.msra.mxu1 %v1801_v5  ;;  %v634_v10 = vld [vmem:[#allocation6 + $0x1c0] sm:$0xff]  ;;  %v639_v15 = vld [vmem:[#allocation6 + $0x1e8] sm:$0xff]  ;;  %v1613_v38 = vld [vmem:[#allocation2] ss:$0 sm:$0xff] }
  0x4c   : > { %s412_s24 = scalar_lea.vmem %s2160_s1, %s1609_s12  ;;  %s407_s30 = scalar_lea.vmem %s2159_s0, %s1695_s11  ;;  %1720 = vmatprep.subr.bf16.mxu1 %v1951_v0  ;;  %v638_v11 = vld [vmem:[#allocation6 + $0x1e0] sm:$0xff]  ;;  %v1679_v18 = vcombine.low %v635_v12, %v639_v15  ;;  %v1680_v19 = vcombine.high %v635_v12, %v639_v15  ;;  %v627_v45 = vld [vmem:[#allocation6 + $0x188] sm:$0xff] }
  0x4d   : > { %v431_v1 = vld [vmem:[%s412_s24] sm:$0xf]  ;;  %v430_v4 = vld [vmem:[%s407_s30 + $0x8] sm:$0xff]  ;;  %v1677_v13 = vcombine.low %v634_v10, %v638_v11  ;;  %v1678_v14 = vcombine.high %v634_v10, %v638_v11  ;;  %s1696_s21 = sshll.u32 %s2177_s27, 6  ;;  %s1612_s23 = sshll.u32 %s2177_s27, 3 }
  0x4e   : > { %v446_v2 = vsel %vm444_vm1, %v431_v1, 0  ;;  %v429_v3 = vld [vmem:[%s407_s30] sm:$0xff]  ;;  %v631_v46 = vld [vmem:[#allocation6 + $0x1a8] sm:$0xff]  ;;  %s2131_s14 = scalar_lea.vmem %s2166_s7, %s1696_s21  ;;  %s427_s25 = scalar_lea.vmem %s2167_s8, %s1612_s23 }
  0x4f   : > { %1713 = vmatpush3.bf16.msra.mxu0 %v446_v2  ;;  %v433_v6 = vpack.c.bf16 %v430_v4, %v429_v3  ;;  %1721 = vmatpush3.bf16.msra.mxu1 %v1802_v7  ;;  %v626_v16 = vld [vmem:[#allocation6 + $0x180] sm:$0xff]  ;;  %v1672_v50 = vcombine.high %v627_v45, %v631_v46  ;;  %v619_v51 = vld [vmem:[#allocation6 + $0x148] sm:$0xff]  ;;  %v1671_v53 = vcombine.low %v627_v45, %v631_v46  ;;  %v620_v45 = vld [vmem:[#allocation6 + $0x150] sm:$0xff] }
  0x50   : > { %1722 = vmatprep.subr.bf16.mxu1 %v1951_v0  ;;  %v630_v17 = vld [vmem:[#allocation6 + $0x1a0] sm:$0xff]  ;;  %1005 = vmatprep.subr.bf16.mxu0 %v1678_v14  ;;  %v623_v52 = vld [vmem:[#allocation6 + $0x168] sm:$0xff]  ;;  %v624_v46 = vld [vmem:[#allocation6 + $0x170] sm:$0xff] }
  0x51   : > { %v1670_v20 = vcombine.high %v626_v16, %v630_v17  ;;  %v1669_v21 = vcombine.low %v626_v16, %v630_v17  ;;  %v618_v22 = vld [vmem:[#allocation6 + $0x140] sm:$0xff]  ;;  %v1664_v54 = vcombine.high %v619_v51, %v623_v52  ;;  %v611_v55 = vld [vmem:[#allocation6 + $0x108] sm:$0xff]  ;;  %v1663_v57 = vcombine.low %v619_v51, %v623_v52 }
  0x52   : > { %1715 = vmatmul.mubr.msk.bf16.vlgmr.msra.gmra.mxu0 %vm440_vm2, %v433_v6  ;;  %v622_v23 = vld [vmem:[#allocation6 + $0x160] sm:$0xff]  ;;  %v615_v56 = vld [vmem:[#allocation6 + $0x128] sm:$0xff]  ;;  %v1666_v51 = vcombine.high %v620_v45, %v624_v46 }
  0x53   : > { %1723 = vmatpush3.bf16.msra.mxu1 %v1803_v8  ;;  %1006 = vmatpush1.bf16.msra.mxu0 %v1677_v13  ;;  %v1662_v24 = vcombine.high %v618_v22, %v622_v23  ;;  %v1661_v25 = vcombine.low %v618_v22, %v622_v23  ;;  %v610_v26 = vld [vmem:[#allocation6 + $0x100] sm:$0xff]  ;;  %v1656_v58 = vcombine.high %v611_v55, %v615_v56  ;;  %v603_v59 = vld [vmem:[#allocation6 + $0xc8] sm:$0xff]  ;;  %v637_v22 = vld [vmem:[#allocation6 + $0x1d8] sm:$0xff] }
  0x54   : > { %1724 = vmatprep.subr.bf16.mxu1 %v1951_v0  ;;  %1007 = vmatprep.subr.bf16.mxu0 %v1670_v20  ;;  %v614_v27 = vld [vmem:[#allocation6 + $0x120] sm:$0xff]  ;;  %v607_v60 = vld [vmem:[#allocation6 + $0xe8] sm:$0xff]  ;;  %v1655_v61 = vcombine.low %v611_v55, %v615_v56  ;;  %v636_v20 = vld [vmem:[#allocation6 + $0x1d0] sm:$0xff] }
  0x55   : > { %v1654_v28 = vcombine.high %v610_v26, %v614_v27  ;;  %v1653_v29 = vcombine.low %v610_v26, %v614_v27  ;;  %v602_v30 = vld [vmem:[#allocation6 + $0xc0] sm:$0xff]  ;;  %v1648_v62 = vcombine.high %v603_v59, %v607_v60  ;;  %v595_v63 = vld [vmem:[#allocation6 + $0x88] sm:$0xff]  ;;  %v1647_v1 = vcombine.low %v603_v59, %v607_v60  ;;  %v613_v55 = vld [vmem:[#allocation6 + $0x118] sm:$0xff] }
  0x56   : > { %v606_v31 = vld [vmem:[#allocation6 + $0xe0] sm:$0xff]  ;;  %v599_v0 = vld [vmem:[#allocation6 + $0xa8] sm:$0xff]  ;;  %v617_v56 = vld [vmem:[#allocation6 + $0x138] sm:$0xff] }
  0x57   : > { %1725 = vmatpush3.bf16.msra.mxu1 %v1804_v9  ;;  %1008 = vmatpush1.bf16.msra.mxu0 %v1669_v21  ;;  %v1646_v32 = vcombine.high %v602_v30, %v606_v31  ;;  %v1645_v33 = vcombine.low %v602_v30, %v606_v31  ;;  %v594_v34 = vld [vmem:[#allocation6 + $0x80] sm:$0xff]  ;;  %v1640_v2 = vcombine.high %v595_v63, %v599_v0  ;;  %v587_v6 = vld [vmem:[#allocation6 + $0x48] sm:$0xff]  ;;  %v640_v21 = vld [vmem:[#allocation6 + $0x1f0] sm:$0xff] }
  0x58   : > { %1048 = vmatprep.subr.bf16.mxu1 %v1680_v19  ;;  %1009 = vmatprep.subr.bf16.mxu0 %v1662_v24  ;;  %v598_v35 = vld [vmem:[#allocation6 + $0xa0] sm:$0xff]  ;;  %v1639_v3 = vcombine.low %v595_v63, %v599_v0  ;;  %v591_v8 = vld [vmem:[#allocation6 + $0x68] sm:$0xff]  ;;  %v1682_v23 = vcombine.high %v636_v20, %v640_v21  ;;  %v641_v24 = vld [vmem:[#allocation6 + $0x1f8] sm:$0xff]  ;;  %v1660_v60 = vcombine.high %v613_v55, %v617_v56 }
  0x59   : > { %v1638_v36 = vcombine.high %v594_v34, %v598_v35  ;;  %v1637_v37 = vcombine.low %v594_v34, %v598_v35  ;;  %v586_v4 = vld [vmem:[#allocation6 + $0x40] sm:$0xff]  ;;  %v1631_v10 = vcombine.low %v587_v6, %v591_v8  ;;  %v1632_v11 = vcombine.high %v587_v6, %v591_v8  ;;  %v579_v14 = vld [vmem:[#allocation6 + $0x8] sm:$0xff]  ;;  %v628_v35 = vld [vmem:[#allocation6 + $0x190] sm:$0xff] }
  0x5a   : > { %v590_v5 = vld [vmem:[#allocation6 + $0x60] sm:$0xff]  ;;  %v583_v16 = vld [vmem:[#allocation6 + $0x28] sm:$0xff]  ;;  %v1683_v26 = vcombine.low %v637_v22, %v641_v24  ;;  %v1684_v27 = vcombine.high %v637_v22, %v641_v24  ;;  %v605_v63 = vld [vmem:[#allocation6 + $0xd8] sm:$0xff] }
  0x5b   : > { %1010 = vmatpush1.bf16.msra.mxu0 %v1661_v25  ;;  %v1630_v7 = vcombine.high %v586_v4, %v590_v5  ;;  %v1629_v9 = vcombine.low %v586_v4, %v590_v5  ;;  %v578_v12 = vld [vmem:[#allocation6] sm:$0xff]  ;;  %v1624_v19 = vcombine.high %v579_v14, %v583_v16  ;;  %v1681_v25 = vcombine.low %v636_v20, %v640_v21  ;;  %v609_v0 = vld [vmem:[#allocation6 + $0xf8] sm:$0xff]  ;;  %v596_v5 = vld [vmem:[#allocation6 + $0x90] sm:$0xff] }
  0x5c   : > { %1011 = vmatprep.subr.bf16.mxu0 %v1654_v28  ;;  %v582_v13 = vld [vmem:[#allocation6 + $0x20] sm:$0xff]  ;;  %v1953_v28 = vmov 0   ;;  %v1652_v4 = vcombine.high %v605_v63, %v609_v0  ;;  %v600_v6 = vld [vmem:[#allocation6 + $0xb0] sm:$0xff]  ;;  %v601_v8 = vld [vmem:[#allocation6 + $0xb8] sm:$0xff] }
  0x5d   : > { %v1622_v15 = vcombine.high %v578_v12, %v582_v13  ;;  %v1621_v17 = vcombine.low %v578_v12, %v582_v13  ;;  %1037 = vmatprep.mubr.bf16.mxu0 %v1953_v28  ;;  %v588_v13 = vld [vmem:[#allocation6 + $0x50] sm:$0xff]  ;;  %v585_v24 = vld [vmem:[#allocation6 + $0x38] sm:$0xff] }
  0x5e   : > { %v580_v21 = vld [vmem:[#allocation6 + $0x10] sm:$0xff] }
  0x5f   : > { %1012 = vmatpush1.bf16.msra.mxu0 %v1653_v29  ;;  %v1615_v29 = vld [vmem:[#allocation4] ss:$0 sm:$0xff]  ;;  %v584_v22 = vld [vmem:[#allocation6 + $0x30] sm:$0xff] }
  0x60   : > { %1013 = vmatprep.subr.bf16.mxu0 %v1646_v32 }
  0x63   : > { %1014 = vmatpush1.bf16.msra.mxu0 %v1645_v33 }
  0x64   : > { %1015 = vmatprep.subr.bf16.mxu0 %v1638_v36 }
  0x67   : > { %1016 = vmatpush1.bf16.msra.mxu0 %v1637_v37  ;;  %v632_v37 = vld [vmem:[#allocation6 + $0x1b0] sm:$0xff] }
  0x68   : > { %1017 = vmatprep.subr.bf16.mxu0 %v1630_v7  ;;  %v597_v7 = vld [vmem:[#allocation6 + $0x98] sm:$0xff] }
  0x69   : > { %v1644_v12 = vcombine.high %v597_v7, %v601_v8 }
  0x6b   : > { %1018 = vmatpush1.bf16.msra.mxu0 %v1629_v9 }
  0x6c   : > { %1019 = vmatprep.subr.bf16.mxu0 %v1622_v15  ;;  %v589_v15 = vld [vmem:[#allocation6 + $0x58] sm:$0xff] }
  0x6f   : > { %1020 = vmatpush1.bf16.msra.mxu0 %v1621_v17  ;;  %v1641_v17 = vcombine.low %v596_v5, %v600_v6 }
  0x70   : > { %1091 = vmatprep.subr.bf16.mxu0 %v1682_v23  ;;  %v581_v23 = vld [vmem:[#allocation6 + $0x18] sm:$0xff] }
 0x112   : > { %v482_v39 = vpop.f32.mrf.mxu0 }
 0x113   : > { %v483_v41 = vadd.f32 %v1613_v38, %v482_v39  ;;  %v633_v39 = vld [vmem:[#allocation6 + $0x1b8] sm:$0xff] }
 0x114   : > { %v1716_v40 = vpop.f32.mrf.mxu0 }
 0x115   : > { %v489_v47 = vmax.f32 %v483_v41, 0.0 }
 0x116   : > { %v485_v42 = vpop.f32.mrf.mxu0 }
 0x117   : > { %v486_v43 = vadd.f32 %v1613_v38, %v485_v42  ;;  %v629_v38 = vld [vmem:[#allocation6 + $0x198] sm:$0xff] }
 0x118   : > { %v1717_v44 = vpop.f32.mrf.mxu0 }
 0x119   : > { %v490_v48 = vmax.f32 %v486_v43, 0.0  ;;  %v1674_v43 = vcombine.high %v628_v35, %v632_v37  ;;  %v1676_v44 = vcombine.high %v629_v38, %v633_v39 }
 0x11b   : > { %v500_v49 = vpack.c.bf16 %v490_v48, %v489_v47  ;;  %v621_v47 = vld [vmem:[#allocation6 + $0x158] sm:$0xff] }
 0x11c   : > { %v625_v48 = vld [vmem:[#allocation6 + $0x178] sm:$0xff] }
 0x11d   : > { %1727 = vmatmul.mubr.msk.bf16.vlgmr.msra.gmra.mxu1 %vm531_vm3, %v500_v49  ;;  %v1673_v49 = vcombine.low %v628_v35, %v632_v37  ;;  %v1668_v52 = vcombine.high %v621_v47, %v625_v48  ;;  %v642_v37 = vld [vmem:[#allocation7] sm:$0xff] }
 0x11e   : > { %1049 = vmatpush1.bf16.msra.mxu1 %v1679_v18  ;;  %v1623_v18 = vcombine.low %v579_v14, %v583_v16  ;;  %1080 = vmatprep.mubr.bf16.mxu1 %v1953_v28  ;;  %v592_v14 = vld [vmem:[#allocation6 + $0x70] sm:$0xff]  ;;  %v593_v16 = vld [vmem:[#allocation6 + $0x78] sm:$0xff] }
 0x11f   : > { %1050 = vmatprep.subr.bf16.mxu1 %v1672_v50  ;;  %v1675_v50 = vcombine.low %v629_v38, %v633_v39  ;;  %v1636_v20 = vcombine.high %v589_v15, %v593_v16 }
 0x122   : > { %1051 = vmatpush1.bf16.msra.mxu1 %v1671_v53  ;;  %v612_v53 = vld [vmem:[#allocation6 + $0x110] sm:$0xff] }
 0x123   : > { %1052 = vmatprep.subr.bf16.mxu1 %v1664_v54  ;;  %v616_v54 = vld [vmem:[#allocation6 + $0x130] sm:$0xff] }
 0x124   : > { %v1658_v59 = vcombine.high %v612_v53, %v616_v54 }
 0x126   : > { %1053 = vmatpush1.bf16.msra.mxu1 %v1663_v57  ;;  %v1665_v57 = vcombine.low %v620_v45, %v624_v46 }
 0x127   : > { %1054 = vmatprep.subr.bf16.mxu1 %v1656_v58  ;;  %v1667_v58 = vcombine.low %v621_v47, %v625_v48 }
 0x12a   : > { %1055 = vmatpush1.bf16.msra.mxu1 %v1655_v61  ;;  %v604_v61 = vld [vmem:[#allocation6 + $0xd0] sm:$0xff] }
 0x12b   : > { %1056 = vmatprep.subr.bf16.mxu1 %v1648_v62  ;;  %v608_v62 = vld [vmem:[#allocation6 + $0xf0] sm:$0xff] }
 0x12c   : > { %v1649_v9 = vcombine.low %v604_v61, %v608_v62 }
 0x12e   : > { %1057 = vmatpush1.bf16.msra.mxu1 %v1647_v1  ;;  %v1657_v1 = vcombine.low %v612_v53, %v616_v54 }
 0x12f   : > { %1058 = vmatprep.subr.bf16.mxu1 %v1640_v2  ;;  %v1659_v2 = vcombine.low %v613_v55, %v617_v56 }
 0x132   : > { %1059 = vmatpush1.bf16.msra.mxu1 %v1639_v3  ;;  %v1650_v3 = vcombine.high %v604_v61, %v608_v62 }
 0x133   : > { %1060 = vmatprep.subr.bf16.mxu1 %v1632_v11  ;;  %v1642_v11 = vcombine.high %v596_v5, %v600_v6 }
 0x136   : > { %1061 = vmatpush1.bf16.msra.mxu1 %v1631_v10  ;;  %v1651_v10 = vcombine.low %v605_v63, %v609_v0 }
 0x137   : > { %1062 = vmatprep.subr.bf16.mxu1 %v1624_v19  ;;  %v1634_v19 = vcombine.high %v588_v13, %v592_v14 }
 0x13a   : > { %1063 = vmatpush1.bf16.msra.mxu1 %v1623_v18  ;;  %v1643_v18 = vcombine.low %v597_v7, %v601_v8 }
 0x13b   : > { %1134 = vmatprep.subr.bf16.mxu1 %v1684_v27  ;;  %v1626_v27 = vcombine.high %v580_v21, %v584_v22 }
 0x1dd   : > { %v569_v30 = vpop.f32.mrf.mxu1 }
 0x1de   : > { %v570_v32 = vadd.f32 %v1615_v29, %v569_v30  ;;  %v1627_v30 = vcombine.low %v581_v23, %v585_v24 }
 0x1df   : > { %v1728_v31 = vpop.f32.mrf.mxu1 }
 0x1e0   : > { %v576_v40 = vmax.f32 %v570_v32, 0.0  ;;  %v645_v31 = vlaneseq }
 0x1e1   : > { %v572_v33 = vpop.f32.mrf.mxu1 }
 0x1e2   : > { %v573_v34 = vadd.f32 %v1615_v29, %v572_v33  ;;  %v1625_v29 = vcombine.low %v580_v21, %v584_v22  ;;  %v2121_v32 = vshrl.u32 %v645_v31, 7 }
 0x1e3   : > { %v1729_v36 = vpop.f32.mrf.mxu1 }
 0x1e4   : > { %v577_v41 = vmax.f32 %v573_v34, 0.0  ;;  %v647_v33 = vsub.s32 0, %v2121_v32  ;;  %v655_v34 = vsub.s32 2, %v2121_v32  ;;  %v651_v35 = vsub.s32 1, %v2121_v32 }
 0x1e5   : > { %v659_v36 = vsub.s32 3, %v2121_v32  ;;  %v671_v5 = vsub.s32 6, %v2121_v32  ;;  %v667_v6 = vsub.s32 5, %v2121_v32  ;;  %v675_v7 = vsub.s32 7, %v2121_v32 }
 0x1e6   : > { %v2115_v42 = vpack.c.bf16 %v577_v41, %v576_v40  ;;  %v648_v38 = vrot.slane %v642_v37, %v647_v33  ;;  %v656_v39 = vrot.slane %v642_v37, %v655_v34  ;;  %v652_v40 = vrot.slane %v642_v37, %v651_v35 }
 0x1e7   : > { %v660_v41 = vrot.slane %v642_v37, %v659_v36 }
 0x1e8   : > { %1038 = vmatmul.mubr.bf16.vlgmr.msra.gmra.mxu0 %v2115_v42  ;;  %1081 = vmatmul.mubr.bf16.vlgmr.msra.gmra.mxu1 %v2115_v42 }
 0x1e9   : > { %1092 = vmatpush1.bf16.msra.mxu0 %v1681_v25  ;;  %1135 = vmatpush1.bf16.msra.mxu1 %v1683_v26  ;;  %v1633_v25 = vcombine.low %v588_v13, %v592_v14  ;;  %v1635_v26 = vcombine.low %v589_v15, %v593_v16  ;;  %v672_v13 = vrot.slane %v642_v37, %v671_v5 }
 0x1ea   : > { %1093 = vmatprep.subr.bf16.mxu0 %v1674_v43  ;;  %1136 = vmatprep.subr.bf16.mxu1 %v1676_v44  ;;  %v668_v14 = vrot.slane %v642_v37, %v667_v6  ;;  %v676_v15 = vrot.slane %v642_v37, %v675_v7 }
 0x1eb   : > { %1123 = vmatprep.mubr.bf16.mxu0 %v1953_v28  ;;  %1166 = vmatprep.mubr.bf16.mxu1 %v1953_v28  ;;  %v1628_v28 = vcombine.high %v581_v23, %v585_v24 }
 0x1ed   : > { %1094 = vmatpush1.bf16.msra.mxu0 %v1673_v49  ;;  %1137 = vmatpush1.bf16.msra.mxu1 %v1675_v50 }
 0x1ee   : > { %1095 = vmatprep.subr.bf16.mxu0 %v1666_v51  ;;  %1138 = vmatprep.subr.bf16.mxu1 %v1668_v52 }
 0x1f1   : > { %1096 = vmatpush1.bf16.msra.mxu0 %v1665_v57  ;;  %1139 = vmatpush1.bf16.msra.mxu1 %v1667_v58 }
 0x1f2   : > { %1097 = vmatprep.subr.bf16.mxu0 %v1658_v59  ;;  %1140 = vmatprep.subr.bf16.mxu1 %v1660_v60 }
 0x1f5   : > { %1098 = vmatpush1.bf16.msra.mxu0 %v1657_v1  ;;  %1141 = vmatpush1.bf16.msra.mxu1 %v1659_v2 }
 0x1f6   : > { %1099 = vmatprep.subr.bf16.mxu0 %v1650_v3  ;;  %1142 = vmatprep.subr.bf16.mxu1 %v1652_v4  ;;  %v663_v4 = vsub.s32 4, %v2121_v32 }
 0x1f9   : > { %1100 = vmatpush1.bf16.msra.mxu0 %v1649_v9  ;;  %1143 = vmatpush1.bf16.msra.mxu1 %v1651_v10 }
 0x1fa   : > { %1101 = vmatprep.subr.bf16.mxu0 %v1642_v11  ;;  %1144 = vmatprep.subr.bf16.mxu1 %v1644_v12  ;;  %v664_v12 = vrot.slane %v642_v37, %v663_v4 }
 0x1fd   : > { %1102 = vmatpush1.bf16.msra.mxu0 %v1641_v17  ;;  %1145 = vmatpush1.bf16.msra.mxu1 %v1643_v18 }
 0x1fe   : > { %1103 = vmatprep.subr.bf16.mxu0 %v1634_v19  ;;  %1146 = vmatprep.subr.bf16.mxu1 %v1636_v20 }
 0x201   : > { %1104 = vmatpush1.bf16.msra.mxu0 %v1633_v25  ;;  %1147 = vmatpush1.bf16.msra.mxu1 %v1635_v26 }
 0x202   : > { %1105 = vmatprep.subr.bf16.mxu0 %v1626_v27  ;;  %1148 = vmatprep.subr.bf16.mxu1 %v1628_v28 }
 0x205   : > { %1106 = vmatpush1.bf16.msra.mxu0 %v1625_v29  ;;  %1149 = vmatpush1.bf16.msra.mxu1 %v1627_v30 }
 0x208   : > { %1124 = vmatmul.mubr.bf16.vlgmr.msra.gmra.mxu0 %v2115_v42  ;;  %1167 = vmatmul.mubr.bf16.vlgmr.msra.gmra.mxu1 %v2115_v42 }
 0x2a8   : > { %v1039_v43 = vpop.f32.mrf.mxu0  ;;  %v1082_v44 = vpop.f32.mrf.mxu1 }
 0x2a9   : > { %v1040_v46 = vadd.f32 %v1039_v43, %v648_v38  ;;  %v1083_v47 = vadd.f32 %v1082_v44, %v656_v39 }
 0x2aa   : > { %v1041_v42 = vpop.f32.mrf.mxu0  ;;  %v1084_v45 = vpop.f32.mrf.mxu1 }
 0x2ab   : > { %v1042_v48 = vadd.f32 %v1041_v42, %v652_v40  ;;  %v1085_v49 = vadd.f32 %v1084_v45, %v660_v41 }
 0x2ac   : > { %v1043_v50 = vpop.f32.mrf.mxu0  ;;  %v1086_v51 = vpop.f32.mrf.mxu1 }
 0x2ad   : > { %v1697_v52 = vpack.c.bf16 %v1042_v48, %v1040_v46  ;;  %v1698_v53 = vpack.c.bf16 %v1085_v49, %v1083_v47  ;;  %v1044_v56 = vadd.f32 %v1043_v50, %v648_v38  ;;  %v1087_v59 = vadd.f32 %v1086_v51, %v656_v39 }
 0x2ae   : > { %v1045_v54 = vpop.f32.mrf.mxu0  ;;  %v1088_v55 = vpop.f32.mrf.mxu1 }
 0x2af   : > { %1225 = vst [vmem:[%s2131_s14] sm:$0xff] %v1697_v52  ;;  %1226 = vst [vmem:[%s2131_s14 + $0x8] sm:$0xff] %v1698_v53  ;;  %v1046_v57 = vadd.f32 %v1045_v54, %v652_v40  ;;  %v1089_v58 = vadd.f32 %v1088_v55, %v660_v41  ;;  %v1233_v0 = vmax.f32 %v1040_v46, %v1044_v56 }
 0x2b0   : > { %v1247_v1 = vmax.f32 %v1083_v47, %v1087_v59  ;;  %v1954_v47 = vmov 1966171168  }
 0x2b1   : > { %v1701_v60 = vpack.c.bf16 %v1046_v57, %v1044_v56  ;;  %v1702_v61 = vpack.c.bf16 %v1089_v58, %v1087_v59  ;;  %v1240_v62 = vmax.f32 %v1042_v48, %v1046_v57  ;;  %v1254_v63 = vmax.f32 %v1085_v49, %v1089_v58 }
 0x2b2   : > { %v1234_v8 = vrot.slane %v1233_v0, 4  ;;  %v1248_v9 = vrot.slane %v1247_v1, 4  ;;  %v1306_v48 = vunpack.c.l.s4 %v1954_v47 }
 0x2b3   : > { %1229 = vst [vmem:[%s2131_s14 + $0x20] sm:$0xff] %v1701_v60  ;;  %1230 = vst [vmem:[%s2131_s14 + $0x28] sm:$0xff] %v1702_v61  ;;  %v1241_v2 = vrot.slane %v1240_v62, 4  ;;  %v1255_v3 = vrot.slane %v1254_v63, 4 }
 0x2b4   : > { %v1235_v16 = vmax.f32 %v1233_v0, %v1234_v8  ;;  %v1249_v17 = vmax.f32 %v1247_v1, %v1248_v9 }
 0x2b5   : > { %v1242_v10 = vmax.f32 %v1240_v62, %v1241_v2  ;;  %v1256_v11 = vmax.f32 %v1254_v63, %v1255_v3  ;;  %v1307_v63 = vunpack.c.0.s8 %v1306_v48 }
 0x2b6   : > { %v1236_v28 = vrot.slane %v1235_v16, 2  ;;  %v1250_v29 = vrot.slane %v1249_v17, 2 }
 0x2b7   : > { %v1243_v20 = vrot.slane %v1242_v10, 2  ;;  %v1257_v21 = vrot.slane %v1256_v11, 2 }
 0x2b8   : > { %v1237_v45 = vmax.f32 %v1235_v16, %v1236_v28  ;;  %v1251_v46 = vmax.f32 %v1249_v17, %v1250_v29 }
 0x2b9   : > { %v1244_v37 = vmax.f32 %v1242_v10, %v1243_v20  ;;  %v1258_v38 = vmax.f32 %v1256_v11, %v1257_v21 }
 0x2ba   : > { %v1238_v60 = vrot.slane %v1237_v45, 1  ;;  %v1252_v61 = vrot.slane %v1251_v46, 1 }
 0x2bb   : > { %v1245_v53 = vrot.slane %v1244_v37, 1  ;;  %v1259_v54 = vrot.slane %v1258_v38, 1 }
 0x2bc   : > { %v1239_v9 = vmax.f32 %v1237_v45, %v1238_v60  ;;  %v1253_v10 = vmax.f32 %v1251_v46, %v1252_v61 }
 0x2bd   : > { %v1246_v3 = vmax.f32 %v1244_v37, %v1245_v53  ;;  %v1260_v4 = vmax.f32 %v1258_v38, %v1259_v54 }
 0x2bf   : > { %v1302_v16 = vcombine.low %v1253_v10, %v1260_v4 }
 0x2c8   : > { %v1125_v18 = vpop.f32.mrf.mxu0  ;;  %v1168_v19 = vpop.f32.mrf.mxu1 }
 0x2c9   : > { %v1126_v24 = vadd.f32 %v1125_v18, %v664_v12  ;;  %v1169_v25 = vadd.f32 %v1168_v19, %v672_v13 }
 0x2ca   : > { %v1127_v22 = vpop.f32.mrf.mxu0  ;;  %v1170_v23 = vpop.f32.mrf.mxu1 }
 0x2cb   : > { %v1128_v26 = vadd.f32 %v1127_v22, %v668_v14  ;;  %v1171_v27 = vadd.f32 %v1170_v23, %v676_v15 }
 0x2cc   : > { %v1129_v30 = vpop.f32.mrf.mxu0  ;;  %v1172_v31 = vpop.f32.mrf.mxu1 }
 0x2cd   : > { %v1699_v33 = vpack.c.bf16 %v1128_v26, %v1126_v24  ;;  %v1700_v34 = vpack.c.bf16 %v1171_v27, %v1169_v25  ;;  %v1130_v35 = vadd.f32 %v1129_v30, %v664_v12  ;;  %v1173_v36 = vadd.f32 %v1172_v31, %v672_v13 }
 0x2ce   : > { %v1131_v39 = vpop.f32.mrf.mxu0  ;;  %v1174_v40 = vpop.f32.mrf.mxu1  ;;  %v1310_v12 = vsub.s32 %v1307_v63, %v2121_v32 }
 0x2cf   : > { %1227 = vst [vmem:[%s2131_s14 + $0x10] sm:$0xff] %v1699_v33  ;;  %1228 = vst [vmem:[%s2131_s14 + $0x18] sm:$0xff] %v1700_v34  ;;  %v1261_v41 = vmax.f32 %v1126_v24, %v1130_v35  ;;  %v1275_v43 = vmax.f32 %v1169_v25, %v1173_v36  ;;  %v1132_v44 = vadd.f32 %v1131_v39, %v668_v14 }
 0x2d0   : > { %v1175_v42 = vadd.f32 %v1174_v40, %v676_v15  ;;  %v1301_v15 = vcombine.low %v1239_v9, %v1246_v3  ;;  %v1318_v24 = vrot.slane %v1302_v16, %v1310_v12 }
 0x2d1   : > { %v1262_v49 = vrot.slane %v1261_v41, 4  ;;  %v1276_v50 = vrot.slane %v1275_v43, 4  ;;  %v1703_v51 = vpack.c.bf16 %v1132_v44, %v1130_v35  ;;  %v1268_v52 = vmax.f32 %v1128_v26, %v1132_v44 }
 0x2d2   : > { %v1704_v55 = vpack.c.bf16 %v1175_v42, %v1173_v36  ;;  %v1282_v56 = vmax.f32 %v1171_v27, %v1175_v42  ;;  %v1311_v23 = vrot.slane %v1301_v15, %v1310_v12 }
 0x2d3   : > { %v1263_v57 = vmax.f32 %v1261_v41, %v1262_v49  ;;  %v1277_v58 = vmax.f32 %v1275_v43, %v1276_v50  ;;  %1231 = vst [vmem:[%s2131_s14 + $0x30] sm:$0xff] %v1703_v51  ;;  %v1269_v59 = vrot.slane %v1268_v52, 4 }
 0x2d4   : > { %1232 = vst [vmem:[%s2131_s14 + $0x38] sm:$0xff] %v1704_v55  ;;  %v1283_v62 = vrot.slane %v1282_v56, 4  ;;  %v1333_v30 = vcombine.low %v1311_v23, %v1318_v24 }
 0x2d5   : > { %v1264_v0 = vrot.slane %v1263_v57, 2  ;;  %v1278_v1 = vrot.slane %v1277_v58, 2  ;;  %v1270_v2 = vmax.f32 %v1268_v52, %v1269_v59 }
 0x2d6   : > { %v1284_v5 = vmax.f32 %v1282_v56, %v1283_v62  ;;  %v1341_v33 = vrot.slane %v1333_v30, %v1310_v12 }
 0x2d7   : > { %v1265_v6 = vmax.f32 %v1263_v57, %v1264_v0  ;;  %v1279_v7 = vmax.f32 %v1277_v58, %v1278_v1  ;;  %v1271_v8 = vrot.slane %v1270_v2, 2 }
 0x2d8   : > { %v1285_v11 = vrot.slane %v1284_v5, 2 }
 0x2d9   : > { %v1266_v13 = vrot.slane %v1265_v6, 1  ;;  %v1272_v14 = vmax.f32 %v1270_v2, %v1271_v8  ;;  %v1280_v17 = vrot.slane %v1279_v7, 1 }
 0x2da   : > { %v1286_v18 = vmax.f32 %v1284_v5, %v1285_v11 }
 0x2db   : > { %v1273_v19 = vrot.slane %v1272_v14, 1  ;;  %v1267_v21 = vmax.f32 %v1265_v6, %v1266_v13  ;;  %v1281_v25 = vmax.f32 %v1279_v7, %v1280_v17 }
 0x2dc   : > { %v1287_v20 = vrot.slane %v1286_v18, 1 }
 0x2dd   : > { %v1274_v22 = vmax.f32 %v1272_v14, %v1273_v19 }
 0x2de   : > { %v1288_v26 = vmax.f32 %v1286_v18, %v1287_v20 }
 0x2df   : > { %v1303_v27 = vcombine.low %v1267_v21, %v1274_v22 }
 0x2e0   : > { %v1304_v28 = vcombine.low %v1281_v25, %v1288_v26 }
 0x2e1   : > { %v1325_v29 = vrot.slane %v1303_v27, %v1310_v12 }
 0x2e2   : > { %v1332_v32 = vrot.slane %v1304_v28, %v1310_v12 }
 0x2e4   : > { %v1334_v31 = vcombine.low %v1325_v29, %v1332_v32 }
 0x2e6   : > { %v1348_v34 = vrot.slane %v1334_v31, %v1310_v12 }
 0x2e8   : > { %v1349_v35 = vcombine.low %v1341_v33, %v1348_v34 }
 0x2ea   : > { %1351 = vst [vmem:[%s427_s25] sm:$0xff] %v1349_v35 }
 0x2eb PF: > { %s22_s29 = sadd.s32 1, %s1943_s29   ;;  %s2172_s27 = smov %s1939_s28 }
 0x2ec   : > { %p19_p2 = scmp.ge.s32.totalorder %s22_s29, 4   ;;  %s2173_s28 = smov %s2175_s13 }
 0x2ee   :  { %21 = sbr.rel (!%p19_p2) target bundleno = 4 (0x4), region = 118 }
 0x2f3   :  { %1463 = vsyncpa [#allocation3], 1 }
 0x2f4   :  { %1465 = vsyncpa [#allocation3 + $0x1], 1 }
 0x2f5   :  { %1466 = vsyncpa [#allocation5], 1 }
 0x2f6   :  { %1467 = vsyncpa [#allocation8], 1 }

// kernel: _lambda_.6
= control target key start
LH: loop header
LB: loop body
LE: loop exit
PB: predicated region body
PF: predicated region fallthrough
CT: control target
= control target key end

     0   :  { %12 = vsyncpa [#allocation3], 0  ;;  %s3772_s0 = inlined_call_operand.vmem [shape: f32[2,1024], index: 0, kind: input, shape index: {}]   ;;  %s3773_s1 = inlined_call_operand.hbm [shape: bf16[1024,512], index: 1, kind: input, shape index: {}]   ;;  %s3774_s2 = inlined_call_operand.vmem [shape: f32[1,512], index: 2, kind: input, shape index: {}]   ;;  %s3775_s3 = inlined_call_operand.hbm [shape: bf16[512,256], index: 3, kind: input, shape index: {}]   ;;  %s3776_s4 = inlined_call_operand.vmem [shape: f32[1,256], index: 4, kind: input, shape index: {}]   ;;  %s3777_s5 = inlined_call_operand.hbm [shape: bf16[256,9], index: 5, kind: input, shape index: {}]   ;;  %s3778_s6 = inlined_call_operand.vmem [shape: f32[1,9], index: 6, kind: input, shape index: {}]   ;;  %s3779_s7 = inlined_call_operand.vmem [shape: f32[2,9], index: 7, kind: output, shape index: {}]  }
   0x1   :  { %13 = vsyncpa [#allocation5], 0  ;;  %s3612_s24 = smov [#allocation4]  }
   0x2   :  { %s35_s25 = sshll.u32 %s3612_s24, 4  ;;  %s36_s25 = int_to_ptr.vmem [resolvable:$true] %s35_s25 }
   0x3   :  { %s3556_s26 = scalar_lea.vmem %s36_s25, 8192  ;;  %p3561_p1 = scmp.lt.s32.totalorder %s36_s25, %s36_s25 }
   0x4   :  { %p3557_p0 = scmp.ne.s32.totalorder %s36_s25, %s3556_s26  ;;  %p3562_p2 = scmp.lt.s32.totalorder %s3556_s26, %s3556_s26 }
   0x6   :  { %p3563_p3 = por %p3562_p2, %p3561_p1 }
   0x8   :  { %p3564_p4 = pnand %p3563_p3, %p3557_p0 }
   0xa   :  { %3567 = shalt.err (!%p3564_p4)
}
   0xb   :  { %s3613_s27 = smov 128   ;;  %s3614_s28 = smov 8  }
   0xc   :  { %41 = dma.hbm_to_vmem [thread:$0]  %s3775_s3, 8192, %s36_s25, [#allocation5], %s3613_s27, %s3613_s27, %s3614_s28  }
   0xd   :  { %s3615_s8 = smov [#allocation2]  }
   0xe   :  { %s21_s9 = sshll.u32 %s3615_s8, 4  ;;  %s22_s9 = int_to_ptr.vmem [resolvable:$true] %s21_s9 }
   0xf   :  { %s3576_s10 = scalar_lea.vmem %s22_s9, 32768  ;;  %p3581_p6 = scmp.lt.s32.totalorder %s22_s9, %s22_s9 }
  0x10   :  { %p3577_p5 = scmp.ne.s32.totalorder %s22_s9, %s3576_s10  ;;  %p3582_p7 = scmp.lt.s32.totalorder %s3576_s10, %s3576_s10 }
  0x12   :  { %p3583_p8 = por %p3582_p7, %p3581_p6 }
  0x14   :  { %p3584_p9 = pnand %p3583_p8, %p3577_p5 }
  0x16   :  { %3587 = shalt.err (!%p3584_p9)
}
  0x17   :  { %s3616_s11 = smov 256   ;;  %s3617_s12 = smov 16  }
  0x18   :  { %27 = dma.hbm_to_vmem [thread:$0]  %s3773_s1, 32768, %s22_s9, [#allocation3], %s3616_s11, %s3616_s11, %s3617_s12  }
  0x19   :  { %s3618_s15 = smov [#allocation6]  }
  0x1a   :  { %s49_s16 = sshll.u32 %s3618_s15, 4  ;;  %s50_s16 = int_to_ptr.vmem [resolvable:$true] %s49_s16 }
  0x1b   :  { %s3596_s3 = scalar_lea.vmem %s50_s16, 2048  ;;  %p3601_p11 = scmp.lt.s32.totalorder %s50_s16, %s50_s16 }
  0x1c   :  { %p3597_p10 = scmp.ne.s32.totalorder %s50_s16, %s3596_s3  ;;  %p3602_p12 = scmp.lt.s32.totalorder %s3596_s3, %s3596_s3 }
  0x1e   :  { %p3603_p13 = por %p3602_p12, %p3601_p11 }
  0x20   :  { %p3604_p0 = pnand %p3603_p13, %p3597_p10 }
  0x22   :  { %3607 = shalt.err (!%p3604_p0)
}
  0x23   :  { %s3619_s17 = smov 64   ;;  %s3620_s18 = smov 4  }
  0x24   :  { %55 = dma.hbm_to_vmem [thread:$0]  %s3777_s5, 2048, %s50_s16, [#allocation5], %s3619_s17, %s3619_s17, %s3620_s18  }
  0x25   :  { %3608 = dma.done.wait [#allocation3], 32768  }
  0x26   :  { %3609 = vsyncadd [#allocation3], 4294934528 }
  0x27   :  { %3610 = dma.done.wait [#allocation5], 10240  }
  0x28   :  { %3611 = vsyncadd [#allocation5], 4294957056  ;;  %v3050_v0 = vld [vmem:[#allocation2 + $0xe4] ss:$16 sps:$4 sm:$0xff]   ;;  %v3054_v2 = vld [vmem:[#allocation2 + $0xe0] ss:$16 sps:$4 sm:$0xff]   ;;  %v333_v38 = vlaneseq }
  0x29   :  { %v3052_v1 = vld [vmem:[#allocation2 + $0x2e4] ss:$16 sps:$4 sm:$0xff]   ;;  %1680 = vmatprep.subr.bf16.mxu0 %v3050_v0  ;;  %v3055_v3 = vld [vmem:[#allocation2 + $0x2e0] ss:$16 sps:$4 sm:$0xff]   ;;  %v3621_v36 = vmov 1983009808  }
  0x2a   :  { %1721 = vmatprep.subr.bf16.mxu1 %v3052_v1  ;;  %v3056_v4 = vld [vmem:[#allocation2 + $0xc4] ss:$16 sps:$4 sm:$0xff]   ;;  %1681 = vmatpush1.bf16.msra.mxu0 %v3054_v2  ;;  %v3060_v6 = vld [vmem:[#allocation2 + $0xc0] ss:$16 sps:$4 sm:$0xff]   ;;  %v331_v37 = vunpack.c.l.s4 %v3621_v36  ;;  %v3671_v43 = vshrl.u32 %v333_v38, 7  ;;  %vm2673_vm0 = vcmask 66560  }
  0x2b   :  { %1722 = vmatpush1.bf16.msra.mxu1 %v3055_v3  ;;  %v3058_v5 = vld [vmem:[#allocation2 + $0x2c4] ss:$16 sps:$4 sm:$0xff]   ;;  %1682 = vmatprep.subr.bf16.mxu0 %v3056_v4  ;;  %v3061_v7 = vld [vmem:[#allocation2 + $0x2c0] ss:$16 sps:$4 sm:$0xff]  }
  0x2c   :  { %1723 = vmatprep.subr.bf16.mxu1 %v3058_v5  ;;  %v3062_v8 = vld [vmem:[#allocation2 + $0xa4] ss:$16 sps:$4 sm:$0xff]   ;;  %v3066_v10 = vld [vmem:[#allocation2 + $0xa0] ss:$16 sps:$4 sm:$0xff]   ;;  %v332_v42 = vunpack.c.0.s8 %v331_v37 }
  0x2d   :  { %v3064_v9 = vld [vmem:[#allocation2 + $0x2a4] ss:$16 sps:$4 sm:$0xff]   ;;  %v3067_v11 = vld [vmem:[#allocation2 + $0x2a0] ss:$16 sps:$4 sm:$0xff]  }
  0x2e   :  { %1683 = vmatpush1.bf16.msra.mxu0 %v3060_v6  ;;  %v3068_v12 = vld [vmem:[#allocation2 + $0x84] ss:$16 sps:$4 sm:$0xff]   ;;  %v3072_v14 = vld [vmem:[#allocation2 + $0x80] ss:$16 sps:$4 sm:$0xff]   ;;  %v3674_v49 = vsub.s32 %v332_v42, %v3671_v43  ;;  %v69_v42 = vld [vmem:[%s3772_s0 + $0x8] sm:$0xff] }
  0x2f   :  { %1724 = vmatpush1.bf16.msra.mxu1 %v3061_v7  ;;  %1684 = vmatprep.subr.bf16.mxu0 %v3062_v8  ;;  %v3070_v13 = vld [vmem:[#allocation2 + $0x284] ss:$16 sps:$4 sm:$0xff]   ;;  %v3073_v15 = vld [vmem:[#allocation2 + $0x280] ss:$16 sps:$4 sm:$0xff]  }
  0x30   :  { %1725 = vmatprep.subr.bf16.mxu1 %v3064_v9  ;;  %v3074_v16 = vld [vmem:[#allocation2 + $0x64] ss:$16 sps:$4 sm:$0xff]   ;;  %v3078_v18 = vld [vmem:[#allocation2 + $0x60] ss:$16 sps:$4 sm:$0xff]  }
  0x31   :  { %v3076_v17 = vld [vmem:[#allocation2 + $0x264] ss:$16 sps:$4 sm:$0xff]   ;;  %v3079_v19 = vld [vmem:[#allocation2 + $0x260] ss:$16 sps:$4 sm:$0xff]  }
  0x32   :  { %1685 = vmatpush1.bf16.msra.mxu0 %v3066_v10  ;;  %v3080_v20 = vld [vmem:[#allocation2 + $0x44] ss:$16 sps:$4 sm:$0xff]   ;;  %v3084_v22 = vld [vmem:[#allocation2 + $0x40] ss:$16 sps:$4 sm:$0xff]  }
  0x33   :  { %1726 = vmatpush1.bf16.msra.mxu1 %v3067_v11  ;;  %1686 = vmatprep.subr.bf16.mxu0 %v3068_v12  ;;  %v3082_v21 = vld [vmem:[#allocation2 + $0x244] ss:$16 sps:$4 sm:$0xff]   ;;  %v3085_v23 = vld [vmem:[#allocation2 + $0x240] ss:$16 sps:$4 sm:$0xff]  }
  0x34   :  { %1727 = vmatprep.subr.bf16.mxu1 %v3070_v13  ;;  %v3086_v24 = vld [vmem:[#allocation2 + $0x24] ss:$16 sps:$4 sm:$0xff]   ;;  %v3090_v26 = vld [vmem:[#allocation2 + $0x20] ss:$16 sps:$4 sm:$0xff]  }
  0x35   :  { %v3088_v25 = vld [vmem:[#allocation2 + $0x224] ss:$16 sps:$4 sm:$0xff]   ;;  %v3091_v27 = vld [vmem:[#allocation2 + $0x220] ss:$16 sps:$4 sm:$0xff]  }
  0x36   :  { %1687 = vmatpush1.bf16.msra.mxu0 %v3072_v14  ;;  %v3092_v28 = vld [vmem:[#allocation2 + $0x4] ss:$16 sps:$4 sm:$0xff]   ;;  %v3096_v30 = vld [vmem:[#allocation2] ss:$16 sps:$4 sm:$0xff]  }
  0x37   :  { %1728 = vmatpush1.bf16.msra.mxu1 %v3073_v15  ;;  %1688 = vmatprep.subr.bf16.mxu0 %v3074_v16  ;;  %v3094_v29 = vld [vmem:[#allocation2 + $0x204] ss:$16 sps:$4 sm:$0xff]   ;;  %v3097_v31 = vld [vmem:[#allocation2 + $0x200] ss:$16 sps:$4 sm:$0xff]  }
  0x38   :  { %1729 = vmatprep.subr.bf16.mxu1 %v3076_v17  ;;  %v3098_v32 = vld [vmem:[#allocation2 + $0x1e4] ss:$16 sps:$4 sm:$0xff]   ;;  %v3102_v34 = vld [vmem:[#allocation2 + $0x1e0] ss:$16 sps:$4 sm:$0xff]  }
  0x39   :  { %v3100_v33 = vld [vmem:[#allocation2 + $0x3e4] ss:$16 sps:$4 sm:$0xff]   ;;  %v3103_v35 = vld [vmem:[#allocation2 + $0x3e0] ss:$16 sps:$4 sm:$0xff]  }
  0x3a   :  { %1689 = vmatpush1.bf16.msra.mxu0 %v3078_v18  ;;  %v3104_v39 = vld [vmem:[#allocation2 + $0x1c4] ss:$16 sps:$4 sm:$0xff]   ;;  %v3108_v41 = vld [vmem:[#allocation2 + $0x1c0] ss:$16 sps:$4 sm:$0xff]  }
  0x3b   :  { %1730 = vmatpush1.bf16.msra.mxu1 %v3079_v19  ;;  %1690 = vmatprep.subr.bf16.mxu0 %v3080_v20  ;;  %v3106_v40 = vld [vmem:[#allocation2 + $0x3c4] ss:$16 sps:$4 sm:$0xff]   ;;  %v3109_v44 = vld [vmem:[#allocation2 + $0x3c0] ss:$16 sps:$4 sm:$0xff]  }
  0x3c   :  { %1731 = vmatprep.subr.bf16.mxu1 %v3082_v21  ;;  %v3110_v45 = vld [vmem:[#allocation2 + $0x1a4] ss:$16 sps:$4 sm:$0xff]   ;;  %v3114_v47 = vld [vmem:[#allocation2 + $0x1a0] ss:$16 sps:$4 sm:$0xff]  }
  0x3d   :  { %v3112_v46 = vld [vmem:[#allocation2 + $0x3a4] ss:$16 sps:$4 sm:$0xff]   ;;  %v3115_v48 = vld [vmem:[#allocation2 + $0x3a0] ss:$16 sps:$4 sm:$0xff]  }
  0x3e   :  { %1691 = vmatpush1.bf16.msra.mxu0 %v3084_v22  ;;  %v3116_v50 = vld [vmem:[#allocation2 + $0x184] ss:$16 sps:$4 sm:$0xff]   ;;  %v3120_v53 = vld [vmem:[#allocation2 + $0x180] ss:$16 sps:$4 sm:$0xff]  }
  0x3f   :  { %1732 = vmatpush1.bf16.msra.mxu1 %v3085_v23  ;;  %1692 = vmatprep.subr.bf16.mxu0 %v3086_v24  ;;  %v3118_v51 = vld [vmem:[#allocation2 + $0x384] ss:$16 sps:$4 sm:$0xff]   ;;  %v3121_v56 = vld [vmem:[#allocation2 + $0x380] ss:$16 sps:$4 sm:$0xff]  }
  0x40   :  { %1733 = vmatprep.subr.bf16.mxu1 %v3088_v25  ;;  %v68_v52 = vld [vmem:[%s3772_s0] sm:$0xff] }
  0x41   :  { %v336_v54 = vrot.slane %v68_v52, %v3674_v49  ;;  %v329_v55 = vcombine.high %v68_v52, %v68_v52  ;;  %v3122_v57 = vld [vmem:[#allocation2 + $0x164] ss:$16 sps:$4 sm:$0xff]   ;;  %v3126_v61 = vld [vmem:[#allocation2 + $0x160] ss:$16 sps:$4 sm:$0xff]  }
  0x42   :  { %1693 = vmatpush1.bf16.msra.mxu0 %v3090_v26  ;;  %v3124_v58 = vld [vmem:[#allocation2 + $0x364] ss:$16 sps:$4 sm:$0xff]   ;;  %v3127_v0 = vld [vmem:[#allocation2 + $0x360] ss:$16 sps:$4 sm:$0xff]  }
  0x43   :  { %1734 = vmatpush1.bf16.msra.mxu1 %v3091_v27  ;;  %1694 = vmatprep.subr.bf16.mxu0 %v3092_v28  ;;  %v344_v59 = vcombine.high %v336_v54, %v336_v54  ;;  %v343_v60 = vrot.slane %v329_v55, %v3674_v49  ;;  %v3128_v1 = vld [vmem:[#allocation2 + $0x144] ss:$16 sps:$4 sm:$0xff]   ;;  %v3132_v4 = vld [vmem:[#allocation2 + $0x140] ss:$16 sps:$4 sm:$0xff]   ;;  %v3687_v16 = vpack.c.bf16 %v336_v54, %v336_v54 }
  0x44   :  { %1735 = vmatprep.subr.bf16.mxu1 %v3094_v29  ;;  %v3130_v2 = vld [vmem:[#allocation2 + $0x344] ss:$16 sps:$4 sm:$0xff]   ;;  %v3133_v5 = vld [vmem:[#allocation2 + $0x340] ss:$16 sps:$4 sm:$0xff]  }
  0x45   :  { %v3681_v62 = vpack.c.bf16 %v344_v59, %v344_v59  ;;  %v345_v63 = vcombine.high %v343_v60, %v343_v60  ;;  %v3134_v6 = vld [vmem:[#allocation2 + $0x124] ss:$16 sps:$4 sm:$0xff]   ;;  %v3138_v8 = vld [vmem:[#allocation2 + $0x120] ss:$16 sps:$4 sm:$0xff]   ;;  %v3689_v17 = vpack.c.bf16 %v343_v60, %v343_v60 }
  0x46   :  { %1695 = vmatpush1.bf16.msra.mxu0 %v3096_v30  ;;  %v3136_v7 = vld [vmem:[#allocation2 + $0x324] ss:$16 sps:$4 sm:$0xff]   ;;  %v3139_v9 = vld [vmem:[#allocation2 + $0x320] ss:$16 sps:$4 sm:$0xff]  }
  0x47   :  { %1736 = vmatpush1.bf16.msra.mxu1 %v3097_v31  ;;  %1696 = vmatprep.subr.bf16.mxu0 %v3098_v32  ;;  %v3683_v3 = vpack.c.bf16 %v345_v63, %v345_v63  ;;  %v3140_v10 = vld [vmem:[#allocation2 + $0x104] ss:$16 sps:$4 sm:$0xff]   ;;  %v3144_v12 = vld [vmem:[#allocation2 + $0x100] ss:$16 sps:$4 sm:$0xff]  }
  0x48   :  { %1737 = vmatprep.subr.bf16.mxu1 %v3100_v33  ;;  %1712 = vmatprep.mubr.bf16.mxu0 %v3681_v62  ;;  %v3142_v11 = vld [vmem:[#allocation2 + $0x304] ss:$16 sps:$4 sm:$0xff]   ;;  %v3145_v13 = vld [vmem:[#allocation2 + $0x300] ss:$16 sps:$4 sm:$0xff]  }
  0x49   :  { %1753 = vmatprep.mubr.bf16.mxu1 %v3683_v3  ;;  %v3149_v14 = vld [vmem:[#allocation2 + $0x4e4] ss:$16 sps:$4 sm:$0xff]   ;;  %v3147_v18 = vld [vmem:[#allocation2 + $0x4e0] ss:$16 sps:$4 sm:$0xff]  }
  0x4a   :  { %1697 = vmatpush2.bf16.msra.mxu0 %v3102_v34  ;;  %v3152_v15 = vld [vmem:[#allocation2 + $0x6e4] ss:$16 sps:$4 sm:$0xff]   ;;  %v3150_v19 = vld [vmem:[#allocation2 + $0x6e0] ss:$16 sps:$4 sm:$0xff]  }
  0x4b   :  { %1738 = vmatpush2.bf16.msra.mxu1 %v3103_v35  ;;  %1698 = vmatprep.subr.bf16.mxu0 %v3104_v39  ;;  %v3155_v20 = vld [vmem:[#allocation2 + $0x4c4] ss:$16 sps:$4 sm:$0xff]   ;;  %v3153_v22 = vld [vmem:[#allocation2 + $0x4c0] ss:$16 sps:$4 sm:$0xff]  }
  0x4c   :  { %1739 = vmatprep.subr.bf16.mxu1 %v3106_v40  ;;  %v3158_v21 = vld [vmem:[#allocation2 + $0x6c4] ss:$16 sps:$4 sm:$0xff]   ;;  %v3156_v23 = vld [vmem:[#allocation2 + $0x6c0] ss:$16 sps:$4 sm:$0xff]  }
  0x4d   :  { %v3161_v24 = vld [vmem:[#allocation2 + $0x4a4] ss:$16 sps:$4 sm:$0xff]   ;;  %v3159_v26 = vld [vmem:[#allocation2 + $0x4a0] ss:$16 sps:$4 sm:$0xff]  }
  0x4e   :  { %1699 = vmatpush2.bf16.msra.mxu0 %v3108_v41  ;;  %v3164_v25 = vld [vmem:[#allocation2 + $0x6a4] ss:$16 sps:$4 sm:$0xff]   ;;  %v3162_v27 = vld [vmem:[#allocation2 + $0x6a0] ss:$16 sps:$4 sm:$0xff]  }
  0x4f   :  { %1740 = vmatpush2.bf16.msra.mxu1 %v3109_v44  ;;  %1700 = vmatprep.subr.bf16.mxu0 %v3110_v45  ;;  %v3167_v28 = vld [vmem:[#allocation2 + $0x484] ss:$16 sps:$4 sm:$0xff]   ;;  %v3165_v30 = vld [vmem:[#allocation2 + $0x480] ss:$16 sps:$4 sm:$0xff]   ;;  %v3697_v44 = vrot.slane %v69_v42, %v3674_v49  ;;  %v346_v45 = vcombine.high %v69_v42, %v69_v42  ;;  %v3259_v42 = vld [vmem:[#allocation2 + $0x2a8] ss:$16 sps:$4 sm:$0xff]  }
  0x50   :  { %1741 = vmatprep.subr.bf16.mxu1 %v3112_v46  ;;  %v3170_v29 = vld [vmem:[#allocation2 + $0x684] ss:$16 sps:$4 sm:$0xff]   ;;  %v3168_v31 = vld [vmem:[#allocation2 + $0x680] ss:$16 sps:$4 sm:$0xff]  }
  0x51   :  { %v3173_v32 = vld [vmem:[#allocation2 + $0x464] ss:$16 sps:$4 sm:$0xff]   ;;  %v3171_v34 = vld [vmem:[#allocation2 + $0x460] ss:$16 sps:$4 sm:$0xff]  }
  0x52   :  { %1701 = vmatpush2.bf16.msra.mxu0 %v3114_v47  ;;  %v3176_v33 = vld [vmem:[#allocation2 + $0x664] ss:$16 sps:$4 sm:$0xff]   ;;  %v3174_v35 = vld [vmem:[#allocation2 + $0x660] ss:$16 sps:$4 sm:$0xff]  }
  0x53   :  { %1742 = vmatpush2.bf16.msra.mxu1 %v3115_v48  ;;  %1702 = vmatprep.subr.bf16.mxu0 %v3116_v50  ;;  %v3179_v36 = vld [vmem:[#allocation2 + $0x444] ss:$16 sps:$4 sm:$0xff]   ;;  %v3177_v38 = vld [vmem:[#allocation2 + $0x440] ss:$16 sps:$4 sm:$0xff]   ;;  %v361_v48 = vcombine.high %v3697_v44, %v3697_v44  ;;  %v3702_v50 = vrot.slane %v346_v45, %v3674_v49  ;;  %v3267_v45 = vld [vmem:[#allocation2 + $0x28c] ss:$16 sps:$4 sm:$0xff]  }
  0x54   :  { %1743 = vmatprep.subr.bf16.mxu1 %v3118_v51  ;;  %v3182_v37 = vld [vmem:[#allocation2 + $0x644] ss:$16 sps:$4 sm:$0xff]   ;;  %v3180_v39 = vld [vmem:[#allocation2 + $0x640] ss:$16 sps:$4 sm:$0xff]  }
  0x55   :  { %v3185_v40 = vld [vmem:[#allocation2 + $0x424] ss:$16 sps:$4 sm:$0xff]   ;;  %v3183_v46 = vld [vmem:[#allocation2 + $0x420] ss:$16 sps:$4 sm:$0xff]   ;;  %v362_v54 = vcombine.high %v3702_v50, %v3702_v50 }
  0x56   :  { %1703 = vmatpush2.bf16.msra.mxu0 %v3120_v53  ;;  %v3188_v41 = vld [vmem:[#allocation2 + $0x624] ss:$16 sps:$4 sm:$0xff]   ;;  %v3186_v47 = vld [vmem:[#allocation2 + $0x620] ss:$16 sps:$4 sm:$0xff]   ;;  %v3704_v53 = vpack.c.bf16 %v361_v48, %v361_v48  ;;  %v3270_v48 = vld [vmem:[#allocation2 + $0x6c] ss:$16 sps:$4 sm:$0xff]  }
  0x57   :  { %1744 = vmatpush2.bf16.msra.mxu1 %v3121_v56  ;;  %1704 = vmatprep.subr.bf16.mxu0 %v3122_v57  ;;  %v3191_v51 = vld [vmem:[#allocation2 + $0x404] ss:$16 sps:$4 sm:$0xff]   ;;  %v3189_v55 = vld [vmem:[#allocation2 + $0x400] ss:$16 sps:$4 sm:$0xff]   ;;  %v3708_v57 = vpack.c.bf16 %v362_v54, %v362_v54  ;;  %v3274_v54 = vld [vmem:[#allocation2 + $0x48] ss:$16 sps:$4 sm:$0xff]  }
  0x58   :  { %1745 = vmatprep.subr.bf16.mxu1 %v3124_v58  ;;  %v3194_v52 = vld [vmem:[#allocation2 + $0x604] ss:$16 sps:$4 sm:$0xff]   ;;  %v3192_v56 = vld [vmem:[#allocation2 + $0x600] ss:$16 sps:$4 sm:$0xff]  }
  0x59   :  { %v3197_v58 = vld [vmem:[#allocation2 + $0x5e4] ss:$16 sps:$4 sm:$0xff]   ;;  %v3195_v59 = vld [vmem:[#allocation2 + $0x5e0] ss:$16 sps:$4 sm:$0xff]  }
  0x5a   :  { %1705 = vmatpush2.bf16.msra.mxu0 %v3126_v61  ;;  %v3200_v49 = vld [vmem:[#allocation2 + $0x7e4] ss:$16 sps:$4 sm:$0xff]   ;;  %v3198_v60 = vld [vmem:[#allocation2 + $0x7e0] ss:$16 sps:$4 sm:$0xff]  }
  0x5b   :  { %1746 = vmatpush2.bf16.msra.mxu1 %v3127_v0  ;;  %1706 = vmatprep.subr.bf16.mxu0 %v3128_v1  ;;  %v3203_v61 = vld [vmem:[#allocation2 + $0x5c4] ss:$16 sps:$4 sm:$0xff]   ;;  %v3201_v0 = vld [vmem:[#allocation2 + $0x5c0] ss:$16 sps:$4 sm:$0xff]  }
  0x5c   :  { %1747 = vmatprep.subr.bf16.mxu1 %v3130_v2  ;;  %v3206_v63 = vld [vmem:[#allocation2 + $0x7c4] ss:$16 sps:$4 sm:$0xff]   ;;  %v3204_v1 = vld [vmem:[#allocation2 + $0x7c0] ss:$16 sps:$4 sm:$0xff]  }
  0x5d   :  { %v3209_v2 = vld [vmem:[#allocation2 + $0x5a4] ss:$16 sps:$4 sm:$0xff]  }
  0x5e   :  { %1707 = vmatpush2.bf16.msra.mxu0 %v3132_v4  ;;  %v3212_v4 = vld [vmem:[#allocation2 + $0x7a4] ss:$16 sps:$4 sm:$0xff]  }
  0x5f   :  { %1748 = vmatpush2.bf16.msra.mxu1 %v3133_v5  ;;  %1708 = vmatprep.subr.bf16.mxu0 %v3134_v6  ;;  %v3207_v5 = vld [vmem:[#allocation2 + $0x5a0] ss:$16 sps:$4 sm:$0xff]  }
  0x60   :  { %1749 = vmatprep.subr.bf16.mxu1 %v3136_v7  ;;  %v3210_v6 = vld [vmem:[#allocation2 + $0x7a0] ss:$16 sps:$4 sm:$0xff]   ;;  %v3215_v7 = vld [vmem:[#allocation2 + $0x584] ss:$16 sps:$4 sm:$0xff]  }
  0x62   :  { %1709 = vmatpush2.bf16.msra.mxu0 %v3138_v8  ;;  %v3218_v8 = vld [vmem:[#allocation2 + $0x784] ss:$16 sps:$4 sm:$0xff]  }
  0x63   :  { %1750 = vmatpush2.bf16.msra.mxu1 %v3139_v9  ;;  %1710 = vmatprep.subr.bf16.mxu0 %v3140_v10  ;;  %v3213_v9 = vld [vmem:[#allocation2 + $0x580] ss:$16 sps:$4 sm:$0xff]  }
  0x64   :  { %1751 = vmatprep.subr.bf16.mxu1 %v3142_v11  ;;  %v3216_v10 = vld [vmem:[#allocation2 + $0x780] ss:$16 sps:$4 sm:$0xff]   ;;  %v3221_v11 = vld [vmem:[#allocation2 + $0x564] ss:$16 sps:$4 sm:$0xff]  }
  0x66   :  { %1711 = vmatpush2.bf16.msra.mxu0 %v3144_v12  ;;  %v3224_v12 = vld [vmem:[#allocation2 + $0x764] ss:$16 sps:$4 sm:$0xff]  }
  0x67   :  { %1752 = vmatpush2.bf16.msra.mxu1 %v3145_v13  ;;  %1762 = vmatprep.subr.bf16.mxu0 %v3149_v14  ;;  %v3219_v13 = vld [vmem:[#allocation2 + $0x560] ss:$16 sps:$4 sm:$0xff]  }
  0x68   :  { %1803 = vmatprep.subr.bf16.mxu1 %v3152_v15  ;;  %v3222_v14 = vld [vmem:[#allocation2 + $0x760] ss:$16 sps:$4 sm:$0xff]   ;;  %v3227_v15 = vld [vmem:[#allocation2 + $0x544] ss:$16 sps:$4 sm:$0xff]  }
  0x69   :  { %1713 = vmatmul.mubr.bf16.vlgmr.msra.gmra.mxu0 %v3687_v16 }
  0x6a   :  { %1754 = vmatmul.mubr.bf16.vlgmr.msra.gmra.mxu1 %v3689_v17  ;;  %1763 = vmatpush1.bf16.msra.mxu0 %v3147_v18  ;;  %v3230_v18 = vld [vmem:[#allocation2 + $0x744] ss:$16 sps:$4 sm:$0xff]  }
  0x6b   :  { %1804 = vmatpush1.bf16.msra.mxu1 %v3150_v19  ;;  %1764 = vmatprep.subr.bf16.mxu0 %v3155_v20  ;;  %v3225_v19 = vld [vmem:[#allocation2 + $0x540] ss:$16 sps:$4 sm:$0xff]  }
  0x6c   :  { %1805 = vmatprep.subr.bf16.mxu1 %v3158_v21  ;;  %1794 = vmatprep.mubr.bf16.mxu0 %v3704_v53  ;;  %v3228_v20 = vld [vmem:[#allocation2 + $0x740] ss:$16 sps:$4 sm:$0xff]   ;;  %v3233_v21 = vld [vmem:[#allocation2 + $0x524] ss:$16 sps:$4 sm:$0xff]  }
  0x6d   :  { %1835 = vmatprep.mubr.bf16.mxu1 %v3708_v57 }
  0x6e   :  { %1765 = vmatpush1.bf16.msra.mxu0 %v3153_v22  ;;  %v3236_v22 = vld [vmem:[#allocation2 + $0x724] ss:$16 sps:$4 sm:$0xff]  }
  0x6f   :  { %1806 = vmatpush1.bf16.msra.mxu1 %v3156_v23  ;;  %1766 = vmatprep.subr.bf16.mxu0 %v3161_v24  ;;  %v3231_v23 = vld [vmem:[#allocation2 + $0x520] ss:$16 sps:$4 sm:$0xff]  }
  0x70   :  { %1807 = vmatprep.subr.bf16.mxu1 %v3164_v25  ;;  %v3234_v24 = vld [vmem:[#allocation2 + $0x720] ss:$16 sps:$4 sm:$0xff]   ;;  %v3239_v25 = vld [vmem:[#allocation2 + $0x504] ss:$16 sps:$4 sm:$0xff]  }
  0x72   :  { %1767 = vmatpush1.bf16.msra.mxu0 %v3159_v26  ;;  %v3242_v26 = vld [vmem:[#allocation2 + $0x704] ss:$16 sps:$4 sm:$0xff]  }
  0x73   :  { %1808 = vmatpush1.bf16.msra.mxu1 %v3162_v27  ;;  %1768 = vmatprep.subr.bf16.mxu0 %v3167_v28  ;;  %v3237_v27 = vld [vmem:[#allocation2 + $0x500] ss:$16 sps:$4 sm:$0xff]  }
  0x74   :  { %1809 = vmatprep.subr.bf16.mxu1 %v3170_v29  ;;  %v3240_v28 = vld [vmem:[#allocation2 + $0x700] ss:$16 sps:$4 sm:$0xff]   ;;  %v3246_v29 = vld [vmem:[#allocation2 + $0xec] ss:$16 sps:$4 sm:$0xff]  }
  0x76   :  { %1769 = vmatpush1.bf16.msra.mxu0 %v3165_v30  ;;  %v3249_v30 = vld [vmem:[#allocation2 + $0x2ec] ss:$16 sps:$4 sm:$0xff]  }
  0x77   :  { %1810 = vmatpush1.bf16.msra.mxu1 %v3168_v31  ;;  %1770 = vmatprep.subr.bf16.mxu0 %v3173_v32  ;;  %v3714_v31 = vpack.c.bf16 %v3697_v44, %v3697_v44  ;;  %v3718_v32 = vpack.c.bf16 %v3702_v50, %v3702_v50  ;;  %v3264_v44 = vld [vmem:[#allocation2 + $0x8c] ss:$16 sps:$4 sm:$0xff]  }
  0x78   :  { %1811 = vmatprep.subr.bf16.mxu1 %v3176_v33  ;;  %v3244_v33 = vld [vmem:[#allocation2 + $0xe8] ss:$16 sps:$4 sm:$0xff]   ;;  %v3273_v50 = vld [vmem:[#allocation2 + $0x26c] ss:$16 sps:$4 sm:$0xff]  }
  0x7a   :  { %1771 = vmatpush1.bf16.msra.mxu0 %v3171_v34  ;;  %v3247_v34 = vld [vmem:[#allocation2 + $0x2e8] ss:$16 sps:$4 sm:$0xff]  }
  0x7b   :  { %1812 = vmatpush1.bf16.msra.mxu1 %v3174_v35  ;;  %1772 = vmatprep.subr.bf16.mxu0 %v3179_v36  ;;  %v3252_v35 = vld [vmem:[#allocation2 + $0xcc] ss:$16 sps:$4 sm:$0xff]  }
  0x7c   :  { %1813 = vmatprep.subr.bf16.mxu1 %v3182_v37  ;;  %v3255_v36 = vld [vmem:[#allocation2 + $0x2cc] ss:$16 sps:$4 sm:$0xff]   ;;  %v3250_v37 = vld [vmem:[#allocation2 + $0xc8] ss:$16 sps:$4 sm:$0xff]  }
  0x7e   :  { %1773 = vmatpush1.bf16.msra.mxu0 %v3177_v38  ;;  %v3253_v38 = vld [vmem:[#allocation2 + $0x2c8] ss:$16 sps:$4 sm:$0xff]  }
  0x7f   :  { %1814 = vmatpush1.bf16.msra.mxu1 %v3180_v39  ;;  %1774 = vmatprep.subr.bf16.mxu0 %v3185_v40  ;;  %v3258_v39 = vld [vmem:[#allocation2 + $0xac] ss:$16 sps:$4 sm:$0xff]  }
  0x80   :  { %1815 = vmatprep.subr.bf16.mxu1 %v3188_v41  ;;  %v3261_v40 = vld [vmem:[#allocation2 + $0x2ac] ss:$16 sps:$4 sm:$0xff]   ;;  %v3256_v41 = vld [vmem:[#allocation2 + $0xa8] ss:$16 sps:$4 sm:$0xff]  }
  0x82   :  { %1775 = vmatpush1.bf16.msra.mxu0 %v3183_v46  ;;  %v3262_v46 = vld [vmem:[#allocation2 + $0x88] ss:$16 sps:$4 sm:$0xff]  }
  0x83   :  { %1816 = vmatpush1.bf16.msra.mxu1 %v3186_v47  ;;  %1776 = vmatprep.subr.bf16.mxu0 %v3191_v51  ;;  %v3265_v47 = vld [vmem:[#allocation2 + $0x288] ss:$16 sps:$4 sm:$0xff]   ;;  %v3276_v51 = vld [vmem:[#allocation2 + $0x4c] ss:$16 sps:$4 sm:$0xff]  }
  0x84   :  { %1817 = vmatprep.subr.bf16.mxu1 %v3194_v52  ;;  %v3279_v52 = vld [vmem:[#allocation2 + $0x24c] ss:$16 sps:$4 sm:$0xff]  }
  0x86   :  { %1777 = vmatpush1.bf16.msra.mxu0 %v3189_v55  ;;  %v3277_v55 = vld [vmem:[#allocation2 + $0x248] ss:$16 sps:$4 sm:$0xff]  }
  0x87   :  { %1818 = vmatpush1.bf16.msra.mxu1 %v3192_v56  ;;  %1778 = vmatprep.subr.bf16.mxu0 %v3197_v58  ;;  %v3282_v56 = vld [vmem:[#allocation2 + $0x2c] ss:$16 sps:$4 sm:$0xff]  }
  0x88   :  { %1819 = vmatprep.subr.bf16.mxu1 %v3200_v49  ;;  %v3285_v58 = vld [vmem:[#allocation2 + $0x22c] ss:$16 sps:$4 sm:$0xff]   ;;  %v3280_v49 = vld [vmem:[#allocation2 + $0x28] ss:$16 sps:$4 sm:$0xff]  }
  0x8a   :  { %1779 = vmatpush2.bf16.msra.mxu0 %v3195_v59  ;;  %v3283_v59 = vld [vmem:[#allocation2 + $0x228] ss:$16 sps:$4 sm:$0xff]  }
  0x8b   :  { %1820 = vmatpush2.bf16.msra.mxu1 %v3198_v60  ;;  %1780 = vmatprep.subr.bf16.mxu0 %v3203_v61  ;;  %v3288_v60 = vld [vmem:[#allocation2 + $0xc] ss:$16 sps:$4 sm:$0xff]  }
  0x8c   :  { %1821 = vmatprep.subr.bf16.mxu1 %v3206_v63  ;;  %v3291_v61 = vld [vmem:[#allocation2 + $0x20c] ss:$16 sps:$4 sm:$0xff]   ;;  %v3286_v63 = vld [vmem:[#allocation2 + $0x8] ss:$16 sps:$4 sm:$0xff]  }
  0x8e   :  { %1781 = vmatpush2.bf16.msra.mxu0 %v3201_v0  ;;  %v3289_v0 = vld [vmem:[#allocation2 + $0x208] ss:$16 sps:$4 sm:$0xff]  }
  0x8f   :  { %1822 = vmatpush2.bf16.msra.mxu1 %v3204_v1  ;;  %1782 = vmatprep.subr.bf16.mxu0 %v3209_v2  ;;  %v3294_v1 = vld [vmem:[#allocation2 + $0x1ec] ss:$16 sps:$4 sm:$0xff]  }
  0x90   :  { %1823 = vmatprep.subr.bf16.mxu1 %v3212_v4  ;;  %v3297_v2 = vld [vmem:[#allocation2 + $0x3ec] ss:$16 sps:$4 sm:$0xff]   ;;  %v3292_v4 = vld [vmem:[#allocation2 + $0x1e8] ss:$16 sps:$4 sm:$0xff]  }
  0x92   :  { %1783 = vmatpush2.bf16.msra.mxu0 %v3207_v5  ;;  %v3295_v5 = vld [vmem:[#allocation2 + $0x3e8] ss:$16 sps:$4 sm:$0xff]  }
  0x93   :  { %1824 = vmatpush2.bf16.msra.mxu1 %v3210_v6  ;;  %1784 = vmatprep.subr.bf16.mxu0 %v3215_v7  ;;  %v3300_v6 = vld [vmem:[#allocation2 + $0x1cc] ss:$16 sps:$4 sm:$0xff]  }
  0x94   :  { %1825 = vmatprep.subr.bf16.mxu1 %v3218_v8  ;;  %v3303_v7 = vld [vmem:[#allocation2 + $0x3cc] ss:$16 sps:$4 sm:$0xff]   ;;  %v3298_v8 = vld [vmem:[#allocation2 + $0x1c8] ss:$16 sps:$4 sm:$0xff]  }
  0x96   :  { %1785 = vmatpush2.bf16.msra.mxu0 %v3213_v9  ;;  %v3301_v9 = vld [vmem:[#allocation2 + $0x3c8] ss:$16 sps:$4 sm:$0xff]  }
  0x97   :  { %1826 = vmatpush2.bf16.msra.mxu1 %v3216_v10  ;;  %1786 = vmatprep.subr.bf16.mxu0 %v3221_v11  ;;  %v3306_v10 = vld [vmem:[#allocation2 + $0x1ac] ss:$16 sps:$4 sm:$0xff]  }
  0x98   :  { %1827 = vmatprep.subr.bf16.mxu1 %v3224_v12  ;;  %v3309_v11 = vld [vmem:[#allocation2 + $0x3ac] ss:$16 sps:$4 sm:$0xff]   ;;  %v3304_v12 = vld [vmem:[#allocation2 + $0x1a8] ss:$16 sps:$4 sm:$0xff]  }
  0x9a   :  { %1787 = vmatpush2.bf16.msra.mxu0 %v3219_v13  ;;  %v3307_v13 = vld [vmem:[#allocation2 + $0x3a8] ss:$16 sps:$4 sm:$0xff]  }
  0x9b   :  { %1828 = vmatpush2.bf16.msra.mxu1 %v3222_v14  ;;  %1788 = vmatprep.subr.bf16.mxu0 %v3227_v15  ;;  %v3312_v14 = vld [vmem:[#allocation2 + $0x18c] ss:$16 sps:$4 sm:$0xff]  }
  0x9c   :  { %1829 = vmatprep.subr.bf16.mxu1 %v3230_v18  ;;  %v3315_v15 = vld [vmem:[#allocation2 + $0x38c] ss:$16 sps:$4 sm:$0xff]   ;;  %v3310_v18 = vld [vmem:[#allocation2 + $0x188] ss:$16 sps:$4 sm:$0xff]  }
  0x9e   :  { %1789 = vmatpush2.bf16.msra.mxu0 %v3225_v19  ;;  %v3313_v19 = vld [vmem:[#allocation2 + $0x388] ss:$16 sps:$4 sm:$0xff]  }
  0x9f   :  { %1830 = vmatpush2.bf16.msra.mxu1 %v3228_v20  ;;  %1790 = vmatprep.subr.bf16.mxu0 %v3233_v21  ;;  %v3318_v20 = vld [vmem:[#allocation2 + $0x16c] ss:$16 sps:$4 sm:$0xff]  }
  0xa0   :  { %1831 = vmatprep.subr.bf16.mxu1 %v3236_v22  ;;  %v3321_v21 = vld [vmem:[#allocation2 + $0x36c] ss:$16 sps:$4 sm:$0xff]   ;;  %v3316_v22 = vld [vmem:[#allocation2 + $0x168] ss:$16 sps:$4 sm:$0xff]  }
  0xa2   :  { %1791 = vmatpush2.bf16.msra.mxu0 %v3231_v23  ;;  %v3319_v23 = vld [vmem:[#allocation2 + $0x368] ss:$16 sps:$4 sm:$0xff]  }
  0xa3   :  { %1832 = vmatpush2.bf16.msra.mxu1 %v3234_v24  ;;  %1792 = vmatprep.subr.bf16.mxu0 %v3239_v25  ;;  %v3324_v24 = vld [vmem:[#allocation2 + $0x14c] ss:$16 sps:$4 sm:$0xff]  }
  0xa4   :  { %1833 = vmatprep.subr.bf16.mxu1 %v3242_v26  ;;  %v3327_v25 = vld [vmem:[#allocation2 + $0x34c] ss:$16 sps:$4 sm:$0xff]   ;;  %v3322_v26 = vld [vmem:[#allocation2 + $0x148] ss:$16 sps:$4 sm:$0xff]  }
  0xa6   :  { %1793 = vmatpush2.bf16.msra.mxu0 %v3237_v27  ;;  %v3325_v27 = vld [vmem:[#allocation2 + $0x348] ss:$16 sps:$4 sm:$0xff]  }
  0xa7   :  { %1834 = vmatpush2.bf16.msra.mxu1 %v3240_v28  ;;  %1844 = vmatprep.subr.bf16.mxu0 %v3246_v29  ;;  %v3330_v28 = vld [vmem:[#allocation2 + $0x12c] ss:$16 sps:$4 sm:$0xff]  }
  0xa8   :  { %1885 = vmatprep.subr.bf16.mxu1 %v3249_v30  ;;  %v3333_v29 = vld [vmem:[#allocation2 + $0x32c] ss:$16 sps:$4 sm:$0xff]   ;;  %v3328_v30 = vld [vmem:[#allocation2 + $0x128] ss:$16 sps:$4 sm:$0xff]  }
  0xa9   :  { %1795 = vmatmul.mubr.bf16.vlgmr.msra.gmra.mxu0 %v3714_v31 }
  0xaa   :  { %1836 = vmatmul.mubr.bf16.vlgmr.msra.gmra.mxu1 %v3718_v32  ;;  %1845 = vmatpush1.bf16.msra.mxu0 %v3244_v33  ;;  %v3331_v33 = vld [vmem:[#allocation2 + $0x328] ss:$16 sps:$4 sm:$0xff]  }
  0xab   :  { %1886 = vmatpush1.bf16.msra.mxu1 %v3247_v34  ;;  %1846 = vmatprep.subr.bf16.mxu0 %v3252_v35  ;;  %v3336_v34 = vld [vmem:[#allocation2 + $0x10c] ss:$16 sps:$4 sm:$0xff]  }
  0xac   :  { %1887 = vmatprep.subr.bf16.mxu1 %v3255_v36  ;;  %1876 = vmatprep.mubr.bf16.mxu0 %v3681_v62  ;;  %v3268_v62 = vld [vmem:[#allocation2 + $0x68] ss:$16 sps:$4 sm:$0xff]   ;;  %v3339_v35 = vld [vmem:[#allocation2 + $0x30c] ss:$16 sps:$4 sm:$0xff]  }
  0xad   :  { %1917 = vmatprep.mubr.bf16.mxu1 %v3683_v3  ;;  %v3271_v3 = vld [vmem:[#allocation2 + $0x268] ss:$16 sps:$4 sm:$0xff]  }
  0xae   :  { %1847 = vmatpush1.bf16.msra.mxu0 %v3250_v37  ;;  %v3334_v36 = vld [vmem:[#allocation2 + $0x108] ss:$16 sps:$4 sm:$0xff]  }
  0xaf   :  { %1888 = vmatpush1.bf16.msra.mxu1 %v3253_v38  ;;  %1848 = vmatprep.subr.bf16.mxu0 %v3258_v39  ;;  %v3337_v37 = vld [vmem:[#allocation2 + $0x308] ss:$16 sps:$4 sm:$0xff]   ;;  %v3342_v38 = vld [vmem:[#allocation2 + $0x4ec] ss:$16 sps:$4 sm:$0xff]  }
  0xb0   :  { %1889 = vmatprep.subr.bf16.mxu1 %v3261_v40  ;;  %v3345_v39 = vld [vmem:[#allocation2 + $0x6ec] ss:$16 sps:$4 sm:$0xff]   ;;  %v3340_v40 = vld [vmem:[#allocation2 + $0x4e8] ss:$16 sps:$4 sm:$0xff]  }
  0xb2   :  { %1849 = vmatpush1.bf16.msra.mxu0 %v3256_v41  ;;  %v3343_v41 = vld [vmem:[#allocation2 + $0x6e8] ss:$16 sps:$4 sm:$0xff]  }
  0xb3   :  { %1890 = vmatpush1.bf16.msra.mxu1 %v3259_v42  ;;  %1850 = vmatprep.subr.bf16.mxu0 %v3264_v44  ;;  %v3348_v42 = vld [vmem:[#allocation2 + $0x4cc] ss:$16 sps:$4 sm:$0xff]  }
  0xb4   :  { %1891 = vmatprep.subr.bf16.mxu1 %v3267_v45  ;;  %v3351_v44 = vld [vmem:[#allocation2 + $0x6cc] ss:$16 sps:$4 sm:$0xff]   ;;  %v3346_v45 = vld [vmem:[#allocation2 + $0x4c8] ss:$16 sps:$4 sm:$0xff]  }
  0xb6   :  { %1851 = vmatpush1.bf16.msra.mxu0 %v3262_v46  ;;  %v3349_v46 = vld [vmem:[#allocation2 + $0x6c8] ss:$16 sps:$4 sm:$0xff]  }
  0xb7   :  { %1892 = vmatpush1.bf16.msra.mxu1 %v3265_v47  ;;  %1852 = vmatprep.subr.bf16.mxu0 %v3270_v48  ;;  %v3354_v47 = vld [vmem:[#allocation2 + $0x4ac] ss:$16 sps:$4 sm:$0xff]  }
  0xb8   :  { %1893 = vmatprep.subr.bf16.mxu1 %v3273_v50  ;;  %v3357_v48 = vld [vmem:[#allocation2 + $0x6ac] ss:$16 sps:$4 sm:$0xff]   ;;  %v3352_v50 = vld [vmem:[#allocation2 + $0x4a8] ss:$16 sps:$4 sm:$0xff]  }
  0xba   :  { %1853 = vmatpush1.bf16.msra.mxu0 %v3268_v62  ;;  %v3355_v62 = vld [vmem:[#allocation2 + $0x6a8] ss:$16 sps:$4 sm:$0xff]  }
  0xbb   :  { %1894 = vmatpush1.bf16.msra.mxu1 %v3271_v3  ;;  %1854 = vmatprep.subr.bf16.mxu0 %v3276_v51  ;;  %v3360_v3 = vld [vmem:[#allocation2 + $0x48c] ss:$16 sps:$4 sm:$0xff]   ;;  %v3358_v51 = vld [vmem:[#allocation2 + $0x488] ss:$16 sps:$4 sm:$0xff]  }
  0xbc   :  { %1895 = vmatprep.subr.bf16.mxu1 %v3279_v52  ;;  %v3366_v52 = vld [vmem:[#allocation2 + $0x46c] ss:$16 sps:$4 sm:$0xff]  }
  0xbe   :  { %1855 = vmatpush1.bf16.msra.mxu0 %v3274_v54  ;;  %v3369_v54 = vld [vmem:[#allocation2 + $0x66c] ss:$16 sps:$4 sm:$0xff]  }
  0xbf   :  { %1896 = vmatpush1.bf16.msra.mxu1 %v3277_v55  ;;  %1856 = vmatprep.subr.bf16.mxu0 %v3282_v56  ;;  %v3364_v55 = vld [vmem:[#allocation2 + $0x468] ss:$16 sps:$4 sm:$0xff]  }
  0xc0   :  { %1897 = vmatprep.subr.bf16.mxu1 %v3285_v58  ;;  %v3367_v56 = vld [vmem:[#allocation2 + $0x668] ss:$16 sps:$4 sm:$0xff]   ;;  %v3372_v58 = vld [vmem:[#allocation2 + $0x44c] ss:$16 sps:$4 sm:$0xff]  }
  0xc2   :  { %1857 = vmatpush1.bf16.msra.mxu0 %v3280_v49  ;;  %v3373_v49 = vld [vmem:[#allocation2 + $0x648] ss:$16 sps:$4 sm:$0xff]  }
  0xc3   :  { %1898 = vmatpush1.bf16.msra.mxu1 %v3283_v59  ;;  %1858 = vmatprep.subr.bf16.mxu0 %v3288_v60  ;;  %v3378_v59 = vld [vmem:[#allocation2 + $0x42c] ss:$16 sps:$4 sm:$0xff]  }
  0xc4   :  { %1899 = vmatprep.subr.bf16.mxu1 %v3291_v61  ;;  %v3381_v60 = vld [vmem:[#allocation2 + $0x62c] ss:$16 sps:$4 sm:$0xff]   ;;  %v3376_v61 = vld [vmem:[#allocation2 + $0x428] ss:$16 sps:$4 sm:$0xff]  }
  0xc6   :  { %1859 = vmatpush1.bf16.msra.mxu0 %v3286_v63  ;;  %v3379_v63 = vld [vmem:[#allocation2 + $0x628] ss:$16 sps:$4 sm:$0xff]  }
  0xc7   :  { %1900 = vmatpush1.bf16.msra.mxu1 %v3289_v0  ;;  %1860 = vmatprep.subr.bf16.mxu0 %v3294_v1  ;;  %v3384_v0 = vld [vmem:[#allocation2 + $0x40c] ss:$16 sps:$4 sm:$0xff]  }
  0xc8   :  { %1901 = vmatprep.subr.bf16.mxu1 %v3297_v2  ;;  %v3387_v1 = vld [vmem:[#allocation2 + $0x60c] ss:$16 sps:$4 sm:$0xff]   ;;  %v3382_v2 = vld [vmem:[#allocation2 + $0x408] ss:$16 sps:$4 sm:$0xff]  }
  0xca   :  { %1861 = vmatpush2.bf16.msra.mxu0 %v3292_v4  ;;  %v3385_v4 = vld [vmem:[#allocation2 + $0x608] ss:$16 sps:$4 sm:$0xff]  }
  0xcb   :  { %1902 = vmatpush2.bf16.msra.mxu1 %v3295_v5  ;;  %1862 = vmatprep.subr.bf16.mxu0 %v3300_v6  ;;  %v3390_v5 = vld [vmem:[#allocation2 + $0x5ec] ss:$16 sps:$4 sm:$0xff]  }
  0xcc   :  { %1903 = vmatprep.subr.bf16.mxu1 %v3303_v7  ;;  %v3393_v6 = vld [vmem:[#allocation2 + $0x7ec] ss:$16 sps:$4 sm:$0xff]   ;;  %v3388_v7 = vld [vmem:[#allocation2 + $0x5e8] ss:$16 sps:$4 sm:$0xff]  }
  0xce   :  { %1863 = vmatpush2.bf16.msra.mxu0 %v3298_v8  ;;  %v3391_v8 = vld [vmem:[#allocation2 + $0x7e8] ss:$16 sps:$4 sm:$0xff]  }
  0xcf   :  { %1904 = vmatpush2.bf16.msra.mxu1 %v3301_v9  ;;  %1864 = vmatprep.subr.bf16.mxu0 %v3306_v10  ;;  %v3396_v9 = vld [vmem:[#allocation2 + $0x5cc] ss:$16 sps:$4 sm:$0xff]  }
  0xd0   :  { %1905 = vmatprep.subr.bf16.mxu1 %v3309_v11  ;;  %v3399_v10 = vld [vmem:[#allocation2 + $0x7cc] ss:$16 sps:$4 sm:$0xff]   ;;  %v3394_v11 = vld [vmem:[#allocation2 + $0x5c8] ss:$16 sps:$4 sm:$0xff]  }
  0xd2   :  { %1865 = vmatpush2.bf16.msra.mxu0 %v3304_v12  ;;  %v3397_v12 = vld [vmem:[#allocation2 + $0x7c8] ss:$16 sps:$4 sm:$0xff]  }
  0xd3   :  { %1906 = vmatpush2.bf16.msra.mxu1 %v3307_v13  ;;  %1866 = vmatprep.subr.bf16.mxu0 %v3312_v14  ;;  %v3402_v13 = vld [vmem:[#allocation2 + $0x5ac] ss:$16 sps:$4 sm:$0xff]  }
  0xd4   :  { %1907 = vmatprep.subr.bf16.mxu1 %v3315_v15  ;;  %v3405_v14 = vld [vmem:[#allocation2 + $0x7ac] ss:$16 sps:$4 sm:$0xff]   ;;  %v3400_v15 = vld [vmem:[#allocation2 + $0x5a8] ss:$16 sps:$4 sm:$0xff]  }
  0xd6   :  { %1867 = vmatpush2.bf16.msra.mxu0 %v3310_v18  ;;  %v3403_v18 = vld [vmem:[#allocation2 + $0x7a8] ss:$16 sps:$4 sm:$0xff]  }
  0xd7   :  { %1908 = vmatpush2.bf16.msra.mxu1 %v3313_v19  ;;  %1868 = vmatprep.subr.bf16.mxu0 %v3318_v20  ;;  %v3408_v19 = vld [vmem:[#allocation2 + $0x58c] ss:$16 sps:$4 sm:$0xff]  }
  0xd8   :  { %1909 = vmatprep.subr.bf16.mxu1 %v3321_v21  ;;  %v3411_v20 = vld [vmem:[#allocation2 + $0x78c] ss:$16 sps:$4 sm:$0xff]   ;;  %v3406_v21 = vld [vmem:[#allocation2 + $0x588] ss:$16 sps:$4 sm:$0xff]  }
  0xda   :  { %1869 = vmatpush2.bf16.msra.mxu0 %v3316_v22  ;;  %v3409_v22 = vld [vmem:[#allocation2 + $0x788] ss:$16 sps:$4 sm:$0xff]  }
  0xdb   :  { %1910 = vmatpush2.bf16.msra.mxu1 %v3319_v23  ;;  %1870 = vmatprep.subr.bf16.mxu0 %v3324_v24  ;;  %v3414_v23 = vld [vmem:[#allocation2 + $0x56c] ss:$16 sps:$4 sm:$0xff]  }
  0xdc   :  { %1911 = vmatprep.subr.bf16.mxu1 %v3327_v25  ;;  %v3417_v24 = vld [vmem:[#allocation2 + $0x76c] ss:$16 sps:$4 sm:$0xff]   ;;  %v3412_v25 = vld [vmem:[#allocation2 + $0x568] ss:$16 sps:$4 sm:$0xff]  }
  0xde   :  { %1871 = vmatpush2.bf16.msra.mxu0 %v3322_v26  ;;  %v3415_v26 = vld [vmem:[#allocation2 + $0x768] ss:$16 sps:$4 sm:$0xff]  }
  0xdf   :  { %1912 = vmatpush2.bf16.msra.mxu1 %v3325_v27  ;;  %1872 = vmatprep.subr.bf16.mxu0 %v3330_v28  ;;  %v3420_v27 = vld [vmem:[#allocation2 + $0x54c] ss:$16 sps:$4 sm:$0xff]  }
  0xe0   :  { %1913 = vmatprep.subr.bf16.mxu1 %v3333_v29  ;;  %v3423_v28 = vld [vmem:[#allocation2 + $0x74c] ss:$16 sps:$4 sm:$0xff]   ;;  %v3418_v29 = vld [vmem:[#allocation2 + $0x548] ss:$16 sps:$4 sm:$0xff]  }
  0xe2   :  { %1873 = vmatpush2.bf16.msra.mxu0 %v3328_v30  ;;  %v3421_v30 = vld [vmem:[#allocation2 + $0x748] ss:$16 sps:$4 sm:$0xff]  }
  0xe3   :  { %1914 = vmatpush2.bf16.msra.mxu1 %v3331_v33  ;;  %1874 = vmatprep.subr.bf16.mxu0 %v3336_v34  ;;  %v3426_v33 = vld [vmem:[#allocation2 + $0x52c] ss:$16 sps:$4 sm:$0xff]  }
  0xe4   :  { %1915 = vmatprep.subr.bf16.mxu1 %v3339_v35  ;;  %v3429_v34 = vld [vmem:[#allocation2 + $0x72c] ss:$16 sps:$4 sm:$0xff]   ;;  %v3424_v35 = vld [vmem:[#allocation2 + $0x528] ss:$16 sps:$4 sm:$0xff]  }
  0xe6   :  { %1875 = vmatpush2.bf16.msra.mxu0 %v3334_v36  ;;  %v3427_v36 = vld [vmem:[#allocation2 + $0x728] ss:$16 sps:$4 sm:$0xff]  }
  0xe7   :  { %1916 = vmatpush2.bf16.msra.mxu1 %v3337_v37  ;;  %1926 = vmatprep.subr.bf16.mxu0 %v3342_v38  ;;  %v3432_v37 = vld [vmem:[#allocation2 + $0x50c] ss:$16 sps:$4 sm:$0xff]  }
  0xe8   :  { %1967 = vmatprep.subr.bf16.mxu1 %v3345_v39  ;;  %v3435_v38 = vld [vmem:[#allocation2 + $0x70c] ss:$16 sps:$4 sm:$0xff]   ;;  %v3430_v39 = vld [vmem:[#allocation2 + $0x508] ss:$16 sps:$4 sm:$0xff]  }
  0xe9   :  { %1877 = vmatmul.mubr.bf16.vlgmr.msra.gmra.mxu0 %v3687_v16  ;;  %v3363_v16 = vld [vmem:[#allocation2 + $0x68c] ss:$16 sps:$4 sm:$0xff]  }
  0xea   :  { %1918 = vmatmul.mubr.bf16.vlgmr.msra.gmra.mxu1 %v3689_v17  ;;  %1927 = vmatpush1.bf16.msra.mxu0 %v3340_v40  ;;  %v3361_v17 = vld [vmem:[#allocation2 + $0x688] ss:$16 sps:$4 sm:$0xff]  }
  0xeb   :  { %1968 = vmatpush1.bf16.msra.mxu1 %v3343_v41  ;;  %1928 = vmatprep.subr.bf16.mxu0 %v3348_v42  ;;  %v3433_v40 = vld [vmem:[#allocation2 + $0x708] ss:$16 sps:$4 sm:$0xff]   ;;  %v3438_v41 = vld [vmem:[#allocation4 + $0x74] ss:$8 sps:$4 sm:$0xff]  }
  0xec   :  { %1969 = vmatprep.subr.bf16.mxu1 %v3351_v44  ;;  %1958 = vmatprep.mubr.bf16.mxu0 %v3704_v53  ;;  %v3375_v53 = vld [vmem:[#allocation2 + $0x64c] ss:$16 sps:$4 sm:$0xff]   ;;  %v3436_v42 = vld [vmem:[#allocation4 + $0x70] ss:$8 sps:$4 sm:$0xff]  }
  0xed   :  { %1999 = vmatprep.mubr.bf16.mxu1 %v3708_v57  ;;  %v3370_v57 = vld [vmem:[#allocation2 + $0x448] ss:$16 sps:$4 sm:$0xff]   ;;  %v3441_v44 = vld [vmem:[#allocation4 + $0x64] ss:$8 sps:$4 sm:$0xff]  }
  0xee   :  { %1929 = vmatpush1.bf16.msra.mxu0 %v3346_v45 }
  0xef   :  { %1970 = vmatpush1.bf16.msra.mxu1 %v3349_v46  ;;  %1930 = vmatprep.subr.bf16.mxu0 %v3354_v47  ;;  %v3439_v47 = vld [vmem:[#allocation4 + $0x60] ss:$8 sps:$4 sm:$0xff]  }
  0xf0   :  { %1971 = vmatprep.subr.bf16.mxu1 %v3357_v48 }
  0xf2   :  { %1931 = vmatpush1.bf16.msra.mxu0 %v3352_v50 }
  0xf3   :  { %1972 = vmatpush1.bf16.msra.mxu1 %v3355_v62  ;;  %1932 = vmatprep.subr.bf16.mxu0 %v3360_v3  ;;  %v3444_v62 = vld [vmem:[#allocation4 + $0x54] ss:$8 sps:$4 sm:$0xff]  }
  0xf4   :  { %1973 = vmatprep.subr.bf16.mxu1 %v3363_v16 }
  0xf6   :  { %1933 = vmatpush1.bf16.msra.mxu0 %v3358_v51  ;;  %v3442_v51 = vld [vmem:[#allocation4 + $0x50] ss:$8 sps:$4 sm:$0xff]  }
  0xf7   :  { %1974 = vmatpush1.bf16.msra.mxu1 %v3361_v17  ;;  %1934 = vmatprep.subr.bf16.mxu0 %v3366_v52 }
  0xf8   :  { %1975 = vmatprep.subr.bf16.mxu1 %v3369_v54  ;;  %v3447_v54 = vld [vmem:[#allocation4 + $0x44] ss:$8 sps:$4 sm:$0xff]  }
  0xfa   :  { %1935 = vmatpush1.bf16.msra.mxu0 %v3364_v55  ;;  %v3484_v55 = vld [vmem:[#allocation4 + $0x170] ss:$8 sps:$4 sm:$0xff]  }
  0xfb   :  { %1976 = vmatpush1.bf16.msra.mxu1 %v3367_v56  ;;  %1936 = vmatprep.subr.bf16.mxu0 %v3372_v58  ;;  %v3489_v56 = vld [vmem:[#allocation4 + $0x164] ss:$8 sps:$4 sm:$0xff]   ;;  %v3487_v58 = vld [vmem:[#allocation4 + $0x160] ss:$8 sps:$4 sm:$0xff]  }
  0xfc   :  { %1977 = vmatprep.subr.bf16.mxu1 %v3375_v53  ;;  %v3450_v53 = vld [vmem:[#allocation4 + $0x34] ss:$8 sps:$4 sm:$0xff]  }
  0xfe   :  { %1937 = vmatpush1.bf16.msra.mxu0 %v3370_v57  ;;  %v3492_v57 = vld [vmem:[#allocation4 + $0x154] ss:$8 sps:$4 sm:$0xff]  }
  0xff   :  { %1978 = vmatpush1.bf16.msra.mxu1 %v3373_v49  ;;  %1938 = vmatprep.subr.bf16.mxu0 %v3378_v59  ;;  %v3448_v49 = vld [vmem:[#allocation4 + $0x30] ss:$8 sps:$4 sm:$0xff]  }
 0x100   :  { %1979 = vmatprep.subr.bf16.mxu1 %v3381_v60  ;;  %v3490_v59 = vld [vmem:[#allocation4 + $0x150] ss:$8 sps:$4 sm:$0xff]   ;;  %v3453_v60 = vld [vmem:[#allocation4 + $0x24] ss:$8 sps:$4 sm:$0xff]  }
 0x102   :  { %1939 = vmatpush1.bf16.msra.mxu0 %v3376_v61  ;;  %v3495_v61 = vld [vmem:[#allocation4 + $0x144] ss:$8 sps:$4 sm:$0xff]  }
 0x103   :  { %1980 = vmatpush1.bf16.msra.mxu1 %v3379_v63  ;;  %1940 = vmatprep.subr.bf16.mxu0 %v3384_v0  ;;  %v3451_v63 = vld [vmem:[#allocation4 + $0x20] ss:$8 sps:$4 sm:$0xff]  }
 0x104   :  { %1981 = vmatprep.subr.bf16.mxu1 %v3387_v1  ;;  %v3493_v0 = vld [vmem:[#allocation4 + $0x140] ss:$8 sps:$4 sm:$0xff]   ;;  %v3456_v1 = vld [vmem:[#allocation4 + $0x14] ss:$8 sps:$4 sm:$0xff]  }
 0x106   :  { %1941 = vmatpush1.bf16.msra.mxu0 %v3382_v2  ;;  %v3498_v2 = vld [vmem:[#allocation4 + $0x134] ss:$8 sps:$4 sm:$0xff]  }
 0x107   :  { %1982 = vmatpush1.bf16.msra.mxu1 %v3385_v4  ;;  %1942 = vmatprep.subr.bf16.mxu0 %v3390_v5  ;;  %v3454_v4 = vld [vmem:[#allocation4 + $0x10] ss:$8 sps:$4 sm:$0xff]  }
 0x108   :  { %1983 = vmatprep.subr.bf16.mxu1 %v3393_v6  ;;  %v3496_v5 = vld [vmem:[#allocation4 + $0x130] ss:$8 sps:$4 sm:$0xff]   ;;  %v3459_v6 = vld [vmem:[#allocation4 + $0x4] ss:$8 sps:$4 sm:$0xff]  }
 0x10a   :  { %1943 = vmatpush2.bf16.msra.mxu0 %v3388_v7  ;;  %v3501_v7 = vld [vmem:[#allocation4 + $0x124] ss:$8 sps:$4 sm:$0xff]  }
 0x10b   :  { %1984 = vmatpush2.bf16.msra.mxu1 %v3391_v8  ;;  %1944 = vmatprep.subr.bf16.mxu0 %v3396_v9  ;;  %v3457_v8 = vld [vmem:[#allocation4] ss:$8 sps:$4 sm:$0xff]  }
 0x10c   :  { %1985 = vmatprep.subr.bf16.mxu1 %v3399_v10  ;;  %v3499_v9 = vld [vmem:[#allocation4 + $0x120] ss:$8 sps:$4 sm:$0xff]   ;;  %v3462_v10 = vld [vmem:[#allocation4 + $0xf4] ss:$8 sps:$4 sm:$0xff]  }
 0x10e   :  { %1945 = vmatpush2.bf16.msra.mxu0 %v3394_v11  ;;  %v3504_v11 = vld [vmem:[#allocation4 + $0x114] ss:$8 sps:$4 sm:$0xff]  }
 0x10f   :  { %1986 = vmatpush2.bf16.msra.mxu1 %v3397_v12  ;;  %1946 = vmatprep.subr.bf16.mxu0 %v3402_v13  ;;  %v3460_v12 = vld [vmem:[#allocation4 + $0xf0] ss:$8 sps:$4 sm:$0xff]  }
 0x110   :  { %1987 = vmatprep.subr.bf16.mxu1 %v3405_v14  ;;  %v3502_v13 = vld [vmem:[#allocation4 + $0x110] ss:$8 sps:$4 sm:$0xff]   ;;  %v3465_v14 = vld [vmem:[#allocation4 + $0xe4] ss:$8 sps:$4 sm:$0xff]  }
 0x112   :  { %1947 = vmatpush2.bf16.msra.mxu0 %v3400_v15  ;;  %v3507_v15 = vld [vmem:[#allocation4 + $0x104] ss:$8 sps:$4 sm:$0xff]  }
 0x113   :  { %1988 = vmatpush2.bf16.msra.mxu1 %v3403_v18  ;;  %1948 = vmatprep.subr.bf16.mxu0 %v3408_v19  ;;  %v3463_v18 = vld [vmem:[#allocation4 + $0xe0] ss:$8 sps:$4 sm:$0xff]  }
 0x114   :  { %1989 = vmatprep.subr.bf16.mxu1 %v3411_v20  ;;  %v3505_v19 = vld [vmem:[#allocation4 + $0x100] ss:$8 sps:$4 sm:$0xff]   ;;  %v3468_v20 = vld [vmem:[#allocation4 + $0xd4] ss:$8 sps:$4 sm:$0xff]  }
 0x116   :  { %1949 = vmatpush2.bf16.msra.mxu0 %v3406_v21  ;;  %v3510_v21 = vld [vmem:[#allocation4 + $0x1f4] ss:$8 sps:$4 sm:$0xff]  }
 0x117   :  { %1990 = vmatpush2.bf16.msra.mxu1 %v3409_v22  ;;  %1950 = vmatprep.subr.bf16.mxu0 %v3414_v23  ;;  %v3466_v22 = vld [vmem:[#allocation4 + $0xd0] ss:$8 sps:$4 sm:$0xff]  }
 0x118   :  { %1991 = vmatprep.subr.bf16.mxu1 %v3417_v24  ;;  %v3508_v23 = vld [vmem:[#allocation4 + $0x1f0] ss:$8 sps:$4 sm:$0xff]   ;;  %v3471_v24 = vld [vmem:[#allocation4 + $0xc4] ss:$8 sps:$4 sm:$0xff]  }
 0x11a   :  { %1951 = vmatpush2.bf16.msra.mxu0 %v3412_v25  ;;  %v3513_v25 = vld [vmem:[#allocation4 + $0x1e4] ss:$8 sps:$4 sm:$0xff]  }
 0x11b   :  { %1992 = vmatpush2.bf16.msra.mxu1 %v3415_v26  ;;  %1952 = vmatprep.subr.bf16.mxu0 %v3420_v27  ;;  %v3469_v26 = vld [vmem:[#allocation4 + $0xc0] ss:$8 sps:$4 sm:$0xff]  }
 0x11c   :  { %1993 = vmatprep.subr.bf16.mxu1 %v3423_v28  ;;  %v3511_v27 = vld [vmem:[#allocation4 + $0x1e0] ss:$8 sps:$4 sm:$0xff]   ;;  %v3474_v28 = vld [vmem:[#allocation4 + $0xb4] ss:$8 sps:$4 sm:$0xff]  }
 0x11e   :  { %1953 = vmatpush2.bf16.msra.mxu0 %v3418_v29  ;;  %v3516_v29 = vld [vmem:[#allocation4 + $0x1d4] ss:$8 sps:$4 sm:$0xff]  }
 0x11f   :  { %1994 = vmatpush2.bf16.msra.mxu1 %v3421_v30  ;;  %1954 = vmatprep.subr.bf16.mxu0 %v3426_v33  ;;  %v3472_v30 = vld [vmem:[#allocation4 + $0xb0] ss:$8 sps:$4 sm:$0xff]  }
 0x120   :  { %1995 = vmatprep.subr.bf16.mxu1 %v3429_v34  ;;  %v3514_v33 = vld [vmem:[#allocation4 + $0x1d0] ss:$8 sps:$4 sm:$0xff]   ;;  %v3477_v34 = vld [vmem:[#allocation4 + $0xa4] ss:$8 sps:$4 sm:$0xff]  }
 0x122   :  { %1955 = vmatpush2.bf16.msra.mxu0 %v3424_v35  ;;  %v3519_v35 = vld [vmem:[#allocation4 + $0x1c4] ss:$8 sps:$4 sm:$0xff]  }
 0x123   :  { %1996 = vmatpush2.bf16.msra.mxu1 %v3427_v36  ;;  %1956 = vmatprep.subr.bf16.mxu0 %v3432_v37  ;;  %v3475_v36 = vld [vmem:[#allocation4 + $0xa0] ss:$8 sps:$4 sm:$0xff]  }
 0x124   :  { %1997 = vmatprep.subr.bf16.mxu1 %v3435_v38  ;;  %v3517_v37 = vld [vmem:[#allocation4 + $0x1c0] ss:$8 sps:$4 sm:$0xff]   ;;  %v3480_v38 = vld [vmem:[#allocation4 + $0x94] ss:$8 sps:$4 sm:$0xff]  }
 0x126   :  { %1957 = vmatpush2.bf16.msra.mxu0 %v3430_v39  ;;  %v3522_v39 = vld [vmem:[#allocation4 + $0x1b4] ss:$8 sps:$4 sm:$0xff]  }
 0x127   :  { %1998 = vmatpush2.bf16.msra.mxu1 %v3433_v40  ;;  %2412 = vmatprep.subr.bf16.mxu0 %v3438_v41  ;;  %v382_v40 = vsub.s32 0, %v3671_v43  ;;  %v3742_v41 = vld [vmem:[%s3774_s2] sm:$0xf] }
 0x129   :  { %v3728_v45 = vpop.f32.mrf.mxu0  ;;  %1959 = vmatmul.mubr.bf16.vlgmr.msra.gmra.mxu0 %v3714_v31  ;;  %v3486_v31 = vld [vmem:[#allocation4 + $0x174] ss:$8 sps:$4 sm:$0xff]  }
 0x12a   :  { %v3730_v46 = vpop.f32.mrf.mxu1  ;;  %2000 = vmatmul.mubr.bf16.vlgmr.msra.gmra.mxu1 %v3718_v32  ;;  %2413 = vmatpush1.bf16.msra.mxu0 %v3436_v42  ;;  %v3445_v32 = vld [vmem:[#allocation4 + $0x40] ss:$8 sps:$4 sm:$0xff]   ;;  %v386_v42 = vsub.s32 1, %v3671_v43 }
 0x12b   :  { %v3734_v48 = vpop.f32.mrf.mxu0  ;;  %2414 = vmatprep.subr.bf16.mxu0 %v3441_v44  ;;  %2453 = vmatprep.subr.bf16.mxu1 %v3486_v31  ;;  %v3478_v44 = vld [vmem:[#allocation4 + $0x90] ss:$8 sps:$4 sm:$0xff]   ;;  %v3523_v31 = vld [vmem:[#allocation4 + $0x1a0] ss:$8 sps:$4 sm:$0xff]  }
 0x12c   :  { %v3736_v50 = vpop.f32.mrf.mxu1  ;;  %2454 = vmatpush1.bf16.msra.mxu1 %v3484_v55 }
 0x12d   :  { %v1718_v3 = vpop.f32.mrf.mxu0  ;;  %2455 = vmatprep.subr.bf16.mxu1 %v3489_v56 }
 0x12e   :  { %v1759_v16 = vpop.f32.mrf.mxu1  ;;  %2415 = vmatpush1.bf16.msra.mxu0 %v3439_v47  ;;  %v3520_v47 = vld [vmem:[#allocation4 + $0x1b0] ss:$8 sps:$4 sm:$0xff]   ;;  %v383_v3 = vrot.slane %v3742_v41, %v382_v40 }
 0x12f   :  { %v1719_v17 = vpop.f32.mrf.mxu0  ;;  %2416 = vmatprep.subr.bf16.mxu0 %v3444_v62  ;;  %v3483_v62 = vld [vmem:[#allocation4 + $0x84] ss:$8 sps:$4 sm:$0xff]   ;;  %v387_v16 = vrot.slane %v3742_v41, %v386_v42 }
 0x130   :  { %v1760_v52 = vpop.f32.mrf.mxu1  ;;  %2456 = vmatpush1.bf16.msra.mxu1 %v3487_v58  ;;  %v1715_v17 = vadd.f32 %v3728_v45, %v383_v3  ;;  %v3526_v45 = vld [vmem:[#allocation4 + $0x190] ss:$8 sps:$4 sm:$0xff]  }
 0x131   :  { %2457 = vmatprep.subr.bf16.mxu1 %v3492_v57  ;;  %v1717_v52 = vadd.f32 %v3734_v48, %v387_v16 }
 0x132   :  { %2417 = vmatpush1.bf16.msra.mxu0 %v3442_v51  ;;  %v3481_v51 = vld [vmem:[#allocation4 + $0x80] ss:$8 sps:$4 sm:$0xff]   ;;  %v1756_v55 = vadd.f32 %v3730_v46, %v1715_v17 }
 0x133   :  { %2418 = vmatprep.subr.bf16.mxu0 %v3447_v54  ;;  %v3525_v54 = vld [vmem:[#allocation4 + $0x1a4] ss:$8 sps:$4 sm:$0xff]   ;;  %v1758_v58 = vadd.f32 %v3736_v50, %v1717_v52 }
 0x134   :  { %2458 = vmatpush1.bf16.msra.mxu1 %v3490_v59  ;;  %v3528_v59 = vld [vmem:[#allocation4 + $0x194] ss:$8 sps:$4 sm:$0xff]  }
 0x135   :  { %2459 = vmatprep.subr.bf16.mxu1 %v3495_v61 }
 0x136   :  { %2419 = vmatpush1.bf16.msra.mxu0 %v3445_v32 }
 0x137   :  { %2420 = vmatprep.subr.bf16.mxu0 %v3450_v53 }
 0x138   :  { %2460 = vmatpush1.bf16.msra.mxu1 %v3493_v0 }
 0x139   :  { %2461 = vmatprep.subr.bf16.mxu1 %v3498_v2 }
 0x13a   :  { %2421 = vmatpush1.bf16.msra.mxu0 %v3448_v49 }
 0x13b   :  { %2422 = vmatprep.subr.bf16.mxu0 %v3453_v60 }
 0x13c   :  { %2462 = vmatpush1.bf16.msra.mxu1 %v3496_v5 }
 0x13d   :  { %2463 = vmatprep.subr.bf16.mxu1 %v3501_v7 }
 0x13e   :  { %2423 = vmatpush1.bf16.msra.mxu0 %v3451_v63 }
 0x13f   :  { %2424 = vmatprep.subr.bf16.mxu0 %v3456_v1 }
 0x140   :  { %2464 = vmatpush1.bf16.msra.mxu1 %v3499_v9 }
 0x141   :  { %2465 = vmatprep.subr.bf16.mxu1 %v3504_v11 }
 0x142   :  { %2425 = vmatpush1.bf16.msra.mxu0 %v3454_v4  ;;  %v3531_v4 = vld [vmem:[#allocation4 + $0x184] ss:$8 sps:$4 sm:$0xff]  }
 0x143   :  { %2426 = vmatprep.subr.bf16.mxu0 %v3459_v6  ;;  %v3529_v6 = vld [vmem:[#allocation4 + $0x180] ss:$8 sps:$4 sm:$0xff]  }
 0x144   :  { %2466 = vmatpush1.bf16.msra.mxu1 %v3502_v13 }
 0x145   :  { %2467 = vmatprep.subr.bf16.mxu1 %v3507_v15 }
 0x146   :  { %2427 = vmatpush1.bf16.msra.mxu0 %v3457_v8 }
 0x147   :  { %2428 = vmatprep.subr.bf16.mxu0 %v3462_v10 }
 0x148   :  { %2468 = vmatpush1.bf16.msra.mxu1 %v3505_v19  ;;  %v3533_v19 = vld [vmem:[#allocation6 + $0x38] sm:$0xff]  }
 0x149   :  { %2469 = vmatprep.subr.bf16.mxu1 %v3510_v21  ;;  %v3535_v21 = vld [vmem:[#allocation6 + $0x30] sm:$0xff]  }
 0x14a   :  { %2429 = vmatpush2.bf16.msra.mxu0 %v3460_v12 }
 0x14b   :  { %2430 = vmatprep.subr.bf16.mxu0 %v3465_v14 }
 0x14c   :  { %2470 = vmatpush2.bf16.msra.mxu1 %v3508_v23  ;;  %v3537_v23 = vld [vmem:[#allocation6 + $0x28] sm:$0xff]  }
 0x14d   :  { %2471 = vmatprep.subr.bf16.mxu1 %v3513_v25  ;;  %v3539_v25 = vld [vmem:[#allocation6 + $0x20] sm:$0xff]  }
 0x14e   :  { %2431 = vmatpush2.bf16.msra.mxu0 %v3463_v18  ;;  %v3532_v18 = vld [vmem:[#allocation6 + $0x78] sm:$0xff]  }
 0x14f   :  { %2432 = vmatprep.subr.bf16.mxu0 %v3468_v20  ;;  %v3534_v20 = vld [vmem:[#allocation6 + $0x70] sm:$0xff]  }
 0x150   :  { %2472 = vmatpush2.bf16.msra.mxu1 %v3511_v27  ;;  %v3541_v27 = vld [vmem:[#allocation6 + $0x18] sm:$0xff]  }
 0x151   :  { %2473 = vmatprep.subr.bf16.mxu1 %v3516_v29  ;;  %v3543_v29 = vld [vmem:[#allocation6 + $0x10] sm:$0xff]  }
 0x152   :  { %2433 = vmatpush2.bf16.msra.mxu0 %v3466_v22  ;;  %v3536_v22 = vld [vmem:[#allocation6 + $0x68] sm:$0xff]  }
 0x153   :  { %2434 = vmatprep.subr.bf16.mxu0 %v3471_v24  ;;  %v3538_v24 = vld [vmem:[#allocation6 + $0x60] sm:$0xff]  }
 0x154   :  { %2474 = vmatpush2.bf16.msra.mxu1 %v3514_v33  ;;  %v394_v33 = vsub.s32 3, %v3671_v43 }
 0x155   :  { %2475 = vmatprep.subr.bf16.mxu1 %v3519_v35 }
 0x156   :  { %2435 = vmatpush2.bf16.msra.mxu0 %v3469_v26  ;;  %v3540_v26 = vld [vmem:[#allocation6 + $0x58] sm:$0xff]   ;;  %v395_v35 = vrot.slane %v3742_v41, %v394_v33 }
 0x157   :  { %2436 = vmatprep.subr.bf16.mxu0 %v3474_v28  ;;  %v3542_v28 = vld [vmem:[#allocation6 + $0x50] sm:$0xff]  }
 0x158   :  { %2476 = vmatpush2.bf16.msra.mxu1 %v3517_v37 }
 0x159   :  { %2477 = vmatprep.subr.bf16.mxu1 %v3522_v39 }
 0x15a   :  { %2437 = vmatpush2.bf16.msra.mxu0 %v3472_v30  ;;  %v390_v30 = vsub.s32 2, %v3671_v43  ;;  %v3001_v43 = vld [vmem:[%s3778_s6] ss:$0 sm:$0xff] }
 0x15b   :  { %2438 = vmatprep.subr.bf16.mxu0 %v3477_v34 }
 0x15c   :  { %2478 = vmatpush2.bf16.msra.mxu1 %v3520_v47  ;;  %v391_v34 = vrot.slane %v3742_v41, %v390_v30 }
 0x15d   :  { %2479 = vmatprep.subr.bf16.mxu1 %v3525_v54 }
 0x15e   :  { %2439 = vmatpush2.bf16.msra.mxu0 %v3475_v36 }
 0x15f   :  { %2440 = vmatprep.subr.bf16.mxu0 %v3480_v38 }
 0x160   :  { %2480 = vmatpush2.bf16.msra.mxu1 %v3523_v31 }
 0x161   :  { %2481 = vmatprep.subr.bf16.mxu1 %v3528_v59  ;;  %v3545_v59 = vld [vmem:[#allocation6 + $0x8] sm:$0xff]  }
 0x162   :  { %2441 = vmatpush2.bf16.msra.mxu0 %v3478_v44 }
 0x163   :  { %2442 = vmatprep.subr.bf16.mxu0 %v3483_v62 }
 0x164   :  { %2482 = vmatpush2.bf16.msra.mxu1 %v3526_v45  ;;  %v3546_v45 = vld [vmem:[#allocation6 + $0x40] sm:$0xff]  }
 0x165   :  { %2483 = vmatprep.subr.bf16.mxu1 %v3531_v4 }
 0x166   :  { %2443 = vmatpush2.bf16.msra.mxu0 %v3481_v51 }
 0x167   :  { %3018 = vmatprep.subr.bf16.mxu0 %v3532_v18 }
 0x168   :  { %2484 = vmatpush2.bf16.msra.mxu1 %v3529_v6 }
 0x169   :  { %v1796_v56 = vpop.f32.mrf.mxu0 }
 0x16a   :  { %v1837_v32 = vpop.f32.mrf.mxu1  ;;  %v1797_v53 = vadd.f32 %v1796_v56, %v1756_v55 }
 0x16b   :  { %v1798_v57 = vpop.f32.mrf.mxu0 }
 0x16c   :  { %v1839_v49 = vpop.f32.mrf.mxu1  ;;  %v1838_v60 = vadd.f32 %v1837_v32, %v1797_v53  ;;  %v1799_v61 = vadd.f32 %v1798_v57, %v1758_v58 }
 0x16d   :  { %v1800_v63 = vpop.f32.mrf.mxu0 }
 0x16e   :  { %v1841_v48 = vpop.f32.mrf.mxu1  ;;  %v1840_v0 = vadd.f32 %v1839_v49, %v1799_v61  ;;  %v2008_v46 = vmax.f32 %v1838_v60, 0.0  ;;  %v3544_v49 = vld [vmem:[#allocation6 + $0x48] sm:$0xff]   ;;  %v3547_v63 = vld [vmem:[#allocation6] sm:$0xff]  }
 0x16f   :  { %v1801_v1 = vpop.f32.mrf.mxu0 }
 0x170   :  { %v1842_v2 = vpop.f32.mrf.mxu1  ;;  %v2009_v5 = vmax.f32 %v1840_v0, 0.0  ;;  %v2077_v7 = vpack.c.bf16 %v2008_v46, %v2008_v46  ;;  %v2076_v0 = vld [vmem:[%s3776_s4] sm:$0x3] }
 0x171   :  { %v2085_v46 = vrot.slane %v2076_v0, %v382_v40  ;;  %v2089_v1 = vrot.slane %v2076_v0, %v386_v42 }
 0x172   :  { %v2078_v50 = vpack.c.bf16 %v2009_v5, %v2009_v5 }
 0x174   :  { %2444 = vmatprep.mubr.bf16.mxu0 %v2078_v50 }
 0x175   :  { %2445 = vmatmul.mubr.bf16.vlgmr.msra.gmra.mxu0 %v2077_v7 }
 0x176   :  { %3019 = vmatpush3.bf16.msra.mxu0 %v3533_v19 }
 0x177   :  { %3020 = vmatprep.subr.bf16.mxu0 %v3534_v20 }
 0x17a   :  { %3021 = vmatpush3.bf16.msra.mxu0 %v3535_v21 }
 0x17b   :  { %3022 = vmatprep.subr.bf16.mxu0 %v3536_v22 }
 0x17e   :  { %3023 = vmatpush3.bf16.msra.mxu0 %v3537_v23 }
 0x17f   :  { %3024 = vmatprep.subr.bf16.mxu0 %v3538_v24 }
 0x182   :  { %3025 = vmatpush3.bf16.msra.mxu0 %v3539_v25 }
 0x183   :  { %3026 = vmatprep.subr.bf16.mxu0 %v3540_v26 }
 0x186   :  { %3027 = vmatpush3.bf16.msra.mxu0 %v3541_v27 }
 0x187   :  { %3028 = vmatprep.subr.bf16.mxu0 %v3542_v28 }
 0x18a   :  { %3029 = vmatpush3.bf16.msra.mxu0 %v3543_v29 }
 0x18b   :  { %3030 = vmatprep.subr.bf16.mxu0 %v3544_v49 }
 0x18e   :  { %3031 = vmatpush3.bf16.msra.mxu0 %v3545_v59 }
 0x18f   :  { %3032 = vmatprep.subr.bf16.mxu0 %v3546_v45 }
 0x192   :  { %3033 = vmatpush3.bf16.msra.mxu0 %v3547_v63 }
 0x1a9   :  { %v1878_v8 = vpop.f32.mrf.mxu0 }
 0x1aa   :  { %v1919_v9 = vpop.f32.mrf.mxu1  ;;  %v1879_v36 = vadd.f32 %v1878_v8, %v391_v34 }
 0x1ab   :  { %v1880_v10 = vpop.f32.mrf.mxu0 }
 0x1ac   :  { %v1921_v11 = vpop.f32.mrf.mxu1  ;;  %v1881_v37 = vadd.f32 %v1880_v10, %v395_v35  ;;  %v1920_v38 = vadd.f32 %v1919_v9, %v1879_v36 }
 0x1ad   :  { %v1882_v12 = vpop.f32.mrf.mxu0 }
 0x1ae   :  { %v1923_v13 = vpop.f32.mrf.mxu1  ;;  %v1922_v47 = vadd.f32 %v1921_v11, %v1881_v37 }
 0x1af   :  { %v1883_v14 = vpop.f32.mrf.mxu0 }
 0x1b0   :  { %v1924_v15 = vpop.f32.mrf.mxu1 }
 0x1e9   :  { %v1960_v39 = vpop.f32.mrf.mxu0 }
 0x1ea   :  { %v2001_v44 = vpop.f32.mrf.mxu1  ;;  %v1961_v62 = vadd.f32 %v1960_v39, %v1920_v38 }
 0x1eb   :  { %v1962_v3 = vpop.f32.mrf.mxu0 }
 0x1ec   :  { %v2003_v16 = vpop.f32.mrf.mxu1  ;;  %v2002_v51 = vadd.f32 %v2001_v44, %v1961_v62  ;;  %v1963_v17 = vadd.f32 %v1962_v3, %v1922_v47 }
 0x1ed   :  { %v1964_v52 = vpop.f32.mrf.mxu0 }
 0x1ee   :  { %v2005_v54 = vpop.f32.mrf.mxu1  ;;  %v2004_v55 = vadd.f32 %v2003_v16, %v1963_v17  ;;  %v2010_v31 = vmax.f32 %v2002_v51, 0.0 }
 0x1ef   :  { %v1965_v56 = vpop.f32.mrf.mxu0 }
 0x1f0   :  { %v2006_v32 = vpop.f32.mrf.mxu1  ;;  %v2011_v58 = vmax.f32 %v2004_v55, 0.0  ;;  %v2079_v41 = vpack.c.bf16 %v2010_v31, %v2010_v31 }
 0x1f2   :  { %v2080_v53 = vpack.c.bf16 %v2011_v58, %v2011_v58 }
 0x1f4   :  { %2485 = vmatprep.mubr.bf16.mxu1 %v2080_v53 }
 0x1f5   :  { %2486 = vmatmul.mubr.bf16.vlgmr.msra.gmra.mxu1 %v2079_v41 }
 0x235   :  { %v2446_v57 = vpop.f32.mrf.mxu0 }
 0x236   :  { %v2447_v2 = vadd.f32 %v2446_v57, %v2085_v46 }
 0x237   :  { %v2448_v60 = vpop.f32.mrf.mxu0 }
 0x238   :  { %v2449_v5 = vadd.f32 %v2448_v60, %v2089_v1 }
 0x239   :  { %v2450_v61 = vpop.f32.mrf.mxu0 }
 0x23b   :  { %v2451_v48 = vpop.f32.mrf.mxu0 }
 0x2b5   :  { %v2487_v4 = vpop.f32.mrf.mxu1 }
 0x2b6   :  { %v2488_v6 = vadd.f32 %v2487_v4, %v2447_v2 }
 0x2b7   :  { %v2489_v50 = vpop.f32.mrf.mxu1 }
 0x2b8   :  { %v2490_v7 = vadd.f32 %v2489_v50, %v2449_v5  ;;  %v2494_v8 = vmax.f32 %v2488_v6, 0.0 }
 0x2b9   :  { %v2491_v9 = vpop.f32.mrf.mxu1 }
 0x2ba   :  { %v2495_v10 = vmax.f32 %v2490_v7, 0.0  ;;  %v2529_v13 = vpack.c.bf16 %v2494_v8, %v2494_v8 }
 0x2bb   :  { %v2492_v11 = vpop.f32.mrf.mxu1 }
 0x2bc   :  { %v2530_v12 = vpack.c.bf16 %v2495_v10, %v2495_v10 }
 0x2be   :  { %2665 = vmatprep.mubr.bf16.mxu0 %v2530_v12 }
 0x2bf   :  { %2666 = vmatmul.mubr.bf16.vlgmr.msra.gmra.mxu0 %v2529_v13 }
 0x37f   :  { %v3034_v14 = vpop.f32.mrf.mxu0 }
 0x381   :  { %v3035_v40 = vpop.f32.mrf.mxu0 }
 0x382   :  { %v3036_v42 = vadd.f32 %v3035_v40, %v3034_v14 }
 0x383   :  { %v3037_v15 = vpop.f32.mrf.mxu0 }
 0x384   :  { %v2668_v18 = vadd.f32 %v3036_v42, %v3001_v43 }
 0x385   :  { %v3038_v19 = vpop.f32.mrf.mxu0 }
 0x386   :  { %2674 = vst.msk [vmem:[%s3779_s7] sm:$0x3] %vm2673_vm0, %v2668_v18 }
 0x387   :  { %2679 = vsyncpa [#allocation3], 1 }
 0x388   :  { %2680 = vsyncpa [#allocation5], 1 }

// kernel: _lambda_.9
= control target key start
LH: loop header
LB: loop body
LE: loop exit
PB: predicated region body
PF: predicated region fallthrough
CT: control target
= control target key end

     0   :  { %s4035_s24 = smov 0   ;;  %s4037_s25 = smov 0   ;;  %s5172_s0 = inlined_call_operand.vmem [shape: bf16[2,16,1024], index: 0, kind: input, shape index: {}]   ;;  %s5173_s1 = inlined_call_operand.vmem [shape: f32[2,1,512], index: 1, kind: input, shape index: {}]   ;;  %s5174_s2 = inlined_call_operand.vmem [shape: bf16[1024,512], index: 2, kind: input, shape index: {}]   ;;  %s5175_s3 = inlined_call_operand.vmem [shape: bf16[512,256], index: 3, kind: input, shape index: {}]   ;;  %s5176_s4 = inlined_call_operand.vmem [shape: f32[1,256], index: 4, kind: input, shape index: {}]   ;;  %s5177_s5 = inlined_call_operand.vmem [shape: bf16[256,6], index: 5, kind: input, shape index: {}]   ;;  %s5178_s6 = inlined_call_operand.vmem [shape: f32[1,6], index: 6, kind: input, shape index: {}]   ;;  %s5179_s7 = inlined_call_operand.vmem [shape: f32[2,16,6], index: 7, kind: output, shape index: {}]  }
   0x1   :  { %s4039_s26 = smov 0  }
   0x2 LB: > { %s29_s27 = sadd.s32 1, %s3989_s25  ;;  %p3074_p0 = scmp.ge.s32.totalorder %s3993_s26, 1  ;;  %s3993_s26 = sphi %s4039_s26, %s17_s26   ;;  %s3989_s25 = sphi %s4037_s25, %s5181_s25   ;;  %s3985_s24 = sphi %s4035_s24, %s5180_s24  }
   0x3   : > { %p31_p1 = scmp.ge.s32.totalorder %s29_s27, 2  ;;  %p268_p2 = scmp.lt.s32.totalorder %s3993_s26, 3 }
   0x5   : > { %s5183_s27 = smov (%p31_p1, %s29_s27), 0  ;;  %p269_p3 = pnand %p3074_p0, %p268_p2 }
   0x6   : > { %p314_p4 = scmp.lt.s32.totalorder (!%p269_p3), %s3985_s24, 1 }
   0x7   : > { %272 = sbr.rel (%p269_p3) target bundleno = 887 (0x377), region = 48 }
   0xc   : > { %v3475_v0 = vld [vmem:[%s5174_s2 + $0xe4] ss:$16 sps:$4 sm:$0xff]   ;;  %v3479_v2 = vld [vmem:[%s5174_s2 + $0xe0] ss:$16 sps:$4 sm:$0xff]   ;;  %s5185_s24 = smov (!%p314_p4, %s3985_s24), 1  ;;  %vm2965_vm0 = vcmask 48128  }
   0xd   : > { %v3477_v1 = vld [vmem:[%s5174_s2 + $0x2e4] ss:$16 sps:$4 sm:$0xff]   ;;  %1945 = vmatprep.subr.bf16.mxu0 %v3475_v0  ;;  %v3480_v3 = vld [vmem:[%s5174_s2 + $0x2e0] ss:$16 sps:$4 sm:$0xff]   ;;  %s3427_s11 = sshll.u32 %s5185_s24, 6  ;;  %s3077_s13 = sshll.u32 %s5185_s24, 2 }
   0xe   : > { %1988 = vmatprep.subr.bf16.mxu1 %v3477_v1  ;;  %v3481_v4 = vld [vmem:[%s5174_s2 + $0xc4] ss:$16 sps:$4 sm:$0xff]   ;;  %1946 = vmatpush1.bf16.msra.mxu0 %v3479_v2  ;;  %v3485_v6 = vld [vmem:[%s5174_s2 + $0xc0] ss:$16 sps:$4 sm:$0xff]   ;;  %s4195_s20 = scalar_lea.vmem %s5172_s0, %s3427_s11  ;;  %s327_s29 = scalar_lea.vmem %s5173_s1, %s3077_s13 }
   0xf   : > { %1989 = vmatpush1.bf16.msra.mxu1 %v3480_v3  ;;  %v3483_v5 = vld [vmem:[%s5174_s2 + $0x2c4] ss:$16 sps:$4 sm:$0xff]   ;;  %1947 = vmatprep.subr.bf16.mxu0 %v3481_v4  ;;  %v3486_v7 = vld [vmem:[%s5174_s2 + $0x2c0] ss:$16 sps:$4 sm:$0xff]   ;;  %v340_v50 = vld [vmem:[%s4195_s20 + $0x8] sm:$0xff]  ;;  %s3428_s8 = sshll.u32 %s5185_s24, 4 }
  0x10   : > { %1990 = vmatprep.subr.bf16.mxu1 %v3483_v5  ;;  %v3487_v8 = vld [vmem:[%s5174_s2 + $0xa4] ss:$16 sps:$4 sm:$0xff]   ;;  %v3491_v10 = vld [vmem:[%s5174_s2 + $0xa0] ss:$16 sps:$4 sm:$0xff]   ;;  %v344_v51 = vld [vmem:[%s4195_s20 + $0x28] sm:$0xff]  ;;  %s336_s12 = scalar_lea.vmem %s5179_s7, %s3428_s8 }
  0x11   : > { %v3489_v9 = vld [vmem:[%s5174_s2 + $0x2a4] ss:$16 sps:$4 sm:$0xff]   ;;  %v3492_v11 = vld [vmem:[%s5174_s2 + $0x2a0] ss:$16 sps:$4 sm:$0xff]   ;;  %v4221_v55 = vcombine.high %v340_v50, %v344_v51 }
  0x12   : > { %1948 = vmatpush1.bf16.msra.mxu0 %v3485_v6  ;;  %v3493_v12 = vld [vmem:[%s5174_s2 + $0x84] ss:$16 sps:$4 sm:$0xff]   ;;  %v3497_v14 = vld [vmem:[%s5174_s2 + $0x80] ss:$16 sps:$4 sm:$0xff]  }
  0x13   : > { %1991 = vmatpush1.bf16.msra.mxu1 %v3486_v7  ;;  %1949 = vmatprep.subr.bf16.mxu0 %v3487_v8  ;;  %v3495_v13 = vld [vmem:[%s5174_s2 + $0x284] ss:$16 sps:$4 sm:$0xff]   ;;  %v3498_v15 = vld [vmem:[%s5174_s2 + $0x280] ss:$16 sps:$4 sm:$0xff]  }
  0x14   : > { %1992 = vmatprep.subr.bf16.mxu1 %v3489_v9  ;;  %v3499_v16 = vld [vmem:[%s5174_s2 + $0x64] ss:$16 sps:$4 sm:$0xff]   ;;  %v3503_v18 = vld [vmem:[%s5174_s2 + $0x60] ss:$16 sps:$4 sm:$0xff]   ;;  %2020 = vmatprep.mubr.bf16.mxu1 %v4221_v55  ;;  %v4275_v9 = vcombine.low %v340_v50, %v344_v51 }
  0x15   : > { %v3501_v17 = vld [vmem:[%s5174_s2 + $0x264] ss:$16 sps:$4 sm:$0xff]   ;;  %v3504_v19 = vld [vmem:[%s5174_s2 + $0x260] ss:$16 sps:$4 sm:$0xff]  }
  0x16   : > { %1950 = vmatpush1.bf16.msra.mxu0 %v3491_v10  ;;  %v3505_v20 = vld [vmem:[%s5174_s2 + $0x44] ss:$16 sps:$4 sm:$0xff]   ;;  %v3509_v22 = vld [vmem:[%s5174_s2 + $0x40] ss:$16 sps:$4 sm:$0xff]  }
  0x17   : > { %1993 = vmatpush1.bf16.msra.mxu1 %v3492_v11  ;;  %1951 = vmatprep.subr.bf16.mxu0 %v3493_v12  ;;  %v3507_v21 = vld [vmem:[%s5174_s2 + $0x244] ss:$16 sps:$4 sm:$0xff]   ;;  %v3510_v23 = vld [vmem:[%s5174_s2 + $0x240] ss:$16 sps:$4 sm:$0xff]  }
  0x18   : > { %1994 = vmatprep.subr.bf16.mxu1 %v3495_v13  ;;  %v3511_v24 = vld [vmem:[%s5174_s2 + $0x24] ss:$16 sps:$4 sm:$0xff]   ;;  %v3515_v26 = vld [vmem:[%s5174_s2 + $0x20] ss:$16 sps:$4 sm:$0xff]  }
  0x19   : > { %v3513_v25 = vld [vmem:[%s5174_s2 + $0x224] ss:$16 sps:$4 sm:$0xff]   ;;  %v3516_v27 = vld [vmem:[%s5174_s2 + $0x220] ss:$16 sps:$4 sm:$0xff]  }
  0x1a   : > { %1952 = vmatpush1.bf16.msra.mxu0 %v3497_v14  ;;  %v3517_v28 = vld [vmem:[%s5174_s2 + $0x4] ss:$16 sps:$4 sm:$0xff]   ;;  %v3521_v30 = vld [vmem:[%s5174_s2] ss:$16 sps:$4 sm:$0xff]  }
  0x1b   : > { %1995 = vmatpush1.bf16.msra.mxu1 %v3498_v15  ;;  %1953 = vmatprep.subr.bf16.mxu0 %v3499_v16  ;;  %v3519_v29 = vld [vmem:[%s5174_s2 + $0x204] ss:$16 sps:$4 sm:$0xff]   ;;  %v3522_v31 = vld [vmem:[%s5174_s2 + $0x200] ss:$16 sps:$4 sm:$0xff]  }
  0x1c   : > { %1996 = vmatprep.subr.bf16.mxu1 %v3501_v17  ;;  %v3523_v32 = vld [vmem:[%s5174_s2 + $0x1e4] ss:$16 sps:$4 sm:$0xff]   ;;  %v3527_v34 = vld [vmem:[%s5174_s2 + $0x1e0] ss:$16 sps:$4 sm:$0xff]  }
  0x1d   : > { %v3525_v33 = vld [vmem:[%s5174_s2 + $0x3e4] ss:$16 sps:$4 sm:$0xff]   ;;  %v3528_v35 = vld [vmem:[%s5174_s2 + $0x3e0] ss:$16 sps:$4 sm:$0xff]  }
  0x1e   : > { %1954 = vmatpush1.bf16.msra.mxu0 %v3503_v18  ;;  %v3529_v36 = vld [vmem:[%s5174_s2 + $0x1c4] ss:$16 sps:$4 sm:$0xff]   ;;  %v3533_v38 = vld [vmem:[%s5174_s2 + $0x1c0] ss:$16 sps:$4 sm:$0xff]  }
  0x1f   : > { %1997 = vmatpush1.bf16.msra.mxu1 %v3504_v19  ;;  %1955 = vmatprep.subr.bf16.mxu0 %v3505_v20  ;;  %v3531_v37 = vld [vmem:[%s5174_s2 + $0x3c4] ss:$16 sps:$4 sm:$0xff]   ;;  %v3534_v39 = vld [vmem:[%s5174_s2 + $0x3c0] ss:$16 sps:$4 sm:$0xff]  }
  0x20   : > { %1998 = vmatprep.subr.bf16.mxu1 %v3507_v21  ;;  %v3535_v40 = vld [vmem:[%s5174_s2 + $0x1a4] ss:$16 sps:$4 sm:$0xff]   ;;  %v3539_v42 = vld [vmem:[%s5174_s2 + $0x1a0] ss:$16 sps:$4 sm:$0xff]  }
  0x21   : > { %v3537_v41 = vld [vmem:[%s5174_s2 + $0x3a4] ss:$16 sps:$4 sm:$0xff]   ;;  %v3540_v43 = vld [vmem:[%s5174_s2 + $0x3a0] ss:$16 sps:$4 sm:$0xff]  }
  0x22   : > { %1956 = vmatpush1.bf16.msra.mxu0 %v3509_v22  ;;  %v3541_v44 = vld [vmem:[%s5174_s2 + $0x184] ss:$16 sps:$4 sm:$0xff]   ;;  %v3545_v46 = vld [vmem:[%s5174_s2 + $0x180] ss:$16 sps:$4 sm:$0xff]  }
  0x23   : > { %1999 = vmatpush1.bf16.msra.mxu1 %v3510_v23  ;;  %1957 = vmatprep.subr.bf16.mxu0 %v3511_v24  ;;  %v3543_v45 = vld [vmem:[%s5174_s2 + $0x384] ss:$16 sps:$4 sm:$0xff]   ;;  %v3546_v47 = vld [vmem:[%s5174_s2 + $0x380] ss:$16 sps:$4 sm:$0xff]  }
  0x24   : > { %2000 = vmatprep.subr.bf16.mxu1 %v3513_v25  ;;  %v339_v48 = vld [vmem:[%s4195_s20] sm:$0xff] }
  0x25   : > { %v343_v49 = vld [vmem:[%s4195_s20 + $0x20] sm:$0xff] }
  0x26   : > { %1958 = vmatpush1.bf16.msra.mxu0 %v3515_v26  ;;  %v3547_v52 = vld [vmem:[%s5174_s2 + $0x164] ss:$16 sps:$4 sm:$0xff]   ;;  %v4216_v53 = vcombine.high %v339_v48, %v343_v49  ;;  %v3551_v56 = vld [vmem:[%s5174_s2 + $0x160] ss:$16 sps:$4 sm:$0xff]   ;;  %v4273_v8 = vcombine.low %v339_v48, %v343_v49 }
  0x27   : > { %2001 = vmatpush1.bf16.msra.mxu1 %v3516_v27  ;;  %1959 = vmatprep.subr.bf16.mxu0 %v3517_v28  ;;  %v3549_v54 = vld [vmem:[%s5174_s2 + $0x364] ss:$16 sps:$4 sm:$0xff]   ;;  %v3552_v57 = vld [vmem:[%s5174_s2 + $0x360] ss:$16 sps:$4 sm:$0xff]  }
  0x28   : > { %2002 = vmatprep.subr.bf16.mxu1 %v3519_v29  ;;  %1977 = vmatprep.mubr.bf16.mxu0 %v4216_v53  ;;  %v3553_v58 = vld [vmem:[%s5174_s2 + $0x144] ss:$16 sps:$4 sm:$0xff]   ;;  %v3557_v60 = vld [vmem:[%s5174_s2 + $0x140] ss:$16 sps:$4 sm:$0xff]  }
  0x29   : > { %v3555_v59 = vld [vmem:[%s5174_s2 + $0x344] ss:$16 sps:$4 sm:$0xff]   ;;  %v3558_v61 = vld [vmem:[%s5174_s2 + $0x340] ss:$16 sps:$4 sm:$0xff]  }
  0x2a   : > { %1960 = vmatpush1.bf16.msra.mxu0 %v3521_v30  ;;  %v3559_v62 = vld [vmem:[%s5174_s2 + $0x124] ss:$16 sps:$4 sm:$0xff]   ;;  %v3563_v0 = vld [vmem:[%s5174_s2 + $0x120] ss:$16 sps:$4 sm:$0xff]  }
  0x2b   : > { %2003 = vmatpush1.bf16.msra.mxu1 %v3522_v31  ;;  %1961 = vmatprep.subr.bf16.mxu0 %v3523_v32  ;;  %v3561_v63 = vld [vmem:[%s5174_s2 + $0x324] ss:$16 sps:$4 sm:$0xff]   ;;  %v3564_v1 = vld [vmem:[%s5174_s2 + $0x320] ss:$16 sps:$4 sm:$0xff]  }
  0x2c   : > { %2004 = vmatprep.subr.bf16.mxu1 %v3525_v33  ;;  %v3565_v2 = vld [vmem:[%s5174_s2 + $0x104] ss:$16 sps:$4 sm:$0xff]   ;;  %v3569_v4 = vld [vmem:[%s5174_s2 + $0x100] ss:$16 sps:$4 sm:$0xff]  }
  0x2d   : > { %v3567_v3 = vld [vmem:[%s5174_s2 + $0x304] ss:$16 sps:$4 sm:$0xff]   ;;  %v3570_v5 = vld [vmem:[%s5174_s2 + $0x300] ss:$16 sps:$4 sm:$0xff]  }
  0x2e   : > { %1962 = vmatpush2.bf16.msra.mxu0 %v3527_v34  ;;  %v3573_v6 = vld [vmem:[%s5174_s2 + $0x4e4] ss:$16 sps:$4 sm:$0xff]   ;;  %v3571_v10 = vld [vmem:[%s5174_s2 + $0x4e0] ss:$16 sps:$4 sm:$0xff]  }
  0x2f   : > { %2005 = vmatpush2.bf16.msra.mxu1 %v3528_v35  ;;  %1963 = vmatprep.subr.bf16.mxu0 %v3529_v36  ;;  %v3576_v7 = vld [vmem:[%s5174_s2 + $0x6e4] ss:$16 sps:$4 sm:$0xff]   ;;  %v3574_v11 = vld [vmem:[%s5174_s2 + $0x6e0] ss:$16 sps:$4 sm:$0xff]  }
  0x30   : > { %2006 = vmatprep.subr.bf16.mxu1 %v3531_v37  ;;  %v3579_v12 = vld [vmem:[%s5174_s2 + $0x4c4] ss:$16 sps:$4 sm:$0xff]   ;;  %v3577_v14 = vld [vmem:[%s5174_s2 + $0x4c0] ss:$16 sps:$4 sm:$0xff]  }
  0x31   : > { %v3582_v13 = vld [vmem:[%s5174_s2 + $0x6c4] ss:$16 sps:$4 sm:$0xff]   ;;  %v3580_v15 = vld [vmem:[%s5174_s2 + $0x6c0] ss:$16 sps:$4 sm:$0xff]  }
  0x32   : > { %1964 = vmatpush2.bf16.msra.mxu0 %v3533_v38  ;;  %v3585_v16 = vld [vmem:[%s5174_s2 + $0x4a4] ss:$16 sps:$4 sm:$0xff]   ;;  %v3583_v18 = vld [vmem:[%s5174_s2 + $0x4a0] ss:$16 sps:$4 sm:$0xff]   ;;  %v4364_v38 = vld [vmem:[%s4195_s20 + $0x18] sm:$0xff] }
  0x33   : > { %2007 = vmatpush2.bf16.msra.mxu1 %v3534_v39  ;;  %1965 = vmatprep.subr.bf16.mxu0 %v3535_v40  ;;  %v3588_v17 = vld [vmem:[%s5174_s2 + $0x6a4] ss:$16 sps:$4 sm:$0xff]   ;;  %v3586_v19 = vld [vmem:[%s5174_s2 + $0x6a0] ss:$16 sps:$4 sm:$0xff]   ;;  %v4367_v39 = vld [vmem:[%s4195_s20 + $0x38] sm:$0xff] }
  0x34   : > { %2008 = vmatprep.subr.bf16.mxu1 %v3537_v41  ;;  %v3591_v20 = vld [vmem:[%s5174_s2 + $0x484] ss:$16 sps:$4 sm:$0xff]   ;;  %v3589_v22 = vld [vmem:[%s5174_s2 + $0x480] ss:$16 sps:$4 sm:$0xff]  }
  0x35   : > { %v3594_v21 = vld [vmem:[%s5174_s2 + $0x684] ss:$16 sps:$4 sm:$0xff]   ;;  %v3592_v23 = vld [vmem:[%s5174_s2 + $0x680] ss:$16 sps:$4 sm:$0xff]  }
  0x36   : > { %1966 = vmatpush2.bf16.msra.mxu0 %v3539_v42  ;;  %v3597_v24 = vld [vmem:[%s5174_s2 + $0x464] ss:$16 sps:$4 sm:$0xff]   ;;  %v3595_v26 = vld [vmem:[%s5174_s2 + $0x460] ss:$16 sps:$4 sm:$0xff]  }
  0x37   : > { %2009 = vmatpush2.bf16.msra.mxu1 %v3540_v43  ;;  %1967 = vmatprep.subr.bf16.mxu0 %v3541_v44  ;;  %v3600_v25 = vld [vmem:[%s5174_s2 + $0x664] ss:$16 sps:$4 sm:$0xff]   ;;  %v3598_v27 = vld [vmem:[%s5174_s2 + $0x660] ss:$16 sps:$4 sm:$0xff]   ;;  %v4381_v43 = vcombine.high %v4364_v38, %v4367_v39 }
  0x38   : > { %2010 = vmatprep.subr.bf16.mxu1 %v3543_v45  ;;  %v3603_v28 = vld [vmem:[%s5174_s2 + $0x444] ss:$16 sps:$4 sm:$0xff]   ;;  %v3601_v30 = vld [vmem:[%s5174_s2 + $0x440] ss:$16 sps:$4 sm:$0xff]  }
  0x39   : > { %v3606_v29 = vld [vmem:[%s5174_s2 + $0x644] ss:$16 sps:$4 sm:$0xff]   ;;  %v3604_v31 = vld [vmem:[%s5174_s2 + $0x640] ss:$16 sps:$4 sm:$0xff]  }
  0x3a   : > { %1968 = vmatpush2.bf16.msra.mxu0 %v3545_v46  ;;  %v3609_v32 = vld [vmem:[%s5174_s2 + $0x424] ss:$16 sps:$4 sm:$0xff]   ;;  %v3607_v34 = vld [vmem:[%s5174_s2 + $0x420] ss:$16 sps:$4 sm:$0xff]  }
  0x3b   : > { %2011 = vmatpush2.bf16.msra.mxu1 %v3546_v47  ;;  %1969 = vmatprep.subr.bf16.mxu0 %v3547_v52  ;;  %v3612_v33 = vld [vmem:[%s5174_s2 + $0x624] ss:$16 sps:$4 sm:$0xff]   ;;  %v3610_v35 = vld [vmem:[%s5174_s2 + $0x620] ss:$16 sps:$4 sm:$0xff]  }
  0x3c   : > { %2012 = vmatprep.subr.bf16.mxu1 %v3549_v54  ;;  %v4358_v36 = vld [vmem:[%s4195_s20 + $0x10] sm:$0xff] }
  0x3d   : > { %v4361_v37 = vld [vmem:[%s4195_s20 + $0x30] sm:$0xff] }
  0x3e   : > { %1970 = vmatpush2.bf16.msra.mxu0 %v3551_v56  ;;  %v3615_v40 = vld [vmem:[%s5174_s2 + $0x404] ss:$16 sps:$4 sm:$0xff]   ;;  %v4374_v41 = vcombine.high %v4358_v36, %v4361_v37  ;;  %v3613_v44 = vld [vmem:[%s5174_s2 + $0x400] ss:$16 sps:$4 sm:$0xff]  }
  0x3f   : > { %2013 = vmatpush2.bf16.msra.mxu1 %v3552_v57  ;;  %1971 = vmatprep.subr.bf16.mxu0 %v3553_v58  ;;  %v3618_v42 = vld [vmem:[%s5174_s2 + $0x604] ss:$16 sps:$4 sm:$0xff]   ;;  %v3616_v45 = vld [vmem:[%s5174_s2 + $0x600] ss:$16 sps:$4 sm:$0xff]  }
  0x40   : > { %2014 = vmatprep.subr.bf16.mxu1 %v3555_v59  ;;  %v3621_v46 = vld [vmem:[%s5174_s2 + $0x5e4] ss:$16 sps:$4 sm:$0xff]   ;;  %v3619_v48 = vld [vmem:[%s5174_s2 + $0x5e0] ss:$16 sps:$4 sm:$0xff]  }
  0x41   : > { %v3624_v47 = vld [vmem:[%s5174_s2 + $0x7e4] ss:$16 sps:$4 sm:$0xff]   ;;  %v3622_v49 = vld [vmem:[%s5174_s2 + $0x7e0] ss:$16 sps:$4 sm:$0xff]  }
  0x42   : > { %1972 = vmatpush2.bf16.msra.mxu0 %v3557_v60  ;;  %v3627_v50 = vld [vmem:[%s5174_s2 + $0x5c4] ss:$16 sps:$4 sm:$0xff]   ;;  %v3625_v52 = vld [vmem:[%s5174_s2 + $0x5c0] ss:$16 sps:$4 sm:$0xff]  }
  0x43   : > { %2015 = vmatpush2.bf16.msra.mxu1 %v3558_v61  ;;  %1973 = vmatprep.subr.bf16.mxu0 %v3559_v62  ;;  %v3630_v51 = vld [vmem:[%s5174_s2 + $0x7c4] ss:$16 sps:$4 sm:$0xff]   ;;  %v3628_v54 = vld [vmem:[%s5174_s2 + $0x7c0] ss:$16 sps:$4 sm:$0xff]  }
  0x44   : > { %2016 = vmatprep.subr.bf16.mxu1 %v3561_v63  ;;  %v3633_v56 = vld [vmem:[%s5174_s2 + $0x5a4] ss:$16 sps:$4 sm:$0xff]   ;;  %v3631_v58 = vld [vmem:[%s5174_s2 + $0x5a0] ss:$16 sps:$4 sm:$0xff]  }
  0x45   : > { %v3636_v57 = vld [vmem:[%s5174_s2 + $0x7a4] ss:$16 sps:$4 sm:$0xff]   ;;  %v3634_v59 = vld [vmem:[%s5174_s2 + $0x7a0] ss:$16 sps:$4 sm:$0xff]  }
  0x46   : > { %1974 = vmatpush2.bf16.msra.mxu0 %v3563_v0  ;;  %v3639_v60 = vld [vmem:[%s5174_s2 + $0x584] ss:$16 sps:$4 sm:$0xff]   ;;  %v3637_v62 = vld [vmem:[%s5174_s2 + $0x580] ss:$16 sps:$4 sm:$0xff]  }
  0x47   : > { %2017 = vmatpush2.bf16.msra.mxu1 %v3564_v1  ;;  %1975 = vmatprep.subr.bf16.mxu0 %v3565_v2  ;;  %v3642_v61 = vld [vmem:[%s5174_s2 + $0x784] ss:$16 sps:$4 sm:$0xff]   ;;  %v3640_v63 = vld [vmem:[%s5174_s2 + $0x780] ss:$16 sps:$4 sm:$0xff]  }
  0x48   : > { %2018 = vmatprep.subr.bf16.mxu1 %v3567_v3  ;;  %v3645_v0 = vld [vmem:[%s5174_s2 + $0x564] ss:$16 sps:$4 sm:$0xff]   ;;  %v3643_v2 = vld [vmem:[%s5174_s2 + $0x560] ss:$16 sps:$4 sm:$0xff]  }
  0x49   : > { %v3648_v1 = vld [vmem:[%s5174_s2 + $0x764] ss:$16 sps:$4 sm:$0xff]   ;;  %v3646_v3 = vld [vmem:[%s5174_s2 + $0x760] ss:$16 sps:$4 sm:$0xff]  }
  0x4a   : > { %1976 = vmatpush2.bf16.msra.mxu0 %v3569_v4  ;;  %v3651_v4 = vld [vmem:[%s5174_s2 + $0x544] ss:$16 sps:$4 sm:$0xff]  }
  0x4b   : > { %2019 = vmatpush2.bf16.msra.mxu1 %v3570_v5  ;;  %2031 = vmatprep.subr.bf16.mxu0 %v3573_v6  ;;  %v3654_v5 = vld [vmem:[%s5174_s2 + $0x744] ss:$16 sps:$4 sm:$0xff]   ;;  %v3649_v6 = vld [vmem:[%s5174_s2 + $0x540] ss:$16 sps:$4 sm:$0xff]  }
  0x4c   : > { %2074 = vmatprep.subr.bf16.mxu1 %v3576_v7  ;;  %v3652_v7 = vld [vmem:[%s5174_s2 + $0x740] ss:$16 sps:$4 sm:$0xff]  }
  0x4d   : > { %1978 = vmatmul.mubr.bf16.vlgmr.msra.gmra.mxu0 %v4273_v8 }
  0x4e   : > { %2021 = vmatmul.mubr.bf16.vlgmr.msra.gmra.mxu1 %v4275_v9  ;;  %2032 = vmatpush1.bf16.msra.mxu0 %v3571_v10  ;;  %v3657_v10 = vld [vmem:[%s5174_s2 + $0x524] ss:$16 sps:$4 sm:$0xff]  }
  0x4f   : > { %2075 = vmatpush1.bf16.msra.mxu1 %v3574_v11  ;;  %2033 = vmatprep.subr.bf16.mxu0 %v3579_v12  ;;  %v3660_v11 = vld [vmem:[%s5174_s2 + $0x724] ss:$16 sps:$4 sm:$0xff]   ;;  %v3655_v12 = vld [vmem:[%s5174_s2 + $0x520] ss:$16 sps:$4 sm:$0xff]  }
  0x50   : > { %2076 = vmatprep.subr.bf16.mxu1 %v3582_v13  ;;  %2063 = vmatprep.mubr.bf16.mxu0 %v4374_v41  ;;  %v3658_v13 = vld [vmem:[%s5174_s2 + $0x720] ss:$16 sps:$4 sm:$0xff]  }
  0x51   : > { %2106 = vmatprep.mubr.bf16.mxu1 %v4381_v43 }
  0x52   : > { %2034 = vmatpush1.bf16.msra.mxu0 %v3577_v14  ;;  %v3663_v14 = vld [vmem:[%s5174_s2 + $0x504] ss:$16 sps:$4 sm:$0xff]  }
  0x53   : > { %2077 = vmatpush1.bf16.msra.mxu1 %v3580_v15  ;;  %2035 = vmatprep.subr.bf16.mxu0 %v3585_v16  ;;  %v3666_v15 = vld [vmem:[%s5174_s2 + $0x704] ss:$16 sps:$4 sm:$0xff]   ;;  %v3661_v16 = vld [vmem:[%s5174_s2 + $0x500] ss:$16 sps:$4 sm:$0xff]  }
  0x54   : > { %2078 = vmatprep.subr.bf16.mxu1 %v3588_v17  ;;  %v3664_v17 = vld [vmem:[%s5174_s2 + $0x700] ss:$16 sps:$4 sm:$0xff]  }
  0x56   : > { %2036 = vmatpush1.bf16.msra.mxu0 %v3583_v18  ;;  %v3669_v18 = vld [vmem:[%s5174_s2 + $0xec] ss:$16 sps:$4 sm:$0xff]  }
  0x57   : > { %2079 = vmatpush1.bf16.msra.mxu1 %v3586_v19  ;;  %2037 = vmatprep.subr.bf16.mxu0 %v3591_v20  ;;  %v3672_v19 = vld [vmem:[%s5174_s2 + $0x2ec] ss:$16 sps:$4 sm:$0xff]   ;;  %v4495_v20 = vcombine.low %v4358_v36, %v4361_v37  ;;  %v3691_v36 = vld [vmem:[%s5174_s2 + $0x68] ss:$16 sps:$4 sm:$0xff]  }
  0x58   : > { %2080 = vmatprep.subr.bf16.mxu1 %v3594_v21  ;;  %v4499_v21 = vcombine.low %v4364_v38, %v4367_v39  ;;  %v3694_v37 = vld [vmem:[%s5174_s2 + $0x268] ss:$16 sps:$4 sm:$0xff]   ;;  %v3699_v38 = vld [vmem:[%s5174_s2 + $0x4c] ss:$16 sps:$4 sm:$0xff]  }
  0x59   : > { %v3702_v39 = vld [vmem:[%s5174_s2 + $0x24c] ss:$16 sps:$4 sm:$0xff]  }
  0x5a   : > { %2038 = vmatpush1.bf16.msra.mxu0 %v3589_v22  ;;  %v3667_v22 = vld [vmem:[%s5174_s2 + $0xe8] ss:$16 sps:$4 sm:$0xff]  }
  0x5b   : > { %2081 = vmatpush1.bf16.msra.mxu1 %v3592_v23  ;;  %2039 = vmatprep.subr.bf16.mxu0 %v3597_v24  ;;  %v3670_v23 = vld [vmem:[%s5174_s2 + $0x2e8] ss:$16 sps:$4 sm:$0xff]   ;;  %v3675_v24 = vld [vmem:[%s5174_s2 + $0xcc] ss:$16 sps:$4 sm:$0xff]  }
  0x5c   : > { %2082 = vmatprep.subr.bf16.mxu1 %v3600_v25  ;;  %v3678_v25 = vld [vmem:[%s5174_s2 + $0x2cc] ss:$16 sps:$4 sm:$0xff]  }
  0x5e   : > { %2040 = vmatpush1.bf16.msra.mxu0 %v3595_v26  ;;  %v3673_v26 = vld [vmem:[%s5174_s2 + $0xc8] ss:$16 sps:$4 sm:$0xff]  }
  0x5f   : > { %2083 = vmatpush1.bf16.msra.mxu1 %v3598_v27  ;;  %2041 = vmatprep.subr.bf16.mxu0 %v3603_v28  ;;  %v3676_v27 = vld [vmem:[%s5174_s2 + $0x2c8] ss:$16 sps:$4 sm:$0xff]   ;;  %v3681_v28 = vld [vmem:[%s5174_s2 + $0xac] ss:$16 sps:$4 sm:$0xff]  }
  0x60   : > { %2084 = vmatprep.subr.bf16.mxu1 %v3606_v29  ;;  %v3684_v29 = vld [vmem:[%s5174_s2 + $0x2ac] ss:$16 sps:$4 sm:$0xff]  }
  0x62   : > { %2042 = vmatpush1.bf16.msra.mxu0 %v3601_v30  ;;  %v3679_v30 = vld [vmem:[%s5174_s2 + $0xa8] ss:$16 sps:$4 sm:$0xff]  }
  0x63   : > { %2085 = vmatpush1.bf16.msra.mxu1 %v3604_v31  ;;  %2043 = vmatprep.subr.bf16.mxu0 %v3609_v32  ;;  %v3682_v31 = vld [vmem:[%s5174_s2 + $0x2a8] ss:$16 sps:$4 sm:$0xff]   ;;  %v3687_v32 = vld [vmem:[%s5174_s2 + $0x8c] ss:$16 sps:$4 sm:$0xff]  }
  0x64   : > { %2086 = vmatprep.subr.bf16.mxu1 %v3612_v33  ;;  %v3688_v33 = vld [vmem:[%s5174_s2 + $0x288] ss:$16 sps:$4 sm:$0xff]  }
  0x66   : > { %2044 = vmatpush1.bf16.msra.mxu0 %v3607_v34  ;;  %v3693_v34 = vld [vmem:[%s5174_s2 + $0x6c] ss:$16 sps:$4 sm:$0xff]  }
  0x67   : > { %2087 = vmatpush1.bf16.msra.mxu1 %v3610_v35  ;;  %2045 = vmatprep.subr.bf16.mxu0 %v3615_v40  ;;  %v3696_v35 = vld [vmem:[%s5174_s2 + $0x26c] ss:$16 sps:$4 sm:$0xff]   ;;  %v3697_v40 = vld [vmem:[%s5174_s2 + $0x48] ss:$16 sps:$4 sm:$0xff]  }
  0x68   : > { %2088 = vmatprep.subr.bf16.mxu1 %v3618_v42  ;;  %v3700_v42 = vld [vmem:[%s5174_s2 + $0x248] ss:$16 sps:$4 sm:$0xff]  }
  0x6a   : > { %2046 = vmatpush1.bf16.msra.mxu0 %v3613_v44  ;;  %v3705_v44 = vld [vmem:[%s5174_s2 + $0x2c] ss:$16 sps:$4 sm:$0xff]  }
  0x6b   : > { %2089 = vmatpush1.bf16.msra.mxu1 %v3616_v45  ;;  %2047 = vmatprep.subr.bf16.mxu0 %v3621_v46  ;;  %v3708_v45 = vld [vmem:[%s5174_s2 + $0x22c] ss:$16 sps:$4 sm:$0xff]   ;;  %v3703_v46 = vld [vmem:[%s5174_s2 + $0x28] ss:$16 sps:$4 sm:$0xff]  }
  0x6c   : > { %2090 = vmatprep.subr.bf16.mxu1 %v3624_v47  ;;  %v3706_v47 = vld [vmem:[%s5174_s2 + $0x228] ss:$16 sps:$4 sm:$0xff]  }
  0x6e   : > { %2048 = vmatpush2.bf16.msra.mxu0 %v3619_v48  ;;  %v3711_v48 = vld [vmem:[%s5174_s2 + $0xc] ss:$16 sps:$4 sm:$0xff]  }
  0x6f   : > { %2091 = vmatpush2.bf16.msra.mxu1 %v3622_v49  ;;  %2049 = vmatprep.subr.bf16.mxu0 %v3627_v50  ;;  %v3714_v49 = vld [vmem:[%s5174_s2 + $0x20c] ss:$16 sps:$4 sm:$0xff]   ;;  %v3709_v50 = vld [vmem:[%s5174_s2 + $0x8] ss:$16 sps:$4 sm:$0xff]  }
  0x70   : > { %2092 = vmatprep.subr.bf16.mxu1 %v3630_v51  ;;  %v3712_v51 = vld [vmem:[%s5174_s2 + $0x208] ss:$16 sps:$4 sm:$0xff]  }
  0x72   : > { %2050 = vmatpush2.bf16.msra.mxu0 %v3625_v52  ;;  %v3717_v52 = vld [vmem:[%s5174_s2 + $0x1ec] ss:$16 sps:$4 sm:$0xff]  }
  0x73   : > { %2093 = vmatpush2.bf16.msra.mxu1 %v3628_v54  ;;  %2051 = vmatprep.subr.bf16.mxu0 %v3633_v56  ;;  %v3720_v54 = vld [vmem:[%s5174_s2 + $0x3ec] ss:$16 sps:$4 sm:$0xff]   ;;  %v3715_v56 = vld [vmem:[%s5174_s2 + $0x1e8] ss:$16 sps:$4 sm:$0xff]  }
  0x74   : > { %2094 = vmatprep.subr.bf16.mxu1 %v3636_v57  ;;  %v3718_v57 = vld [vmem:[%s5174_s2 + $0x3e8] ss:$16 sps:$4 sm:$0xff]  }
  0x76   : > { %2052 = vmatpush2.bf16.msra.mxu0 %v3631_v58  ;;  %v3723_v58 = vld [vmem:[%s5174_s2 + $0x1cc] ss:$16 sps:$4 sm:$0xff]  }
  0x77   : > { %2095 = vmatpush2.bf16.msra.mxu1 %v3634_v59  ;;  %2053 = vmatprep.subr.bf16.mxu0 %v3639_v60  ;;  %v3726_v59 = vld [vmem:[%s5174_s2 + $0x3cc] ss:$16 sps:$4 sm:$0xff]   ;;  %v3721_v60 = vld [vmem:[%s5174_s2 + $0x1c8] ss:$16 sps:$4 sm:$0xff]  }
  0x78   : > { %2096 = vmatprep.subr.bf16.mxu1 %v3642_v61  ;;  %v3724_v61 = vld [vmem:[%s5174_s2 + $0x3c8] ss:$16 sps:$4 sm:$0xff]  }
  0x7a   : > { %2054 = vmatpush2.bf16.msra.mxu0 %v3637_v62  ;;  %v3729_v62 = vld [vmem:[%s5174_s2 + $0x1ac] ss:$16 sps:$4 sm:$0xff]  }
  0x7b   : > { %2097 = vmatpush2.bf16.msra.mxu1 %v3640_v63  ;;  %2055 = vmatprep.subr.bf16.mxu0 %v3645_v0  ;;  %v3732_v63 = vld [vmem:[%s5174_s2 + $0x3ac] ss:$16 sps:$4 sm:$0xff]   ;;  %v3727_v0 = vld [vmem:[%s5174_s2 + $0x1a8] ss:$16 sps:$4 sm:$0xff]  }
  0x7c   : > { %2098 = vmatprep.subr.bf16.mxu1 %v3648_v1  ;;  %v3730_v1 = vld [vmem:[%s5174_s2 + $0x3a8] ss:$16 sps:$4 sm:$0xff]  }
  0x7e   : > { %2056 = vmatpush2.bf16.msra.mxu0 %v3643_v2  ;;  %v3735_v2 = vld [vmem:[%s5174_s2 + $0x18c] ss:$16 sps:$4 sm:$0xff]  }
  0x7f   : > { %2099 = vmatpush2.bf16.msra.mxu1 %v3646_v3  ;;  %2057 = vmatprep.subr.bf16.mxu0 %v3651_v4  ;;  %v3738_v3 = vld [vmem:[%s5174_s2 + $0x38c] ss:$16 sps:$4 sm:$0xff]   ;;  %v3733_v4 = vld [vmem:[%s5174_s2 + $0x188] ss:$16 sps:$4 sm:$0xff]  }
  0x80   : > { %2100 = vmatprep.subr.bf16.mxu1 %v3654_v5  ;;  %v3736_v5 = vld [vmem:[%s5174_s2 + $0x388] ss:$16 sps:$4 sm:$0xff]  }
  0x82   : > { %2058 = vmatpush2.bf16.msra.mxu0 %v3649_v6  ;;  %v3741_v6 = vld [vmem:[%s5174_s2 + $0x16c] ss:$16 sps:$4 sm:$0xff]  }
  0x83   : > { %2101 = vmatpush2.bf16.msra.mxu1 %v3652_v7  ;;  %2059 = vmatprep.subr.bf16.mxu0 %v3657_v10  ;;  %v3744_v7 = vld [vmem:[%s5174_s2 + $0x36c] ss:$16 sps:$4 sm:$0xff]   ;;  %v3739_v10 = vld [vmem:[%s5174_s2 + $0x168] ss:$16 sps:$4 sm:$0xff]  }
  0x84   : > { %2102 = vmatprep.subr.bf16.mxu1 %v3660_v11  ;;  %v3742_v11 = vld [vmem:[%s5174_s2 + $0x368] ss:$16 sps:$4 sm:$0xff]  }
  0x86   : > { %2060 = vmatpush2.bf16.msra.mxu0 %v3655_v12  ;;  %v3747_v12 = vld [vmem:[%s5174_s2 + $0x14c] ss:$16 sps:$4 sm:$0xff]  }
  0x87   : > { %2103 = vmatpush2.bf16.msra.mxu1 %v3658_v13  ;;  %2061 = vmatprep.subr.bf16.mxu0 %v3663_v14  ;;  %v3750_v13 = vld [vmem:[%s5174_s2 + $0x34c] ss:$16 sps:$4 sm:$0xff]   ;;  %v3745_v14 = vld [vmem:[%s5174_s2 + $0x148] ss:$16 sps:$4 sm:$0xff]  }
  0x88   : > { %2104 = vmatprep.subr.bf16.mxu1 %v3666_v15  ;;  %v3748_v15 = vld [vmem:[%s5174_s2 + $0x348] ss:$16 sps:$4 sm:$0xff]  }
  0x8a   : > { %2062 = vmatpush2.bf16.msra.mxu0 %v3661_v16  ;;  %v3753_v16 = vld [vmem:[%s5174_s2 + $0x12c] ss:$16 sps:$4 sm:$0xff]  }
  0x8b   : > { %2105 = vmatpush2.bf16.msra.mxu1 %v3664_v17  ;;  %2117 = vmatprep.subr.bf16.mxu0 %v3669_v18  ;;  %v3756_v17 = vld [vmem:[%s5174_s2 + $0x32c] ss:$16 sps:$4 sm:$0xff]   ;;  %v3751_v18 = vld [vmem:[%s5174_s2 + $0x128] ss:$16 sps:$4 sm:$0xff]  }
  0x8c   : > { %2160 = vmatprep.subr.bf16.mxu1 %v3672_v19  ;;  %v3754_v19 = vld [vmem:[%s5174_s2 + $0x328] ss:$16 sps:$4 sm:$0xff]  }
  0x8d   : > { %2064 = vmatmul.mubr.bf16.vlgmr.msra.gmra.mxu0 %v4495_v20 }
  0x8e   : > { %2107 = vmatmul.mubr.bf16.vlgmr.msra.gmra.mxu1 %v4499_v21  ;;  %2118 = vmatpush1.bf16.msra.mxu0 %v3667_v22  ;;  %v3759_v22 = vld [vmem:[%s5174_s2 + $0x10c] ss:$16 sps:$4 sm:$0xff]  }
  0x8f   : > { %2161 = vmatpush1.bf16.msra.mxu1 %v3670_v23  ;;  %2119 = vmatprep.subr.bf16.mxu0 %v3675_v24  ;;  %v3762_v23 = vld [vmem:[%s5174_s2 + $0x30c] ss:$16 sps:$4 sm:$0xff]   ;;  %v3757_v24 = vld [vmem:[%s5174_s2 + $0x108] ss:$16 sps:$4 sm:$0xff]  }
  0x90   : > { %2162 = vmatprep.subr.bf16.mxu1 %v3678_v25  ;;  %2149 = vmatprep.mubr.bf16.mxu0 %v4216_v53  ;;  %v3690_v53 = vld [vmem:[%s5174_s2 + $0x28c] ss:$16 sps:$4 sm:$0xff]   ;;  %v3760_v25 = vld [vmem:[%s5174_s2 + $0x308] ss:$16 sps:$4 sm:$0xff]  }
  0x91   : > { %2192 = vmatprep.mubr.bf16.mxu1 %v4221_v55  ;;  %v3685_v55 = vld [vmem:[%s5174_s2 + $0x88] ss:$16 sps:$4 sm:$0xff]  }
  0x92   : > { %2120 = vmatpush1.bf16.msra.mxu0 %v3673_v26  ;;  %v3765_v26 = vld [vmem:[%s5174_s2 + $0x4ec] ss:$16 sps:$4 sm:$0xff]  }
  0x93   : > { %2163 = vmatpush1.bf16.msra.mxu1 %v3676_v27  ;;  %2121 = vmatprep.subr.bf16.mxu0 %v3681_v28  ;;  %v3768_v27 = vld [vmem:[%s5174_s2 + $0x6ec] ss:$16 sps:$4 sm:$0xff]   ;;  %v3763_v28 = vld [vmem:[%s5174_s2 + $0x4e8] ss:$16 sps:$4 sm:$0xff]  }
  0x94   : > { %2164 = vmatprep.subr.bf16.mxu1 %v3684_v29  ;;  %v3766_v29 = vld [vmem:[%s5174_s2 + $0x6e8] ss:$16 sps:$4 sm:$0xff]  }
  0x96   : > { %2122 = vmatpush1.bf16.msra.mxu0 %v3679_v30  ;;  %v3771_v30 = vld [vmem:[%s5174_s2 + $0x4cc] ss:$16 sps:$4 sm:$0xff]  }
  0x97   : > { %2165 = vmatpush1.bf16.msra.mxu1 %v3682_v31  ;;  %2123 = vmatprep.subr.bf16.mxu0 %v3687_v32  ;;  %v3774_v31 = vld [vmem:[%s5174_s2 + $0x6cc] ss:$16 sps:$4 sm:$0xff]   ;;  %v3769_v32 = vld [vmem:[%s5174_s2 + $0x4c8] ss:$16 sps:$4 sm:$0xff]  }
  0x98   : > { %2166 = vmatprep.subr.bf16.mxu1 %v3690_v53  ;;  %v3772_v53 = vld [vmem:[%s5174_s2 + $0x6c8] ss:$16 sps:$4 sm:$0xff]  }
  0x9a   : > { %2124 = vmatpush1.bf16.msra.mxu0 %v3685_v55  ;;  %v3777_v55 = vld [vmem:[%s5174_s2 + $0x4ac] ss:$16 sps:$4 sm:$0xff]  }
  0x9b   : > { %2167 = vmatpush1.bf16.msra.mxu1 %v3688_v33  ;;  %2125 = vmatprep.subr.bf16.mxu0 %v3693_v34  ;;  %v3780_v33 = vld [vmem:[%s5174_s2 + $0x6ac] ss:$16 sps:$4 sm:$0xff]   ;;  %v3775_v34 = vld [vmem:[%s5174_s2 + $0x4a8] ss:$16 sps:$4 sm:$0xff]  }
  0x9c   : > { %2168 = vmatprep.subr.bf16.mxu1 %v3696_v35  ;;  %v3786_v35 = vld [vmem:[%s5174_s2 + $0x68c] ss:$16 sps:$4 sm:$0xff]  }
  0x9e   : > { %2126 = vmatpush1.bf16.msra.mxu0 %v3691_v36  ;;  %v3781_v36 = vld [vmem:[%s5174_s2 + $0x488] ss:$16 sps:$4 sm:$0xff]  }
  0x9f   : > { %2169 = vmatpush1.bf16.msra.mxu1 %v3694_v37  ;;  %2127 = vmatprep.subr.bf16.mxu0 %v3699_v38  ;;  %v3792_v37 = vld [vmem:[%s5174_s2 + $0x66c] ss:$16 sps:$4 sm:$0xff]   ;;  %v3787_v38 = vld [vmem:[%s5174_s2 + $0x468] ss:$16 sps:$4 sm:$0xff]  }
  0xa0   : > { %2170 = vmatprep.subr.bf16.mxu1 %v3702_v39  ;;  %v3790_v39 = vld [vmem:[%s5174_s2 + $0x668] ss:$16 sps:$4 sm:$0xff]  }
  0xa2   : > { %2128 = vmatpush1.bf16.msra.mxu0 %v3697_v40  ;;  %v3795_v40 = vld [vmem:[%s5174_s2 + $0x44c] ss:$16 sps:$4 sm:$0xff]  }
  0xa3   : > { %2171 = vmatpush1.bf16.msra.mxu1 %v3700_v42  ;;  %2129 = vmatprep.subr.bf16.mxu0 %v3705_v44  ;;  %v3798_v42 = vld [vmem:[%s5174_s2 + $0x64c] ss:$16 sps:$4 sm:$0xff]   ;;  %v3793_v44 = vld [vmem:[%s5174_s2 + $0x448] ss:$16 sps:$4 sm:$0xff]  }
  0xa4   : > { %2172 = vmatprep.subr.bf16.mxu1 %v3708_v45  ;;  %v3796_v45 = vld [vmem:[%s5174_s2 + $0x648] ss:$16 sps:$4 sm:$0xff]  }
  0xa6   : > { %2130 = vmatpush1.bf16.msra.mxu0 %v3703_v46  ;;  %v3801_v46 = vld [vmem:[%s5174_s2 + $0x42c] ss:$16 sps:$4 sm:$0xff]  }
  0xa7   : > { %2173 = vmatpush1.bf16.msra.mxu1 %v3706_v47  ;;  %2131 = vmatprep.subr.bf16.mxu0 %v3711_v48  ;;  %v3804_v47 = vld [vmem:[%s5174_s2 + $0x62c] ss:$16 sps:$4 sm:$0xff]   ;;  %v3799_v48 = vld [vmem:[%s5174_s2 + $0x428] ss:$16 sps:$4 sm:$0xff]  }
  0xa8   : > { %2174 = vmatprep.subr.bf16.mxu1 %v3714_v49  ;;  %v3802_v49 = vld [vmem:[%s5174_s2 + $0x628] ss:$16 sps:$4 sm:$0xff]  }
  0xaa   : > { %2132 = vmatpush1.bf16.msra.mxu0 %v3709_v50  ;;  %v3807_v50 = vld [vmem:[%s5174_s2 + $0x40c] ss:$16 sps:$4 sm:$0xff]  }
  0xab   : > { %2175 = vmatpush1.bf16.msra.mxu1 %v3712_v51  ;;  %2133 = vmatprep.subr.bf16.mxu0 %v3717_v52  ;;  %v3810_v51 = vld [vmem:[%s5174_s2 + $0x60c] ss:$16 sps:$4 sm:$0xff]   ;;  %v3805_v52 = vld [vmem:[%s5174_s2 + $0x408] ss:$16 sps:$4 sm:$0xff]  }
  0xac   : > { %2176 = vmatprep.subr.bf16.mxu1 %v3720_v54  ;;  %v3808_v54 = vld [vmem:[%s5174_s2 + $0x608] ss:$16 sps:$4 sm:$0xff]  }
  0xae   : > { %2134 = vmatpush2.bf16.msra.mxu0 %v3715_v56  ;;  %v3813_v56 = vld [vmem:[%s5174_s2 + $0x5ec] ss:$16 sps:$4 sm:$0xff]  }
  0xaf   : > { %2177 = vmatpush2.bf16.msra.mxu1 %v3718_v57  ;;  %2135 = vmatprep.subr.bf16.mxu0 %v3723_v58  ;;  %v3816_v57 = vld [vmem:[%s5174_s2 + $0x7ec] ss:$16 sps:$4 sm:$0xff]   ;;  %v3811_v58 = vld [vmem:[%s5174_s2 + $0x5e8] ss:$16 sps:$4 sm:$0xff]  }
  0xb0   : > { %2178 = vmatprep.subr.bf16.mxu1 %v3726_v59  ;;  %v3814_v59 = vld [vmem:[%s5174_s2 + $0x7e8] ss:$16 sps:$4 sm:$0xff]  }
  0xb2   : > { %2136 = vmatpush2.bf16.msra.mxu0 %v3721_v60  ;;  %v3819_v60 = vld [vmem:[%s5174_s2 + $0x5cc] ss:$16 sps:$4 sm:$0xff]  }
  0xb3   : > { %2179 = vmatpush2.bf16.msra.mxu1 %v3724_v61  ;;  %2137 = vmatprep.subr.bf16.mxu0 %v3729_v62  ;;  %v3822_v61 = vld [vmem:[%s5174_s2 + $0x7cc] ss:$16 sps:$4 sm:$0xff]   ;;  %v3817_v62 = vld [vmem:[%s5174_s2 + $0x5c8] ss:$16 sps:$4 sm:$0xff]  }
  0xb4   : > { %2180 = vmatprep.subr.bf16.mxu1 %v3732_v63  ;;  %v3820_v63 = vld [vmem:[%s5174_s2 + $0x7c8] ss:$16 sps:$4 sm:$0xff]  }
  0xb6   : > { %2138 = vmatpush2.bf16.msra.mxu0 %v3727_v0  ;;  %v3825_v0 = vld [vmem:[%s5174_s2 + $0x5ac] ss:$16 sps:$4 sm:$0xff]  }
  0xb7   : > { %2181 = vmatpush2.bf16.msra.mxu1 %v3730_v1  ;;  %2139 = vmatprep.subr.bf16.mxu0 %v3735_v2  ;;  %v3828_v1 = vld [vmem:[%s5174_s2 + $0x7ac] ss:$16 sps:$4 sm:$0xff]   ;;  %v3823_v2 = vld [vmem:[%s5174_s2 + $0x5a8] ss:$16 sps:$4 sm:$0xff]  }
  0xb8   : > { %2182 = vmatprep.subr.bf16.mxu1 %v3738_v3  ;;  %v3826_v3 = vld [vmem:[%s5174_s2 + $0x7a8] ss:$16 sps:$4 sm:$0xff]  }
  0xba   : > { %2140 = vmatpush2.bf16.msra.mxu0 %v3733_v4  ;;  %v3831_v4 = vld [vmem:[%s5174_s2 + $0x58c] ss:$16 sps:$4 sm:$0xff]  }
  0xbb   : > { %2183 = vmatpush2.bf16.msra.mxu1 %v3736_v5  ;;  %2141 = vmatprep.subr.bf16.mxu0 %v3741_v6  ;;  %v3834_v5 = vld [vmem:[%s5174_s2 + $0x78c] ss:$16 sps:$4 sm:$0xff]   ;;  %v3829_v6 = vld [vmem:[%s5174_s2 + $0x588] ss:$16 sps:$4 sm:$0xff]  }
  0xbc   : > { %2184 = vmatprep.subr.bf16.mxu1 %v3744_v7  ;;  %v3832_v7 = vld [vmem:[%s5174_s2 + $0x788] ss:$16 sps:$4 sm:$0xff]  }
  0xbe   : > { %2142 = vmatpush2.bf16.msra.mxu0 %v3739_v10  ;;  %v3837_v10 = vld [vmem:[%s5174_s2 + $0x56c] ss:$16 sps:$4 sm:$0xff]  }
  0xbf   : > { %2185 = vmatpush2.bf16.msra.mxu1 %v3742_v11  ;;  %2143 = vmatprep.subr.bf16.mxu0 %v3747_v12  ;;  %v3840_v11 = vld [vmem:[%s5174_s2 + $0x76c] ss:$16 sps:$4 sm:$0xff]   ;;  %v3835_v12 = vld [vmem:[%s5174_s2 + $0x568] ss:$16 sps:$4 sm:$0xff]  }
  0xc0   : > { %2186 = vmatprep.subr.bf16.mxu1 %v3750_v13  ;;  %v3838_v13 = vld [vmem:[%s5174_s2 + $0x768] ss:$16 sps:$4 sm:$0xff]  }
  0xc2   : > { %2144 = vmatpush2.bf16.msra.mxu0 %v3745_v14  ;;  %v3843_v14 = vld [vmem:[%s5174_s2 + $0x54c] ss:$16 sps:$4 sm:$0xff]  }
  0xc3   : > { %2187 = vmatpush2.bf16.msra.mxu1 %v3748_v15  ;;  %2145 = vmatprep.subr.bf16.mxu0 %v3753_v16  ;;  %v3846_v15 = vld [vmem:[%s5174_s2 + $0x74c] ss:$16 sps:$4 sm:$0xff]   ;;  %v3841_v16 = vld [vmem:[%s5174_s2 + $0x548] ss:$16 sps:$4 sm:$0xff]  }
  0xc4   : > { %2188 = vmatprep.subr.bf16.mxu1 %v3756_v17  ;;  %v3844_v17 = vld [vmem:[%s5174_s2 + $0x748] ss:$16 sps:$4 sm:$0xff]  }
  0xc6   : > { %2146 = vmatpush2.bf16.msra.mxu0 %v3751_v18  ;;  %v3849_v18 = vld [vmem:[%s5174_s2 + $0x52c] ss:$16 sps:$4 sm:$0xff]  }
  0xc7   : > { %2189 = vmatpush2.bf16.msra.mxu1 %v3754_v19  ;;  %2147 = vmatprep.subr.bf16.mxu0 %v3759_v22  ;;  %v3852_v19 = vld [vmem:[%s5174_s2 + $0x72c] ss:$16 sps:$4 sm:$0xff]   ;;  %v3847_v22 = vld [vmem:[%s5174_s2 + $0x528] ss:$16 sps:$4 sm:$0xff]  }
  0xc8   : > { %2190 = vmatprep.subr.bf16.mxu1 %v3762_v23  ;;  %v3850_v23 = vld [vmem:[%s5174_s2 + $0x728] ss:$16 sps:$4 sm:$0xff]  }
  0xca   : > { %2148 = vmatpush2.bf16.msra.mxu0 %v3757_v24  ;;  %v3855_v24 = vld [vmem:[%s5174_s2 + $0x50c] ss:$16 sps:$4 sm:$0xff]  }
  0xcb   : > { %2191 = vmatpush2.bf16.msra.mxu1 %v3760_v25  ;;  %2203 = vmatprep.subr.bf16.mxu0 %v3765_v26  ;;  %v3858_v25 = vld [vmem:[%s5174_s2 + $0x70c] ss:$16 sps:$4 sm:$0xff]   ;;  %v3853_v26 = vld [vmem:[%s5174_s2 + $0x508] ss:$16 sps:$4 sm:$0xff]  }
  0xcc   : > { %2246 = vmatprep.subr.bf16.mxu1 %v3768_v27  ;;  %v3856_v27 = vld [vmem:[%s5174_s2 + $0x708] ss:$16 sps:$4 sm:$0xff]  }
  0xcd   : > { %2150 = vmatmul.mubr.bf16.vlgmr.msra.gmra.mxu0 %v4273_v8  ;;  %v3778_v8 = vld [vmem:[%s5174_s2 + $0x6a8] ss:$16 sps:$4 sm:$0xff]  }
  0xce   : > { %2193 = vmatmul.mubr.bf16.vlgmr.msra.gmra.mxu1 %v4275_v9  ;;  %2204 = vmatpush1.bf16.msra.mxu0 %v3763_v28  ;;  %v3783_v9 = vld [vmem:[%s5174_s2 + $0x48c] ss:$16 sps:$4 sm:$0xff]  }
  0xcf   : > { %2247 = vmatpush1.bf16.msra.mxu1 %v3766_v29  ;;  %2205 = vmatprep.subr.bf16.mxu0 %v3771_v30  ;;  %v3861_v28 = vld [vmem:[%s5175_s3 + $0x74] ss:$8 sps:$4 sm:$0xff]   ;;  %v3859_v29 = vld [vmem:[%s5175_s3 + $0x70] ss:$8 sps:$4 sm:$0xff]   ;;  %v3864_v30 = vld [vmem:[%s5175_s3 + $0x64] ss:$8 sps:$4 sm:$0xff]  }
  0xd0   : > { %2248 = vmatprep.subr.bf16.mxu1 %v3774_v31  ;;  %2235 = vmatprep.mubr.bf16.mxu0 %v4374_v41  ;;  %v3784_v41 = vld [vmem:[%s5174_s2 + $0x688] ss:$16 sps:$4 sm:$0xff]  }
  0xd1   : > { %2278 = vmatprep.mubr.bf16.mxu1 %v4381_v43  ;;  %v3789_v43 = vld [vmem:[%s5174_s2 + $0x46c] ss:$16 sps:$4 sm:$0xff]   ;;  %v3862_v31 = vld [vmem:[%s5175_s3 + $0x60] ss:$8 sps:$4 sm:$0xff]  }
  0xd2   : > { %2206 = vmatpush1.bf16.msra.mxu0 %v3769_v32  ;;  %v3867_v32 = vld [vmem:[%s5175_s3 + $0x54] ss:$8 sps:$4 sm:$0xff]  }
  0xd3   : > { %2249 = vmatpush1.bf16.msra.mxu1 %v3772_v53  ;;  %2207 = vmatprep.subr.bf16.mxu0 %v3777_v55  ;;  %v3865_v53 = vld [vmem:[%s5175_s3 + $0x50] ss:$8 sps:$4 sm:$0xff]  }
  0xd4   : > { %2250 = vmatprep.subr.bf16.mxu1 %v3780_v33  ;;  %v3907_v55 = vld [vmem:[%s5175_s3 + $0x170] ss:$8 sps:$4 sm:$0xff]   ;;  %v3909_v33 = vld [vmem:[%s5175_s3 + $0x174] ss:$8 sps:$4 sm:$0xff]  }
  0xd6   : > { %2208 = vmatpush1.bf16.msra.mxu0 %v3775_v34  ;;  %v3873_v34 = vld [vmem:[%s5175_s3 + $0x34] ss:$8 sps:$4 sm:$0xff]  }
  0xd7   : > { %2251 = vmatpush1.bf16.msra.mxu1 %v3778_v8  ;;  %2209 = vmatprep.subr.bf16.mxu0 %v3783_v9  ;;  %v3912_v8 = vld [vmem:[%s5175_s3 + $0x164] ss:$8 sps:$4 sm:$0xff]   ;;  %v3910_v9 = vld [vmem:[%s5175_s3 + $0x160] ss:$8 sps:$4 sm:$0xff]  }
  0xd8   : > { %2252 = vmatprep.subr.bf16.mxu1 %v3786_v35  ;;  %v3871_v35 = vld [vmem:[%s5175_s3 + $0x30] ss:$8 sps:$4 sm:$0xff]  }
  0xda   : > { %2210 = vmatpush1.bf16.msra.mxu0 %v3781_v36  ;;  %v3915_v36 = vld [vmem:[%s5175_s3 + $0x154] ss:$8 sps:$4 sm:$0xff]  }
  0xdb   : > { %2253 = vmatpush1.bf16.msra.mxu1 %v3784_v41  ;;  %2211 = vmatprep.subr.bf16.mxu0 %v3789_v43  ;;  %v3876_v41 = vld [vmem:[%s5175_s3 + $0x24] ss:$8 sps:$4 sm:$0xff]   ;;  %v3913_v43 = vld [vmem:[%s5175_s3 + $0x150] ss:$8 sps:$4 sm:$0xff]  }
  0xdc   : > { %2254 = vmatprep.subr.bf16.mxu1 %v3792_v37  ;;  %v3874_v37 = vld [vmem:[%s5175_s3 + $0x20] ss:$8 sps:$4 sm:$0xff]  }
  0xde   : > { %2212 = vmatpush1.bf16.msra.mxu0 %v3787_v38  ;;  %v3918_v38 = vld [vmem:[%s5175_s3 + $0x144] ss:$8 sps:$4 sm:$0xff]  }
  0xdf   : > { %2255 = vmatpush1.bf16.msra.mxu1 %v3790_v39  ;;  %2213 = vmatprep.subr.bf16.mxu0 %v3795_v40  ;;  %v3879_v39 = vld [vmem:[%s5175_s3 + $0x14] ss:$8 sps:$4 sm:$0xff]   ;;  %v3916_v40 = vld [vmem:[%s5175_s3 + $0x140] ss:$8 sps:$4 sm:$0xff]  }
  0xe0   : > { %2256 = vmatprep.subr.bf16.mxu1 %v3798_v42  ;;  %v3877_v42 = vld [vmem:[%s5175_s3 + $0x10] ss:$8 sps:$4 sm:$0xff]  }
  0xe2   : > { %2214 = vmatpush1.bf16.msra.mxu0 %v3793_v44  ;;  %v3921_v44 = vld [vmem:[%s5175_s3 + $0x134] ss:$8 sps:$4 sm:$0xff]  }
  0xe3   : > { %2257 = vmatpush1.bf16.msra.mxu1 %v3796_v45  ;;  %2215 = vmatprep.subr.bf16.mxu0 %v3801_v46  ;;  %v3882_v45 = vld [vmem:[%s5175_s3 + $0x4] ss:$8 sps:$4 sm:$0xff]   ;;  %v3919_v46 = vld [vmem:[%s5175_s3 + $0x130] ss:$8 sps:$4 sm:$0xff]  }
  0xe4   : > { %2258 = vmatprep.subr.bf16.mxu1 %v3804_v47  ;;  %v3880_v47 = vld [vmem:[%s5175_s3] ss:$8 sps:$4 sm:$0xff]  }
  0xe6   : > { %2216 = vmatpush1.bf16.msra.mxu0 %v3799_v48  ;;  %v3924_v48 = vld [vmem:[%s5175_s3 + $0x124] ss:$8 sps:$4 sm:$0xff]  }
  0xe7   : > { %2259 = vmatpush1.bf16.msra.mxu1 %v3802_v49  ;;  %2217 = vmatprep.subr.bf16.mxu0 %v3807_v50  ;;  %v3885_v49 = vld [vmem:[%s5175_s3 + $0xf4] ss:$8 sps:$4 sm:$0xff]   ;;  %v3922_v50 = vld [vmem:[%s5175_s3 + $0x120] ss:$8 sps:$4 sm:$0xff]  }
  0xe8   : > { %2260 = vmatprep.subr.bf16.mxu1 %v3810_v51  ;;  %v3883_v51 = vld [vmem:[%s5175_s3 + $0xf0] ss:$8 sps:$4 sm:$0xff]  }
  0xea   : > { %2218 = vmatpush1.bf16.msra.mxu0 %v3805_v52  ;;  %v3927_v52 = vld [vmem:[%s5175_s3 + $0x114] ss:$8 sps:$4 sm:$0xff]  }
  0xeb   : > { %2261 = vmatpush1.bf16.msra.mxu1 %v3808_v54  ;;  %2219 = vmatprep.subr.bf16.mxu0 %v3813_v56  ;;  %v3888_v54 = vld [vmem:[%s5175_s3 + $0xe4] ss:$8 sps:$4 sm:$0xff]   ;;  %v3925_v56 = vld [vmem:[%s5175_s3 + $0x110] ss:$8 sps:$4 sm:$0xff]  }
  0xec   : > { %2262 = vmatprep.subr.bf16.mxu1 %v3816_v57  ;;  %v3886_v57 = vld [vmem:[%s5175_s3 + $0xe0] ss:$8 sps:$4 sm:$0xff]  }
  0xee   : > { %2220 = vmatpush2.bf16.msra.mxu0 %v3811_v58  ;;  %v3930_v58 = vld [vmem:[%s5175_s3 + $0x104] ss:$8 sps:$4 sm:$0xff]  }
  0xef   : > { %2263 = vmatpush2.bf16.msra.mxu1 %v3814_v59  ;;  %2221 = vmatprep.subr.bf16.mxu0 %v3819_v60  ;;  %v3891_v59 = vld [vmem:[%s5175_s3 + $0xd4] ss:$8 sps:$4 sm:$0xff]   ;;  %v3928_v60 = vld [vmem:[%s5175_s3 + $0x100] ss:$8 sps:$4 sm:$0xff]  }
  0xf0   : > { %2264 = vmatprep.subr.bf16.mxu1 %v3822_v61  ;;  %v3889_v61 = vld [vmem:[%s5175_s3 + $0xd0] ss:$8 sps:$4 sm:$0xff]  }
  0xf2   : > { %2222 = vmatpush2.bf16.msra.mxu0 %v3817_v62  ;;  %v3933_v62 = vld [vmem:[%s5175_s3 + $0x1f4] ss:$8 sps:$4 sm:$0xff]  }
  0xf3   : > { %2265 = vmatpush2.bf16.msra.mxu1 %v3820_v63  ;;  %2223 = vmatprep.subr.bf16.mxu0 %v3825_v0  ;;  %v3894_v63 = vld [vmem:[%s5175_s3 + $0xc4] ss:$8 sps:$4 sm:$0xff]   ;;  %v3931_v0 = vld [vmem:[%s5175_s3 + $0x1f0] ss:$8 sps:$4 sm:$0xff]  }
  0xf4   : > { %2266 = vmatprep.subr.bf16.mxu1 %v3828_v1  ;;  %v3892_v1 = vld [vmem:[%s5175_s3 + $0xc0] ss:$8 sps:$4 sm:$0xff]  }
  0xf6   : > { %2224 = vmatpush2.bf16.msra.mxu0 %v3823_v2  ;;  %v3936_v2 = vld [vmem:[%s5175_s3 + $0x1e4] ss:$8 sps:$4 sm:$0xff]  }
  0xf7   : > { %2267 = vmatpush2.bf16.msra.mxu1 %v3826_v3  ;;  %2225 = vmatprep.subr.bf16.mxu0 %v3831_v4  ;;  %v3897_v3 = vld [vmem:[%s5175_s3 + $0xb4] ss:$8 sps:$4 sm:$0xff]   ;;  %v3934_v4 = vld [vmem:[%s5175_s3 + $0x1e0] ss:$8 sps:$4 sm:$0xff]  }
  0xf8   : > { %2268 = vmatprep.subr.bf16.mxu1 %v3834_v5  ;;  %v605_v5 = vlaneseq }
  0xfa   : > { %2226 = vmatpush2.bf16.msra.mxu0 %v3829_v6  ;;  %v3895_v6 = vld [vmem:[%s5175_s3 + $0xb0] ss:$8 sps:$4 sm:$0xff]  }
  0xfb   : > { %2269 = vmatpush2.bf16.msra.mxu1 %v3832_v7  ;;  %2227 = vmatprep.subr.bf16.mxu0 %v3837_v10  ;;  %v3939_v7 = vld [vmem:[%s5175_s3 + $0x1d4] ss:$8 sps:$4 sm:$0xff]   ;;  %v3900_v10 = vld [vmem:[%s5175_s3 + $0xa4] ss:$8 sps:$4 sm:$0xff]  }
  0xfc   : > { %2270 = vmatprep.subr.bf16.mxu1 %v3840_v11  ;;  %v3937_v11 = vld [vmem:[%s5175_s3 + $0x1d0] ss:$8 sps:$4 sm:$0xff]  }
  0xfe   : > { %2228 = vmatpush2.bf16.msra.mxu0 %v3835_v12  ;;  %v5037_v12 = vshrl.u32 %v605_v5, 7  ;;  %v3955_v5 = vld [vmem:[%s5177_s5 + $0x78] sm:$0xff]  }
  0xff   : > { %2271 = vmatpush2.bf16.msra.mxu1 %v3838_v13  ;;  %2229 = vmatprep.subr.bf16.mxu0 %v3843_v14  ;;  %v3898_v13 = vld [vmem:[%s5175_s3 + $0xa0] ss:$8 sps:$4 sm:$0xff]   ;;  %v3942_v14 = vld [vmem:[%s5175_s3 + $0x1c4] ss:$8 sps:$4 sm:$0xff]  }
 0x100   : > { %2272 = vmatprep.subr.bf16.mxu1 %v3846_v15 }
 0x102   : > { %2230 = vmatpush2.bf16.msra.mxu0 %v3841_v16 }
 0x103   : > { %2273 = vmatpush2.bf16.msra.mxu1 %v3844_v17  ;;  %2231 = vmatprep.subr.bf16.mxu0 %v3849_v18  ;;  %v3903_v17 = vld [vmem:[%s5175_s3 + $0x94] ss:$8 sps:$4 sm:$0xff]   ;;  %v3940_v18 = vld [vmem:[%s5175_s3 + $0x1c0] ss:$8 sps:$4 sm:$0xff]  }
 0x104   : > { %2274 = vmatprep.subr.bf16.mxu1 %v3852_v19  ;;  %v611_v19 = vsub.s32 1, %v5037_v12 }
 0x106   : > { %2232 = vmatpush2.bf16.msra.mxu0 %v3847_v22  ;;  %v3901_v22 = vld [vmem:[%s5175_s3 + $0x90] ss:$8 sps:$4 sm:$0xff]  }
 0x107   : > { %2275 = vmatpush2.bf16.msra.mxu1 %v3850_v23  ;;  %2233 = vmatprep.subr.bf16.mxu0 %v3855_v24  ;;  %v5058_v23 = vld [vmem:[%s327_s29] sm:$0xf]  ;;  %v607_v24 = vsub.s32 0, %v5037_v12 }
 0x108   : > { %2276 = vmatprep.subr.bf16.mxu1 %v3858_v25 }
 0x10a   : > { %2234 = vmatpush2.bf16.msra.mxu0 %v3853_v26 }
 0x10b   : > { %2277 = vmatpush2.bf16.msra.mxu1 %v3856_v27  ;;  %2697 = vmatprep.subr.bf16.mxu0 %v3861_v28  ;;  %v3906_v27 = vld [vmem:[%s5175_s3 + $0x84] ss:$8 sps:$4 sm:$0xff]   ;;  %v612_v28 = vrot.slane %v5058_v23, %v611_v19 }
 0x10c   : > { %2740 = vmatprep.subr.bf16.mxu1 %v3909_v33  ;;  %v3945_v33 = vld [vmem:[%s5175_s3 + $0x1b4] ss:$8 sps:$4 sm:$0xff]  }
 0x10d   : > { %2236 = vmatmul.mubr.bf16.vlgmr.msra.gmra.mxu0 %v4495_v20  ;;  %v3870_v20 = vld [vmem:[%s5175_s3 + $0x44] ss:$8 sps:$4 sm:$0xff]   ;;  %v1979_v15 = vpop.f32.mrf.mxu0 }
 0x10e   : > { %2279 = vmatmul.mubr.bf16.vlgmr.msra.gmra.mxu1 %v4499_v21  ;;  %2698 = vmatpush1.bf16.msra.mxu0 %v3859_v29  ;;  %v3868_v21 = vld [vmem:[%s5175_s3 + $0x40] ss:$8 sps:$4 sm:$0xff]   ;;  %v2022_v16 = vpop.f32.mrf.mxu1 }
 0x10f   : > { %2699 = vmatprep.subr.bf16.mxu0 %v3864_v30  ;;  %2741 = vmatpush1.bf16.msra.mxu1 %v3907_v55  ;;  %v1981_v25 = vpop.f32.mrf.mxu0  ;;  %v3904_v29 = vld [vmem:[%s5175_s3 + $0x80] ss:$8 sps:$4 sm:$0xff]   ;;  %v608_v30 = vrot.slane %v5058_v23, %v607_v24 }
 0x110   : > { %2742 = vmatprep.subr.bf16.mxu1 %v3912_v8  ;;  %v2024_v26 = vpop.f32.mrf.mxu1  ;;  %v3943_v8 = vld [vmem:[%s5175_s3 + $0x1b0] ss:$8 sps:$4 sm:$0xff]  }
 0x112   : > { %2700 = vmatpush1.bf16.msra.mxu0 %v3862_v31  ;;  %v1983_v31 = vpop.f32.mrf.mxu0 }
 0x113   : > { %2701 = vmatprep.subr.bf16.mxu0 %v3867_v32  ;;  %2743 = vmatpush1.bf16.msra.mxu1 %v3910_v9  ;;  %v2026_v32 = vpop.f32.mrf.mxu1 }
 0x114   : > { %2744 = vmatprep.subr.bf16.mxu1 %v3915_v36 }
 0x115   : > { %v2028_v55 = vpop.f32.mrf.mxu1 }
 0x116   : > { %2702 = vmatpush1.bf16.msra.mxu0 %v3865_v53  ;;  %v1982_v53 = vadd.f32 %v1981_v25, %v612_v28  ;;  %v619_v25 = vsub.s32 3, %v5037_v12 }
 0x117   : > { %2703 = vmatprep.subr.bf16.mxu0 %v3870_v20  ;;  %2745 = vmatpush1.bf16.msra.mxu1 %v3913_v43  ;;  %v1980_v20 = vadd.f32 %v1979_v15, %v608_v30  ;;  %v3962_v15 = vld [vmem:[%s5177_s5 + $0x20] sm:$0xff]  }
 0x118   : > { %2746 = vmatprep.subr.bf16.mxu1 %v3918_v38  ;;  %v2025_v36 = vadd.f32 %v2024_v26, %v1982_v53  ;;  %v615_v26 = vsub.s32 2, %v5037_v12 }
 0x119   : > { %v2023_v43 = vadd.f32 %v2022_v16, %v1980_v20  ;;  %v3963_v16 = vld [vmem:[%s5177_s5 + $0x58] sm:$0xff]  }
 0x11a   : > { %2704 = vmatpush1.bf16.msra.mxu0 %v3868_v21  ;;  %v1985_v21 = vpop.f32.mrf.mxu0 }
 0x11b   : > { %2705 = vmatprep.subr.bf16.mxu0 %v3873_v34  ;;  %2747 = vmatpush1.bf16.msra.mxu1 %v3916_v40  ;;  %v1984_v34 = vadd.f32 %v1983_v31, %v608_v30  ;;  %v616_v30 = vrot.slane %v5058_v23, %v615_v26 }
 0x11c   : > { %2748 = vmatprep.subr.bf16.mxu1 %v3921_v44  ;;  %v3946_v44 = vld [vmem:[%s5175_s3 + $0x1a0] ss:$8 sps:$4 sm:$0xff]  }
 0x11d   : > { %v2027_v40 = vadd.f32 %v2026_v32, %v1984_v34 }
 0x11e   : > { %2706 = vmatpush1.bf16.msra.mxu0 %v3871_v35 }
 0x11f   : > { %2707 = vmatprep.subr.bf16.mxu0 %v3876_v41  ;;  %2749 = vmatpush1.bf16.msra.mxu1 %v3919_v46  ;;  %v1986_v41 = vadd.f32 %v1985_v21, %v612_v28 }
 0x120   : > { %2750 = vmatprep.subr.bf16.mxu1 %v3924_v48 }
 0x121   : > { %v2029_v48 = vadd.f32 %v2028_v55, %v1986_v41 }
 0x122   : > { %2708 = vmatpush1.bf16.msra.mxu0 %v3874_v37 }
 0x123   : > { %2709 = vmatprep.subr.bf16.mxu0 %v3879_v39  ;;  %2751 = vmatpush1.bf16.msra.mxu1 %v3922_v50  ;;  %v3948_v39 = vld [vmem:[%s5175_s3 + $0x1a4] ss:$8 sps:$4 sm:$0xff]  }
 0x124   : > { %2752 = vmatprep.subr.bf16.mxu1 %v3927_v52 }
 0x126   : > { %2710 = vmatpush1.bf16.msra.mxu0 %v3877_v42 }
 0x127   : > { %2711 = vmatprep.subr.bf16.mxu0 %v3882_v45  ;;  %2753 = vmatpush1.bf16.msra.mxu1 %v3925_v56 }
 0x128   : > { %2754 = vmatprep.subr.bf16.mxu1 %v3930_v58 }
 0x12a   : > { %2712 = vmatpush1.bf16.msra.mxu0 %v3880_v47 }
 0x12b   : > { %2713 = vmatprep.subr.bf16.mxu0 %v3885_v49  ;;  %2755 = vmatpush1.bf16.msra.mxu1 %v3928_v60 }
 0x12c   : > { %2756 = vmatprep.subr.bf16.mxu1 %v3933_v62  ;;  %v3954_v62 = vld [vmem:[%s5175_s3 + $0x184] ss:$8 sps:$4 sm:$0xff]  }
 0x12e   : > { %2714 = vmatpush2.bf16.msra.mxu0 %v3883_v51  ;;  %v3951_v51 = vld [vmem:[%s5175_s3 + $0x194] ss:$8 sps:$4 sm:$0xff]  }
 0x12f   : > { %2715 = vmatprep.subr.bf16.mxu0 %v3888_v54  ;;  %2757 = vmatpush2.bf16.msra.mxu1 %v3931_v0 }
 0x130   : > { %2758 = vmatprep.subr.bf16.mxu1 %v3936_v2 }
 0x132   : > { %2716 = vmatpush2.bf16.msra.mxu0 %v3886_v57  ;;  %v3949_v57 = vld [vmem:[%s5175_s3 + $0x190] ss:$8 sps:$4 sm:$0xff]  }
 0x133   : > { %2717 = vmatprep.subr.bf16.mxu0 %v3891_v59  ;;  %2759 = vmatpush2.bf16.msra.mxu1 %v3934_v4 }
 0x134   : > { %2760 = vmatprep.subr.bf16.mxu1 %v3939_v7  ;;  %v3957_v7 = vld [vmem:[%s5177_s5 + $0x70] sm:$0xff]  }
 0x136   : > { %2718 = vmatpush2.bf16.msra.mxu0 %v3889_v61 }
 0x137   : > { %2719 = vmatprep.subr.bf16.mxu0 %v3894_v63  ;;  %2761 = vmatpush2.bf16.msra.mxu1 %v3937_v11  ;;  %v3959_v11 = vld [vmem:[%s5177_s5 + $0x68] sm:$0xff]  }
 0x138   : > { %2762 = vmatprep.subr.bf16.mxu1 %v3942_v14  ;;  %v3961_v14 = vld [vmem:[%s5177_s5 + $0x60] sm:$0xff]  }
 0x13a   : > { %2720 = vmatpush2.bf16.msra.mxu0 %v3892_v1  ;;  %v3952_v1 = vld [vmem:[%s5175_s3 + $0x180] ss:$8 sps:$4 sm:$0xff]  }
 0x13b   : > { %2721 = vmatprep.subr.bf16.mxu0 %v3897_v3  ;;  %2763 = vmatpush2.bf16.msra.mxu1 %v3940_v18 }
 0x13c   : > { %2764 = vmatprep.subr.bf16.mxu1 %v3945_v33 }
 0x13e   : > { %2722 = vmatpush2.bf16.msra.mxu0 %v3895_v6  ;;  %v3956_v6 = vld [vmem:[%s5177_s5 + $0x38] sm:$0xff]  }
 0x13f   : > { %2723 = vmatprep.subr.bf16.mxu0 %v3900_v10  ;;  %2765 = vmatpush2.bf16.msra.mxu1 %v3943_v8  ;;  %v3958_v10 = vld [vmem:[%s5177_s5 + $0x30] sm:$0xff]  }
 0x140   : > { %2766 = vmatprep.subr.bf16.mxu1 %v3948_v39 }
 0x142   : > { %2724 = vmatpush2.bf16.msra.mxu0 %v3898_v13  ;;  %v3960_v13 = vld [vmem:[%s5177_s5 + $0x28] sm:$0xff]  }
 0x143   : > { %2725 = vmatprep.subr.bf16.mxu0 %v3903_v17  ;;  %2767 = vmatpush2.bf16.msra.mxu1 %v3946_v44  ;;  %v3964_v17 = vld [vmem:[%s5177_s5 + $0x18] sm:$0xff]  }
 0x144   : > { %2768 = vmatprep.subr.bf16.mxu1 %v3951_v51 }
 0x146   : > { %2726 = vmatpush2.bf16.msra.mxu0 %v3901_v22 }
 0x147   : > { %2727 = vmatprep.subr.bf16.mxu0 %v3906_v27  ;;  %2769 = vmatpush2.bf16.msra.mxu1 %v3949_v57 }
 0x148   : > { %2770 = vmatprep.subr.bf16.mxu1 %v3954_v62  ;;  %v3967_v62 = vld [vmem:[%s5177_s5 + $0x48] sm:$0xff]  }
 0x14a   : > { %2728 = vmatpush2.bf16.msra.mxu0 %v3904_v29  ;;  %v620_v29 = vrot.slane %v5058_v23, %v619_v25 }
 0x14b   : > { %2771 = vmatpush2.bf16.msra.mxu1 %v3952_v1  ;;  %3429 = vmatprep.subr.bf16.mxu0 %v3955_v5  ;;  %v3970_v1 = vld [vmem:[%s5177_s5] sm:$0xff]  }
 0x14d   : > { %v2065_v9 = vpop.f32.mrf.mxu0 }
 0x14e   : > { %v2108_v35 = vpop.f32.mrf.mxu1  ;;  %v2066_v45 = vadd.f32 %v2065_v9, %v2023_v43 }
 0x14f   : > { %v2067_v37 = vpop.f32.mrf.mxu0 }
 0x150   : > { %v2110_v38 = vpop.f32.mrf.mxu1  ;;  %v2068_v42 = vadd.f32 %v2067_v37, %v2025_v36  ;;  %v2109_v58 = vadd.f32 %v2108_v35, %v2066_v45 }
 0x151   : > { %v2069_v46 = vpop.f32.mrf.mxu0 }
 0x152   : > { %v2112_v47 = vpop.f32.mrf.mxu1  ;;  %v2070_v49 = vadd.f32 %v2069_v46, %v2027_v40  ;;  %v2111_v52 = vadd.f32 %v2110_v38, %v2068_v42  ;;  %v2289_v2 = vmax.f32 %v2109_v58, 0.0 }
 0x153   : > { %v2071_v50 = vpop.f32.mrf.mxu0 }
 0x154   : > { %v2113_v54 = vadd.f32 %v2112_v47, %v2070_v49  ;;  %v2072_v56 = vadd.f32 %v2071_v50, %v2029_v48  ;;  %v2114_v59 = vpop.f32.mrf.mxu1  ;;  %v2290_v63 = vmax.f32 %v2111_v52, 0.0 }
 0x156   : > { %v2115_v60 = vadd.f32 %v2114_v59, %v2072_v56  ;;  %v2293_v61 = vmax.f32 %v2113_v54, 0.0 }
 0x158   : > { %v2294_v0 = vmax.f32 %v2115_v60, 0.0  ;;  %v2362_v4 = vpack.c.bf16 %v2293_v61, %v2289_v2  ;;  %v3965_v60 = vld [vmem:[%s5177_s5 + $0x50] sm:$0xff]  }
 0x159   : > { %v3966_v61 = vld [vmem:[%s5177_s5 + $0x10] sm:$0xff]  }
 0x15a   : > { %v2363_v3 = vpack.c.bf16 %v2294_v0, %v2290_v63  ;;  %v3968_v63 = vld [vmem:[%s5177_s5 + $0x8] sm:$0xff]   ;;  %v3969_v0 = vld [vmem:[%s5177_s5 + $0x40] sm:$0xff]  }
 0x15c   : > { %2729 = vmatprep.mubr.bf16.mxu0 %v2363_v3 }
 0x15d   : > { %2730 = vmatmul.mubr.bf16.vlgmr.msra.gmra.mxu0 %v2362_v4  ;;  %v2361_v4 = vld [vmem:[%s5176_s4] sm:$0x3] }
 0x15e   : > { %3430 = vmatpush3.bf16.msra.mxu0 %v3956_v6  ;;  %v2374_v6 = vrot.slane %v2361_v4, %v611_v19 }
 0x15f   : > { %3431 = vmatprep.subr.bf16.mxu0 %v3957_v7  ;;  %v2370_v7 = vrot.slane %v2361_v4, %v607_v24 }
 0x162   : > { %3432 = vmatpush3.bf16.msra.mxu0 %v3958_v10 }
 0x163   : > { %3433 = vmatprep.subr.bf16.mxu0 %v3959_v11 }
 0x166   : > { %3434 = vmatpush3.bf16.msra.mxu0 %v3960_v13 }
 0x167   : > { %3435 = vmatprep.subr.bf16.mxu0 %v3961_v14 }
 0x16a   : > { %3436 = vmatpush3.bf16.msra.mxu0 %v3962_v15 }
 0x16b   : > { %3437 = vmatprep.subr.bf16.mxu0 %v3963_v16 }
 0x16e   : > { %3438 = vmatpush3.bf16.msra.mxu0 %v3964_v17 }
 0x16f   : > { %3439 = vmatprep.subr.bf16.mxu0 %v3965_v60 }
 0x172   : > { %3440 = vmatpush3.bf16.msra.mxu0 %v3966_v61 }
 0x173   : > { %3441 = vmatprep.subr.bf16.mxu0 %v3967_v62 }
 0x176   : > { %3442 = vmatpush3.bf16.msra.mxu0 %v3968_v63 }
 0x177   : > { %3443 = vmatprep.subr.bf16.mxu0 %v3969_v0 }
 0x17a   : > { %3444 = vmatpush3.bf16.msra.mxu0 %v3970_v1 }
 0x18d   : > { %v2151_v18 = vpop.f32.mrf.mxu0 }
 0x18e   : > { %v2194_v22 = vpop.f32.mrf.mxu1  ;;  %v2152_v20 = vadd.f32 %v2151_v18, %v616_v30 }
 0x18f   : > { %v2153_v27 = vpop.f32.mrf.mxu0 }
 0x190   : > { %v2196_v28 = vpop.f32.mrf.mxu1  ;;  %v2154_v53 = vadd.f32 %v2153_v27, %v620_v29  ;;  %v2195_v36 = vadd.f32 %v2194_v22, %v2152_v20 }
 0x191   : > { %v2155_v31 = vpop.f32.mrf.mxu0 }
 0x192   : > { %v2198_v32 = vpop.f32.mrf.mxu1  ;;  %v2156_v33 = vadd.f32 %v2155_v31, %v616_v30  ;;  %v2197_v9 = vadd.f32 %v2196_v28, %v2154_v53  ;;  %v3408_v53 = vld [vmem:[%s5178_s6] ss:$0 sm:$0xff] }
 0x193   : > { %v2157_v21 = vpop.f32.mrf.mxu0 }
 0x194   : > { %v2200_v55 = vpop.f32.mrf.mxu1  ;;  %v2158_v35 = vadd.f32 %v2157_v21, %v620_v29  ;;  %v2199_v37 = vadd.f32 %v2198_v32, %v2156_v33 }
 0x196   : > { %v2201_v23 = vadd.f32 %v2200_v55, %v2158_v35 }
 0x1cd   : > { %v2237_v34 = vpop.f32.mrf.mxu0 }
 0x1ce   : > { %v2280_v8 = vpop.f32.mrf.mxu1  ;;  %v2238_v39 = vadd.f32 %v2237_v34, %v2195_v36 }
 0x1cf   : > { %v2239_v41 = vpop.f32.mrf.mxu0 }
 0x1d0   : > { %v2282_v43 = vpop.f32.mrf.mxu1  ;;  %v2240_v38 = vadd.f32 %v2239_v41, %v2197_v9  ;;  %v2281_v49 = vadd.f32 %v2280_v8, %v2238_v39 }
 0x1d1   : > { %v2241_v40 = vpop.f32.mrf.mxu0 }
 0x1d2   : > { %v2284_v42 = vpop.f32.mrf.mxu1  ;;  %v2242_v44 = vadd.f32 %v2241_v40, %v2199_v37  ;;  %v2283_v46 = vadd.f32 %v2282_v43, %v2240_v38  ;;  %v2291_v57 = vmax.f32 %v2281_v49, 0.0 }
 0x1d3   : > { %v2243_v45 = vpop.f32.mrf.mxu0 }
 0x1d4   : > { %v2285_v47 = vadd.f32 %v2284_v42, %v2242_v44  ;;  %v2244_v48 = vadd.f32 %v2243_v45, %v2201_v23  ;;  %v2286_v50 = vpop.f32.mrf.mxu1  ;;  %v2292_v54 = vmax.f32 %v2283_v46, 0.0 }
 0x1d6   : > { %v2287_v51 = vadd.f32 %v2286_v50, %v2244_v48  ;;  %v2295_v52 = vmax.f32 %v2285_v47, 0.0 }
 0x1d8   : > { %v2296_v56 = vmax.f32 %v2287_v51, 0.0  ;;  %v2364_v59 = vpack.c.bf16 %v2295_v52, %v2291_v57 }
 0x1da   : > { %v2365_v58 = vpack.c.bf16 %v2296_v56, %v2292_v54 }
 0x1dc   : > { %2772 = vmatprep.mubr.bf16.mxu1 %v2365_v58 }
 0x1dd   : > { %2773 = vmatmul.mubr.bf16.vlgmr.msra.gmra.mxu1 %v2364_v59 }
 0x21d   : > { %v2731_v2 = vpop.f32.mrf.mxu0 }
 0x21e   : > { %v2732_v16 = vadd.f32 %v2731_v2, %v2370_v7 }
 0x21f   : > { %v2733_v3 = vpop.f32.mrf.mxu0 }
 0x220   : > { %v2734_v14 = vadd.f32 %v2733_v3, %v2374_v6 }
 0x221   : > { %v2735_v5 = vpop.f32.mrf.mxu0 }
 0x222   : > { %v2736_v15 = vadd.f32 %v2735_v5, %v2370_v7 }
 0x223   : > { %v2737_v11 = vpop.f32.mrf.mxu0 }
 0x224   : > { %v2738_v18 = vadd.f32 %v2737_v11, %v2374_v6 }
 0x29d   : > { %v2774_v10 = vpop.f32.mrf.mxu1 }
 0x29e   : > { %v2775_v26 = vadd.f32 %v2774_v10, %v2732_v16 }
 0x29f   : > { %v2776_v13 = vpop.f32.mrf.mxu1 }
 0x2a0   : > { %v2777_v22 = vadd.f32 %v2776_v13, %v2734_v14  ;;  %v2783_v31 = vmax.f32 %v2775_v26, 0.0 }
 0x2a1   : > { %v2778_v17 = vpop.f32.mrf.mxu1 }
 0x2a2   : > { %v2779_v25 = vadd.f32 %v2778_v17, %v2736_v15  ;;  %v2784_v30 = vmax.f32 %v2777_v22, 0.0 }
 0x2a3   : > { %v2780_v27 = vpop.f32.mrf.mxu1 }
 0x2a4   : > { %v2781_v28 = vadd.f32 %v2780_v27, %v2738_v18  ;;  %v2785_v29 = vmax.f32 %v2779_v25, 0.0 }
 0x2a6   : > { %v2786_v19 = vmax.f32 %v2781_v28, 0.0  ;;  %v2820_v24 = vpack.c.bf16 %v2785_v29, %v2783_v31 }
 0x2a8   : > { %v2821_v12 = vpack.c.bf16 %v2786_v19, %v2784_v30 }
 0x2aa   : > { %2956 = vmatprep.mubr.bf16.mxu0 %v2821_v12 }
 0x2ab   : > { %2957 = vmatmul.mubr.bf16.vlgmr.msra.gmra.mxu0 %v2820_v24 }
 0x36b   : > { %v3445_v32 = vpop.f32.mrf.mxu0 }
 0x36d   : > { %v3446_v20 = vpop.f32.mrf.mxu0 }
 0x36e   : > { %v3447_v21 = vadd.f32 %v3446_v20, %v3445_v32 }
 0x36f   : > { %v3448_v55 = vpop.f32.mrf.mxu0 }
 0x370   : > { %v2959_v33 = vadd.f32 %v3447_v21, %v3408_v53 }
 0x371   : > { %v3449_v34 = vpop.f32.mrf.mxu0 }
 0x372   : > { %2966 = vst.msk [vmem:[%s336_s12] sm:$0xff] %vm2965_vm0, %v2959_v33  ;;  %v3450_v8 = vadd.f32 %v3449_v34, %v3448_v55 }
 0x374   : > { %v2962_v9 = vadd.f32 %v3450_v8, %v3408_v53 }
 0x376   : > { %2967 = vst.msk [vmem:[%s336_s12 + $0x8] sm:$0xff] %vm2965_vm0, %v2962_v9 }
 0x377 PF: > { %s17_s26 = sadd.s32 1, %s3993_s26   ;;  %s5180_s24 = smov %s3989_s25 }
 0x378   : > { %p14_p5 = scmp.ge.s32.totalorder %s17_s26, 4   ;;  %s5181_s25 = smov %s5183_s27 }
 0x37a   :  { %16 = sbr.rel (!%p14_p5) target bundleno = 2 (0x2), region = 81 }

// kernel: _lambda_.8
= control target key start
LH: loop header
LB: loop body
LE: loop exit
PB: predicated region body
PF: predicated region fallthrough
CT: control target
= control target key end

     0   :  { %s15672_s0 = inlined_call_operand.vmem [shape: f32[2,1024], index: 0, kind: input, shape index: {}]   ;;  %s15673_s1 = inlined_call_operand.hbm [shape: bf16[1024,512], index: 1, kind: input, shape index: {}]   ;;  %s15674_s2 = inlined_call_operand.hbm [shape: f32[1,512], index: 2, kind: input, shape index: {}]   ;;  %s15675_s3 = inlined_call_operand.hbm [shape: bf16[512,256], index: 3, kind: input, shape index: {}]   ;;  %s15676_s4 = inlined_call_operand.hbm [shape: f32[1,256], index: 4, kind: input, shape index: {}]   ;;  %s15677_s5 = inlined_call_operand.hbm [shape: bf16[256,10], index: 5, kind: input, shape index: {}]   ;;  %s15678_s6 = inlined_call_operand.hbm [shape: f32[1,10], index: 6, kind: input, shape index: {}]   ;;  %s15679_s7 = inlined_call_operand.hbm [shape: bf16[1024,512], index: 7, kind: input, shape index: {}]   ;;  %s15680_s8 = inlined_call_operand.hbm [shape: f32[1,512], index: 8, kind: input, shape index: {}]   ;;  %s15681_s9 = inlined_call_operand.hbm [shape: bf16[512,256], index: 9, kind: input, shape index: {}]   ;;  %s15682_s10 = inlined_call_operand.hbm [shape: f32[1,256], index: 10, kind: input, shape index: {}]   ;;  %s15683_s11 = inlined_call_operand.hbm [shape: bf16[256,3], index: 11, kind: input, shape index: {}]   ;;  %s15684_s12 = inlined_call_operand.hbm [shape: f32[1,3], index: 12, kind: input, shape index: {}]   ;;  %s15685_s13 = inlined_call_operand.vmem [shape: bf16[1024,512], index: 13, kind: input, shape index: {}]   ;;  %s15686_s14 = inlined_call_operand.hbm [shape: f32[1,512], index: 14, kind: input, shape index: {}]   ;;  %s15687_s15 = inlined_call_operand.hbm [shape: bf16[512,256], index: 15, kind: input, shape index: {}]   ;;  %s15688_s16 = inlined_call_operand.hbm [shape: f32[1,256], index: 16, kind: input, shape index: {}]   ;;  %s15689_s17 = inlined_call_operand.hbm [shape: bf16[256,2], index: 17, kind: input, shape index: {}]   ;;  %s15690_s18 = inlined_call_operand.hbm [shape: f32[1,2], index: 18, kind: input, shape index: {}]   ;;  %s15691_s19 = inlined_call_operand.vmem [shape: bf16[1024,512], index: 19, kind: input, shape index: {}]   ;;  %s15692_s20 = inlined_call_operand.vmem [shape: f32[1,512], index: 20, kind: input, shape index: {}]   ;;  %s15693_s21 = inlined_call_operand.hbm [shape: f32[2,10], index: 21, kind: output, shape index: {0}]   ;;  %s15694_s22 = inlined_call_operand.hbm [shape: f32[2,3], index: 22, kind: output, shape index: {1}]   ;;  %s15695_s23 = inlined_call_operand.hbm [shape: f32[2,2], index: 23, kind: output, shape index: {2}]   ;;  %s15696_s24 = inlined_call_operand.vmem [shape: f32[2,512], index: 24, kind: output, shape index: {3}]  }
   0x1   :  { %15698 = sst [smem:[#allocation44_spill]] %s15672_s0 }
   0x2   :  { %15699 = sst [smem:[#allocation45_spill]] %s15673_s1 }
   0x3   :  { %15700 = sst [smem:[#allocation46_spill]] %s15674_s2 }
   0x4   :  { %15701 = sst [smem:[#allocation47_spill]] %s15675_s3 }
   0x5   :  { %15702 = sst [smem:[#allocation48_spill]] %s15676_s4 }
   0x6   :  { %15703 = sst [smem:[#allocation49_spill]] %s15677_s5 }
   0x7   :  { %15704 = sst [smem:[#allocation50_spill]] %s15678_s6 }
   0x8   :  { %15705 = sst [smem:[#allocation51_spill]] %s15679_s7 }
   0x9   :  { %15706 = sst [smem:[#allocation52_spill]] %s15680_s8 }
   0xa   :  { %30 = vsyncpa [#allocation3], 0 }
   0xb   :  { %31 = vsyncpa [#allocation6], 0 }
   0xc   :  { %32 = vsyncpa [#allocation9], 0 }
   0xd   :  { %33 = vsyncpa [#allocation12], 0 }
   0xe   :  { %34 = vsyncpa [#allocation15], 0 }
   0xf   :  { %35 = vsyncpa [#allocation18], 0 }
  0x10   :  { %36 = vsyncpa [#allocation21], 0 }
  0x11   :  { %37 = vsyncpa [#allocation24], 0 }
  0x12   :  { %38 = vsyncpa [#allocation27], 0 }
  0x13   :  { %39 = vsyncpa [#allocation4], 0 }
  0x14   :  { %40 = vsyncpa [#allocation31], 0  ;;  %s13619_s5 = smov [#allocation5]   ;;  %s13620_s27 = smov [#allocation8]  }
  0x15   :  { %s61_s26 = sshll.u32 %s13619_s5, 4  ;;  %s83_s28 = sshll.u32 %s13620_s27, 4  ;;  %s62_s26 = int_to_ptr.vmem [resolvable:$true] %s61_s26  ;;  %s84_s28 = int_to_ptr.vmem [resolvable:$true] %s83_s28 }
  0x16   :  { %s13205_s6 = scalar_lea.vmem %s62_s26, 64  ;;  %p13210_p1 = scmp.lt.s32.totalorder %s62_s26, %s62_s26 }
  0x17   :  { %p13206_p0 = scmp.ne.s32.totalorder %s62_s26, %s13205_s6  ;;  %p13211_p2 = scmp.lt.s32.totalorder %s13205_s6, %s13205_s6 }
  0x19   :  { %p13212_p3 = por %p13211_p2, %p13210_p1 }
  0x1b   :  { %p13213_p4 = pnand %p13212_p3, %p13206_p0 }
  0x1d   :  { %13216 = shalt.err (!%p13213_p4)
}
  0x1e   :  { %s15707_s0 = sld [smem:[#allocation46_spill]]  ;;  %s13225_s7 = scalar_lea.vmem %s84_s28, 32 }
  0x1f   :  { %p13226_p5 = scmp.ne.s32.totalorder %s84_s28, %s13225_s7  ;;  %p13230_p6 = scmp.lt.s32.totalorder %s84_s28, %s84_s28 }
  0x20   :  { %p13231_p7 = scmp.lt.s32.totalorder %s13225_s7, %s13225_s7 }
  0x22   :  { %p13232_p8 = por %p13231_p7, %p13230_p6 }
  0x24   :  { %64 = dma.hbm_to_vmem [thread:$0]  %s15707_s0, 64, %s62_s26, [#allocation6]  }
  0x25   :  { %p13233_p9 = pnand %p13232_p8, %p13226_p5 }
  0x27   :  { %13236 = shalt.err (!%p13233_p9)
}
  0x28   :  { %s15708_s25 = sld [smem:[#allocation48_spill]]  ;;  %s13621_s8 = smov [#allocation11]  }
  0x29   :  { %s105_s4 = sshll.u32 %s13621_s8, 4  ;;  %s13622_s1 = smov [#allocation14]   ;;  %s106_s4 = int_to_ptr.vmem [resolvable:$true] %s105_s4 }
  0x2a   :  { %s127_s5 = sshll.u32 %s13622_s1, 4  ;;  %s13245_s27 = scalar_lea.vmem %s106_s4, 16  ;;  %s128_s5 = int_to_ptr.vmem [resolvable:$true] %s127_s5 }
  0x2b   :  { %p13246_p10 = scmp.ne.s32.totalorder %s106_s4, %s13245_s27  ;;  %s13249_s26 = scalar_lea.vmem %s106_s4, 32 }
  0x2c   :  { %p13250_p11 = scmp.lt.s32.totalorder %s106_s4, %s106_s4  ;;  %p13251_p12 = scmp.lt.s32.totalorder %s13249_s26, %s13245_s27 }
  0x2e   :  { %86 = dma.hbm_to_vmem [thread:$0]  %s15708_s25, 32, %s84_s28, [#allocation9]  }
  0x2f   :  { %p13252_p13 = por %p13251_p12, %p13250_p11 }
  0x31   :  { %p13253_p0 = pnand %p13252_p13, %p13246_p10 }
  0x33   :  { %13256 = shalt.err (!%p13253_p0)
}
  0x34   :  { %s15709_s29 = sld [smem:[#allocation50_spill]]  ;;  %s13265_s0 = scalar_lea.vmem %s128_s5, 64 }
  0x35   :  { %p13266_p1 = scmp.ne.s32.totalorder %s128_s5, %s13265_s0  ;;  %p13270_p2 = scmp.lt.s32.totalorder %s128_s5, %s128_s5 }
  0x36   :  { %p13271_p3 = scmp.lt.s32.totalorder %s13265_s0, %s13265_s0 }
  0x38   :  { %p13272_p4 = por %p13271_p3, %p13270_p2 }
  0x3a   :  { %108 = dma.hbm_to_vmem [thread:$0]  %s15709_s29, 16, %s106_s4, [#allocation12]  }
  0x3b   :  { %p13273_p5 = pnand %p13272_p4, %p13266_p1 }
  0x3d   :  { %13276 = shalt.err (!%p13273_p5)
}
  0x3e   :  { %s15710_s30 = sld [smem:[#allocation52_spill]]  ;;  %s13623_s3 = smov [#allocation17]  }
  0x3f   :  { %s149_s25 = sshll.u32 %s13623_s3, 4  ;;  %s13624_s8 = smov [#allocation20]   ;;  %s150_s25 = int_to_ptr.vmem [resolvable:$true] %s149_s25 }
  0x40   :  { %s171_s1 = sshll.u32 %s13624_s8, 4  ;;  %s13285_s27 = scalar_lea.vmem %s150_s25, 32  ;;  %s172_s1 = int_to_ptr.vmem [resolvable:$true] %s171_s1 }
  0x41   :  { %p13286_p6 = scmp.ne.s32.totalorder %s150_s25, %s13285_s27  ;;  %p13290_p7 = scmp.lt.s32.totalorder %s150_s25, %s150_s25 }
  0x42   :  { %p13291_p8 = scmp.lt.s32.totalorder %s13285_s27, %s13285_s27 }
  0x44   :  { %130 = dma.hbm_to_vmem [thread:$0]  %s15710_s30, 64, %s128_s5, [#allocation15]  }
  0x45   :  { %p13292_p9 = por %p13291_p8, %p13290_p7 }
  0x47   :  { %p13293_p10 = pnand %p13292_p9, %p13286_p6 }
  0x49   :  { %13296 = shalt.err (!%p13293_p10)
}
  0x4a   :  { %152 = dma.hbm_to_vmem [thread:$0]  %s15682_s10, 32, %s150_s25, [#allocation18]  }
  0x4b   :  { %s13305_s6 = scalar_lea.vmem %s172_s1, 16  ;;  %s13309_s5 = scalar_lea.vmem %s172_s1, 32 }
  0x4c   :  { %p13306_p11 = scmp.ne.s32.totalorder %s172_s1, %s13305_s6  ;;  %p13310_p12 = scmp.lt.s32.totalorder %s172_s1, %s172_s1 }
  0x4d   :  { %p13311_p13 = scmp.lt.s32.totalorder %s13309_s5, %s13305_s6 }
  0x4f   :  { %p13312_p0 = por %p13311_p13, %p13310_p12 }
  0x51   :  { %p13313_p1 = pnand %p13312_p0, %p13306_p11 }
  0x53   :  { %13316 = shalt.err (!%p13313_p1)
}
  0x54   :  { %174 = dma.hbm_to_vmem [thread:$0]  %s15684_s12, 16, %s172_s1, [#allocation21]  }
  0x55   :  { %s13625_s0 = smov [#allocation23]  }
  0x56   :  { %s192_s28 = sshll.u32 %s13625_s0, 4  ;;  %s193_s28 = int_to_ptr.vmem [resolvable:$true] %s192_s28 }
  0x57   :  { %s13325_s7 = scalar_lea.vmem %s193_s28, 8192  ;;  %p13330_p3 = scmp.lt.s32.totalorder %s193_s28, %s193_s28 }
  0x58   :  { %p13326_p2 = scmp.ne.s32.totalorder %s193_s28, %s13325_s7  ;;  %p13331_p4 = scmp.lt.s32.totalorder %s13325_s7, %s13325_s7 }
  0x5a   :  { %p13332_p5 = por %p13331_p4, %p13330_p3 }
  0x5c   :  { %p13333_p6 = pnand %p13332_p5, %p13326_p2 }
  0x5e   :  { %13336 = shalt.err (!%p13333_p6)
}
  0x5f   :  { %s13626_s10 = smov 128   ;;  %s13627_s30 = smov 8  }
  0x60   :  { %198 = dma.hbm_to_vmem [thread:$0]  %s15687_s15, 8192, %s193_s28, [#allocation24], %s13626_s10, %s13626_s10, %s13627_s30  }
  0x61   :  { %s13628_s12 = smov [#allocation26]   ;;  %s13629_s1 = smov [#allocation2]  }
  0x62   :  { %s214_s8 = sshll.u32 %s13628_s12, 4  ;;  %s48_s27 = sshll.u32 %s13629_s1, 4  ;;  %s215_s8 = int_to_ptr.vmem [resolvable:$true] %s214_s8  ;;  %s49_s27 = int_to_ptr.vmem [resolvable:$true] %s48_s27 }
  0x63   :  { %s13345_s4 = scalar_lea.vmem %s215_s8, 2048  ;;  %p13350_p8 = scmp.lt.s32.totalorder %s215_s8, %s215_s8 }
  0x64   :  { %p13346_p7 = scmp.ne.s32.totalorder %s215_s8, %s13345_s4  ;;  %p13351_p9 = scmp.lt.s32.totalorder %s13345_s4, %s13345_s4 }
  0x66   :  { %p13352_p10 = por %p13351_p9, %p13350_p8 }
  0x68   :  { %p13353_p11 = pnand %p13352_p10, %p13346_p7 }
  0x6a   :  { %13356 = shalt.err (!%p13353_p11)
}
  0x6b   :  { %s13630_s26 = smov 64   ;;  %s13631_s6 = smov 4  }
  0x6c   :  { %220 = dma.hbm_to_vmem [thread:$0]  %s15689_s17, 2048, %s215_s8, [#allocation27], %s13630_s26, %s13630_s26, %s13631_s6  }
  0x6d   :  { %s13365_s15 = scalar_lea.vmem %s49_s27, 32768  ;;  %p13370_p13 = scmp.lt.s32.totalorder %s49_s27, %s49_s27 }
  0x6e   :  { %p13366_p12 = scmp.ne.s32.totalorder %s49_s27, %s13365_s15  ;;  %p13371_p0 = scmp.lt.s32.totalorder %s13365_s15, %s13365_s15 }
  0x70   :  { %p13372_p1 = por %p13371_p0, %p13370_p13 }
  0x72   :  { %p13373_p2 = pnand %p13372_p1, %p13366_p12 }
  0x74   :  { %13376 = shalt.err (!%p13373_p2)
}
  0x75   :  { %s13632_s29 = smov 256   ;;  %s13633_s0 = smov 16  }
  0x76   :  { %s15711_s3 = sld [smem:[#allocation45_spill]]  ;;  %s13634_s25 = smov [#allocation7]  }
  0x77   :  { %s70_s12 = sshll.u32 %s13634_s25, 4  ;;  %s13635_s17 = smov [#allocation10]   ;;  %s71_s12 = int_to_ptr.vmem [resolvable:$true] %s70_s12 }
  0x78   :  { %s92_s8 = sshll.u32 %s13635_s17, 4  ;;  %s13385_s1 = scalar_lea.vmem %s71_s12, 8192  ;;  %s93_s8 = int_to_ptr.vmem [resolvable:$true] %s92_s8 }
  0x79   :  { %p13386_p3 = scmp.ne.s32.totalorder %s71_s12, %s13385_s1  ;;  %p13390_p4 = scmp.lt.s32.totalorder %s71_s12, %s71_s12 }
  0x7a   :  { %p13391_p5 = scmp.lt.s32.totalorder %s13385_s1, %s13385_s1 }
  0x7c   :  { %54 = dma.hbm_to_vmem [thread:$0]  %s15711_s3, 32768, %s49_s27, [#allocation3], %s13632_s29, %s13632_s29, %s13633_s0  }
  0x7d   :  { %p13392_p6 = por %p13391_p5, %p13390_p4 }
  0x7f   :  { %p13393_p7 = pnand %p13392_p6, %p13386_p3 }
  0x81   :  { %13396 = shalt.err (!%p13393_p7)
}
  0x82   :  { %s15712_s2 = sld [smem:[#allocation47_spill]]  ;;  %s13405_s27 = scalar_lea.vmem %s93_s8, 2048 }
  0x83   :  { %p13406_p8 = scmp.ne.s32.totalorder %s93_s8, %s13405_s27  ;;  %p13410_p9 = scmp.lt.s32.totalorder %s93_s8, %s93_s8 }
  0x84   :  { %p13411_p10 = scmp.lt.s32.totalorder %s13405_s27, %s13405_s27 }
  0x86   :  { %p13412_p11 = por %p13411_p10, %p13410_p9 }
  0x88   :  { %76 = dma.hbm_to_vmem [thread:$0]  %s15712_s2, 8192, %s71_s12, [#allocation6], %s13626_s10, %s13626_s10, %s13627_s30  }
  0x89   :  { %p13413_p12 = pnand %p13412_p11, %p13406_p8 }
  0x8b   :  { %13416 = shalt.err (!%p13413_p12)
}
  0x8c   :  { %s15713_s7 = sld [smem:[#allocation49_spill]]  ;;  %s13636_s3 = smov [#allocation13]  }
  0x8d   :  { %s114_s25 = sshll.u32 %s13636_s3, 4  ;;  %s13637_s17 = smov [#allocation16]   ;;  %s115_s25 = int_to_ptr.vmem [resolvable:$true] %s114_s25 }
  0x8e   :  { %s136_s12 = sshll.u32 %s13637_s17, 4  ;;  %s13425_s1 = scalar_lea.vmem %s115_s25, 32768  ;;  %s137_s12 = int_to_ptr.vmem [resolvable:$true] %s136_s12 }
  0x8f   :  { %p13426_p13 = scmp.ne.s32.totalorder %s115_s25, %s13425_s1  ;;  %p13430_p0 = scmp.lt.s32.totalorder %s115_s25, %s115_s25 }
  0x90   :  { %p13431_p1 = scmp.lt.s32.totalorder %s13425_s1, %s13425_s1 }
  0x92   :  { %98 = dma.hbm_to_vmem [thread:$0]  %s15713_s7, 2048, %s93_s8, [#allocation9], %s13630_s26, %s13630_s26, %s13631_s6  }
  0x93   :  { %p13432_p2 = por %p13431_p1, %p13430_p0 }
  0x95   :  { %p13433_p3 = pnand %p13432_p2, %p13426_p13 }
  0x97   :  { %13436 = shalt.err (!%p13433_p3)
}
  0x98   :  { %s15714_s2 = sld [smem:[#allocation51_spill]]  ;;  %s13445_s8 = scalar_lea.vmem %s137_s12, 8192 }
  0x99   :  { %p13446_p4 = scmp.ne.s32.totalorder %s137_s12, %s13445_s8  ;;  %p13450_p5 = scmp.lt.s32.totalorder %s137_s12, %s137_s12 }
  0x9a   :  { %p13451_p6 = scmp.lt.s32.totalorder %s13445_s8, %s13445_s8 }
  0x9c   :  { %p13452_p7 = por %p13451_p6, %p13450_p5 }
  0x9e   :  { %120 = dma.hbm_to_vmem [thread:$0]  %s15714_s2, 32768, %s115_s25, [#allocation12], %s13632_s29, %s13632_s29, %s13633_s0  }
  0x9f   :  { %p13453_p8 = pnand %p13452_p7, %p13446_p4 }
  0xa1   :  { %13456 = shalt.err (!%p13453_p8)
}
  0xa2   :  { %142 = dma.hbm_to_vmem [thread:$0]  %s15681_s9, 8192, %s137_s12, [#allocation15], %s13626_s10, %s13626_s10, %s13627_s30  }
  0xa3   :  { %s13638_s28 = smov [#allocation19]   ;;  %s13639_s3 = smov [#allocation22]  }
  0xa4   :  { %s158_s7 = sshll.u32 %s13638_s28, 4  ;;  %s183_s29 = sshll.u32 %s13639_s3, 4  ;;  %s159_s7 = int_to_ptr.vmem [resolvable:$true] %s158_s7  ;;  %s184_s29 = int_to_ptr.vmem [resolvable:$true] %s183_s29 }
  0xa5   :  { %s13465_s0 = scalar_lea.vmem %s159_s7, 2048  ;;  %p13470_p10 = scmp.lt.s32.totalorder %s159_s7, %s159_s7 }
  0xa6   :  { %p13466_p9 = scmp.ne.s32.totalorder %s159_s7, %s13465_s0  ;;  %p13471_p11 = scmp.lt.s32.totalorder %s13465_s0, %s13465_s0 }
  0xa8   :  { %p13472_p12 = por %p13471_p11, %p13470_p10 }
  0xaa   :  { %p13473_p13 = pnand %p13472_p12, %p13466_p9 }
  0xac   :  { %13476 = shalt.err (!%p13473_p13)
}
  0xad   :  { %164 = dma.hbm_to_vmem [thread:$0]  %s15683_s11, 2048, %s159_s7, [#allocation18], %s13630_s26, %s13630_s26, %s13631_s6  }
  0xae   :  { %s13485_s9 = scalar_lea.vmem %s184_s29, 64  ;;  %p13490_p1 = scmp.lt.s32.totalorder %s184_s29, %s184_s29 }
  0xaf   :  { %p13486_p0 = scmp.ne.s32.totalorder %s184_s29, %s13485_s9  ;;  %p13491_p2 = scmp.lt.s32.totalorder %s13485_s9, %s13485_s9 }
  0xb1   :  { %p13492_p3 = por %p13491_p2, %p13490_p1 }
  0xb3   :  { %p13493_p4 = pnand %p13492_p3, %p13486_p0 }
  0xb5   :  { %13496 = shalt.err (!%p13493_p4)
}
  0xb6   :  { %186 = dma.hbm_to_vmem [thread:$0]  %s15686_s14, 64, %s184_s29, [#allocation21]  }
  0xb7   :  { %s13640_s12 = smov [#allocation25]   ;;  %s13641_s4 = smov [#allocation28]  }
  0xb8   :  { %s205_s1 = sshll.u32 %s13640_s12, 4  ;;  %s227_s5 = sshll.u32 %s13641_s4, 4  ;;  %s206_s1 = int_to_ptr.vmem [resolvable:$true] %s205_s1  ;;  %s228_s5 = int_to_ptr.vmem [resolvable:$true] %s227_s5 }
  0xb9   :  { %s13505_s2 = scalar_lea.vmem %s206_s1, 32  ;;  %p13510_p6 = scmp.lt.s32.totalorder %s206_s1, %s206_s1 }
  0xba   :  { %p13506_p5 = scmp.ne.s32.totalorder %s206_s1, %s13505_s2  ;;  %p13511_p7 = scmp.lt.s32.totalorder %s13505_s2, %s13505_s2 }
  0xbc   :  { %p13512_p8 = por %p13511_p7, %p13510_p6 }
  0xbe   :  { %p13513_p9 = pnand %p13512_p8, %p13506_p5 }
  0xc0   :  { %13516 = shalt.err (!%p13513_p9)
}
  0xc1   :  { %208 = dma.hbm_to_vmem [thread:$0]  %s15688_s16, 32, %s206_s1, [#allocation24]  }
  0xc2   :  { %s13525_s6 = scalar_lea.vmem %s228_s5, 16  ;;  %s13529_s14 = scalar_lea.vmem %s228_s5, 32 }
  0xc3   :  { %p13526_p10 = scmp.ne.s32.totalorder %s228_s5, %s13525_s6  ;;  %p13530_p11 = scmp.lt.s32.totalorder %s228_s5, %s228_s5 }
  0xc4   :  { %p13531_p12 = scmp.lt.s32.totalorder %s13529_s14, %s13525_s6 }
  0xc6   :  { %p13532_p13 = por %p13531_p12, %p13530_p11 }
  0xc8   :  { %p13533_p0 = pnand %p13532_p13, %p13526_p10 }
  0xca   :  { %13536 = shalt.err (!%p13533_p0)
}
  0xcb   :  { %230 = dma.hbm_to_vmem [thread:$0]  %s15690_s18, 16, %s228_s5, [#allocation27]  }
  0xcc   :  { %13597 = dma.done.wait [#allocation3], 32768  }
  0xcd   :  { %13598 = vsyncadd [#allocation3], 4294934528 }
  0xce   :  { %13599 = dma.done.wait [#allocation6], 8256  }
  0xcf   :  { %13600 = vsyncadd [#allocation6], 4294959040 }
  0xd0   :  { %13601 = dma.done.wait [#allocation9], 2080  }
  0xd1   :  { %13602 = vsyncadd [#allocation9], 4294965216 }
  0xd2   :  { %13603 = dma.done.wait [#allocation12], 32784  }
  0xd3   :  { %13604 = vsyncadd [#allocation12], 4294934512 }
  0xd4   :  { %13605 = dma.done.wait [#allocation15], 8256  }
  0xd5   :  { %13606 = vsyncadd [#allocation15], 4294959040 }
  0xd6   :  { %13607 = dma.done.wait [#allocation18], 2080  }
  0xd7   :  { %13608 = vsyncadd [#allocation18], 4294965216 }
  0xd8   :  { %13609 = dma.done.wait [#allocation21], 80  }
  0xd9   :  { %13610 = vsyncadd [#allocation21], 4294967216 }
  0xda   :  { %13611 = dma.done.wait [#allocation24], 8224  }
  0xdb   :  { %13612 = vsyncadd [#allocation24], 4294959072 }
  0xdc   :  { %13613 = dma.done.wait [#allocation27], 2064  }
  0xdd   :  { %13614 = vsyncadd [#allocation27], 4294965232  ;;  %v11323_v0 = vld [vmem:[#allocation2 + $0xe4] ss:$16 sps:$4 sm:$0xff]   ;;  %v11327_v2 = vld [vmem:[#allocation2 + $0xe0] ss:$16 sps:$4 sm:$0xff]   ;;  %v552_v38 = vlaneseq }
  0xde   :  { %v11325_v1 = vld [vmem:[#allocation2 + $0x2e4] ss:$16 sps:$4 sm:$0xff]   ;;  %1899 = vmatprep.subr.bf16.mxu0 %v11323_v0  ;;  %v11328_v3 = vld [vmem:[#allocation2 + $0x2e0] ss:$16 sps:$4 sm:$0xff]   ;;  %v13642_v36 = vmov 1983009808  }
  0xdf   :  { %1940 = vmatprep.subr.bf16.mxu1 %v11325_v1  ;;  %v11329_v4 = vld [vmem:[#allocation2 + $0xc4] ss:$16 sps:$4 sm:$0xff]   ;;  %1900 = vmatpush1.bf16.msra.mxu0 %v11327_v2  ;;  %v11333_v6 = vld [vmem:[#allocation2 + $0xc0] ss:$16 sps:$4 sm:$0xff]   ;;  %v550_v37 = vunpack.c.l.s4 %v13642_v36  ;;  %v13846_v43 = vshrl.u32 %v552_v38, 7  ;;  %s15715_s15 = sld [smem:[#allocation44_spill]] }
  0xe0   :  { %1941 = vmatpush1.bf16.msra.mxu1 %v11328_v3  ;;  %v11331_v5 = vld [vmem:[#allocation2 + $0x2c4] ss:$16 sps:$4 sm:$0xff]   ;;  %1901 = vmatprep.subr.bf16.mxu0 %v11329_v4  ;;  %v11334_v7 = vld [vmem:[#allocation2 + $0x2c0] ss:$16 sps:$4 sm:$0xff]   ;;  %vm2892_vm0 = vcmask 74752   ;;  %vm5445_vm1 = vcmask 17408  }
  0xe1   :  { %1942 = vmatprep.subr.bf16.mxu1 %v11331_v5  ;;  %v11335_v8 = vld [vmem:[#allocation2 + $0xa4] ss:$16 sps:$4 sm:$0xff]   ;;  %v11339_v10 = vld [vmem:[#allocation2 + $0xa0] ss:$16 sps:$4 sm:$0xff]   ;;  %v551_v42 = vunpack.c.0.s8 %v550_v37  ;;  %vm7998_vm2 = vcmask 9216  }
  0xe2   :  { %v11337_v9 = vld [vmem:[#allocation2 + $0x2a4] ss:$16 sps:$4 sm:$0xff]   ;;  %v11340_v11 = vld [vmem:[#allocation2 + $0x2a0] ss:$16 sps:$4 sm:$0xff]  }
  0xe3   :  { %1902 = vmatpush1.bf16.msra.mxu0 %v11333_v6  ;;  %v11341_v12 = vld [vmem:[#allocation2 + $0x84] ss:$16 sps:$4 sm:$0xff]   ;;  %v11345_v14 = vld [vmem:[#allocation2 + $0x80] ss:$16 sps:$4 sm:$0xff]   ;;  %v13849_v49 = vsub.s32 %v551_v42, %v13846_v43 }
  0xe4   :  { %1943 = vmatpush1.bf16.msra.mxu1 %v11334_v7  ;;  %1903 = vmatprep.subr.bf16.mxu0 %v11335_v8  ;;  %v11343_v13 = vld [vmem:[#allocation2 + $0x284] ss:$16 sps:$4 sm:$0xff]   ;;  %v11346_v15 = vld [vmem:[#allocation2 + $0x280] ss:$16 sps:$4 sm:$0xff]  }
  0xe5   :  { %1944 = vmatprep.subr.bf16.mxu1 %v11337_v9  ;;  %v11347_v16 = vld [vmem:[#allocation2 + $0x64] ss:$16 sps:$4 sm:$0xff]   ;;  %v11351_v18 = vld [vmem:[#allocation2 + $0x60] ss:$16 sps:$4 sm:$0xff]   ;;  %v288_v42 = vld [vmem:[%s15715_s15 + $0x8] sm:$0xff] }
  0xe6   :  { %v11349_v17 = vld [vmem:[#allocation2 + $0x264] ss:$16 sps:$4 sm:$0xff]   ;;  %v11352_v19 = vld [vmem:[#allocation2 + $0x260] ss:$16 sps:$4 sm:$0xff]  }
  0xe7   :  { %1904 = vmatpush1.bf16.msra.mxu0 %v11339_v10  ;;  %v11353_v20 = vld [vmem:[#allocation2 + $0x44] ss:$16 sps:$4 sm:$0xff]   ;;  %v11357_v22 = vld [vmem:[#allocation2 + $0x40] ss:$16 sps:$4 sm:$0xff]  }
  0xe8   :  { %1945 = vmatpush1.bf16.msra.mxu1 %v11340_v11  ;;  %1905 = vmatprep.subr.bf16.mxu0 %v11341_v12  ;;  %v11355_v21 = vld [vmem:[#allocation2 + $0x244] ss:$16 sps:$4 sm:$0xff]   ;;  %v11358_v23 = vld [vmem:[#allocation2 + $0x240] ss:$16 sps:$4 sm:$0xff]  }
  0xe9   :  { %1946 = vmatprep.subr.bf16.mxu1 %v11343_v13  ;;  %v11359_v24 = vld [vmem:[#allocation2 + $0x24] ss:$16 sps:$4 sm:$0xff]   ;;  %v11363_v26 = vld [vmem:[#allocation2 + $0x20] ss:$16 sps:$4 sm:$0xff]  }
  0xea   :  { %v11361_v25 = vld [vmem:[#allocation2 + $0x224] ss:$16 sps:$4 sm:$0xff]   ;;  %v11364_v27 = vld [vmem:[#allocation2 + $0x220] ss:$16 sps:$4 sm:$0xff]  }
  0xeb   :  { %1906 = vmatpush1.bf16.msra.mxu0 %v11345_v14  ;;  %v11365_v28 = vld [vmem:[#allocation2 + $0x4] ss:$16 sps:$4 sm:$0xff]   ;;  %v11369_v30 = vld [vmem:[#allocation2] ss:$16 sps:$4 sm:$0xff]  }
  0xec   :  { %1947 = vmatpush1.bf16.msra.mxu1 %v11346_v15  ;;  %1907 = vmatprep.subr.bf16.mxu0 %v11347_v16  ;;  %v11367_v29 = vld [vmem:[#allocation2 + $0x204] ss:$16 sps:$4 sm:$0xff]   ;;  %v11370_v31 = vld [vmem:[#allocation2 + $0x200] ss:$16 sps:$4 sm:$0xff]  }
  0xed   :  { %1948 = vmatprep.subr.bf16.mxu1 %v11349_v17  ;;  %v11371_v32 = vld [vmem:[#allocation2 + $0x1e4] ss:$16 sps:$4 sm:$0xff]   ;;  %v11375_v34 = vld [vmem:[#allocation2 + $0x1e0] ss:$16 sps:$4 sm:$0xff]  }
  0xee   :  { %v11373_v33 = vld [vmem:[#allocation2 + $0x3e4] ss:$16 sps:$4 sm:$0xff]   ;;  %v11376_v35 = vld [vmem:[#allocation2 + $0x3e0] ss:$16 sps:$4 sm:$0xff]  }
  0xef   :  { %1908 = vmatpush1.bf16.msra.mxu0 %v11351_v18  ;;  %v11377_v39 = vld [vmem:[#allocation2 + $0x1c4] ss:$16 sps:$4 sm:$0xff]   ;;  %v11381_v41 = vld [vmem:[#allocation2 + $0x1c0] ss:$16 sps:$4 sm:$0xff]  }
  0xf0   :  { %1949 = vmatpush1.bf16.msra.mxu1 %v11352_v19  ;;  %1909 = vmatprep.subr.bf16.mxu0 %v11353_v20  ;;  %v11379_v40 = vld [vmem:[#allocation2 + $0x3c4] ss:$16 sps:$4 sm:$0xff]   ;;  %v11382_v44 = vld [vmem:[#allocation2 + $0x3c0] ss:$16 sps:$4 sm:$0xff]  }
  0xf1   :  { %1950 = vmatprep.subr.bf16.mxu1 %v11355_v21  ;;  %v11383_v45 = vld [vmem:[#allocation2 + $0x1a4] ss:$16 sps:$4 sm:$0xff]   ;;  %v11387_v47 = vld [vmem:[#allocation2 + $0x1a0] ss:$16 sps:$4 sm:$0xff]  }
  0xf2   :  { %v11385_v46 = vld [vmem:[#allocation2 + $0x3a4] ss:$16 sps:$4 sm:$0xff]   ;;  %v11388_v48 = vld [vmem:[#allocation2 + $0x3a0] ss:$16 sps:$4 sm:$0xff]  }
  0xf3   :  { %1910 = vmatpush1.bf16.msra.mxu0 %v11357_v22  ;;  %v11389_v50 = vld [vmem:[#allocation2 + $0x184] ss:$16 sps:$4 sm:$0xff]   ;;  %v11393_v53 = vld [vmem:[#allocation2 + $0x180] ss:$16 sps:$4 sm:$0xff]  }
  0xf4   :  { %1951 = vmatpush1.bf16.msra.mxu1 %v11358_v23  ;;  %1911 = vmatprep.subr.bf16.mxu0 %v11359_v24  ;;  %v11391_v51 = vld [vmem:[#allocation2 + $0x384] ss:$16 sps:$4 sm:$0xff]   ;;  %v11394_v56 = vld [vmem:[#allocation2 + $0x380] ss:$16 sps:$4 sm:$0xff]  }
  0xf5   :  { %1952 = vmatprep.subr.bf16.mxu1 %v11361_v25  ;;  %v287_v52 = vld [vmem:[%s15715_s15] sm:$0xff]  ;;  %s13644_s15 = smov [#allocation29]  }
  0xf6   :  { %v555_v54 = vrot.slane %v287_v52, %v13849_v49  ;;  %v548_v55 = vcombine.high %v287_v52, %v287_v52  ;;  %v11395_v57 = vld [vmem:[#allocation2 + $0x164] ss:$16 sps:$4 sm:$0xff]   ;;  %v11399_v61 = vld [vmem:[#allocation2 + $0x160] ss:$16 sps:$4 sm:$0xff]   ;;  %s9915_s28 = sshll.u32 %s13644_s15, 4  ;;  %s9916_s28 = int_to_ptr.vmem [resolvable:$true] %s9915_s28 }
  0xf7   :  { %1912 = vmatpush1.bf16.msra.mxu0 %v11363_v26  ;;  %v11397_v58 = vld [vmem:[#allocation2 + $0x364] ss:$16 sps:$4 sm:$0xff]   ;;  %v11400_v0 = vld [vmem:[#allocation2 + $0x360] ss:$16 sps:$4 sm:$0xff]  }
  0xf8   :  { %1953 = vmatpush1.bf16.msra.mxu1 %v11364_v27  ;;  %1913 = vmatprep.subr.bf16.mxu0 %v11365_v28  ;;  %v563_v59 = vcombine.high %v555_v54, %v555_v54  ;;  %v562_v60 = vrot.slane %v548_v55, %v13849_v49  ;;  %v11401_v1 = vld [vmem:[#allocation2 + $0x144] ss:$16 sps:$4 sm:$0xff]   ;;  %v11405_v4 = vld [vmem:[#allocation2 + $0x140] ss:$16 sps:$4 sm:$0xff]   ;;  %v13862_v16 = vpack.c.bf16 %v555_v54, %v555_v54 }
  0xf9   :  { %1954 = vmatprep.subr.bf16.mxu1 %v11367_v29  ;;  %v11403_v2 = vld [vmem:[#allocation2 + $0x344] ss:$16 sps:$4 sm:$0xff]   ;;  %v11406_v5 = vld [vmem:[#allocation2 + $0x340] ss:$16 sps:$4 sm:$0xff]  }
  0xfa   :  { %v13856_v62 = vpack.c.bf16 %v563_v59, %v563_v59  ;;  %v564_v63 = vcombine.high %v562_v60, %v562_v60  ;;  %v11407_v6 = vld [vmem:[#allocation2 + $0x124] ss:$16 sps:$4 sm:$0xff]   ;;  %v11411_v8 = vld [vmem:[#allocation2 + $0x120] ss:$16 sps:$4 sm:$0xff]   ;;  %v13864_v17 = vpack.c.bf16 %v562_v60, %v562_v60 }
  0xfb   :  { %1914 = vmatpush1.bf16.msra.mxu0 %v11369_v30  ;;  %v11409_v7 = vld [vmem:[#allocation2 + $0x324] ss:$16 sps:$4 sm:$0xff]   ;;  %v11412_v9 = vld [vmem:[#allocation2 + $0x320] ss:$16 sps:$4 sm:$0xff]  }
  0xfc   :  { %1955 = vmatpush1.bf16.msra.mxu1 %v11370_v31  ;;  %1915 = vmatprep.subr.bf16.mxu0 %v11371_v32  ;;  %v13858_v3 = vpack.c.bf16 %v564_v63, %v564_v63  ;;  %v11413_v10 = vld [vmem:[#allocation2 + $0x104] ss:$16 sps:$4 sm:$0xff]   ;;  %v11417_v12 = vld [vmem:[#allocation2 + $0x100] ss:$16 sps:$4 sm:$0xff]  }
  0xfd   :  { %1956 = vmatprep.subr.bf16.mxu1 %v11373_v33  ;;  %1931 = vmatprep.mubr.bf16.mxu0 %v13856_v62  ;;  %v11415_v11 = vld [vmem:[#allocation2 + $0x304] ss:$16 sps:$4 sm:$0xff]   ;;  %v11418_v13 = vld [vmem:[#allocation2 + $0x300] ss:$16 sps:$4 sm:$0xff]  }
  0xfe   :  { %1972 = vmatprep.mubr.bf16.mxu1 %v13858_v3  ;;  %v11422_v14 = vld [vmem:[#allocation2 + $0x4e4] ss:$16 sps:$4 sm:$0xff]   ;;  %v11420_v18 = vld [vmem:[#allocation2 + $0x4e0] ss:$16 sps:$4 sm:$0xff]  }
  0xff   :  { %1916 = vmatpush2.bf16.msra.mxu0 %v11375_v34  ;;  %v11425_v15 = vld [vmem:[#allocation2 + $0x6e4] ss:$16 sps:$4 sm:$0xff]   ;;  %v11423_v19 = vld [vmem:[#allocation2 + $0x6e0] ss:$16 sps:$4 sm:$0xff]  }
 0x100   :  { %1957 = vmatpush2.bf16.msra.mxu1 %v11376_v35  ;;  %1917 = vmatprep.subr.bf16.mxu0 %v11377_v39  ;;  %v11428_v20 = vld [vmem:[#allocation2 + $0x4c4] ss:$16 sps:$4 sm:$0xff]   ;;  %v11426_v22 = vld [vmem:[#allocation2 + $0x4c0] ss:$16 sps:$4 sm:$0xff]  }
 0x101   :  { %1958 = vmatprep.subr.bf16.mxu1 %v11379_v40  ;;  %v11431_v21 = vld [vmem:[#allocation2 + $0x6c4] ss:$16 sps:$4 sm:$0xff]   ;;  %v11429_v23 = vld [vmem:[#allocation2 + $0x6c0] ss:$16 sps:$4 sm:$0xff]  }
 0x102   :  { %v11434_v24 = vld [vmem:[#allocation2 + $0x4a4] ss:$16 sps:$4 sm:$0xff]   ;;  %v11432_v26 = vld [vmem:[#allocation2 + $0x4a0] ss:$16 sps:$4 sm:$0xff]  }
 0x103   :  { %1918 = vmatpush2.bf16.msra.mxu0 %v11381_v41  ;;  %v11437_v25 = vld [vmem:[#allocation2 + $0x6a4] ss:$16 sps:$4 sm:$0xff]   ;;  %v11435_v27 = vld [vmem:[#allocation2 + $0x6a0] ss:$16 sps:$4 sm:$0xff]  }
 0x104   :  { %1959 = vmatpush2.bf16.msra.mxu1 %v11382_v44  ;;  %1919 = vmatprep.subr.bf16.mxu0 %v11383_v45  ;;  %v11440_v28 = vld [vmem:[#allocation2 + $0x484] ss:$16 sps:$4 sm:$0xff]   ;;  %v11438_v30 = vld [vmem:[#allocation2 + $0x480] ss:$16 sps:$4 sm:$0xff]   ;;  %v13872_v44 = vrot.slane %v288_v42, %v13849_v49  ;;  %v565_v45 = vcombine.high %v288_v42, %v288_v42  ;;  %v11529_v42 = vld [vmem:[#allocation2 + $0xa8] ss:$16 sps:$4 sm:$0xff]  }
 0x105   :  { %1960 = vmatprep.subr.bf16.mxu1 %v11385_v46  ;;  %v11443_v29 = vld [vmem:[#allocation2 + $0x684] ss:$16 sps:$4 sm:$0xff]   ;;  %v11441_v31 = vld [vmem:[#allocation2 + $0x680] ss:$16 sps:$4 sm:$0xff]  }
 0x106   :  { %v11446_v32 = vld [vmem:[#allocation2 + $0x464] ss:$16 sps:$4 sm:$0xff]   ;;  %v11444_v34 = vld [vmem:[#allocation2 + $0x460] ss:$16 sps:$4 sm:$0xff]  }
 0x107   :  { %1920 = vmatpush2.bf16.msra.mxu0 %v11387_v47  ;;  %v11449_v33 = vld [vmem:[#allocation2 + $0x664] ss:$16 sps:$4 sm:$0xff]   ;;  %v11447_v35 = vld [vmem:[#allocation2 + $0x660] ss:$16 sps:$4 sm:$0xff]  }
 0x108   :  { %1961 = vmatpush2.bf16.msra.mxu1 %v11388_v48  ;;  %1921 = vmatprep.subr.bf16.mxu0 %v11389_v50  ;;  %v11452_v36 = vld [vmem:[#allocation2 + $0x444] ss:$16 sps:$4 sm:$0xff]   ;;  %v11450_v38 = vld [vmem:[#allocation2 + $0x440] ss:$16 sps:$4 sm:$0xff]   ;;  %v580_v48 = vcombine.high %v13872_v44, %v13872_v44  ;;  %v13877_v50 = vrot.slane %v565_v45, %v13849_v49  ;;  %v11537_v45 = vld [vmem:[#allocation2 + $0x8c] ss:$16 sps:$4 sm:$0xff]  }
 0x109   :  { %1962 = vmatprep.subr.bf16.mxu1 %v11391_v51  ;;  %v11455_v37 = vld [vmem:[#allocation2 + $0x644] ss:$16 sps:$4 sm:$0xff]   ;;  %v11453_v39 = vld [vmem:[#allocation2 + $0x640] ss:$16 sps:$4 sm:$0xff]  }
 0x10a   :  { %v11458_v40 = vld [vmem:[#allocation2 + $0x424] ss:$16 sps:$4 sm:$0xff]   ;;  %v11456_v46 = vld [vmem:[#allocation2 + $0x420] ss:$16 sps:$4 sm:$0xff]   ;;  %v581_v54 = vcombine.high %v13877_v50, %v13877_v50 }
 0x10b   :  { %1922 = vmatpush2.bf16.msra.mxu0 %v11393_v53  ;;  %v11461_v41 = vld [vmem:[#allocation2 + $0x624] ss:$16 sps:$4 sm:$0xff]   ;;  %v11459_v47 = vld [vmem:[#allocation2 + $0x620] ss:$16 sps:$4 sm:$0xff]   ;;  %v13879_v53 = vpack.c.bf16 %v580_v48, %v580_v48  ;;  %v11538_v48 = vld [vmem:[#allocation2 + $0x288] ss:$16 sps:$4 sm:$0xff]  }
 0x10c   :  { %1963 = vmatpush2.bf16.msra.mxu1 %v11394_v56  ;;  %1923 = vmatprep.subr.bf16.mxu0 %v11395_v57  ;;  %v11464_v51 = vld [vmem:[#allocation2 + $0x404] ss:$16 sps:$4 sm:$0xff]   ;;  %v11462_v55 = vld [vmem:[#allocation2 + $0x400] ss:$16 sps:$4 sm:$0xff]   ;;  %v13883_v57 = vpack.c.bf16 %v581_v54, %v581_v54  ;;  %v11544_v54 = vld [vmem:[#allocation2 + $0x268] ss:$16 sps:$4 sm:$0xff]  }
 0x10d   :  { %1964 = vmatprep.subr.bf16.mxu1 %v11397_v58  ;;  %v11467_v52 = vld [vmem:[#allocation2 + $0x604] ss:$16 sps:$4 sm:$0xff]   ;;  %v11465_v56 = vld [vmem:[#allocation2 + $0x600] ss:$16 sps:$4 sm:$0xff]  }
 0x10e   :  { %v11470_v58 = vld [vmem:[#allocation2 + $0x5e4] ss:$16 sps:$4 sm:$0xff]   ;;  %v11468_v60 = vld [vmem:[#allocation2 + $0x5e0] ss:$16 sps:$4 sm:$0xff]  }
 0x10f   :  { %1924 = vmatpush2.bf16.msra.mxu0 %v11399_v61  ;;  %v11473_v59 = vld [vmem:[#allocation2 + $0x7e4] ss:$16 sps:$4 sm:$0xff]   ;;  %v11471_v61 = vld [vmem:[#allocation2 + $0x7e0] ss:$16 sps:$4 sm:$0xff]  }
 0x110   :  { %1965 = vmatpush2.bf16.msra.mxu1 %v11400_v0  ;;  %1925 = vmatprep.subr.bf16.mxu0 %v11401_v1  ;;  %v11476_v63 = vld [vmem:[#allocation2 + $0x5c4] ss:$16 sps:$4 sm:$0xff]   ;;  %v11474_v1 = vld [vmem:[#allocation2 + $0x5c0] ss:$16 sps:$4 sm:$0xff]  }
 0x111   :  { %1966 = vmatprep.subr.bf16.mxu1 %v11403_v2  ;;  %v11479_v0 = vld [vmem:[#allocation2 + $0x7c4] ss:$16 sps:$4 sm:$0xff]   ;;  %v11477_v2 = vld [vmem:[#allocation2 + $0x7c0] ss:$16 sps:$4 sm:$0xff]  }
 0x113   :  { %1926 = vmatpush2.bf16.msra.mxu0 %v11405_v4  ;;  %v11482_v4 = vld [vmem:[#allocation2 + $0x5a4] ss:$16 sps:$4 sm:$0xff]  }
 0x114   :  { %1967 = vmatpush2.bf16.msra.mxu1 %v11406_v5  ;;  %1927 = vmatprep.subr.bf16.mxu0 %v11407_v6  ;;  %v11485_v5 = vld [vmem:[#allocation2 + $0x7a4] ss:$16 sps:$4 sm:$0xff]   ;;  %v11480_v6 = vld [vmem:[#allocation2 + $0x5a0] ss:$16 sps:$4 sm:$0xff]  }
 0x115   :  { %1968 = vmatprep.subr.bf16.mxu1 %v11409_v7  ;;  %v11483_v7 = vld [vmem:[#allocation2 + $0x7a0] ss:$16 sps:$4 sm:$0xff]  }
 0x117   :  { %1928 = vmatpush2.bf16.msra.mxu0 %v11411_v8  ;;  %v11488_v8 = vld [vmem:[#allocation2 + $0x584] ss:$16 sps:$4 sm:$0xff]  }
 0x118   :  { %1969 = vmatpush2.bf16.msra.mxu1 %v11412_v9  ;;  %1929 = vmatprep.subr.bf16.mxu0 %v11413_v10  ;;  %v11491_v9 = vld [vmem:[#allocation2 + $0x784] ss:$16 sps:$4 sm:$0xff]   ;;  %v11486_v10 = vld [vmem:[#allocation2 + $0x580] ss:$16 sps:$4 sm:$0xff]  }
 0x119   :  { %1970 = vmatprep.subr.bf16.mxu1 %v11415_v11  ;;  %v11489_v11 = vld [vmem:[#allocation2 + $0x780] ss:$16 sps:$4 sm:$0xff]  }
 0x11b   :  { %1930 = vmatpush2.bf16.msra.mxu0 %v11417_v12  ;;  %v11494_v12 = vld [vmem:[#allocation2 + $0x564] ss:$16 sps:$4 sm:$0xff]  }
 0x11c   :  { %1971 = vmatpush2.bf16.msra.mxu1 %v11418_v13  ;;  %1981 = vmatprep.subr.bf16.mxu0 %v11422_v14  ;;  %v11497_v13 = vld [vmem:[#allocation2 + $0x764] ss:$16 sps:$4 sm:$0xff]   ;;  %v11492_v14 = vld [vmem:[#allocation2 + $0x560] ss:$16 sps:$4 sm:$0xff]  }
 0x11d   :  { %2022 = vmatprep.subr.bf16.mxu1 %v11425_v15  ;;  %v11495_v15 = vld [vmem:[#allocation2 + $0x760] ss:$16 sps:$4 sm:$0xff]  }
 0x11e   :  { %1932 = vmatmul.mubr.bf16.vlgmr.msra.gmra.mxu0 %v13862_v16 }
 0x11f   :  { %1973 = vmatmul.mubr.bf16.vlgmr.msra.gmra.mxu1 %v13864_v17  ;;  %1982 = vmatpush1.bf16.msra.mxu0 %v11420_v18  ;;  %v11500_v18 = vld [vmem:[#allocation2 + $0x544] ss:$16 sps:$4 sm:$0xff]  }
 0x120   :  { %2023 = vmatpush1.bf16.msra.mxu1 %v11423_v19  ;;  %1983 = vmatprep.subr.bf16.mxu0 %v11428_v20  ;;  %v11503_v19 = vld [vmem:[#allocation2 + $0x744] ss:$16 sps:$4 sm:$0xff]   ;;  %v11498_v20 = vld [vmem:[#allocation2 + $0x540] ss:$16 sps:$4 sm:$0xff]  }
 0x121   :  { %2024 = vmatprep.subr.bf16.mxu1 %v11431_v21  ;;  %2013 = vmatprep.mubr.bf16.mxu0 %v13879_v53  ;;  %v11501_v21 = vld [vmem:[#allocation2 + $0x740] ss:$16 sps:$4 sm:$0xff]  }
 0x122   :  { %2054 = vmatprep.mubr.bf16.mxu1 %v13883_v57 }
 0x123   :  { %1984 = vmatpush1.bf16.msra.mxu0 %v11426_v22  ;;  %v11506_v22 = vld [vmem:[#allocation2 + $0x524] ss:$16 sps:$4 sm:$0xff]  }
 0x124   :  { %2025 = vmatpush1.bf16.msra.mxu1 %v11429_v23  ;;  %1985 = vmatprep.subr.bf16.mxu0 %v11434_v24  ;;  %v11509_v23 = vld [vmem:[#allocation2 + $0x724] ss:$16 sps:$4 sm:$0xff]   ;;  %v11504_v24 = vld [vmem:[#allocation2 + $0x520] ss:$16 sps:$4 sm:$0xff]  }
 0x125   :  { %2026 = vmatprep.subr.bf16.mxu1 %v11437_v25  ;;  %v11507_v25 = vld [vmem:[#allocation2 + $0x720] ss:$16 sps:$4 sm:$0xff]  }
 0x127   :  { %1986 = vmatpush1.bf16.msra.mxu0 %v11432_v26  ;;  %v11512_v26 = vld [vmem:[#allocation2 + $0x504] ss:$16 sps:$4 sm:$0xff]  }
 0x128   :  { %2027 = vmatpush1.bf16.msra.mxu1 %v11435_v27  ;;  %1987 = vmatprep.subr.bf16.mxu0 %v11440_v28  ;;  %v11515_v27 = vld [vmem:[#allocation2 + $0x704] ss:$16 sps:$4 sm:$0xff]   ;;  %v11510_v28 = vld [vmem:[#allocation2 + $0x500] ss:$16 sps:$4 sm:$0xff]  }
 0x129   :  { %2028 = vmatprep.subr.bf16.mxu1 %v11443_v29  ;;  %v11513_v29 = vld [vmem:[#allocation2 + $0x700] ss:$16 sps:$4 sm:$0xff]  }
 0x12b   :  { %1988 = vmatpush1.bf16.msra.mxu0 %v11438_v30  ;;  %v11519_v30 = vld [vmem:[#allocation2 + $0xec] ss:$16 sps:$4 sm:$0xff]  }
 0x12c   :  { %2029 = vmatpush1.bf16.msra.mxu1 %v11441_v31  ;;  %1989 = vmatprep.subr.bf16.mxu0 %v11446_v32  ;;  %v11522_v31 = vld [vmem:[#allocation2 + $0x2ec] ss:$16 sps:$4 sm:$0xff]   ;;  %v13889_v32 = vpack.c.bf16 %v13872_v44, %v13872_v44  ;;  %v11532_v44 = vld [vmem:[#allocation2 + $0x2a8] ss:$16 sps:$4 sm:$0xff]  }
 0x12d   :  { %2030 = vmatprep.subr.bf16.mxu1 %v11449_v33  ;;  %v13893_v33 = vpack.c.bf16 %v13877_v50, %v13877_v50  ;;  %v11543_v50 = vld [vmem:[#allocation2 + $0x6c] ss:$16 sps:$4 sm:$0xff]  }
 0x12f   :  { %1990 = vmatpush1.bf16.msra.mxu0 %v11444_v34  ;;  %v11517_v34 = vld [vmem:[#allocation2 + $0xe8] ss:$16 sps:$4 sm:$0xff]  }
 0x130   :  { %2031 = vmatpush1.bf16.msra.mxu1 %v11447_v35  ;;  %1991 = vmatprep.subr.bf16.mxu0 %v11452_v36  ;;  %v11520_v35 = vld [vmem:[#allocation2 + $0x2e8] ss:$16 sps:$4 sm:$0xff]   ;;  %v11525_v36 = vld [vmem:[#allocation2 + $0xcc] ss:$16 sps:$4 sm:$0xff]  }
 0x131   :  { %2032 = vmatprep.subr.bf16.mxu1 %v11455_v37  ;;  %v11528_v37 = vld [vmem:[#allocation2 + $0x2cc] ss:$16 sps:$4 sm:$0xff]  }
 0x133   :  { %1992 = vmatpush1.bf16.msra.mxu0 %v11450_v38  ;;  %v11523_v38 = vld [vmem:[#allocation2 + $0xc8] ss:$16 sps:$4 sm:$0xff]  }
 0x134   :  { %2033 = vmatpush1.bf16.msra.mxu1 %v11453_v39  ;;  %1993 = vmatprep.subr.bf16.mxu0 %v11458_v40  ;;  %v11526_v39 = vld [vmem:[#allocation2 + $0x2c8] ss:$16 sps:$4 sm:$0xff]   ;;  %v11531_v40 = vld [vmem:[#allocation2 + $0xac] ss:$16 sps:$4 sm:$0xff]  }
 0x135   :  { %2034 = vmatprep.subr.bf16.mxu1 %v11461_v41  ;;  %v11534_v41 = vld [vmem:[#allocation2 + $0x2ac] ss:$16 sps:$4 sm:$0xff]  }
 0x137   :  { %1994 = vmatpush1.bf16.msra.mxu0 %v11456_v46  ;;  %v11540_v46 = vld [vmem:[#allocation2 + $0x28c] ss:$16 sps:$4 sm:$0xff]  }
 0x138   :  { %2035 = vmatpush1.bf16.msra.mxu1 %v11459_v47  ;;  %1995 = vmatprep.subr.bf16.mxu0 %v11464_v51  ;;  %v11535_v47 = vld [vmem:[#allocation2 + $0x88] ss:$16 sps:$4 sm:$0xff]   ;;  %v11546_v51 = vld [vmem:[#allocation2 + $0x26c] ss:$16 sps:$4 sm:$0xff]  }
 0x139   :  { %2036 = vmatprep.subr.bf16.mxu1 %v11467_v52  ;;  %v11541_v52 = vld [vmem:[#allocation2 + $0x68] ss:$16 sps:$4 sm:$0xff]  }
 0x13b   :  { %1996 = vmatpush1.bf16.msra.mxu0 %v11462_v55  ;;  %v11549_v55 = vld [vmem:[#allocation2 + $0x4c] ss:$16 sps:$4 sm:$0xff]  }
 0x13c   :  { %2037 = vmatpush1.bf16.msra.mxu1 %v11465_v56  ;;  %1997 = vmatprep.subr.bf16.mxu0 %v11470_v58  ;;  %v11552_v56 = vld [vmem:[#allocation2 + $0x24c] ss:$16 sps:$4 sm:$0xff]   ;;  %v11547_v58 = vld [vmem:[#allocation2 + $0x48] ss:$16 sps:$4 sm:$0xff]  }
 0x13d   :  { %2038 = vmatprep.subr.bf16.mxu1 %v11473_v59  ;;  %v11550_v59 = vld [vmem:[#allocation2 + $0x248] ss:$16 sps:$4 sm:$0xff]  }
 0x13f   :  { %1998 = vmatpush2.bf16.msra.mxu0 %v11468_v60  ;;  %v11555_v60 = vld [vmem:[#allocation2 + $0x2c] ss:$16 sps:$4 sm:$0xff]  }
 0x140   :  { %2039 = vmatpush2.bf16.msra.mxu1 %v11471_v61  ;;  %1999 = vmatprep.subr.bf16.mxu0 %v11476_v63  ;;  %v11558_v61 = vld [vmem:[#allocation2 + $0x22c] ss:$16 sps:$4 sm:$0xff]   ;;  %v11553_v63 = vld [vmem:[#allocation2 + $0x28] ss:$16 sps:$4 sm:$0xff]  }
 0x141   :  { %2040 = vmatprep.subr.bf16.mxu1 %v11479_v0  ;;  %v11556_v0 = vld [vmem:[#allocation2 + $0x228] ss:$16 sps:$4 sm:$0xff]  }
 0x143   :  { %2000 = vmatpush2.bf16.msra.mxu0 %v11474_v1  ;;  %v11561_v1 = vld [vmem:[#allocation2 + $0xc] ss:$16 sps:$4 sm:$0xff]  }
 0x144   :  { %2041 = vmatpush2.bf16.msra.mxu1 %v11477_v2  ;;  %2001 = vmatprep.subr.bf16.mxu0 %v11482_v4  ;;  %v11564_v2 = vld [vmem:[#allocation2 + $0x20c] ss:$16 sps:$4 sm:$0xff]   ;;  %v11559_v4 = vld [vmem:[#allocation2 + $0x8] ss:$16 sps:$4 sm:$0xff]  }
 0x145   :  { %2042 = vmatprep.subr.bf16.mxu1 %v11485_v5  ;;  %v11562_v5 = vld [vmem:[#allocation2 + $0x208] ss:$16 sps:$4 sm:$0xff]  }
 0x147   :  { %2002 = vmatpush2.bf16.msra.mxu0 %v11480_v6  ;;  %v11567_v6 = vld [vmem:[#allocation2 + $0x1ec] ss:$16 sps:$4 sm:$0xff]  }
 0x148   :  { %2043 = vmatpush2.bf16.msra.mxu1 %v11483_v7  ;;  %2003 = vmatprep.subr.bf16.mxu0 %v11488_v8  ;;  %v11570_v7 = vld [vmem:[#allocation2 + $0x3ec] ss:$16 sps:$4 sm:$0xff]   ;;  %v11565_v8 = vld [vmem:[#allocation2 + $0x1e8] ss:$16 sps:$4 sm:$0xff]  }
 0x149   :  { %2044 = vmatprep.subr.bf16.mxu1 %v11491_v9  ;;  %v11568_v9 = vld [vmem:[#allocation2 + $0x3e8] ss:$16 sps:$4 sm:$0xff]  }
 0x14b   :  { %2004 = vmatpush2.bf16.msra.mxu0 %v11486_v10  ;;  %v11573_v10 = vld [vmem:[#allocation2 + $0x1cc] ss:$16 sps:$4 sm:$0xff]  }
 0x14c   :  { %2045 = vmatpush2.bf16.msra.mxu1 %v11489_v11  ;;  %2005 = vmatprep.subr.bf16.mxu0 %v11494_v12  ;;  %v11576_v11 = vld [vmem:[#allocation2 + $0x3cc] ss:$16 sps:$4 sm:$0xff]   ;;  %v11571_v12 = vld [vmem:[#allocation2 + $0x1c8] ss:$16 sps:$4 sm:$0xff]  }
 0x14d   :  { %2046 = vmatprep.subr.bf16.mxu1 %v11497_v13  ;;  %v11574_v13 = vld [vmem:[#allocation2 + $0x3c8] ss:$16 sps:$4 sm:$0xff]  }
 0x14f   :  { %2006 = vmatpush2.bf16.msra.mxu0 %v11492_v14  ;;  %v11579_v14 = vld [vmem:[#allocation2 + $0x1ac] ss:$16 sps:$4 sm:$0xff]  }
 0x150   :  { %2047 = vmatpush2.bf16.msra.mxu1 %v11495_v15  ;;  %2007 = vmatprep.subr.bf16.mxu0 %v11500_v18  ;;  %v11582_v15 = vld [vmem:[#allocation2 + $0x3ac] ss:$16 sps:$4 sm:$0xff]   ;;  %v11577_v18 = vld [vmem:[#allocation2 + $0x1a8] ss:$16 sps:$4 sm:$0xff]  }
 0x151   :  { %2048 = vmatprep.subr.bf16.mxu1 %v11503_v19  ;;  %v11580_v19 = vld [vmem:[#allocation2 + $0x3a8] ss:$16 sps:$4 sm:$0xff]  }
 0x153   :  { %2008 = vmatpush2.bf16.msra.mxu0 %v11498_v20  ;;  %v11585_v20 = vld [vmem:[#allocation2 + $0x18c] ss:$16 sps:$4 sm:$0xff]  }
 0x154   :  { %2049 = vmatpush2.bf16.msra.mxu1 %v11501_v21  ;;  %2009 = vmatprep.subr.bf16.mxu0 %v11506_v22  ;;  %v11588_v21 = vld [vmem:[#allocation2 + $0x38c] ss:$16 sps:$4 sm:$0xff]   ;;  %v11583_v22 = vld [vmem:[#allocation2 + $0x188] ss:$16 sps:$4 sm:$0xff]  }
 0x155   :  { %2050 = vmatprep.subr.bf16.mxu1 %v11509_v23  ;;  %v11586_v23 = vld [vmem:[#allocation2 + $0x388] ss:$16 sps:$4 sm:$0xff]  }
 0x157   :  { %2010 = vmatpush2.bf16.msra.mxu0 %v11504_v24  ;;  %v11591_v24 = vld [vmem:[#allocation2 + $0x16c] ss:$16 sps:$4 sm:$0xff]  }
 0x158   :  { %2051 = vmatpush2.bf16.msra.mxu1 %v11507_v25  ;;  %2011 = vmatprep.subr.bf16.mxu0 %v11512_v26  ;;  %v11594_v25 = vld [vmem:[#allocation2 + $0x36c] ss:$16 sps:$4 sm:$0xff]   ;;  %v11589_v26 = vld [vmem:[#allocation2 + $0x168] ss:$16 sps:$4 sm:$0xff]  }
 0x159   :  { %2052 = vmatprep.subr.bf16.mxu1 %v11515_v27  ;;  %v11592_v27 = vld [vmem:[#allocation2 + $0x368] ss:$16 sps:$4 sm:$0xff]  }
 0x15b   :  { %2012 = vmatpush2.bf16.msra.mxu0 %v11510_v28  ;;  %v11597_v28 = vld [vmem:[#allocation2 + $0x14c] ss:$16 sps:$4 sm:$0xff]  }
 0x15c   :  { %2053 = vmatpush2.bf16.msra.mxu1 %v11513_v29  ;;  %2063 = vmatprep.subr.bf16.mxu0 %v11519_v30  ;;  %v11600_v29 = vld [vmem:[#allocation2 + $0x34c] ss:$16 sps:$4 sm:$0xff]   ;;  %v11595_v30 = vld [vmem:[#allocation2 + $0x148] ss:$16 sps:$4 sm:$0xff]  }
 0x15d   :  { %2104 = vmatprep.subr.bf16.mxu1 %v11522_v31  ;;  %v11598_v31 = vld [vmem:[#allocation2 + $0x348] ss:$16 sps:$4 sm:$0xff]  }
 0x15e   :  { %2014 = vmatmul.mubr.bf16.vlgmr.msra.gmra.mxu0 %v13889_v32 }
 0x15f   :  { %2055 = vmatmul.mubr.bf16.vlgmr.msra.gmra.mxu1 %v13893_v33  ;;  %2064 = vmatpush1.bf16.msra.mxu0 %v11517_v34  ;;  %v11603_v34 = vld [vmem:[#allocation2 + $0x12c] ss:$16 sps:$4 sm:$0xff]  }
 0x160   :  { %2105 = vmatpush1.bf16.msra.mxu1 %v11520_v35  ;;  %2065 = vmatprep.subr.bf16.mxu0 %v11525_v36  ;;  %v11606_v35 = vld [vmem:[#allocation2 + $0x32c] ss:$16 sps:$4 sm:$0xff]   ;;  %v11601_v36 = vld [vmem:[#allocation2 + $0x128] ss:$16 sps:$4 sm:$0xff]  }
 0x161   :  { %2106 = vmatprep.subr.bf16.mxu1 %v11528_v37  ;;  %2095 = vmatprep.mubr.bf16.mxu0 %v13856_v62  ;;  %v11604_v37 = vld [vmem:[#allocation2 + $0x328] ss:$16 sps:$4 sm:$0xff]  }
 0x162   :  { %2136 = vmatprep.mubr.bf16.mxu1 %v13858_v3 }
 0x163   :  { %2066 = vmatpush1.bf16.msra.mxu0 %v11523_v38  ;;  %v11609_v38 = vld [vmem:[#allocation2 + $0x10c] ss:$16 sps:$4 sm:$0xff]  }
 0x164   :  { %2107 = vmatpush1.bf16.msra.mxu1 %v11526_v39  ;;  %2067 = vmatprep.subr.bf16.mxu0 %v11531_v40  ;;  %v11612_v39 = vld [vmem:[#allocation2 + $0x30c] ss:$16 sps:$4 sm:$0xff]   ;;  %v11607_v40 = vld [vmem:[#allocation2 + $0x108] ss:$16 sps:$4 sm:$0xff]  }
 0x165   :  { %2108 = vmatprep.subr.bf16.mxu1 %v11534_v41  ;;  %v11610_v41 = vld [vmem:[#allocation2 + $0x308] ss:$16 sps:$4 sm:$0xff]  }
 0x167   :  { %2068 = vmatpush1.bf16.msra.mxu0 %v11529_v42  ;;  %v11615_v42 = vld [vmem:[#allocation2 + $0x4ec] ss:$16 sps:$4 sm:$0xff]  }
 0x168   :  { %2109 = vmatpush1.bf16.msra.mxu1 %v11532_v44  ;;  %2069 = vmatprep.subr.bf16.mxu0 %v11537_v45  ;;  %v11618_v44 = vld [vmem:[#allocation2 + $0x6ec] ss:$16 sps:$4 sm:$0xff]   ;;  %v11613_v45 = vld [vmem:[#allocation2 + $0x4e8] ss:$16 sps:$4 sm:$0xff]  }
 0x169   :  { %2110 = vmatprep.subr.bf16.mxu1 %v11540_v46  ;;  %v11616_v46 = vld [vmem:[#allocation2 + $0x6e8] ss:$16 sps:$4 sm:$0xff]  }
 0x16b   :  { %2070 = vmatpush1.bf16.msra.mxu0 %v11535_v47  ;;  %v11621_v47 = vld [vmem:[#allocation2 + $0x4cc] ss:$16 sps:$4 sm:$0xff]  }
 0x16c   :  { %2111 = vmatpush1.bf16.msra.mxu1 %v11538_v48  ;;  %2071 = vmatprep.subr.bf16.mxu0 %v11543_v50  ;;  %v11624_v48 = vld [vmem:[#allocation2 + $0x6cc] ss:$16 sps:$4 sm:$0xff]   ;;  %v11619_v50 = vld [vmem:[#allocation2 + $0x4c8] ss:$16 sps:$4 sm:$0xff]  }
 0x16d   :  { %2112 = vmatprep.subr.bf16.mxu1 %v11546_v51  ;;  %v11622_v51 = vld [vmem:[#allocation2 + $0x6c8] ss:$16 sps:$4 sm:$0xff]  }
 0x16f   :  { %2072 = vmatpush1.bf16.msra.mxu0 %v11541_v52  ;;  %v11627_v52 = vld [vmem:[#allocation2 + $0x4ac] ss:$16 sps:$4 sm:$0xff]  }
 0x170   :  { %2113 = vmatpush1.bf16.msra.mxu1 %v11544_v54  ;;  %2073 = vmatprep.subr.bf16.mxu0 %v11549_v55  ;;  %v11630_v54 = vld [vmem:[#allocation2 + $0x6ac] ss:$16 sps:$4 sm:$0xff]   ;;  %v11625_v55 = vld [vmem:[#allocation2 + $0x4a8] ss:$16 sps:$4 sm:$0xff]  }
 0x171   :  { %2114 = vmatprep.subr.bf16.mxu1 %v11552_v56  ;;  %v11628_v56 = vld [vmem:[#allocation2 + $0x6a8] ss:$16 sps:$4 sm:$0xff]  }
 0x173   :  { %2074 = vmatpush1.bf16.msra.mxu0 %v11547_v58  ;;  %v11633_v58 = vld [vmem:[#allocation2 + $0x48c] ss:$16 sps:$4 sm:$0xff]  }
 0x174   :  { %2115 = vmatpush1.bf16.msra.mxu1 %v11550_v59  ;;  %2075 = vmatprep.subr.bf16.mxu0 %v11555_v60  ;;  %v11636_v59 = vld [vmem:[#allocation2 + $0x68c] ss:$16 sps:$4 sm:$0xff]   ;;  %v11631_v60 = vld [vmem:[#allocation2 + $0x488] ss:$16 sps:$4 sm:$0xff]  }
 0x175   :  { %2116 = vmatprep.subr.bf16.mxu1 %v11558_v61  ;;  %v11634_v61 = vld [vmem:[#allocation2 + $0x688] ss:$16 sps:$4 sm:$0xff]  }
 0x177   :  { %2076 = vmatpush1.bf16.msra.mxu0 %v11553_v63  ;;  %v11639_v63 = vld [vmem:[#allocation2 + $0x46c] ss:$16 sps:$4 sm:$0xff]  }
 0x178   :  { %2117 = vmatpush1.bf16.msra.mxu1 %v11556_v0  ;;  %2077 = vmatprep.subr.bf16.mxu0 %v11561_v1  ;;  %v11642_v0 = vld [vmem:[#allocation2 + $0x66c] ss:$16 sps:$4 sm:$0xff]   ;;  %v11637_v1 = vld [vmem:[#allocation2 + $0x468] ss:$16 sps:$4 sm:$0xff]  }
 0x179   :  { %2118 = vmatprep.subr.bf16.mxu1 %v11564_v2  ;;  %v11640_v2 = vld [vmem:[#allocation2 + $0x668] ss:$16 sps:$4 sm:$0xff]  }
 0x17b   :  { %2078 = vmatpush1.bf16.msra.mxu0 %v11559_v4  ;;  %v11645_v4 = vld [vmem:[#allocation2 + $0x44c] ss:$16 sps:$4 sm:$0xff]  }
 0x17c   :  { %2119 = vmatpush1.bf16.msra.mxu1 %v11562_v5  ;;  %2079 = vmatprep.subr.bf16.mxu0 %v11567_v6  ;;  %v11648_v5 = vld [vmem:[#allocation2 + $0x64c] ss:$16 sps:$4 sm:$0xff]   ;;  %v11643_v6 = vld [vmem:[#allocation2 + $0x448] ss:$16 sps:$4 sm:$0xff]  }
 0x17d   :  { %2120 = vmatprep.subr.bf16.mxu1 %v11570_v7  ;;  %v11646_v7 = vld [vmem:[#allocation2 + $0x648] ss:$16 sps:$4 sm:$0xff]  }
 0x17f   :  { %2080 = vmatpush2.bf16.msra.mxu0 %v11565_v8  ;;  %v11651_v8 = vld [vmem:[#allocation2 + $0x42c] ss:$16 sps:$4 sm:$0xff]  }
 0x180   :  { %2121 = vmatpush2.bf16.msra.mxu1 %v11568_v9  ;;  %2081 = vmatprep.subr.bf16.mxu0 %v11573_v10  ;;  %v11654_v9 = vld [vmem:[#allocation2 + $0x62c] ss:$16 sps:$4 sm:$0xff]   ;;  %v11649_v10 = vld [vmem:[#allocation2 + $0x428] ss:$16 sps:$4 sm:$0xff]  }
 0x181   :  { %2122 = vmatprep.subr.bf16.mxu1 %v11576_v11  ;;  %v11652_v11 = vld [vmem:[#allocation2 + $0x628] ss:$16 sps:$4 sm:$0xff]  }
 0x183   :  { %2082 = vmatpush2.bf16.msra.mxu0 %v11571_v12  ;;  %v11657_v12 = vld [vmem:[#allocation2 + $0x40c] ss:$16 sps:$4 sm:$0xff]  }
 0x184   :  { %2123 = vmatpush2.bf16.msra.mxu1 %v11574_v13  ;;  %2083 = vmatprep.subr.bf16.mxu0 %v11579_v14  ;;  %v11660_v13 = vld [vmem:[#allocation2 + $0x60c] ss:$16 sps:$4 sm:$0xff]   ;;  %v11655_v14 = vld [vmem:[#allocation2 + $0x408] ss:$16 sps:$4 sm:$0xff]  }
 0x185   :  { %2124 = vmatprep.subr.bf16.mxu1 %v11582_v15  ;;  %v11658_v15 = vld [vmem:[#allocation2 + $0x608] ss:$16 sps:$4 sm:$0xff]  }
 0x187   :  { %2084 = vmatpush2.bf16.msra.mxu0 %v11577_v18  ;;  %v11663_v18 = vld [vmem:[#allocation2 + $0x5ec] ss:$16 sps:$4 sm:$0xff]  }
 0x188   :  { %2125 = vmatpush2.bf16.msra.mxu1 %v11580_v19  ;;  %2085 = vmatprep.subr.bf16.mxu0 %v11585_v20  ;;  %v11666_v19 = vld [vmem:[#allocation2 + $0x7ec] ss:$16 sps:$4 sm:$0xff]   ;;  %v11661_v20 = vld [vmem:[#allocation2 + $0x5e8] ss:$16 sps:$4 sm:$0xff]  }
 0x189   :  { %2126 = vmatprep.subr.bf16.mxu1 %v11588_v21  ;;  %v11664_v21 = vld [vmem:[#allocation2 + $0x7e8] ss:$16 sps:$4 sm:$0xff]  }
 0x18b   :  { %2086 = vmatpush2.bf16.msra.mxu0 %v11583_v22  ;;  %v11669_v22 = vld [vmem:[#allocation2 + $0x5cc] ss:$16 sps:$4 sm:$0xff]  }
 0x18c   :  { %2127 = vmatpush2.bf16.msra.mxu1 %v11586_v23  ;;  %2087 = vmatprep.subr.bf16.mxu0 %v11591_v24  ;;  %v11672_v23 = vld [vmem:[#allocation2 + $0x7cc] ss:$16 sps:$4 sm:$0xff]   ;;  %v11667_v24 = vld [vmem:[#allocation2 + $0x5c8] ss:$16 sps:$4 sm:$0xff]  }
 0x18d   :  { %2128 = vmatprep.subr.bf16.mxu1 %v11594_v25  ;;  %v11670_v25 = vld [vmem:[#allocation2 + $0x7c8] ss:$16 sps:$4 sm:$0xff]  }
 0x18f   :  { %2088 = vmatpush2.bf16.msra.mxu0 %v11589_v26  ;;  %v11675_v26 = vld [vmem:[#allocation2 + $0x5ac] ss:$16 sps:$4 sm:$0xff]  }
 0x190   :  { %2129 = vmatpush2.bf16.msra.mxu1 %v11592_v27  ;;  %2089 = vmatprep.subr.bf16.mxu0 %v11597_v28  ;;  %v11678_v27 = vld [vmem:[#allocation2 + $0x7ac] ss:$16 sps:$4 sm:$0xff]   ;;  %v11673_v28 = vld [vmem:[#allocation2 + $0x5a8] ss:$16 sps:$4 sm:$0xff]  }
 0x191   :  { %2130 = vmatprep.subr.bf16.mxu1 %v11600_v29  ;;  %v11676_v29 = vld [vmem:[#allocation2 + $0x7a8] ss:$16 sps:$4 sm:$0xff]  }
 0x193   :  { %2090 = vmatpush2.bf16.msra.mxu0 %v11595_v30  ;;  %v11681_v30 = vld [vmem:[#allocation2 + $0x58c] ss:$16 sps:$4 sm:$0xff]  }
 0x194   :  { %2131 = vmatpush2.bf16.msra.mxu1 %v11598_v31  ;;  %2091 = vmatprep.subr.bf16.mxu0 %v11603_v34  ;;  %v11684_v31 = vld [vmem:[#allocation2 + $0x78c] ss:$16 sps:$4 sm:$0xff]   ;;  %v11679_v34 = vld [vmem:[#allocation2 + $0x588] ss:$16 sps:$4 sm:$0xff]  }
 0x195   :  { %2132 = vmatprep.subr.bf16.mxu1 %v11606_v35  ;;  %v11682_v35 = vld [vmem:[#allocation2 + $0x788] ss:$16 sps:$4 sm:$0xff]  }
 0x197   :  { %2092 = vmatpush2.bf16.msra.mxu0 %v11601_v36  ;;  %v11687_v36 = vld [vmem:[#allocation2 + $0x56c] ss:$16 sps:$4 sm:$0xff]  }
 0x198   :  { %2133 = vmatpush2.bf16.msra.mxu1 %v11604_v37  ;;  %2093 = vmatprep.subr.bf16.mxu0 %v11609_v38  ;;  %v11690_v37 = vld [vmem:[#allocation2 + $0x76c] ss:$16 sps:$4 sm:$0xff]   ;;  %v11685_v38 = vld [vmem:[#allocation2 + $0x568] ss:$16 sps:$4 sm:$0xff]  }
 0x199   :  { %2134 = vmatprep.subr.bf16.mxu1 %v11612_v39  ;;  %v11688_v39 = vld [vmem:[#allocation2 + $0x768] ss:$16 sps:$4 sm:$0xff]  }
 0x19b   :  { %2094 = vmatpush2.bf16.msra.mxu0 %v11607_v40  ;;  %v11693_v40 = vld [vmem:[#allocation2 + $0x54c] ss:$16 sps:$4 sm:$0xff]  }
 0x19c   :  { %2135 = vmatpush2.bf16.msra.mxu1 %v11610_v41  ;;  %2145 = vmatprep.subr.bf16.mxu0 %v11615_v42  ;;  %v11696_v41 = vld [vmem:[#allocation2 + $0x74c] ss:$16 sps:$4 sm:$0xff]   ;;  %v11691_v42 = vld [vmem:[#allocation2 + $0x548] ss:$16 sps:$4 sm:$0xff]  }
 0x19d   :  { %2186 = vmatprep.subr.bf16.mxu1 %v11618_v44  ;;  %v11694_v44 = vld [vmem:[#allocation2 + $0x748] ss:$16 sps:$4 sm:$0xff]  }
 0x19e   :  { %2096 = vmatmul.mubr.bf16.vlgmr.msra.gmra.mxu0 %v13862_v16 }
 0x19f   :  { %2137 = vmatmul.mubr.bf16.vlgmr.msra.gmra.mxu1 %v13864_v17  ;;  %2146 = vmatpush1.bf16.msra.mxu0 %v11613_v45  ;;  %v11699_v45 = vld [vmem:[#allocation2 + $0x52c] ss:$16 sps:$4 sm:$0xff]  }
 0x1a0   :  { %2187 = vmatpush1.bf16.msra.mxu1 %v11616_v46  ;;  %2147 = vmatprep.subr.bf16.mxu0 %v11621_v47  ;;  %v11702_v46 = vld [vmem:[#allocation2 + $0x72c] ss:$16 sps:$4 sm:$0xff]   ;;  %v11697_v47 = vld [vmem:[#allocation2 + $0x528] ss:$16 sps:$4 sm:$0xff]  }
 0x1a1   :  { %2188 = vmatprep.subr.bf16.mxu1 %v11624_v48  ;;  %2177 = vmatprep.mubr.bf16.mxu0 %v13879_v53  ;;  %v11700_v48 = vld [vmem:[#allocation2 + $0x728] ss:$16 sps:$4 sm:$0xff]  }
 0x1a2   :  { %2218 = vmatprep.mubr.bf16.mxu1 %v13883_v57 }
 0x1a3   :  { %2148 = vmatpush1.bf16.msra.mxu0 %v11619_v50  ;;  %v11705_v50 = vld [vmem:[#allocation2 + $0x50c] ss:$16 sps:$4 sm:$0xff]  }
 0x1a4   :  { %2189 = vmatpush1.bf16.msra.mxu1 %v11622_v51  ;;  %2149 = vmatprep.subr.bf16.mxu0 %v11627_v52  ;;  %v11708_v51 = vld [vmem:[#allocation2 + $0x70c] ss:$16 sps:$4 sm:$0xff]   ;;  %v11703_v52 = vld [vmem:[#allocation2 + $0x508] ss:$16 sps:$4 sm:$0xff]  }
 0x1a5   :  { %2190 = vmatprep.subr.bf16.mxu1 %v11630_v54  ;;  %v11706_v54 = vld [vmem:[#allocation2 + $0x708] ss:$16 sps:$4 sm:$0xff]  }
 0x1a7   :  { %2150 = vmatpush1.bf16.msra.mxu0 %v11625_v55  ;;  %v11711_v55 = vld [vmem:[#allocation7 + $0x74] ss:$8 sps:$4 sm:$0xff]  }
 0x1a8   :  { %2191 = vmatpush1.bf16.msra.mxu1 %v11628_v56  ;;  %2151 = vmatprep.subr.bf16.mxu0 %v11633_v58  ;;  %v11709_v56 = vld [vmem:[#allocation7 + $0x70] ss:$8 sps:$4 sm:$0xff]   ;;  %v11714_v58 = vld [vmem:[#allocation7 + $0x64] ss:$8 sps:$4 sm:$0xff]  }
 0x1a9   :  { %2192 = vmatprep.subr.bf16.mxu1 %v11636_v59  ;;  %v11712_v59 = vld [vmem:[#allocation7 + $0x60] ss:$8 sps:$4 sm:$0xff]  }
 0x1ab   :  { %2152 = vmatpush1.bf16.msra.mxu0 %v11631_v60 }
 0x1ac   :  { %2193 = vmatpush1.bf16.msra.mxu1 %v11634_v61  ;;  %2153 = vmatprep.subr.bf16.mxu0 %v11639_v63  ;;  %v11717_v63 = vld [vmem:[#allocation7 + $0x54] ss:$8 sps:$4 sm:$0xff]  }
 0x1ad   :  { %2194 = vmatprep.subr.bf16.mxu1 %v11642_v0 }
 0x1af   :  { %2154 = vmatpush1.bf16.msra.mxu0 %v11637_v1 }
 0x1b0   :  { %2195 = vmatpush1.bf16.msra.mxu1 %v11640_v2  ;;  %2155 = vmatprep.subr.bf16.mxu0 %v11645_v4  ;;  %v11715_v2 = vld [vmem:[#allocation7 + $0x50] ss:$8 sps:$4 sm:$0xff]  }
 0x1b1   :  { %2196 = vmatprep.subr.bf16.mxu1 %v11648_v5 }
 0x1b3   :  { %2156 = vmatpush1.bf16.msra.mxu0 %v11643_v6 }
 0x1b4   :  { %2197 = vmatpush1.bf16.msra.mxu1 %v11646_v7  ;;  %2157 = vmatprep.subr.bf16.mxu0 %v11651_v8  ;;  %v11720_v8 = vld [vmem:[#allocation7 + $0x44] ss:$8 sps:$4 sm:$0xff]  }
 0x1b5   :  { %2198 = vmatprep.subr.bf16.mxu1 %v11654_v9  ;;  %v11757_v9 = vld [vmem:[#allocation7 + $0x170] ss:$8 sps:$4 sm:$0xff]  }
 0x1b7   :  { %2158 = vmatpush1.bf16.msra.mxu0 %v11649_v10  ;;  %v11759_v10 = vld [vmem:[#allocation7 + $0x174] ss:$8 sps:$4 sm:$0xff]  }
 0x1b8   :  { %2199 = vmatpush1.bf16.msra.mxu1 %v11652_v11  ;;  %2159 = vmatprep.subr.bf16.mxu0 %v11657_v12  ;;  %v11762_v11 = vld [vmem:[#allocation7 + $0x164] ss:$8 sps:$4 sm:$0xff]   ;;  %v11718_v12 = vld [vmem:[#allocation7 + $0x40] ss:$8 sps:$4 sm:$0xff]  }
 0x1b9   :  { %2200 = vmatprep.subr.bf16.mxu1 %v11660_v13  ;;  %v11760_v13 = vld [vmem:[#allocation7 + $0x160] ss:$8 sps:$4 sm:$0xff]  }
 0x1bb   :  { %2160 = vmatpush1.bf16.msra.mxu0 %v11655_v14  ;;  %v11723_v14 = vld [vmem:[#allocation7 + $0x34] ss:$8 sps:$4 sm:$0xff]  }
 0x1bc   :  { %2201 = vmatpush1.bf16.msra.mxu1 %v11658_v15  ;;  %2161 = vmatprep.subr.bf16.mxu0 %v11663_v18  ;;  %v11765_v15 = vld [vmem:[#allocation7 + $0x154] ss:$8 sps:$4 sm:$0xff]   ;;  %v11721_v18 = vld [vmem:[#allocation7 + $0x30] ss:$8 sps:$4 sm:$0xff]  }
 0x1bd   :  { %2202 = vmatprep.subr.bf16.mxu1 %v11666_v19  ;;  %v11763_v19 = vld [vmem:[#allocation7 + $0x150] ss:$8 sps:$4 sm:$0xff]  }
 0x1bf   :  { %2162 = vmatpush2.bf16.msra.mxu0 %v11661_v20  ;;  %v11726_v20 = vld [vmem:[#allocation7 + $0x24] ss:$8 sps:$4 sm:$0xff]  }
 0x1c0   :  { %2203 = vmatpush2.bf16.msra.mxu1 %v11664_v21  ;;  %2163 = vmatprep.subr.bf16.mxu0 %v11669_v22  ;;  %v11768_v21 = vld [vmem:[#allocation7 + $0x144] ss:$8 sps:$4 sm:$0xff]   ;;  %v11724_v22 = vld [vmem:[#allocation7 + $0x20] ss:$8 sps:$4 sm:$0xff]  }
 0x1c1   :  { %2204 = vmatprep.subr.bf16.mxu1 %v11672_v23  ;;  %v11766_v23 = vld [vmem:[#allocation7 + $0x140] ss:$8 sps:$4 sm:$0xff]  }
 0x1c3   :  { %2164 = vmatpush2.bf16.msra.mxu0 %v11667_v24  ;;  %v11729_v24 = vld [vmem:[#allocation7 + $0x14] ss:$8 sps:$4 sm:$0xff]  }
 0x1c4   :  { %2205 = vmatpush2.bf16.msra.mxu1 %v11670_v25  ;;  %2165 = vmatprep.subr.bf16.mxu0 %v11675_v26  ;;  %v11771_v25 = vld [vmem:[#allocation7 + $0x134] ss:$8 sps:$4 sm:$0xff]   ;;  %v11727_v26 = vld [vmem:[#allocation7 + $0x10] ss:$8 sps:$4 sm:$0xff]  }
 0x1c5   :  { %2206 = vmatprep.subr.bf16.mxu1 %v11678_v27  ;;  %v11769_v27 = vld [vmem:[#allocation7 + $0x130] ss:$8 sps:$4 sm:$0xff]  }
 0x1c7   :  { %2166 = vmatpush2.bf16.msra.mxu0 %v11673_v28  ;;  %v11732_v28 = vld [vmem:[#allocation7 + $0x4] ss:$8 sps:$4 sm:$0xff]  }
 0x1c8   :  { %2207 = vmatpush2.bf16.msra.mxu1 %v11676_v29  ;;  %2167 = vmatprep.subr.bf16.mxu0 %v11681_v30  ;;  %v11774_v29 = vld [vmem:[#allocation7 + $0x124] ss:$8 sps:$4 sm:$0xff]   ;;  %v11730_v30 = vld [vmem:[#allocation7] ss:$8 sps:$4 sm:$0xff]  }
 0x1c9   :  { %2208 = vmatprep.subr.bf16.mxu1 %v11684_v31  ;;  %v11772_v31 = vld [vmem:[#allocation7 + $0x120] ss:$8 sps:$4 sm:$0xff]  }
 0x1cb   :  { %2168 = vmatpush2.bf16.msra.mxu0 %v11679_v34  ;;  %v11735_v34 = vld [vmem:[#allocation7 + $0xf4] ss:$8 sps:$4 sm:$0xff]  }
 0x1cc   :  { %2209 = vmatpush2.bf16.msra.mxu1 %v11682_v35  ;;  %2169 = vmatprep.subr.bf16.mxu0 %v11687_v36  ;;  %v11777_v35 = vld [vmem:[#allocation7 + $0x114] ss:$8 sps:$4 sm:$0xff]   ;;  %v11733_v36 = vld [vmem:[#allocation7 + $0xf0] ss:$8 sps:$4 sm:$0xff]  }
 0x1cd   :  { %2210 = vmatprep.subr.bf16.mxu1 %v11690_v37  ;;  %v11775_v37 = vld [vmem:[#allocation7 + $0x110] ss:$8 sps:$4 sm:$0xff]  }
 0x1cf   :  { %2170 = vmatpush2.bf16.msra.mxu0 %v11685_v38  ;;  %v11738_v38 = vld [vmem:[#allocation7 + $0xe4] ss:$8 sps:$4 sm:$0xff]  }
 0x1d0   :  { %2211 = vmatpush2.bf16.msra.mxu1 %v11688_v39  ;;  %2171 = vmatprep.subr.bf16.mxu0 %v11693_v40  ;;  %v11780_v39 = vld [vmem:[#allocation7 + $0x104] ss:$8 sps:$4 sm:$0xff]   ;;  %v11736_v40 = vld [vmem:[#allocation7 + $0xe0] ss:$8 sps:$4 sm:$0xff]  }
 0x1d1   :  { %2212 = vmatprep.subr.bf16.mxu1 %v11696_v41  ;;  %v11778_v41 = vld [vmem:[#allocation7 + $0x100] ss:$8 sps:$4 sm:$0xff]  }
 0x1d3   :  { %2172 = vmatpush2.bf16.msra.mxu0 %v11691_v42  ;;  %v11741_v42 = vld [vmem:[#allocation7 + $0xd4] ss:$8 sps:$4 sm:$0xff]  }
 0x1d4   :  { %2213 = vmatpush2.bf16.msra.mxu1 %v11694_v44  ;;  %2173 = vmatprep.subr.bf16.mxu0 %v11699_v45  ;;  %v11783_v44 = vld [vmem:[#allocation7 + $0x1f4] ss:$8 sps:$4 sm:$0xff]   ;;  %v11739_v45 = vld [vmem:[#allocation7 + $0xd0] ss:$8 sps:$4 sm:$0xff]  }
 0x1d5   :  { %2214 = vmatprep.subr.bf16.mxu1 %v11702_v46  ;;  %v11781_v46 = vld [vmem:[#allocation7 + $0x1f0] ss:$8 sps:$4 sm:$0xff]  }
 0x1d7   :  { %2174 = vmatpush2.bf16.msra.mxu0 %v11697_v47  ;;  %v11744_v47 = vld [vmem:[#allocation7 + $0xc4] ss:$8 sps:$4 sm:$0xff]  }
 0x1d8   :  { %2215 = vmatpush2.bf16.msra.mxu1 %v11700_v48  ;;  %2175 = vmatprep.subr.bf16.mxu0 %v11705_v50  ;;  %v11786_v48 = vld [vmem:[#allocation7 + $0x1e4] ss:$8 sps:$4 sm:$0xff]   ;;  %v11742_v50 = vld [vmem:[#allocation7 + $0xc0] ss:$8 sps:$4 sm:$0xff]  }
 0x1d9   :  { %2216 = vmatprep.subr.bf16.mxu1 %v11708_v51  ;;  %v11784_v51 = vld [vmem:[#allocation7 + $0x1e0] ss:$8 sps:$4 sm:$0xff]  }
 0x1db   :  { %2176 = vmatpush2.bf16.msra.mxu0 %v11703_v52  ;;  %v11747_v52 = vld [vmem:[#allocation7 + $0xb4] ss:$8 sps:$4 sm:$0xff]  }
 0x1dc   :  { %2217 = vmatpush2.bf16.msra.mxu1 %v11706_v54  ;;  %2631 = vmatprep.subr.bf16.mxu0 %v11711_v55  ;;  %v11789_v54 = vld [vmem:[#allocation7 + $0x1d4] ss:$8 sps:$4 sm:$0xff]   ;;  %v11745_v55 = vld [vmem:[#allocation7 + $0xb0] ss:$8 sps:$4 sm:$0xff]  }
 0x1dd   :  { %2672 = vmatprep.subr.bf16.mxu1 %v11759_v10  ;;  %v11756_v10 = vld [vmem:[#allocation7 + $0x84] ss:$8 sps:$4 sm:$0xff]  }
 0x1de   :  { %v13903_v60 = vpop.f32.mrf.mxu0  ;;  %2178 = vmatmul.mubr.bf16.vlgmr.msra.gmra.mxu0 %v13889_v32 }
 0x1df   :  { %v13905_v61 = vpop.f32.mrf.mxu1  ;;  %2219 = vmatmul.mubr.bf16.vlgmr.msra.gmra.mxu1 %v13893_v33  ;;  %2632 = vmatpush1.bf16.msra.mxu0 %v11709_v56  ;;  %v11787_v56 = vld [vmem:[#allocation7 + $0x1d0] ss:$8 sps:$4 sm:$0xff]  }
 0x1e0   :  { %v13909_v0 = vpop.f32.mrf.mxu0  ;;  %2633 = vmatprep.subr.bf16.mxu0 %v11714_v58  ;;  %2673 = vmatpush1.bf16.msra.mxu1 %v11757_v9  ;;  %v11750_v58 = vld [vmem:[#allocation7 + $0xa4] ss:$8 sps:$4 sm:$0xff]   ;;  %v11793_v9 = vld [vmem:[#allocation7 + $0x1b0] ss:$8 sps:$4 sm:$0xff]  }
 0x1e1   :  { %v13911_v1 = vpop.f32.mrf.mxu1  ;;  %2674 = vmatprep.subr.bf16.mxu1 %v11762_v11  ;;  %v13919_v11 = vsub.s32 1, %v13846_v43 }
 0x1e2   :  { %v1937_v4 = vpop.f32.mrf.mxu0 }
 0x1e3   :  { %v1978_v5 = vpop.f32.mrf.mxu1  ;;  %2634 = vmatpush1.bf16.msra.mxu0 %v11712_v59  ;;  %v11792_v59 = vld [vmem:[#allocation7 + $0x1c4] ss:$8 sps:$4 sm:$0xff]   ;;  %v11753_v4 = vld [vmem:[#allocation7 + $0x94] ss:$8 sps:$4 sm:$0xff]  }
 0x1e4   :  { %v1938_v6 = vpop.f32.mrf.mxu0  ;;  %2635 = vmatprep.subr.bf16.mxu0 %v11717_v63  ;;  %2675 = vmatpush1.bf16.msra.mxu1 %v11760_v13  ;;  %v11748_v63 = vld [vmem:[#allocation7 + $0xa0] ss:$8 sps:$4 sm:$0xff]   ;;  %v11795_v5 = vld [vmem:[#allocation7 + $0x1b4] ss:$8 sps:$4 sm:$0xff]  }
 0x1e5   :  { %v1979_v7 = vpop.f32.mrf.mxu1  ;;  %2676 = vmatprep.subr.bf16.mxu1 %v11765_v15  ;;  %v13913_v6 = vld [vmem:[#allocation5] sm:$0xf]  ;;  %v11754_v13 = vld [vmem:[#allocation7 + $0x80] ss:$8 sps:$4 sm:$0xff]  }
 0x1e6   :  { %v13916_v7 = vsub.s32 0, %v13846_v43 }
 0x1e7   :  { %2636 = vmatpush1.bf16.msra.mxu0 %v11715_v2  ;;  %v11790_v2 = vld [vmem:[#allocation7 + $0x1c0] ss:$8 sps:$4 sm:$0xff]  }
 0x1e8   :  { %2637 = vmatprep.subr.bf16.mxu0 %v11720_v8  ;;  %2677 = vmatpush1.bf16.msra.mxu1 %v11763_v19  ;;  %v11751_v8 = vld [vmem:[#allocation7 + $0x90] ss:$8 sps:$4 sm:$0xff]   ;;  %v11798_v19 = vld [vmem:[#allocation7 + $0x1a4] ss:$8 sps:$4 sm:$0xff]  }
 0x1e9   :  { %2678 = vmatprep.subr.bf16.mxu1 %v11768_v21  ;;  %v11796_v21 = vld [vmem:[#allocation7 + $0x1a0] ss:$8 sps:$4 sm:$0xff]  }
 0x1eb   :  { %2638 = vmatpush1.bf16.msra.mxu0 %v11718_v12  ;;  %v602_v12 = vrot.slane %v13913_v6, %v13916_v7 }
 0x1ec   :  { %2639 = vmatprep.subr.bf16.mxu0 %v11723_v14  ;;  %2679 = vmatpush1.bf16.msra.mxu1 %v11766_v23  ;;  %v606_v14 = vrot.slane %v13913_v6, %v13919_v11 }
 0x1ed   :  { %2680 = vmatprep.subr.bf16.mxu1 %v11771_v25  ;;  %v1934_v15 = vadd.f32 %v13903_v60, %v602_v12  ;;  %v11799_v60 = vld [vmem:[#allocation7 + $0x190] ss:$8 sps:$4 sm:$0xff]   ;;  %v13933_v12 = vsub.s32 3, %v13846_v43 }
 0x1ef   :  { %2640 = vmatpush1.bf16.msra.mxu0 %v11721_v18  ;;  %v1936_v18 = vadd.f32 %v13909_v0, %v606_v14  ;;  %v614_v14 = vrot.slane %v13913_v6, %v13933_v12 }
 0x1f0   :  { %2641 = vmatprep.subr.bf16.mxu0 %v11726_v20  ;;  %2681 = vmatpush1.bf16.msra.mxu1 %v11769_v27  ;;  %v1975_v20 = vadd.f32 %v13905_v61, %v1934_v15 }
 0x1f1   :  { %2682 = vmatprep.subr.bf16.mxu1 %v11774_v29 }
 0x1f3   :  { %2642 = vmatpush1.bf16.msra.mxu0 %v11724_v22 }
 0x1f4   :  { %2643 = vmatprep.subr.bf16.mxu0 %v11729_v24  ;;  %2683 = vmatpush1.bf16.msra.mxu1 %v11772_v31  ;;  %v1977_v24 = vadd.f32 %v13911_v1, %v1936_v18 }
 0x1f5   :  { %2684 = vmatprep.subr.bf16.mxu1 %v11777_v35 }
 0x1f7   :  { %2644 = vmatpush1.bf16.msra.mxu0 %v11727_v26 }
 0x1f8   :  { %2645 = vmatprep.subr.bf16.mxu0 %v11732_v28  ;;  %2685 = vmatpush1.bf16.msra.mxu1 %v11775_v37  ;;  %v11801_v28 = vld [vmem:[#allocation7 + $0x194] ss:$8 sps:$4 sm:$0xff]   ;;  %v11804_v37 = vld [vmem:[#allocation7 + $0x184] ss:$8 sps:$4 sm:$0xff]  }
 0x1f9   :  { %2686 = vmatprep.subr.bf16.mxu1 %v11780_v39  ;;  %v11802_v39 = vld [vmem:[#allocation7 + $0x180] ss:$8 sps:$4 sm:$0xff]  }
 0x1fb   :  { %2646 = vmatpush1.bf16.msra.mxu0 %v11730_v30 }
 0x1fc   :  { %2647 = vmatprep.subr.bf16.mxu0 %v11735_v34  ;;  %2687 = vmatpush1.bf16.msra.mxu1 %v11778_v41 }
 0x1fd   :  { %2688 = vmatprep.subr.bf16.mxu1 %v11783_v44 }
 0x1ff   :  { %2648 = vmatpush2.bf16.msra.mxu0 %v11733_v36 }
 0x200   :  { %2649 = vmatprep.subr.bf16.mxu0 %v11738_v38  ;;  %2689 = vmatpush2.bf16.msra.mxu1 %v11781_v46 }
 0x201   :  { %2690 = vmatprep.subr.bf16.mxu1 %v11786_v48 }
 0x203   :  { %2650 = vmatpush2.bf16.msra.mxu0 %v11736_v40 }
 0x204   :  { %2651 = vmatprep.subr.bf16.mxu0 %v11741_v42  ;;  %2691 = vmatpush2.bf16.msra.mxu1 %v11784_v51  ;;  %v11807_v51 = vld [vmem:[#allocation13 + $0xe4] ss:$16 sps:$4 sm:$0xff]  }
 0x205   :  { %2692 = vmatprep.subr.bf16.mxu1 %v11789_v54  ;;  %v11830_v54 = vld [vmem:[#allocation10 + $0x38] sm:$0xff]  }
 0x207   :  { %2652 = vmatpush2.bf16.msra.mxu0 %v11739_v45 }
 0x208   :  { %2653 = vmatprep.subr.bf16.mxu0 %v11744_v47  ;;  %2693 = vmatpush2.bf16.msra.mxu1 %v11787_v56  ;;  %v11835_v56 = vld [vmem:[#allocation10 + $0x30] sm:$0xff]  }
 0x209   :  { %2694 = vmatprep.subr.bf16.mxu1 %v11792_v59  ;;  %v11840_v59 = vld [vmem:[#allocation10 + $0x28] sm:$0xff]  }
 0x20b   :  { %2654 = vmatpush2.bf16.msra.mxu0 %v11742_v50 }
 0x20c   :  { %2655 = vmatprep.subr.bf16.mxu0 %v11747_v52  ;;  %2695 = vmatpush2.bf16.msra.mxu1 %v11790_v2  ;;  %v11829_v52 = vld [vmem:[#allocation10 + $0x78] sm:$0xff]   ;;  %v11845_v2 = vld [vmem:[#allocation10 + $0x20] sm:$0xff]  }
 0x20d   :  { %2696 = vmatprep.subr.bf16.mxu1 %v11795_v5  ;;  %v11850_v5 = vld [vmem:[#allocation10 + $0x18] sm:$0xff]  }
 0x20f   :  { %2656 = vmatpush2.bf16.msra.mxu0 %v11745_v55  ;;  %v11834_v55 = vld [vmem:[#allocation10 + $0x70] sm:$0xff]  }
 0x210   :  { %2657 = vmatprep.subr.bf16.mxu0 %v11750_v58  ;;  %2697 = vmatpush2.bf16.msra.mxu1 %v11793_v9  ;;  %v11839_v58 = vld [vmem:[#allocation10 + $0x68] sm:$0xff]   ;;  %v11855_v9 = vld [vmem:[#allocation10 + $0x10] sm:$0xff]  }
 0x211   :  { %2698 = vmatprep.subr.bf16.mxu1 %v11798_v19 }
 0x213   :  { %2658 = vmatpush2.bf16.msra.mxu0 %v11748_v63  ;;  %v11844_v63 = vld [vmem:[#allocation10 + $0x60] sm:$0xff]  }
 0x214   :  { %2659 = vmatprep.subr.bf16.mxu0 %v11753_v4  ;;  %2699 = vmatpush2.bf16.msra.mxu1 %v11796_v21  ;;  %v11849_v4 = vld [vmem:[#allocation10 + $0x58] sm:$0xff]  }
 0x215   :  { %2700 = vmatprep.subr.bf16.mxu1 %v11801_v28 }
 0x217   :  { %2660 = vmatpush2.bf16.msra.mxu0 %v11751_v8  ;;  %v11854_v8 = vld [vmem:[#allocation10 + $0x50] sm:$0xff]  }
 0x218   :  { %2661 = vmatprep.subr.bf16.mxu0 %v11756_v10  ;;  %2701 = vmatpush2.bf16.msra.mxu1 %v11799_v60  ;;  %v13930_v10 = vsub.s32 2, %v13846_v43 }
 0x219   :  { %2702 = vmatprep.subr.bf16.mxu1 %v11804_v37  ;;  %v11813_v37 = vld [vmem:[#allocation13 + $0xa4] ss:$16 sps:$4 sm:$0xff]  }
 0x21b   :  { %2662 = vmatpush2.bf16.msra.mxu0 %v11754_v13  ;;  %v610_v13 = vrot.slane %v13913_v6, %v13930_v10  ;;  %v11810_v6 = vld [vmem:[#allocation13 + $0xc4] ss:$16 sps:$4 sm:$0xff]  }
 0x21c   :  { %2703 = vmatpush2.bf16.msra.mxu1 %v11802_v39  ;;  %11230 = vmatprep.subr.bf16.mxu0 %v11829_v52  ;;  %v11816_v39 = vld [vmem:[#allocation13 + $0x84] ss:$16 sps:$4 sm:$0xff]  }
 0x21d   :  { %4452 = vmatprep.subr.bf16.mxu1 %v11807_v51  ;;  %v11831_v51 = vld [vmem:[#allocation13 + $0x1e0] ss:$16 sps:$4 sm:$0xff]   ;;  %v11838_v52 = vld [vmem:[#allocation13 + $0x1c4] ss:$16 sps:$4 sm:$0xff]  }
 0x21e   :  { %v2015_v22 = vpop.f32.mrf.mxu0 }
 0x21f   :  { %v2056_v23 = vpop.f32.mrf.mxu1  ;;  %v2016_v25 = vadd.f32 %v2015_v22, %v1975_v20 }
 0x220   :  { %v2017_v26 = vpop.f32.mrf.mxu0 }
 0x221   :  { %v2058_v27 = vpop.f32.mrf.mxu1  ;;  %v2057_v29 = vadd.f32 %v2056_v23, %v2016_v25  ;;  %v2018_v30 = vadd.f32 %v2017_v26, %v1977_v24 }
 0x222   :  { %v2019_v31 = vpop.f32.mrf.mxu0 }
 0x223   :  { %v2060_v0 = vpop.f32.mrf.mxu1  ;;  %v2059_v34 = vadd.f32 %v2058_v27, %v2018_v30  ;;  %v2227_v61 = vmax.f32 %v2057_v29, 0.0 }
 0x224   :  { %v2020_v35 = vpop.f32.mrf.mxu0 }
 0x225   :  { %v2061_v36 = vpop.f32.mrf.mxu1  ;;  %v2228_v38 = vmax.f32 %v2059_v34, 0.0  ;;  %v2296_v40 = vpack.c.bf16 %v2227_v61, %v2227_v61  ;;  %v11805_v34 = vld [vmem:[#allocation13 + $0xe0] ss:$16 sps:$4 sm:$0xff]  }
 0x226   :  { %v11808_v36 = vld [vmem:[#allocation13 + $0xc0] ss:$16 sps:$4 sm:$0xff]  }
 0x227   :  { %v2297_v1 = vpack.c.bf16 %v2228_v38, %v2228_v38  ;;  %v11811_v38 = vld [vmem:[#allocation13 + $0xa0] ss:$16 sps:$4 sm:$0xff]  }
 0x229   :  { %2663 = vmatprep.mubr.bf16.mxu0 %v2297_v1  ;;  %v11814_v1 = vld [vmem:[#allocation13 + $0x80] ss:$16 sps:$4 sm:$0xff]  }
 0x22a   :  { %2664 = vmatmul.mubr.bf16.vlgmr.msra.gmra.mxu0 %v2296_v40  ;;  %v11819_v40 = vld [vmem:[#allocation13 + $0x64] ss:$16 sps:$4 sm:$0xff]  }
 0x22b   :  { %11231 = vmatpush3.bf16.msra.mxu0 %v11830_v54  ;;  %v11836_v54 = vld [vmem:[#allocation13 + $0x1c0] ss:$16 sps:$4 sm:$0xff]  }
 0x22c   :  { %11232 = vmatprep.subr.bf16.mxu0 %v11834_v55  ;;  %v11843_v55 = vld [vmem:[#allocation13 + $0x1a4] ss:$16 sps:$4 sm:$0xff]  }
 0x22f   :  { %11233 = vmatpush3.bf16.msra.mxu0 %v11835_v56  ;;  %v11841_v56 = vld [vmem:[#allocation13 + $0x1a0] ss:$16 sps:$4 sm:$0xff]  }
 0x230   :  { %11234 = vmatprep.subr.bf16.mxu0 %v11839_v58  ;;  %v11848_v58 = vld [vmem:[#allocation13 + $0x184] ss:$16 sps:$4 sm:$0xff]  }
 0x233   :  { %11235 = vmatpush3.bf16.msra.mxu0 %v11840_v59  ;;  %v11846_v59 = vld [vmem:[#allocation13 + $0x180] ss:$16 sps:$4 sm:$0xff]  }
 0x234   :  { %11236 = vmatprep.subr.bf16.mxu0 %v11844_v63  ;;  %v11853_v63 = vld [vmem:[#allocation13 + $0x164] ss:$16 sps:$4 sm:$0xff]  }
 0x237   :  { %11237 = vmatpush3.bf16.msra.mxu0 %v11845_v2  ;;  %v11851_v2 = vld [vmem:[#allocation13 + $0x160] ss:$16 sps:$4 sm:$0xff]  }
 0x238   :  { %11238 = vmatprep.subr.bf16.mxu0 %v11849_v4  ;;  %v11858_v4 = vld [vmem:[#allocation13 + $0x144] ss:$16 sps:$4 sm:$0xff]  }
 0x23b   :  { %11239 = vmatpush3.bf16.msra.mxu0 %v11850_v5  ;;  %v11856_v5 = vld [vmem:[#allocation13 + $0x140] ss:$16 sps:$4 sm:$0xff]  }
 0x23c   :  { %11240 = vmatprep.subr.bf16.mxu0 %v11854_v8  ;;  %v11859_v8 = vld [vmem:[#allocation10 + $0x48] sm:$0xff]  }
 0x23f   :  { %11241 = vmatpush3.bf16.msra.mxu0 %v11855_v9 }
 0x240   :  { %11242 = vmatprep.subr.bf16.mxu0 %v11859_v8  ;;  %v11988_v8 = vld [vmem:[#allocation13 + $0x8c] ss:$16 sps:$4 sm:$0xff]  }
 0x25e   :  { %v2097_v41 = vpop.f32.mrf.mxu0 }
 0x25f   :  { %v2138_v42 = vpop.f32.mrf.mxu1  ;;  %v2098_v15 = vadd.f32 %v2097_v41, %v610_v13  ;;  %v11817_v41 = vld [vmem:[#allocation13 + $0x60] ss:$16 sps:$4 sm:$0xff]   ;;  %v11860_v13 = vld [vmem:[#allocation10 + $0x8] sm:$0xff]  }
 0x260   :  { %v2099_v44 = vpop.f32.mrf.mxu0  ;;  %11243 = vmatpush3.bf16.msra.mxu0 %v11860_v13  ;;  %v11986_v13 = vld [vmem:[#allocation13 + $0x88] ss:$16 sps:$4 sm:$0xff]  }
 0x261   :  { %v2140_v45 = vpop.f32.mrf.mxu1  ;;  %v2100_v18 = vadd.f32 %v2099_v44, %v614_v14  ;;  %v2139_v19 = vadd.f32 %v2138_v42, %v2098_v15  ;;  %v11822_v42 = vld [vmem:[#allocation13 + $0x44] ss:$16 sps:$4 sm:$0xff]   ;;  %v11820_v44 = vld [vmem:[#allocation13 + $0x40] ss:$16 sps:$4 sm:$0xff]  }
 0x262   :  { %v2101_v46 = vpop.f32.mrf.mxu0  ;;  %v11863_v14 = vld [vmem:[#allocation13 + $0x124] ss:$16 sps:$4 sm:$0xff]  }
 0x263   :  { %v2142_v47 = vpop.f32.mrf.mxu1  ;;  %v2141_v22 = vadd.f32 %v2140_v45, %v2100_v18  ;;  %v11825_v45 = vld [vmem:[#allocation13 + $0x24] ss:$16 sps:$4 sm:$0xff]   ;;  %v11823_v46 = vld [vmem:[#allocation13 + $0x20] ss:$16 sps:$4 sm:$0xff]  }
 0x264   :  { %v2102_v48 = vpop.f32.mrf.mxu0  ;;  %v11828_v47 = vld [vmem:[#allocation13 + $0x4] ss:$16 sps:$4 sm:$0xff]   ;;  %v11861_v18 = vld [vmem:[#allocation13 + $0x120] ss:$16 sps:$4 sm:$0xff]  }
 0x265   :  { %v2143_v50 = vpop.f32.mrf.mxu1  ;;  %v11826_v48 = vld [vmem:[#allocation13] ss:$16 sps:$4 sm:$0xff]  }
 0x266   :  { %v11833_v50 = vld [vmem:[#allocation13 + $0x1e4] ss:$16 sps:$4 sm:$0xff]  }
 0x29e   :  { %v2179_v20 = vpop.f32.mrf.mxu0 }
 0x29f   :  { %v2220_v21 = vpop.f32.mrf.mxu1  ;;  %v2180_v23 = vadd.f32 %v2179_v20, %v2139_v19  ;;  %v11864_v19 = vld [vmem:[#allocation10 + $0x40] sm:$0xff]  }
 0x2a0   :  { %v2181_v24 = vpop.f32.mrf.mxu0  ;;  %11244 = vmatprep.subr.bf16.mxu0 %v11864_v19  ;;  %v12000_v19 = vld [vmem:[#allocation13 + $0x4c] ss:$16 sps:$4 sm:$0xff]  }
 0x2a1   :  { %v2222_v25 = vpop.f32.mrf.mxu1  ;;  %v2221_v26 = vadd.f32 %v2220_v21, %v2180_v23  ;;  %v2182_v27 = vadd.f32 %v2181_v24, %v2141_v22  ;;  %v11865_v21 = vld [vmem:[#allocation10] sm:$0xff]  }
 0x2a2   :  { %v2183_v28 = vpop.f32.mrf.mxu0  ;;  %v11868_v22 = vld [vmem:[#allocation13 + $0x104] ss:$16 sps:$4 sm:$0xff]   ;;  %11245 = vmatpush3.bf16.msra.mxu0 %v11865_v21  ;;  %v11866_v24 = vld [vmem:[#allocation13 + $0x100] ss:$16 sps:$4 sm:$0xff]   ;;  %v12006_v21 = vld [vmem:[#allocation13 + $0x2c] ss:$16 sps:$4 sm:$0xff]  }
 0x2a3   :  { %v2224_v43 = vpop.f32.mrf.mxu1  ;;  %v2223_v29 = vadd.f32 %v2222_v25, %v2182_v27  ;;  %v2229_v30 = vmax.f32 %v2221_v26, 0.0  ;;  %v11871_v25 = vld [vmem:[#allocation13 + $0x2e4] ss:$16 sps:$4 sm:$0xff]   ;;  %v11872_v27 = vld [vmem:[#allocation13 + $0x4e0] ss:$16 sps:$4 sm:$0xff]  }
 0x2a4   :  { %v2184_v60 = vpop.f32.mrf.mxu0  ;;  %4493 = vmatprep.subr.bf16.mxu0 %v11871_v25  ;;  %v11874_v26 = vld [vmem:[#allocation13 + $0x4e4] ss:$16 sps:$4 sm:$0xff]   ;;  %v11878_v43 = vld [vmem:[#allocation13 + $0x4c0] ss:$16 sps:$4 sm:$0xff]   ;;  %v12018_v25 = vld [vmem:[#allocation13 + $0x1ec] ss:$16 sps:$4 sm:$0xff]  }
 0x2a5   :  { %v2225_v31 = vpop.f32.mrf.mxu1  ;;  %v2230_v0 = vmax.f32 %v2223_v29, 0.0  ;;  %v2298_v35 = vpack.c.bf16 %v2229_v30, %v2229_v30  ;;  %v11880_v28 = vld [vmem:[#allocation13 + $0x4c4] ss:$16 sps:$4 sm:$0xff]   ;;  %v11884_v30 = vld [vmem:[#allocation13 + $0x4a0] ss:$16 sps:$4 sm:$0xff]  }
 0x2a6   :  { %v11886_v29 = vld [vmem:[#allocation13 + $0x4a4] ss:$16 sps:$4 sm:$0xff]   ;;  %v11890_v31 = vld [vmem:[#allocation13 + $0x480] ss:$16 sps:$4 sm:$0xff]  }
 0x2a7   :  { %v2299_v61 = vpack.c.bf16 %v2230_v0, %v2230_v0  ;;  %v11892_v60 = vld [vmem:[#allocation13 + $0x484] ss:$16 sps:$4 sm:$0xff]  }
 0x2a8   :  { %v11898_v0 = vld [vmem:[#allocation13 + $0x464] ss:$16 sps:$4 sm:$0xff]  }
 0x2a9   :  { %2704 = vmatprep.mubr.bf16.mxu1 %v2299_v61  ;;  %v11902_v61 = vld [vmem:[#allocation13 + $0x440] ss:$16 sps:$4 sm:$0xff]  }
 0x2aa   :  { %2705 = vmatmul.mubr.bf16.vlgmr.msra.gmra.mxu1 %v2298_v35  ;;  %v11910_v35 = vld [vmem:[#allocation13 + $0x424] ss:$16 sps:$4 sm:$0xff]  }
 0x2ab   :  { %4453 = vmatpush1.bf16.msra.mxu1 %v11805_v34  ;;  %4484 = vmatprep.mubr.bf16.mxu1 %v13856_v62  ;;  %v11896_v34 = vld [vmem:[#allocation13 + $0x460] ss:$16 sps:$4 sm:$0xff]  }
 0x2ac   :  { %4454 = vmatprep.subr.bf16.mxu1 %v11810_v6  ;;  %v11904_v6 = vld [vmem:[#allocation13 + $0x444] ss:$16 sps:$4 sm:$0xff]  }
 0x2af   :  { %4455 = vmatpush1.bf16.msra.mxu1 %v11808_v36  ;;  %v11908_v36 = vld [vmem:[#allocation13 + $0x420] ss:$16 sps:$4 sm:$0xff]  }
 0x2b0   :  { %4456 = vmatprep.subr.bf16.mxu1 %v11813_v37  ;;  %v11916_v37 = vld [vmem:[#allocation13 + $0x404] ss:$16 sps:$4 sm:$0xff]  }
 0x2b3   :  { %4457 = vmatpush1.bf16.msra.mxu1 %v11811_v38  ;;  %v11914_v38 = vld [vmem:[#allocation13 + $0x400] ss:$16 sps:$4 sm:$0xff]  }
 0x2b4   :  { %4458 = vmatprep.subr.bf16.mxu1 %v11816_v39  ;;  %v11922_v39 = vld [vmem:[#allocation13 + $0x5e4] ss:$16 sps:$4 sm:$0xff]  }
 0x2b7   :  { %4459 = vmatpush1.bf16.msra.mxu1 %v11814_v1  ;;  %v11920_v1 = vld [vmem:[#allocation13 + $0x5e0] ss:$16 sps:$4 sm:$0xff]  }
 0x2b8   :  { %4460 = vmatprep.subr.bf16.mxu1 %v11819_v40  ;;  %v11928_v40 = vld [vmem:[#allocation13 + $0x5c4] ss:$16 sps:$4 sm:$0xff]  }
 0x2bb   :  { %4461 = vmatpush1.bf16.msra.mxu1 %v11817_v41  ;;  %v11926_v41 = vld [vmem:[#allocation13 + $0x5c0] ss:$16 sps:$4 sm:$0xff]  }
 0x2bc   :  { %4462 = vmatprep.subr.bf16.mxu1 %v11822_v42  ;;  %v11934_v42 = vld [vmem:[#allocation13 + $0x5a4] ss:$16 sps:$4 sm:$0xff]  }
 0x2bf   :  { %4463 = vmatpush1.bf16.msra.mxu1 %v11820_v44  ;;  %v11932_v44 = vld [vmem:[#allocation13 + $0x5a0] ss:$16 sps:$4 sm:$0xff]  }
 0x2c0   :  { %4464 = vmatprep.subr.bf16.mxu1 %v11825_v45  ;;  %v11940_v45 = vld [vmem:[#allocation13 + $0x584] ss:$16 sps:$4 sm:$0xff]  }
 0x2c3   :  { %4465 = vmatpush1.bf16.msra.mxu1 %v11823_v46  ;;  %v11938_v46 = vld [vmem:[#allocation13 + $0x580] ss:$16 sps:$4 sm:$0xff]  }
 0x2c4   :  { %4466 = vmatprep.subr.bf16.mxu1 %v11828_v47  ;;  %v11946_v47 = vld [vmem:[#allocation13 + $0x564] ss:$16 sps:$4 sm:$0xff]  }
 0x2c7   :  { %4467 = vmatpush1.bf16.msra.mxu1 %v11826_v48  ;;  %v11944_v48 = vld [vmem:[#allocation13 + $0x560] ss:$16 sps:$4 sm:$0xff]  }
 0x2c8   :  { %4468 = vmatprep.subr.bf16.mxu1 %v11833_v50  ;;  %v11952_v50 = vld [vmem:[#allocation13 + $0x544] ss:$16 sps:$4 sm:$0xff]  }
 0x2cb   :  { %4469 = vmatpush2.bf16.msra.mxu1 %v11831_v51  ;;  %v11950_v51 = vld [vmem:[#allocation13 + $0x540] ss:$16 sps:$4 sm:$0xff]  }
 0x2cc   :  { %4470 = vmatprep.subr.bf16.mxu1 %v11838_v52  ;;  %v11958_v52 = vld [vmem:[#allocation13 + $0x524] ss:$16 sps:$4 sm:$0xff]  }
 0x2cf   :  { %4471 = vmatpush2.bf16.msra.mxu1 %v11836_v54  ;;  %v11956_v54 = vld [vmem:[#allocation13 + $0x520] ss:$16 sps:$4 sm:$0xff]  }
 0x2d0   :  { %4472 = vmatprep.subr.bf16.mxu1 %v11843_v55  ;;  %v11964_v55 = vld [vmem:[#allocation13 + $0x504] ss:$16 sps:$4 sm:$0xff]  }
 0x2d3   :  { %4473 = vmatpush2.bf16.msra.mxu1 %v11841_v56  ;;  %v11962_v56 = vld [vmem:[#allocation13 + $0x500] ss:$16 sps:$4 sm:$0xff]  }
 0x2d4   :  { %4474 = vmatprep.subr.bf16.mxu1 %v11848_v58  ;;  %v11970_v58 = vld [vmem:[#allocation13 + $0xec] ss:$16 sps:$4 sm:$0xff]  }
 0x2d7   :  { %4475 = vmatpush2.bf16.msra.mxu1 %v11846_v59  ;;  %v11968_v59 = vld [vmem:[#allocation13 + $0xe8] ss:$16 sps:$4 sm:$0xff]  }
 0x2d8   :  { %4476 = vmatprep.subr.bf16.mxu1 %v11853_v63  ;;  %v11976_v63 = vld [vmem:[#allocation13 + $0xcc] ss:$16 sps:$4 sm:$0xff]  }
 0x2db   :  { %4477 = vmatpush2.bf16.msra.mxu1 %v11851_v2  ;;  %v11974_v2 = vld [vmem:[#allocation13 + $0xc8] ss:$16 sps:$4 sm:$0xff]  }
 0x2dc   :  { %4478 = vmatprep.subr.bf16.mxu1 %v11858_v4  ;;  %v11982_v4 = vld [vmem:[#allocation13 + $0xac] ss:$16 sps:$4 sm:$0xff]  }
 0x2df   :  { %4479 = vmatpush2.bf16.msra.mxu1 %v11856_v5  ;;  %v11980_v5 = vld [vmem:[#allocation13 + $0xa8] ss:$16 sps:$4 sm:$0xff]  }
 0x2e0   :  { %4480 = vmatprep.subr.bf16.mxu1 %v11863_v14  ;;  %v11994_v14 = vld [vmem:[#allocation13 + $0x6c] ss:$16 sps:$4 sm:$0xff]  }
 0x2e3   :  { %4481 = vmatpush2.bf16.msra.mxu1 %v11861_v18  ;;  %v11992_v18 = vld [vmem:[#allocation13 + $0x68] ss:$16 sps:$4 sm:$0xff]  }
 0x2e4   :  { %4482 = vmatprep.subr.bf16.mxu1 %v11868_v22  ;;  %v12004_v22 = vld [vmem:[#allocation13 + $0x28] ss:$16 sps:$4 sm:$0xff]  }
 0x2e7   :  { %4483 = vmatpush2.bf16.msra.mxu1 %v11866_v24  ;;  %v12010_v24 = vld [vmem:[#allocation13 + $0x8] ss:$16 sps:$4 sm:$0xff]  }
 0x2e8   :  { %4534 = vmatprep.subr.bf16.mxu1 %v11874_v26  ;;  %v12016_v26 = vld [vmem:[#allocation13 + $0x1e8] ss:$16 sps:$4 sm:$0xff]  }
 0x2ea   :  { %v13940_v9 = vpop.f32.mrf.mxu0  ;;  %4485 = vmatmul.mubr.bf16.vlgmr.msra.gmra.mxu1 %v13862_v16 }
 0x2eb   :  { %4566 = vmatprep.mubr.bf16.mxu1 %v13879_v53  ;;  %4535 = vmatpush1.bf16.msra.mxu1 %v11872_v27  ;;  %v12024_v27 = vld [vmem:[#allocation13 + $0x1cc] ss:$16 sps:$4 sm:$0xff]  }
 0x2ec   :  { %v13942_v15 = vpop.f32.mrf.mxu0  ;;  %4536 = vmatprep.subr.bf16.mxu1 %v11880_v28  ;;  %v12022_v28 = vld [vmem:[#allocation13 + $0x1c8] ss:$16 sps:$4 sm:$0xff]  }
 0x2ee   :  { %v2669_v20 = vpop.f32.mrf.mxu0 }
 0x2ef   :  { %4537 = vmatpush1.bf16.msra.mxu1 %v11878_v43  ;;  %v11998_v20 = vld [vmem:[#allocation13 + $0x48] ss:$16 sps:$4 sm:$0xff]   ;;  %v12030_v43 = vld [vmem:[#allocation13 + $0x1ac] ss:$16 sps:$4 sm:$0xff]  }
 0x2f0   :  { %v2670_v23 = vpop.f32.mrf.mxu0  ;;  %4538 = vmatprep.subr.bf16.mxu1 %v11886_v29  ;;  %v12028_v29 = vld [vmem:[#allocation13 + $0x1a8] ss:$16 sps:$4 sm:$0xff]  }
 0x2f1   :  { %v12012_v23 = vld [vmem:[#allocation13 + $0xc] ss:$16 sps:$4 sm:$0xff]  }
 0x2f3   :  { %4539 = vmatpush1.bf16.msra.mxu1 %v11884_v30  ;;  %v12036_v30 = vld [vmem:[#allocation13 + $0x18c] ss:$16 sps:$4 sm:$0xff]  }
 0x2f4   :  { %4540 = vmatprep.subr.bf16.mxu1 %v11892_v60  ;;  %v12034_v60 = vld [vmem:[#allocation13 + $0x188] ss:$16 sps:$4 sm:$0xff]  }
 0x2f7   :  { %4541 = vmatpush1.bf16.msra.mxu1 %v11890_v31  ;;  %v2295_v31 = vld [vmem:[#allocation8] sm:$0x3] }
 0x2f8   :  { %4542 = vmatprep.subr.bf16.mxu1 %v11898_v0  ;;  %v12042_v0 = vld [vmem:[#allocation13 + $0x16c] ss:$16 sps:$4 sm:$0xff]  }
 0x2fb   :  { %4543 = vmatpush1.bf16.msra.mxu1 %v11896_v34  ;;  %v2304_v34 = vrot.slane %v2295_v31, %v13916_v7 }
 0x2fc   :  { %4544 = vmatprep.subr.bf16.mxu1 %v11904_v6  ;;  %v12040_v6 = vld [vmem:[#allocation13 + $0x168] ss:$16 sps:$4 sm:$0xff]  }
 0x2ff   :  { %4545 = vmatpush1.bf16.msra.mxu1 %v11902_v61  ;;  %v2308_v61 = vrot.slane %v2295_v31, %v13919_v11  ;;  %v12100_v31 = vld [vmem:[#allocation13 + $0x428] ss:$16 sps:$4 sm:$0xff]  }
 0x300   :  { %4546 = vmatprep.subr.bf16.mxu1 %v11910_v35  ;;  %v12048_v35 = vld [vmem:[#allocation13 + $0x14c] ss:$16 sps:$4 sm:$0xff]  }
 0x303   :  { %4547 = vmatpush1.bf16.msra.mxu1 %v11908_v36  ;;  %v2666_v36 = vadd.f32 %v13940_v9, %v2304_v34  ;;  %v11869_v9 = vld [vmem:[#allocation13 + $0x2e0] ss:$16 sps:$4 sm:$0xff]   ;;  %v12108_v34 = vld [vmem:[#allocation13 + $0x40c] ss:$16 sps:$4 sm:$0xff]  }
 0x304   :  { %4548 = vmatprep.subr.bf16.mxu1 %v11916_v37  ;;  %v12046_v37 = vld [vmem:[#allocation13 + $0x148] ss:$16 sps:$4 sm:$0xff]  }
 0x307   :  { %4549 = vmatpush1.bf16.msra.mxu1 %v11914_v38 }
 0x308   :  { %4550 = vmatprep.subr.bf16.mxu1 %v11922_v39  ;;  %v2668_v39 = vadd.f32 %v13942_v15, %v2308_v61  ;;  %v12066_v15 = vld [vmem:[#allocation13 + $0x4ec] ss:$16 sps:$4 sm:$0xff]   ;;  %v12106_v61 = vld [vmem:[#allocation13 + $0x408] ss:$16 sps:$4 sm:$0xff]  }
 0x30b   :  { %4551 = vmatpush2.bf16.msra.mxu1 %v11920_v1 }
 0x30c   :  { %4552 = vmatprep.subr.bf16.mxu1 %v11928_v40 }
 0x30f   :  { %4553 = vmatpush2.bf16.msra.mxu1 %v11926_v41  ;;  %v12054_v41 = vld [vmem:[#allocation13 + $0x12c] ss:$16 sps:$4 sm:$0xff]  }
 0x310   :  { %4554 = vmatprep.subr.bf16.mxu1 %v11934_v42 }
 0x313   :  { %4555 = vmatpush2.bf16.msra.mxu1 %v11932_v44  ;;  %v12052_v44 = vld [vmem:[#allocation13 + $0x128] ss:$16 sps:$4 sm:$0xff]  }
 0x314   :  { %4556 = vmatprep.subr.bf16.mxu1 %v11940_v45 }
 0x317   :  { %4557 = vmatpush2.bf16.msra.mxu1 %v11938_v46 }
 0x318   :  { %4558 = vmatprep.subr.bf16.mxu1 %v11946_v47 }
 0x31b   :  { %4559 = vmatpush2.bf16.msra.mxu1 %v11944_v48 }
 0x31c   :  { %4560 = vmatprep.subr.bf16.mxu1 %v11952_v50  ;;  %v12060_v50 = vld [vmem:[#allocation13 + $0x10c] ss:$16 sps:$4 sm:$0xff]  }
 0x31f   :  { %4561 = vmatpush2.bf16.msra.mxu1 %v11950_v51 }
 0x320   :  { %4562 = vmatprep.subr.bf16.mxu1 %v11958_v52  ;;  %v12058_v52 = vld [vmem:[#allocation13 + $0x108] ss:$16 sps:$4 sm:$0xff]  }
 0x323   :  { %4563 = vmatpush2.bf16.msra.mxu1 %v11956_v54 }
 0x324   :  { %4564 = vmatprep.subr.bf16.mxu1 %v11964_v55  ;;  %v11877_v55 = vld [vmem:[#allocation13 + $0x2c4] ss:$16 sps:$4 sm:$0xff]  }
 0x327   :  { %4565 = vmatpush2.bf16.msra.mxu1 %v11962_v56  ;;  %v11875_v56 = vld [vmem:[#allocation13 + $0x2c0] ss:$16 sps:$4 sm:$0xff]  }
 0x328   :  { %4616 = vmatprep.subr.bf16.mxu1 %v11970_v58  ;;  %v12064_v58 = vld [vmem:[#allocation13 + $0x4e8] ss:$16 sps:$4 sm:$0xff]  }
 0x32a   :  { %4567 = vmatmul.mubr.bf16.vlgmr.msra.gmra.mxu1 %v13889_v32 }
 0x32b   :  { %4617 = vmatpush1.bf16.msra.mxu1 %v11968_v59  ;;  %4648 = vmatprep.mubr.bf16.mxu1 %v13856_v62  ;;  %v11883_v59 = vld [vmem:[#allocation13 + $0x2a4] ss:$16 sps:$4 sm:$0xff]  }
 0x32c   :  { %4618 = vmatprep.subr.bf16.mxu1 %v11976_v63  ;;  %v12072_v63 = vld [vmem:[#allocation13 + $0x4cc] ss:$16 sps:$4 sm:$0xff]  }
 0x32f   :  { %4619 = vmatpush1.bf16.msra.mxu1 %v11974_v2  ;;  %v11881_v2 = vld [vmem:[#allocation13 + $0x2a0] ss:$16 sps:$4 sm:$0xff]  }
 0x330   :  { %4620 = vmatprep.subr.bf16.mxu1 %v11982_v4  ;;  %v12070_v4 = vld [vmem:[#allocation13 + $0x4c8] ss:$16 sps:$4 sm:$0xff]  }
 0x333   :  { %4621 = vmatpush1.bf16.msra.mxu1 %v11980_v5  ;;  %v11889_v5 = vld [vmem:[#allocation13 + $0x284] ss:$16 sps:$4 sm:$0xff]  }
 0x334   :  { %4622 = vmatprep.subr.bf16.mxu1 %v11988_v8  ;;  %v12078_v8 = vld [vmem:[#allocation13 + $0x4ac] ss:$16 sps:$4 sm:$0xff]  }
 0x337   :  { %4623 = vmatpush1.bf16.msra.mxu1 %v11986_v13  ;;  %v11887_v13 = vld [vmem:[#allocation13 + $0x280] ss:$16 sps:$4 sm:$0xff]  }
 0x338   :  { %4624 = vmatprep.subr.bf16.mxu1 %v11994_v14  ;;  %v12076_v14 = vld [vmem:[#allocation13 + $0x4a8] ss:$16 sps:$4 sm:$0xff]  }
 0x33b   :  { %4625 = vmatpush1.bf16.msra.mxu1 %v11992_v18  ;;  %v11895_v18 = vld [vmem:[#allocation13 + $0x264] ss:$16 sps:$4 sm:$0xff]  }
 0x33c   :  { %4626 = vmatprep.subr.bf16.mxu1 %v12000_v19  ;;  %v12084_v19 = vld [vmem:[#allocation13 + $0x48c] ss:$16 sps:$4 sm:$0xff]  }
 0x33f   :  { %4627 = vmatpush1.bf16.msra.mxu1 %v11998_v20  ;;  %v11893_v20 = vld [vmem:[#allocation13 + $0x260] ss:$16 sps:$4 sm:$0xff]  }
 0x340   :  { %4628 = vmatprep.subr.bf16.mxu1 %v12006_v21  ;;  %v12082_v21 = vld [vmem:[#allocation13 + $0x488] ss:$16 sps:$4 sm:$0xff]  }
 0x343   :  { %4629 = vmatpush1.bf16.msra.mxu1 %v12004_v22  ;;  %v11901_v22 = vld [vmem:[#allocation13 + $0x244] ss:$16 sps:$4 sm:$0xff]  }
 0x344   :  { %4630 = vmatprep.subr.bf16.mxu1 %v12012_v23  ;;  %v12090_v23 = vld [vmem:[#allocation13 + $0x46c] ss:$16 sps:$4 sm:$0xff]  }
 0x347   :  { %4631 = vmatpush1.bf16.msra.mxu1 %v12010_v24  ;;  %v11899_v24 = vld [vmem:[#allocation13 + $0x240] ss:$16 sps:$4 sm:$0xff]  }
 0x348   :  { %4632 = vmatprep.subr.bf16.mxu1 %v12018_v25  ;;  %v12088_v25 = vld [vmem:[#allocation13 + $0x468] ss:$16 sps:$4 sm:$0xff]  }
 0x34b   :  { %4633 = vmatpush2.bf16.msra.mxu1 %v12016_v26  ;;  %v11907_v26 = vld [vmem:[#allocation13 + $0x224] ss:$16 sps:$4 sm:$0xff]  }
 0x34c   :  { %4634 = vmatprep.subr.bf16.mxu1 %v12024_v27  ;;  %v12096_v27 = vld [vmem:[#allocation13 + $0x44c] ss:$16 sps:$4 sm:$0xff]  }
 0x34f   :  { %4635 = vmatpush2.bf16.msra.mxu1 %v12022_v28  ;;  %v11905_v28 = vld [vmem:[#allocation13 + $0x220] ss:$16 sps:$4 sm:$0xff]  }
 0x350   :  { %4636 = vmatprep.subr.bf16.mxu1 %v12030_v43  ;;  %v12094_v43 = vld [vmem:[#allocation13 + $0x448] ss:$16 sps:$4 sm:$0xff]  }
 0x353   :  { %4637 = vmatpush2.bf16.msra.mxu1 %v12028_v29  ;;  %v11913_v29 = vld [vmem:[#allocation13 + $0x204] ss:$16 sps:$4 sm:$0xff]  }
 0x354   :  { %4638 = vmatprep.subr.bf16.mxu1 %v12036_v30  ;;  %v12102_v30 = vld [vmem:[#allocation13 + $0x42c] ss:$16 sps:$4 sm:$0xff]  }
 0x357   :  { %4639 = vmatpush2.bf16.msra.mxu1 %v12034_v60  ;;  %v11911_v60 = vld [vmem:[#allocation13 + $0x200] ss:$16 sps:$4 sm:$0xff]  }
 0x358   :  { %4640 = vmatprep.subr.bf16.mxu1 %v12042_v0  ;;  %v11919_v0 = vld [vmem:[#allocation13 + $0x3e4] ss:$16 sps:$4 sm:$0xff]  }
 0x35b   :  { %4641 = vmatpush2.bf16.msra.mxu1 %v12040_v6  ;;  %v11917_v6 = vld [vmem:[#allocation13 + $0x3e0] ss:$16 sps:$4 sm:$0xff]  }
 0x35c   :  { %4642 = vmatprep.subr.bf16.mxu1 %v12048_v35  ;;  %v11925_v35 = vld [vmem:[#allocation13 + $0x3c4] ss:$16 sps:$4 sm:$0xff]  }
 0x35f   :  { %4643 = vmatpush2.bf16.msra.mxu1 %v12046_v37  ;;  %v11923_v37 = vld [vmem:[#allocation13 + $0x3c0] ss:$16 sps:$4 sm:$0xff]  }
 0x360   :  { %4644 = vmatprep.subr.bf16.mxu1 %v12054_v41  ;;  %v12118_v41 = vld [vmem:[#allocation13 + $0x5c8] ss:$16 sps:$4 sm:$0xff]  }
 0x363   :  { %4645 = vmatpush2.bf16.msra.mxu1 %v12052_v44  ;;  %v12126_v44 = vld [vmem:[#allocation13 + $0x5ac] ss:$16 sps:$4 sm:$0xff]  }
 0x364   :  { %4646 = vmatprep.subr.bf16.mxu1 %v12060_v50  ;;  %v11941_v50 = vld [vmem:[#allocation13 + $0x360] ss:$16 sps:$4 sm:$0xff]  }
 0x367   :  { %4647 = vmatpush2.bf16.msra.mxu1 %v12058_v52  ;;  %v12138_v52 = vld [vmem:[#allocation13 + $0x56c] ss:$16 sps:$4 sm:$0xff]  }
 0x368   :  { %4698 = vmatprep.subr.bf16.mxu1 %v12066_v15  ;;  %v11955_v15 = vld [vmem:[#allocation13 + $0x324] ss:$16 sps:$4 sm:$0xff]  }
 0x36a   :  { %v2706_v38 = vpop.f32.mrf.mxu1  ;;  %4649 = vmatmul.mubr.bf16.vlgmr.msra.gmra.mxu1 %v13862_v16 }
 0x36b   :  { %v2707_v1 = vadd.f32 %v2706_v38, %v2666_v36  ;;  %4699 = vmatpush1.bf16.msra.mxu1 %v12064_v58  ;;  %4730 = vmatprep.mubr.bf16.mxu1 %v13879_v53  ;;  %v12114_v36 = vld [vmem:[#allocation13 + $0x5ec] ss:$16 sps:$4 sm:$0xff]   ;;  %v12112_v38 = vld [vmem:[#allocation13 + $0x5e8] ss:$16 sps:$4 sm:$0xff]   ;;  %v11953_v58 = vld [vmem:[#allocation13 + $0x320] ss:$16 sps:$4 sm:$0xff]  }
 0x36c   :  { %v2708_v40 = vpop.f32.mrf.mxu1  ;;  %4700 = vmatprep.subr.bf16.mxu1 %v12072_v63  ;;  %v11961_v63 = vld [vmem:[#allocation13 + $0x304] ss:$16 sps:$4 sm:$0xff]  }
 0x36d   :  { %v2709_v42 = vadd.f32 %v2708_v40, %v2668_v39  ;;  %v2713_v45 = vmax.f32 %v2707_v1, 0.0  ;;  %v11931_v39 = vld [vmem:[#allocation13 + $0x3a4] ss:$16 sps:$4 sm:$0xff]   ;;  %v12120_v1 = vld [vmem:[#allocation13 + $0x5cc] ss:$16 sps:$4 sm:$0xff]  }
 0x36e   :  { %v2710_v46 = vpop.f32.mrf.mxu1  ;;  %v11929_v40 = vld [vmem:[#allocation13 + $0x3a0] ss:$16 sps:$4 sm:$0xff]  }
 0x36f   :  { %v2714_v47 = vmax.f32 %v2709_v42, 0.0  ;;  %v2748_v54 = vpack.c.bf16 %v2713_v45, %v2713_v45  ;;  %4701 = vmatpush1.bf16.msra.mxu1 %v12070_v4  ;;  %v11937_v42 = vld [vmem:[#allocation13 + $0x384] ss:$16 sps:$4 sm:$0xff]   ;;  %v11935_v45 = vld [vmem:[#allocation13 + $0x380] ss:$16 sps:$4 sm:$0xff]  }
 0x370   :  { %v2711_v48 = vpop.f32.mrf.mxu1  ;;  %4702 = vmatprep.subr.bf16.mxu1 %v12078_v8  ;;  %v12124_v46 = vld [vmem:[#allocation13 + $0x5a8] ss:$16 sps:$4 sm:$0xff]   ;;  %v11959_v4 = vld [vmem:[#allocation13 + $0x300] ss:$16 sps:$4 sm:$0xff]   ;;  %v11967_v8 = vld [vmem:[#allocation13 + $0x6e4] ss:$16 sps:$4 sm:$0xff]  }
 0x371   :  { %v2749_v51 = vpack.c.bf16 %v2714_v47, %v2714_v47  ;;  %v11943_v47 = vld [vmem:[#allocation13 + $0x364] ss:$16 sps:$4 sm:$0xff]   ;;  %v12132_v48 = vld [vmem:[#allocation13 + $0x58c] ss:$16 sps:$4 sm:$0xff]  }
 0x373   :  { %2884 = vmatprep.mubr.bf16.mxu0 %v2749_v51  ;;  %4703 = vmatpush1.bf16.msra.mxu1 %v12076_v14  ;;  %v12130_v51 = vld [vmem:[#allocation13 + $0x588] ss:$16 sps:$4 sm:$0xff]   ;;  %v11965_v14 = vld [vmem:[#allocation13 + $0x6e0] ss:$16 sps:$4 sm:$0xff]  }
 0x374   :  { %2885 = vmatmul.mubr.bf16.vlgmr.msra.gmra.mxu0 %v2748_v54  ;;  %4704 = vmatprep.subr.bf16.mxu1 %v12084_v19  ;;  %v11947_v54 = vld [vmem:[#allocation13 + $0x340] ss:$16 sps:$4 sm:$0xff]   ;;  %v11973_v19 = vld [vmem:[#allocation13 + $0x6c4] ss:$16 sps:$4 sm:$0xff]  }
 0x375   :  { %4494 = vmatpush1.bf16.msra.mxu0 %v11869_v9  ;;  %4525 = vmatprep.mubr.bf16.mxu0 %v13858_v3  ;;  %v11949_v9 = vld [vmem:[#allocation13 + $0x344] ss:$16 sps:$4 sm:$0xff]  }
 0x376   :  { %4495 = vmatprep.subr.bf16.mxu0 %v11877_v55  ;;  %v12136_v55 = vld [vmem:[#allocation13 + $0x568] ss:$16 sps:$4 sm:$0xff]  }
 0x377   :  { %4705 = vmatpush1.bf16.msra.mxu1 %v12082_v21  ;;  %v11979_v21 = vld [vmem:[#allocation13 + $0x6a4] ss:$16 sps:$4 sm:$0xff]  }
 0x378   :  { %4706 = vmatprep.subr.bf16.mxu1 %v12090_v23  ;;  %v11985_v23 = vld [vmem:[#allocation13 + $0x684] ss:$16 sps:$4 sm:$0xff]  }
 0x379   :  { %4496 = vmatpush1.bf16.msra.mxu0 %v11875_v56  ;;  %v12144_v56 = vld [vmem:[#allocation13 + $0x54c] ss:$16 sps:$4 sm:$0xff]  }
 0x37a   :  { %4497 = vmatprep.subr.bf16.mxu0 %v11883_v59  ;;  %v12142_v59 = vld [vmem:[#allocation13 + $0x548] ss:$16 sps:$4 sm:$0xff]  }
 0x37b   :  { %4707 = vmatpush1.bf16.msra.mxu1 %v12088_v25  ;;  %v11991_v25 = vld [vmem:[#allocation13 + $0x664] ss:$16 sps:$4 sm:$0xff]  }
 0x37c   :  { %4708 = vmatprep.subr.bf16.mxu1 %v12096_v27  ;;  %v11997_v27 = vld [vmem:[#allocation13 + $0x644] ss:$16 sps:$4 sm:$0xff]  }
 0x37d   :  { %4498 = vmatpush1.bf16.msra.mxu0 %v11881_v2  ;;  %v12150_v2 = vld [vmem:[#allocation13 + $0x52c] ss:$16 sps:$4 sm:$0xff]  }
 0x37e   :  { %4499 = vmatprep.subr.bf16.mxu0 %v11889_v5  ;;  %v12148_v5 = vld [vmem:[#allocation13 + $0x528] ss:$16 sps:$4 sm:$0xff]  }
 0x37f   :  { %4709 = vmatpush1.bf16.msra.mxu1 %v12094_v43  ;;  %v12003_v43 = vld [vmem:[#allocation13 + $0x624] ss:$16 sps:$4 sm:$0xff]  }
 0x380   :  { %4710 = vmatprep.subr.bf16.mxu1 %v12102_v30  ;;  %v12009_v30 = vld [vmem:[#allocation13 + $0x604] ss:$16 sps:$4 sm:$0xff]  }
 0x381   :  { %4500 = vmatpush1.bf16.msra.mxu0 %v11887_v13  ;;  %v12156_v13 = vld [vmem:[#allocation13 + $0x50c] ss:$16 sps:$4 sm:$0xff]  }
 0x382   :  { %4501 = vmatprep.subr.bf16.mxu0 %v11895_v18  ;;  %v12154_v18 = vld [vmem:[#allocation13 + $0x508] ss:$16 sps:$4 sm:$0xff]  }
 0x383   :  { %4711 = vmatpush1.bf16.msra.mxu1 %v12100_v31  ;;  %v12015_v31 = vld [vmem:[#allocation13 + $0x7e4] ss:$16 sps:$4 sm:$0xff]  }
 0x384   :  { %4712 = vmatprep.subr.bf16.mxu1 %v12108_v34  ;;  %v12021_v34 = vld [vmem:[#allocation13 + $0x7c4] ss:$16 sps:$4 sm:$0xff]  }
 0x385   :  { %4502 = vmatpush1.bf16.msra.mxu0 %v11893_v20  ;;  %v11971_v20 = vld [vmem:[#allocation13 + $0x6c0] ss:$16 sps:$4 sm:$0xff]  }
 0x386   :  { %4503 = vmatprep.subr.bf16.mxu0 %v11901_v22  ;;  %v11977_v22 = vld [vmem:[#allocation13 + $0x6a0] ss:$16 sps:$4 sm:$0xff]  }
 0x387   :  { %4713 = vmatpush1.bf16.msra.mxu1 %v12106_v61  ;;  %v12027_v61 = vld [vmem:[#allocation13 + $0x7a4] ss:$16 sps:$4 sm:$0xff]  }
 0x388   :  { %4714 = vmatprep.subr.bf16.mxu1 %v12114_v36  ;;  %v12033_v36 = vld [vmem:[#allocation13 + $0x784] ss:$16 sps:$4 sm:$0xff]  }
 0x389   :  { %4504 = vmatpush1.bf16.msra.mxu0 %v11899_v24  ;;  %v11983_v24 = vld [vmem:[#allocation13 + $0x680] ss:$16 sps:$4 sm:$0xff]  }
 0x38a   :  { %4505 = vmatprep.subr.bf16.mxu0 %v11907_v26  ;;  %v11989_v26 = vld [vmem:[#allocation13 + $0x660] ss:$16 sps:$4 sm:$0xff]  }
 0x38b   :  { %4715 = vmatpush2.bf16.msra.mxu1 %v12112_v38  ;;  %v12039_v38 = vld [vmem:[#allocation13 + $0x764] ss:$16 sps:$4 sm:$0xff]  }
 0x38c   :  { %4716 = vmatprep.subr.bf16.mxu1 %v12120_v1  ;;  %v12045_v1 = vld [vmem:[#allocation13 + $0x744] ss:$16 sps:$4 sm:$0xff]  }
 0x38d   :  { %4506 = vmatpush1.bf16.msra.mxu0 %v11905_v28  ;;  %v11995_v28 = vld [vmem:[#allocation13 + $0x640] ss:$16 sps:$4 sm:$0xff]  }
 0x38e   :  { %4507 = vmatprep.subr.bf16.mxu0 %v11913_v29  ;;  %v12001_v29 = vld [vmem:[#allocation13 + $0x620] ss:$16 sps:$4 sm:$0xff]  }
 0x38f   :  { %4717 = vmatpush2.bf16.msra.mxu1 %v12118_v41  ;;  %v12051_v41 = vld [vmem:[#allocation13 + $0x724] ss:$16 sps:$4 sm:$0xff]  }
 0x390   :  { %4718 = vmatprep.subr.bf16.mxu1 %v12126_v44  ;;  %v12057_v44 = vld [vmem:[#allocation13 + $0x704] ss:$16 sps:$4 sm:$0xff]  }
 0x391   :  { %4508 = vmatpush1.bf16.msra.mxu0 %v11911_v60  ;;  %v12007_v60 = vld [vmem:[#allocation13 + $0x600] ss:$16 sps:$4 sm:$0xff]  }
 0x392   :  { %4509 = vmatprep.subr.bf16.mxu0 %v11919_v0  ;;  %v12013_v0 = vld [vmem:[#allocation13 + $0x7e0] ss:$16 sps:$4 sm:$0xff]  }
 0x393   :  { %4719 = vmatpush2.bf16.msra.mxu1 %v12124_v46  ;;  %v12055_v46 = vld [vmem:[#allocation13 + $0x700] ss:$16 sps:$4 sm:$0xff]  }
 0x394   :  { %4720 = vmatprep.subr.bf16.mxu1 %v12132_v48  ;;  %v12063_v48 = vld [vmem:[#allocation13 + $0x2ec] ss:$16 sps:$4 sm:$0xff]  }
 0x395   :  { %4510 = vmatpush2.bf16.msra.mxu0 %v11917_v6  ;;  %v12019_v6 = vld [vmem:[#allocation13 + $0x7c0] ss:$16 sps:$4 sm:$0xff]  }
 0x396   :  { %4511 = vmatprep.subr.bf16.mxu0 %v11925_v35  ;;  %v12025_v35 = vld [vmem:[#allocation13 + $0x7a0] ss:$16 sps:$4 sm:$0xff]  }
 0x397   :  { %4721 = vmatpush2.bf16.msra.mxu1 %v12130_v51  ;;  %v12061_v51 = vld [vmem:[#allocation13 + $0x2e8] ss:$16 sps:$4 sm:$0xff]  }
 0x398   :  { %4722 = vmatprep.subr.bf16.mxu1 %v12138_v52  ;;  %v12069_v52 = vld [vmem:[#allocation13 + $0x2cc] ss:$16 sps:$4 sm:$0xff]  }
 0x399   :  { %4512 = vmatpush2.bf16.msra.mxu0 %v11923_v37  ;;  %v12031_v37 = vld [vmem:[#allocation13 + $0x780] ss:$16 sps:$4 sm:$0xff]  }
 0x39a   :  { %4513 = vmatprep.subr.bf16.mxu0 %v11931_v39  ;;  %v12037_v39 = vld [vmem:[#allocation13 + $0x760] ss:$16 sps:$4 sm:$0xff]  }
 0x39b   :  { %4723 = vmatpush2.bf16.msra.mxu1 %v12136_v55  ;;  %v12075_v55 = vld [vmem:[#allocation13 + $0x2ac] ss:$16 sps:$4 sm:$0xff]  }
 0x39c   :  { %4724 = vmatprep.subr.bf16.mxu1 %v12144_v56 }
 0x39d   :  { %4514 = vmatpush2.bf16.msra.mxu0 %v11929_v40  ;;  %v12043_v40 = vld [vmem:[#allocation13 + $0x740] ss:$16 sps:$4 sm:$0xff]  }
 0x39e   :  { %4515 = vmatprep.subr.bf16.mxu0 %v11937_v42  ;;  %v12049_v42 = vld [vmem:[#allocation13 + $0x720] ss:$16 sps:$4 sm:$0xff]  }
 0x39f   :  { %4725 = vmatpush2.bf16.msra.mxu1 %v12142_v59  ;;  %v12081_v59 = vld [vmem:[#allocation13 + $0x28c] ss:$16 sps:$4 sm:$0xff]  }
 0x3a0   :  { %4726 = vmatprep.subr.bf16.mxu1 %v12150_v2  ;;  %v12207_v2 = vld [vmem:[#allocation16 + $0x74] ss:$8 sps:$4 sm:$0xff]  }
 0x3a1   :  { %4516 = vmatpush2.bf16.msra.mxu0 %v11935_v45 }
 0x3a2   :  { %4517 = vmatprep.subr.bf16.mxu0 %v11943_v47 }
 0x3a3   :  { %4727 = vmatpush2.bf16.msra.mxu1 %v12148_v5  ;;  %v12210_v5 = vld [vmem:[#allocation16 + $0x64] ss:$8 sps:$4 sm:$0xff]  }
 0x3a4   :  { %4728 = vmatprep.subr.bf16.mxu1 %v12156_v13  ;;  %v12079_v13 = vld [vmem:[#allocation13 + $0x288] ss:$16 sps:$4 sm:$0xff]  }
 0x3a5   :  { %4518 = vmatpush2.bf16.msra.mxu0 %v11941_v50 }
 0x3a6   :  { %4519 = vmatprep.subr.bf16.mxu0 %v11949_v9 }
 0x3a7   :  { %4729 = vmatpush2.bf16.msra.mxu1 %v12154_v18  ;;  %v12087_v18 = vld [vmem:[#allocation13 + $0x26c] ss:$16 sps:$4 sm:$0xff]  }
 0x3a8   :  { %5184 = vmatprep.subr.bf16.mxu1 %v12207_v2  ;;  %v12243_v2 = vld [vmem:[#allocation16 + $0xb4] ss:$8 sps:$4 sm:$0xff]  }
 0x3a9   :  { %4520 = vmatpush2.bf16.msra.mxu0 %v11947_v54  ;;  %v12067_v54 = vld [vmem:[#allocation13 + $0x2c8] ss:$16 sps:$4 sm:$0xff]  }
 0x3aa   :  { %4521 = vmatprep.subr.bf16.mxu0 %v11955_v15  ;;  %4731 = vmatmul.mubr.bf16.vlgmr.msra.gmra.mxu1 %v13889_v32  ;;  %v13958_v45 = vpop.f32.mrf.mxu1 }
 0x3ac   :  { %v13960_v47 = vpop.f32.mrf.mxu1 }
 0x3ad   :  { %4522 = vmatpush2.bf16.msra.mxu0 %v11953_v58  ;;  %v12073_v58 = vld [vmem:[#allocation13 + $0x2a8] ss:$16 sps:$4 sm:$0xff]  }
 0x3ae   :  { %4523 = vmatprep.subr.bf16.mxu0 %v11961_v63  ;;  %v4490_v50 = vpop.f32.mrf.mxu1  ;;  %v12205_v63 = vld [vmem:[#allocation16 + $0x70] ss:$8 sps:$4 sm:$0xff]  }
 0x3af   :  { %5185 = vmatpush1.bf16.msra.mxu1 %v12205_v63  ;;  %v12135_v50 = vld [vmem:[#allocation13 + $0x36c] ss:$16 sps:$4 sm:$0xff]  }
 0x3b0   :  { %v4491_v9 = vpop.f32.mrf.mxu1  ;;  %5186 = vmatprep.subr.bf16.mxu1 %v12210_v5  ;;  %v12147_v63 = vld [vmem:[#allocation13 + $0x32c] ss:$16 sps:$4 sm:$0xff]  }
 0x3b1   :  { %4524 = vmatpush2.bf16.msra.mxu0 %v11959_v4  ;;  %v12133_v9 = vld [vmem:[#allocation13 + $0x368] ss:$16 sps:$4 sm:$0xff]   ;;  %v12241_v5 = vld [vmem:[#allocation16 + $0xb0] ss:$8 sps:$4 sm:$0xff]  }
 0x3b2   :  { %4575 = vmatprep.subr.bf16.mxu0 %v11967_v8 }
 0x3b4   :  { %4526 = vmatmul.mubr.bf16.vlgmr.msra.gmra.mxu0 %v13864_v17 }
 0x3b5   :  { %4576 = vmatpush1.bf16.msra.mxu0 %v11965_v14  ;;  %4607 = vmatprep.mubr.bf16.mxu0 %v13883_v57  ;;  %v12208_v14 = vld [vmem:[#allocation16 + $0x60] ss:$8 sps:$4 sm:$0xff]  }
 0x3b6   :  { %4577 = vmatprep.subr.bf16.mxu0 %v11973_v19  ;;  %v12213_v19 = vld [vmem:[#allocation16 + $0x54] ss:$8 sps:$4 sm:$0xff]   ;;  %5187 = vmatpush1.bf16.msra.mxu1 %v12208_v14 }
 0x3b7   :  { %5188 = vmatprep.subr.bf16.mxu1 %v12213_v19  ;;  %v12151_v14 = vld [vmem:[#allocation13 + $0x308] ss:$16 sps:$4 sm:$0xff]   ;;  %v12159_v19 = vld [vmem:[#allocation13 + $0x6ec] ss:$16 sps:$4 sm:$0xff]  }
 0x3b9   :  { %4578 = vmatpush1.bf16.msra.mxu0 %v11971_v20  ;;  %v12085_v20 = vld [vmem:[#allocation13 + $0x268] ss:$16 sps:$4 sm:$0xff]  }
 0x3ba   :  { %4579 = vmatprep.subr.bf16.mxu0 %v11979_v21  ;;  %v12211_v21 = vld [vmem:[#allocation16 + $0x50] ss:$8 sps:$4 sm:$0xff]  }
 0x3bb   :  { %5189 = vmatpush1.bf16.msra.mxu1 %v12211_v21  ;;  %v12162_v21 = vld [vmem:[#allocation13 + $0x6cc] ss:$16 sps:$4 sm:$0xff]  }
 0x3bd   :  { %4580 = vmatpush1.bf16.msra.mxu0 %v11977_v22  ;;  %v12093_v22 = vld [vmem:[#allocation13 + $0x24c] ss:$16 sps:$4 sm:$0xff]  }
 0x3be   :  { %4581 = vmatprep.subr.bf16.mxu0 %v11985_v23  ;;  %v12216_v23 = vld [vmem:[#allocation16 + $0x44] ss:$8 sps:$4 sm:$0xff]  }
 0x3bf   :  { %5190 = vmatprep.subr.bf16.mxu1 %v12216_v23  ;;  %v12249_v23 = vld [vmem:[#allocation16 + $0x94] ss:$8 sps:$4 sm:$0xff]  }
 0x3c1   :  { %4582 = vmatpush1.bf16.msra.mxu0 %v11983_v24  ;;  %v12091_v24 = vld [vmem:[#allocation13 + $0x248] ss:$16 sps:$4 sm:$0xff]  }
 0x3c2   :  { %4583 = vmatprep.subr.bf16.mxu0 %v11991_v25  ;;  %v12214_v25 = vld [vmem:[#allocation16 + $0x40] ss:$8 sps:$4 sm:$0xff]  }
 0x3c3   :  { %5191 = vmatpush1.bf16.msra.mxu1 %v12214_v25  ;;  %v12247_v25 = vld [vmem:[#allocation16 + $0x90] ss:$8 sps:$4 sm:$0xff]  }
 0x3c5   :  { %4584 = vmatpush1.bf16.msra.mxu0 %v11989_v26  ;;  %v12099_v26 = vld [vmem:[#allocation13 + $0x22c] ss:$16 sps:$4 sm:$0xff]  }
 0x3c6   :  { %4585 = vmatprep.subr.bf16.mxu0 %v11997_v27  ;;  %v12219_v27 = vld [vmem:[#allocation16 + $0x34] ss:$8 sps:$4 sm:$0xff]  }
 0x3c7   :  { %5192 = vmatprep.subr.bf16.mxu1 %v12219_v27 }
 0x3c9   :  { %4586 = vmatpush1.bf16.msra.mxu0 %v11995_v28  ;;  %v12097_v28 = vld [vmem:[#allocation13 + $0x228] ss:$16 sps:$4 sm:$0xff]  }
 0x3ca   :  { %4587 = vmatprep.subr.bf16.mxu0 %v12003_v43  ;;  %v12217_v43 = vld [vmem:[#allocation16 + $0x30] ss:$8 sps:$4 sm:$0xff]  }
 0x3cb   :  { %5193 = vmatpush1.bf16.msra.mxu1 %v12217_v43 }
 0x3cd   :  { %4588 = vmatpush1.bf16.msra.mxu0 %v12001_v29  ;;  %v12105_v29 = vld [vmem:[#allocation13 + $0x20c] ss:$16 sps:$4 sm:$0xff]  }
 0x3ce   :  { %4589 = vmatprep.subr.bf16.mxu0 %v12009_v30  ;;  %v12222_v30 = vld [vmem:[#allocation16 + $0x24] ss:$8 sps:$4 sm:$0xff]  }
 0x3cf   :  { %5194 = vmatprep.subr.bf16.mxu1 %v12222_v30  ;;  %v12252_v30 = vld [vmem:[#allocation16 + $0x84] ss:$8 sps:$4 sm:$0xff]  }
 0x3d1   :  { %4590 = vmatpush1.bf16.msra.mxu0 %v12007_v60  ;;  %v12103_v60 = vld [vmem:[#allocation13 + $0x208] ss:$16 sps:$4 sm:$0xff]  }
 0x3d2   :  { %4591 = vmatprep.subr.bf16.mxu0 %v12015_v31  ;;  %v12220_v31 = vld [vmem:[#allocation16 + $0x20] ss:$8 sps:$4 sm:$0xff]  }
 0x3d3   :  { %5195 = vmatpush1.bf16.msra.mxu1 %v12220_v31  ;;  %v12163_v31 = vld [vmem:[#allocation13 + $0x6a8] ss:$16 sps:$4 sm:$0xff]  }
 0x3d5   :  { %4592 = vmatpush2.bf16.msra.mxu0 %v12013_v0  ;;  %v12111_v0 = vld [vmem:[#allocation13 + $0x3ec] ss:$16 sps:$4 sm:$0xff]  }
 0x3d6   :  { %4593 = vmatprep.subr.bf16.mxu0 %v12021_v34  ;;  %v12225_v34 = vld [vmem:[#allocation16 + $0x14] ss:$8 sps:$4 sm:$0xff]  }
 0x3d7   :  { %5196 = vmatprep.subr.bf16.mxu1 %v12225_v34 }
 0x3d9   :  { %4594 = vmatpush2.bf16.msra.mxu0 %v12019_v6  ;;  %v12109_v6 = vld [vmem:[#allocation13 + $0x3e8] ss:$16 sps:$4 sm:$0xff]  }
 0x3da   :  { %4595 = vmatprep.subr.bf16.mxu0 %v12027_v61  ;;  %v12223_v61 = vld [vmem:[#allocation16 + $0x10] ss:$8 sps:$4 sm:$0xff]  }
 0x3db   :  { %5197 = vmatpush1.bf16.msra.mxu1 %v12223_v61  ;;  %v12166_v61 = vld [vmem:[#allocation13 + $0x688] ss:$16 sps:$4 sm:$0xff]  }
 0x3dd   :  { %4596 = vmatpush2.bf16.msra.mxu0 %v12025_v35  ;;  %v12117_v35 = vld [vmem:[#allocation13 + $0x3cc] ss:$16 sps:$4 sm:$0xff]  }
 0x3de   :  { %4597 = vmatprep.subr.bf16.mxu0 %v12033_v36  ;;  %v12228_v36 = vld [vmem:[#allocation16 + $0x4] ss:$8 sps:$4 sm:$0xff]  }
 0x3df   :  { %5198 = vmatprep.subr.bf16.mxu1 %v12228_v36 }
 0x3e1   :  { %4598 = vmatpush2.bf16.msra.mxu0 %v12031_v37  ;;  %v12115_v37 = vld [vmem:[#allocation13 + $0x3c8] ss:$16 sps:$4 sm:$0xff]  }
 0x3e2   :  { %4599 = vmatprep.subr.bf16.mxu0 %v12039_v38  ;;  %v12226_v38 = vld [vmem:[#allocation16] ss:$8 sps:$4 sm:$0xff]  }
 0x3e3   :  { %5199 = vmatpush1.bf16.msra.mxu1 %v12226_v38  ;;  %v12169_v38 = vld [vmem:[#allocation13 + $0x668] ss:$16 sps:$4 sm:$0xff]  }
 0x3e5   :  { %4600 = vmatpush2.bf16.msra.mxu0 %v12037_v39  ;;  %v12123_v39 = vld [vmem:[#allocation13 + $0x3ac] ss:$16 sps:$4 sm:$0xff]  }
 0x3e6   :  { %4601 = vmatprep.subr.bf16.mxu0 %v12045_v1  ;;  %v12231_v1 = vld [vmem:[#allocation16 + $0xf4] ss:$8 sps:$4 sm:$0xff]  }
 0x3e7   :  { %5200 = vmatprep.subr.bf16.mxu1 %v12231_v1 }
 0x3e9   :  { %4602 = vmatpush2.bf16.msra.mxu0 %v12043_v40  ;;  %v12121_v40 = vld [vmem:[#allocation13 + $0x3a8] ss:$16 sps:$4 sm:$0xff]  }
 0x3ea   :  { %4603 = vmatprep.subr.bf16.mxu0 %v12051_v41  ;;  %v13964_v15 = vpop.f32.mrf.mxu1  ;;  %v12229_v41 = vld [vmem:[#allocation16 + $0xf0] ss:$8 sps:$4 sm:$0xff]  }
 0x3eb   :  { %5201 = vmatpush2.bf16.msra.mxu1 %v12229_v41  ;;  %v12172_v41 = vld [vmem:[#allocation13 + $0x648] ss:$16 sps:$4 sm:$0xff]  }
 0x3ec   :  { %v13966_v56 = vpop.f32.mrf.mxu1 }
 0x3ed   :  { %4604 = vmatpush2.bf16.msra.mxu0 %v12049_v42  ;;  %v12129_v42 = vld [vmem:[#allocation13 + $0x38c] ss:$16 sps:$4 sm:$0xff]  }
 0x3ee   :  { %4605 = vmatprep.subr.bf16.mxu0 %v12057_v44  ;;  %v4572_v4 = vpop.f32.mrf.mxu1  ;;  %v12234_v44 = vld [vmem:[#allocation16 + $0xe4] ss:$8 sps:$4 sm:$0xff]  }
 0x3ef   :  { %5202 = vmatprep.subr.bf16.mxu1 %v12234_v44  ;;  %v12145_v4 = vld [vmem:[#allocation13 + $0x328] ss:$16 sps:$4 sm:$0xff]  }
 0x3f0   :  { %v4573_v8 = vpop.f32.mrf.mxu1  ;;  %v12175_v44 = vld [vmem:[#allocation13 + $0x628] ss:$16 sps:$4 sm:$0xff]  }
 0x3f1   :  { %4606 = vmatpush2.bf16.msra.mxu0 %v12055_v46  ;;  %v12127_v46 = vld [vmem:[#allocation13 + $0x388] ss:$16 sps:$4 sm:$0xff]   ;;  %v12153_v8 = vld [vmem:[#allocation13 + $0x30c] ss:$16 sps:$4 sm:$0xff]  }
 0x3f2   :  { %4657 = vmatprep.subr.bf16.mxu0 %v12063_v48  ;;  %v12232_v48 = vld [vmem:[#allocation16 + $0xe0] ss:$8 sps:$4 sm:$0xff]  }
 0x3f3   :  { %5203 = vmatpush2.bf16.msra.mxu1 %v12232_v48  ;;  %v12178_v48 = vld [vmem:[#allocation13 + $0x608] ss:$16 sps:$4 sm:$0xff]  }
 0x3f4   :  { %4608 = vmatmul.mubr.bf16.vlgmr.msra.gmra.mxu0 %v13893_v33 }
 0x3f5   :  { %4658 = vmatpush1.bf16.msra.mxu0 %v12061_v51  ;;  %4689 = vmatprep.mubr.bf16.mxu0 %v13858_v3  ;;  %v12237_v51 = vld [vmem:[#allocation16 + $0xd4] ss:$8 sps:$4 sm:$0xff]  }
 0x3f6   :  { %4659 = vmatprep.subr.bf16.mxu0 %v12069_v52  ;;  %v12235_v52 = vld [vmem:[#allocation16 + $0xd0] ss:$8 sps:$4 sm:$0xff]   ;;  %5204 = vmatprep.subr.bf16.mxu1 %v12237_v51  ;;  %v12181_v51 = vld [vmem:[#allocation13 + $0x7e8] ss:$16 sps:$4 sm:$0xff]  }
 0x3f7   :  { %5205 = vmatpush2.bf16.msra.mxu1 %v12235_v52  ;;  %v12184_v52 = vld [vmem:[#allocation13 + $0x7c8] ss:$16 sps:$4 sm:$0xff]  }
 0x3f9   :  { %4660 = vmatpush1.bf16.msra.mxu0 %v12067_v54  ;;  %v12141_v54 = vld [vmem:[#allocation13 + $0x34c] ss:$16 sps:$4 sm:$0xff]  }
 0x3fa   :  { %4661 = vmatprep.subr.bf16.mxu0 %v12075_v55  ;;  %v12240_v55 = vld [vmem:[#allocation16 + $0xc4] ss:$8 sps:$4 sm:$0xff]  }
 0x3fb   :  { %5206 = vmatprep.subr.bf16.mxu1 %v12240_v55  ;;  %v12187_v55 = vld [vmem:[#allocation13 + $0x7a8] ss:$16 sps:$4 sm:$0xff]  }
 0x3fd   :  { %4662 = vmatpush1.bf16.msra.mxu0 %v12073_v58  ;;  %v12139_v58 = vld [vmem:[#allocation13 + $0x348] ss:$16 sps:$4 sm:$0xff]  }
 0x3fe   :  { %4663 = vmatprep.subr.bf16.mxu0 %v12081_v59  ;;  %v12238_v59 = vld [vmem:[#allocation16 + $0xc0] ss:$8 sps:$4 sm:$0xff]  }
 0x3ff   :  { %5207 = vmatpush2.bf16.msra.mxu1 %v12238_v59  ;;  %v12190_v59 = vld [vmem:[#allocation13 + $0x788] ss:$16 sps:$4 sm:$0xff]  }
 0x400   :  { %5208 = vmatprep.subr.bf16.mxu1 %v12243_v2  ;;  %v12193_v2 = vld [vmem:[#allocation13 + $0x768] ss:$16 sps:$4 sm:$0xff]  }
 0x401   :  { %4664 = vmatpush1.bf16.msra.mxu0 %v12079_v13  ;;  %v12246_v13 = vld [vmem:[#allocation16 + $0xa4] ss:$8 sps:$4 sm:$0xff]  }
 0x402   :  { %4665 = vmatprep.subr.bf16.mxu0 %v12087_v18  ;;  %v12244_v18 = vld [vmem:[#allocation16 + $0xa0] ss:$8 sps:$4 sm:$0xff]  }
 0x403   :  { %5209 = vmatpush2.bf16.msra.mxu1 %v12241_v5  ;;  %v12196_v5 = vld [vmem:[#allocation13 + $0x748] ss:$16 sps:$4 sm:$0xff]  }
 0x404   :  { %5210 = vmatprep.subr.bf16.mxu1 %v12246_v13  ;;  %v12199_v13 = vld [vmem:[#allocation13 + $0x728] ss:$16 sps:$4 sm:$0xff]  }
 0x405   :  { %4666 = vmatpush1.bf16.msra.mxu0 %v12085_v20  ;;  %v12157_v20 = vld [vmem:[#allocation13 + $0x6e8] ss:$16 sps:$4 sm:$0xff]  }
 0x406   :  { %4667 = vmatprep.subr.bf16.mxu0 %v12093_v22 }
 0x407   :  { %5211 = vmatpush2.bf16.msra.mxu1 %v12244_v18  ;;  %v12202_v18 = vld [vmem:[#allocation13 + $0x708] ss:$16 sps:$4 sm:$0xff]  }
 0x408   :  { %5212 = vmatprep.subr.bf16.mxu1 %v12249_v23 }
 0x409   :  { %4668 = vmatpush1.bf16.msra.mxu0 %v12091_v24  ;;  %v12160_v24 = vld [vmem:[#allocation13 + $0x6c8] ss:$16 sps:$4 sm:$0xff]  }
 0x40a   :  { %4669 = vmatprep.subr.bf16.mxu0 %v12099_v26  ;;  %v10283_v26 = vld [vmem:[#allocation11] ss:$0 sm:$0xff] }
 0x40b   :  { %5213 = vmatpush2.bf16.msra.mxu1 %v12247_v25  ;;  %v12253_v25 = vld [vmem:[#allocation16 + $0x170] ss:$8 sps:$4 sm:$0xff]  }
 0x40c   :  { %5214 = vmatprep.subr.bf16.mxu1 %v12252_v30  ;;  %v12261_v30 = vld [vmem:[#allocation16 + $0x154] ss:$8 sps:$4 sm:$0xff]  }
 0x40d   :  { %4670 = vmatpush1.bf16.msra.mxu0 %v12097_v28  ;;  %v12165_v28 = vld [vmem:[#allocation13 + $0x6ac] ss:$16 sps:$4 sm:$0xff]  }
 0x40e   :  { %4671 = vmatprep.subr.bf16.mxu0 %v12105_v29 }
 0x411   :  { %4672 = vmatpush1.bf16.msra.mxu0 %v12103_v60 }
 0x412   :  { %4673 = vmatprep.subr.bf16.mxu0 %v12111_v0  ;;  %v12250_v0 = vld [vmem:[#allocation16 + $0x80] ss:$8 sps:$4 sm:$0xff]  }
 0x413   :  { %5215 = vmatpush2.bf16.msra.mxu1 %v12250_v0  ;;  %v12262_v0 = vld [vmem:[#allocation16 + $0x140] ss:$8 sps:$4 sm:$0xff]  }
 0x415   :  { %4674 = vmatpush2.bf16.msra.mxu0 %v12109_v6  ;;  %v12168_v6 = vld [vmem:[#allocation13 + $0x68c] ss:$16 sps:$4 sm:$0xff]  }
 0x416   :  { %4675 = vmatprep.subr.bf16.mxu0 %v12117_v35  ;;  %v12171_v35 = vld [vmem:[#allocation13 + $0x66c] ss:$16 sps:$4 sm:$0xff]  }
 0x419   :  { %4676 = vmatpush2.bf16.msra.mxu0 %v12115_v37 }
 0x41a   :  { %4677 = vmatprep.subr.bf16.mxu0 %v12123_v39  ;;  %v12174_v39 = vld [vmem:[#allocation13 + $0x64c] ss:$16 sps:$4 sm:$0xff]  }
 0x41d   :  { %4678 = vmatpush2.bf16.msra.mxu0 %v12121_v40 }
 0x41e   :  { %4679 = vmatprep.subr.bf16.mxu0 %v12129_v42  ;;  %v12177_v42 = vld [vmem:[#allocation13 + $0x62c] ss:$16 sps:$4 sm:$0xff]  }
 0x421   :  { %4680 = vmatpush2.bf16.msra.mxu0 %v12127_v46  ;;  %v12180_v46 = vld [vmem:[#allocation13 + $0x60c] ss:$16 sps:$4 sm:$0xff]  }
 0x422   :  { %4681 = vmatprep.subr.bf16.mxu0 %v12135_v50  ;;  %v12183_v50 = vld [vmem:[#allocation13 + $0x7ec] ss:$16 sps:$4 sm:$0xff]  }
 0x425   :  { %4682 = vmatpush2.bf16.msra.mxu0 %v12133_v9  ;;  %v12186_v9 = vld [vmem:[#allocation13 + $0x7cc] ss:$16 sps:$4 sm:$0xff]  }
 0x426   :  { %4683 = vmatprep.subr.bf16.mxu0 %v12141_v54  ;;  %v12189_v54 = vld [vmem:[#allocation13 + $0x7ac] ss:$16 sps:$4 sm:$0xff]  }
 0x429   :  { %4684 = vmatpush2.bf16.msra.mxu0 %v12139_v58  ;;  %v12192_v58 = vld [vmem:[#allocation13 + $0x78c] ss:$16 sps:$4 sm:$0xff]  }
 0x42a   :  { %4685 = vmatprep.subr.bf16.mxu0 %v12147_v63  ;;  %v13970_v36 = vpop.f32.mrf.mxu1  ;;  %v12195_v63 = vld [vmem:[#allocation13 + $0x76c] ss:$16 sps:$4 sm:$0xff]  }
 0x42c   :  { %v13972_v37 = vpop.f32.mrf.mxu1 }
 0x42d   :  { %4686 = vmatpush2.bf16.msra.mxu0 %v12145_v4  ;;  %v12198_v4 = vld [vmem:[#allocation13 + $0x74c] ss:$16 sps:$4 sm:$0xff]  }
 0x42e   :  { %4687 = vmatprep.subr.bf16.mxu0 %v12153_v8  ;;  %v4654_v1 = vpop.f32.mrf.mxu1  ;;  %v12201_v8 = vld [vmem:[#allocation13 + $0x72c] ss:$16 sps:$4 sm:$0xff]  }
 0x42f   :  { %v12276_v1 = vld [vmem:[#allocation16 + $0x104] ss:$8 sps:$4 sm:$0xff]  }
 0x430   :  { %v4655_v40 = vpop.f32.mrf.mxu1 }
 0x431   :  { %4688 = vmatpush2.bf16.msra.mxu0 %v12151_v14  ;;  %v12204_v14 = vld [vmem:[#allocation13 + $0x70c] ss:$16 sps:$4 sm:$0xff]  }
 0x432   :  { %4739 = vmatprep.subr.bf16.mxu0 %v12159_v19  ;;  %v12274_v40 = vld [vmem:[#allocation16 + $0x100] ss:$8 sps:$4 sm:$0xff]  }
 0x434   :  { %4690 = vmatmul.mubr.bf16.vlgmr.msra.gmra.mxu0 %v13864_v17  ;;  %v11246_v22 = vpop.f32.mrf.mxu0 }
 0x435   :  { %4740 = vmatpush1.bf16.msra.mxu0 %v12157_v20  ;;  %4771 = vmatprep.mubr.bf16.mxu0 %v13883_v57 }
 0x436   :  { %v11247_v27 = vpop.f32.mrf.mxu0  ;;  %4741 = vmatprep.subr.bf16.mxu0 %v12162_v21 }
 0x437   :  { %v11248_v43 = vadd.f32 %v11247_v27, %v11246_v22  ;;  %v12258_v27 = vld [vmem:[#allocation16 + $0x164] ss:$8 sps:$4 sm:$0xff]  }
 0x438   :  { %v11249_v29 = vpop.f32.mrf.mxu0 }
 0x439   :  { %v2887_v60 = vadd.f32 %v11248_v43, %v10283_v26  ;;  %4742 = vmatpush1.bf16.msra.mxu0 %v12160_v24  ;;  %v12255_v26 = vld [vmem:[#allocation16 + $0x174] ss:$8 sps:$4 sm:$0xff]   ;;  %v12256_v43 = vld [vmem:[#allocation16 + $0x160] ss:$8 sps:$4 sm:$0xff]  }
 0x43a   :  { %v11250_v34 = vpop.f32.mrf.mxu0  ;;  %4743 = vmatprep.subr.bf16.mxu0 %v12165_v28 }
 0x43b   :  { %2893 = vst.msk [vmem:[#allocation29] sm:$0x3] %vm2892_vm0, %v2887_v60  ;;  %v12259_v60 = vld [vmem:[#allocation16 + $0x150] ss:$8 sps:$4 sm:$0xff]   ;;  %v12267_v34 = vld [vmem:[#allocation16 + $0x134] ss:$8 sps:$4 sm:$0xff]  }
 0x43d   :  { %4744 = vmatpush1.bf16.msra.mxu0 %v12163_v31  ;;  %v12264_v31 = vld [vmem:[#allocation16 + $0x144] ss:$8 sps:$4 sm:$0xff]  }
 0x43e   :  { %4745 = vmatprep.subr.bf16.mxu0 %v12168_v6  ;;  %v12265_v6 = vld [vmem:[#allocation16 + $0x130] ss:$8 sps:$4 sm:$0xff]  }
 0x441   :  { %4746 = vmatpush1.bf16.msra.mxu0 %v12166_v61  ;;  %v12270_v61 = vld [vmem:[#allocation16 + $0x124] ss:$8 sps:$4 sm:$0xff]  }
 0x442   :  { %4747 = vmatprep.subr.bf16.mxu0 %v12171_v35  ;;  %v12268_v35 = vld [vmem:[#allocation16 + $0x120] ss:$8 sps:$4 sm:$0xff]  }
 0x445   :  { %4748 = vmatpush1.bf16.msra.mxu0 %v12169_v38  ;;  %v12273_v38 = vld [vmem:[#allocation16 + $0x114] ss:$8 sps:$4 sm:$0xff]  }
 0x446   :  { %4749 = vmatprep.subr.bf16.mxu0 %v12174_v39  ;;  %v12271_v39 = vld [vmem:[#allocation16 + $0x110] ss:$8 sps:$4 sm:$0xff]  }
 0x449   :  { %4750 = vmatpush1.bf16.msra.mxu0 %v12172_v41  ;;  %v12279_v41 = vld [vmem:[#allocation16 + $0x1f4] ss:$8 sps:$4 sm:$0xff]  }
 0x44a   :  { %4751 = vmatprep.subr.bf16.mxu0 %v12177_v42  ;;  %v12277_v42 = vld [vmem:[#allocation16 + $0x1f0] ss:$8 sps:$4 sm:$0xff]  }
 0x44d   :  { %4752 = vmatpush1.bf16.msra.mxu0 %v12175_v44  ;;  %v12282_v44 = vld [vmem:[#allocation16 + $0x1e4] ss:$8 sps:$4 sm:$0xff]  }
 0x44e   :  { %4753 = vmatprep.subr.bf16.mxu0 %v12180_v46  ;;  %v12280_v46 = vld [vmem:[#allocation16 + $0x1e0] ss:$8 sps:$4 sm:$0xff]  }
 0x451   :  { %4754 = vmatpush1.bf16.msra.mxu0 %v12178_v48  ;;  %v12285_v48 = vld [vmem:[#allocation16 + $0x1d4] ss:$8 sps:$4 sm:$0xff]  }
 0x452   :  { %4755 = vmatprep.subr.bf16.mxu0 %v12183_v50  ;;  %v12283_v50 = vld [vmem:[#allocation16 + $0x1d0] ss:$8 sps:$4 sm:$0xff]  }
 0x455   :  { %4756 = vmatpush2.bf16.msra.mxu0 %v12181_v51  ;;  %v12288_v51 = vld [vmem:[#allocation16 + $0x1c4] ss:$8 sps:$4 sm:$0xff]  }
 0x456   :  { %4757 = vmatprep.subr.bf16.mxu0 %v12186_v9  ;;  %v13983_v9 = vld [vmem:[#allocation14] sm:$0xf] }
 0x459   :  { %4758 = vmatpush2.bf16.msra.mxu0 %v12184_v52  ;;  %v12286_v52 = vld [vmem:[#allocation16 + $0x1c0] ss:$8 sps:$4 sm:$0xff]  }
 0x45a   :  { %4759 = vmatprep.subr.bf16.mxu0 %v12189_v54  ;;  %v12291_v54 = vld [vmem:[#allocation16 + $0x1b4] ss:$8 sps:$4 sm:$0xff]  }
 0x45d   :  { %4760 = vmatpush2.bf16.msra.mxu0 %v12187_v55  ;;  %v3155_v55 = vrot.slane %v13983_v9, %v13916_v7 }
 0x45e   :  { %4761 = vmatprep.subr.bf16.mxu0 %v12192_v58  ;;  %v3159_v58 = vrot.slane %v13983_v9, %v13919_v11 }
 0x461   :  { %4762 = vmatpush2.bf16.msra.mxu0 %v12190_v59  ;;  %v12289_v59 = vld [vmem:[#allocation16 + $0x1b0] ss:$8 sps:$4 sm:$0xff]  }
 0x462   :  { %4763 = vmatprep.subr.bf16.mxu0 %v12195_v63  ;;  %v12294_v63 = vld [vmem:[#allocation16 + $0x1a4] ss:$8 sps:$4 sm:$0xff]  }
 0x465   :  { %4764 = vmatpush2.bf16.msra.mxu0 %v12193_v2  ;;  %v4487_v2 = vadd.f32 %v13958_v45, %v3155_v55 }
 0x466   :  { %4765 = vmatprep.subr.bf16.mxu0 %v12198_v4  ;;  %v4489_v4 = vadd.f32 %v13960_v47, %v3159_v58 }
 0x469   :  { %4766 = vmatpush2.bf16.msra.mxu0 %v12196_v5  ;;  %v12292_v5 = vld [vmem:[#allocation16 + $0x1a0] ss:$8 sps:$4 sm:$0xff]  }
 0x46a   :  { %4767 = vmatprep.subr.bf16.mxu0 %v12201_v8  ;;  %v13979_v21 = vpop.f32.mrf.mxu1 }
 0x46c   :  { %v13981_v23 = vpop.f32.mrf.mxu1 }
 0x46d   :  { %4768 = vmatpush2.bf16.msra.mxu0 %v12199_v13 }
 0x46e   :  { %4769 = vmatprep.subr.bf16.mxu0 %v12204_v14  ;;  %v4736_v28 = vpop.f32.mrf.mxu1 }
 0x470   :  { %v4737_v29 = vpop.f32.mrf.mxu1 }
 0x471   :  { %4770 = vmatpush2.bf16.msra.mxu0 %v12202_v18 }
 0x472   :  { %5225 = vmatprep.subr.bf16.mxu0 %v12255_v26  ;;  %v12295_v26 = vld [vmem:[#allocation16 + $0x190] ss:$8 sps:$4 sm:$0xff]  }
 0x474   :  { %v13974_v19 = vpop.f32.mrf.mxu0  ;;  %4772 = vmatmul.mubr.bf16.vlgmr.msra.gmra.mxu0 %v13893_v33 }
 0x475   :  { %5226 = vmatpush1.bf16.msra.mxu0 %v12253_v25  ;;  %v4528_v8 = vadd.f32 %v13974_v19, %v4487_v2  ;;  %v12298_v19 = vld [vmem:[#allocation16 + $0x180] ss:$8 sps:$4 sm:$0xff]  }
 0x476   :  { %v13977_v20 = vpop.f32.mrf.mxu0  ;;  %5227 = vmatprep.subr.bf16.mxu0 %v12258_v27 }
 0x477   :  { %v4530_v13 = vadd.f32 %v13977_v20, %v4489_v4  ;;  %v4569_v14 = vadd.f32 %v13964_v15, %v4528_v8 }
 0x478   :  { %v4531_v22 = vpop.f32.mrf.mxu0 }
 0x479   :  { %5228 = vmatpush1.bf16.msra.mxu0 %v12256_v43  ;;  %v12297_v22 = vld [vmem:[#allocation16 + $0x194] ss:$8 sps:$4 sm:$0xff]   ;;  %v12300_v43 = vld [vmem:[#allocation16 + $0x184] ss:$8 sps:$4 sm:$0xff]  }
 0x47a   :  { %v4532_v24 = vpop.f32.mrf.mxu0  ;;  %5229 = vmatprep.subr.bf16.mxu0 %v12261_v30 }
 0x47b   :  { %v4571_v24 = vadd.f32 %v13966_v56, %v4530_v13 }
 0x47d   :  { %5230 = vmatpush1.bf16.msra.mxu0 %v12259_v60 }
 0x47e   :  { %5231 = vmatprep.subr.bf16.mxu0 %v12264_v31 }
 0x481   :  { %5232 = vmatpush1.bf16.msra.mxu0 %v12262_v0 }
 0x482   :  { %5233 = vmatprep.subr.bf16.mxu0 %v12267_v34  ;;  %v12303_v34 = vld [vmem:[%s15685_s13 + $0xe4] ss:$16 sps:$4 sm:$0xff]  }
 0x485   :  { %5234 = vmatpush1.bf16.msra.mxu0 %v12265_v6  ;;  %v12325_v6 = vld [vmem:[#allocation19 + $0x78] sm:$0xff]  }
 0x486   :  { %5235 = vmatprep.subr.bf16.mxu0 %v12270_v61  ;;  %v12326_v61 = vld [vmem:[#allocation19 + $0x38] sm:$0xff]   ;;  %11252 = vmatprep.subr.bf16.mxu1 %v12325_v6 }
 0x487   :  { %v12344_v6 = vld [vmem:[%s15685_s13 + $0x184] ss:$16 sps:$4 sm:$0xff]  }
 0x489   :  { %5236 = vmatpush1.bf16.msra.mxu0 %v12268_v35  ;;  %v12330_v35 = vld [vmem:[#allocation19 + $0x70] sm:$0xff]  }
 0x48a   :  { %5237 = vmatprep.subr.bf16.mxu0 %v12273_v38  ;;  %v12331_v38 = vld [vmem:[#allocation19 + $0x30] sm:$0xff]  }
 0x48d   :  { %5238 = vmatpush1.bf16.msra.mxu0 %v12271_v39  ;;  %v12335_v39 = vld [vmem:[#allocation19 + $0x68] sm:$0xff]  }
 0x48e   :  { %5239 = vmatprep.subr.bf16.mxu0 %v12276_v1  ;;  %v12336_v1 = vld [vmem:[#allocation19 + $0x28] sm:$0xff]  }
 0x491   :  { %5240 = vmatpush1.bf16.msra.mxu0 %v12274_v40  ;;  %v12340_v40 = vld [vmem:[#allocation19 + $0x60] sm:$0xff]  }
 0x492   :  { %5241 = vmatprep.subr.bf16.mxu0 %v12279_v41  ;;  %v12341_v41 = vld [vmem:[#allocation19 + $0x20] sm:$0xff]  }
 0x495   :  { %5242 = vmatpush2.bf16.msra.mxu0 %v12277_v42  ;;  %v12345_v42 = vld [vmem:[#allocation19 + $0x58] sm:$0xff]  }
 0x496   :  { %5243 = vmatprep.subr.bf16.mxu0 %v12282_v44  ;;  %v12346_v44 = vld [vmem:[#allocation19 + $0x18] sm:$0xff]  }
 0x499   :  { %5244 = vmatpush2.bf16.msra.mxu0 %v12280_v46  ;;  %v12350_v46 = vld [vmem:[#allocation19 + $0x50] sm:$0xff]  }
 0x49a   :  { %5245 = vmatprep.subr.bf16.mxu0 %v12285_v48  ;;  %v12351_v48 = vld [vmem:[#allocation19 + $0x10] sm:$0xff]  }
 0x49d   :  { %5246 = vmatpush2.bf16.msra.mxu0 %v12283_v50  ;;  %v3163_v50 = vrot.slane %v13983_v9, %v13930_v10 }
 0x49e   :  { %5247 = vmatprep.subr.bf16.mxu0 %v12288_v51  ;;  %v3167_v51 = vrot.slane %v13983_v9, %v13933_v12  ;;  %v12309_v9 = vld [vmem:[%s15685_s13 + $0xa4] ss:$16 sps:$4 sm:$0xff]  }
 0x4a1   :  { %5248 = vmatpush2.bf16.msra.mxu0 %v12286_v52  ;;  %v4651_v52 = vadd.f32 %v13970_v36, %v3163_v50  ;;  %v12301_v36 = vld [vmem:[%s15685_s13 + $0xe0] ss:$16 sps:$4 sm:$0xff]  }
 0x4a2   :  { %5249 = vmatprep.subr.bf16.mxu0 %v12291_v54  ;;  %v4653_v54 = vadd.f32 %v13972_v37, %v3167_v51  ;;  %v12360_v50 = vld [vmem:[#allocation19 + $0x40] sm:$0xff]  }
 0x4a5   :  { %5250 = vmatpush2.bf16.msra.mxu0 %v12289_v59 }
 0x4a6   :  { %5251 = vmatprep.subr.bf16.mxu0 %v12294_v63 }
 0x4a9   :  { %5252 = vmatpush2.bf16.msra.mxu0 %v12292_v5 }
 0x4aa   :  { %5253 = vmatprep.subr.bf16.mxu0 %v12297_v22 }
 0x4ad   :  { %5254 = vmatpush2.bf16.msra.mxu0 %v12295_v26  ;;  %v12312_v26 = vld [vmem:[%s15685_s13 + $0x84] ss:$16 sps:$4 sm:$0xff]  }
 0x4ae   :  { %5255 = vmatprep.subr.bf16.mxu0 %v12300_v43  ;;  %v12316_v43 = vld [vmem:[%s15685_s13 + $0x40] ss:$16 sps:$4 sm:$0xff]  }
 0x4b1   :  { %5256 = vmatpush2.bf16.msra.mxu0 %v12298_v19  ;;  %v12319_v19 = vld [vmem:[%s15685_s13 + $0x20] ss:$16 sps:$4 sm:$0xff]  }
 0x4b2   :  { %7005 = vmatprep.subr.bf16.mxu0 %v12303_v34  ;;  %v12337_v34 = vld [vmem:[%s15685_s13 + $0x1a0] ss:$16 sps:$4 sm:$0xff]  }
 0x4b4   :  { %v4609_v18 = vpop.f32.mrf.mxu0 }
 0x4b5   :  { %v4610_v25 = vadd.f32 %v4609_v18, %v4569_v14 }
 0x4b6   :  { %v4611_v27 = vpop.f32.mrf.mxu0 }
 0x4b7   :  { %v4612_v45 = vadd.f32 %v4611_v27, %v4571_v24  ;;  %v4780_v47 = vmax.f32 %v4610_v25, 0.0  ;;  %v12307_v25 = vld [vmem:[%s15685_s13 + $0xa0] ss:$16 sps:$4 sm:$0xff]  }
 0x4b8   :  { %v4613_v28 = vpop.f32.mrf.mxu0  ;;  %v12310_v27 = vld [vmem:[%s15685_s13 + $0x80] ss:$16 sps:$4 sm:$0xff]  }
 0x4b9   :  { %v4781_v29 = vmax.f32 %v4612_v45, 0.0  ;;  %v4849_v15 = vpack.c.bf16 %v4780_v47, %v4780_v47  ;;  %v12315_v45 = vld [vmem:[%s15685_s13 + $0x64] ss:$16 sps:$4 sm:$0xff]   ;;  %v12313_v47 = vld [vmem:[%s15685_s13 + $0x60] ss:$16 sps:$4 sm:$0xff]  }
 0x4ba   :  { %v4614_v30 = vpop.f32.mrf.mxu0  ;;  %v12318_v28 = vld [vmem:[%s15685_s13 + $0x44] ss:$16 sps:$4 sm:$0xff]  }
 0x4bb   :  { %v4850_v20 = vpack.c.bf16 %v4781_v29, %v4781_v29  ;;  %v12321_v29 = vld [vmem:[%s15685_s13 + $0x24] ss:$16 sps:$4 sm:$0xff]  }
 0x4bc   :  { %v12324_v30 = vld [vmem:[%s15685_s13 + $0x4] ss:$16 sps:$4 sm:$0xff]  }
 0x4bd   :  { %5216 = vmatprep.mubr.bf16.mxu1 %v4850_v20  ;;  %v12322_v20 = vld [vmem:[%s15685_s13] ss:$16 sps:$4 sm:$0xff]  }
 0x4be   :  { %5217 = vmatmul.mubr.bf16.vlgmr.msra.gmra.mxu1 %v4849_v15  ;;  %v12329_v15 = vld [vmem:[%s15685_s13 + $0x1e4] ss:$16 sps:$4 sm:$0xff]  }
 0x4bf   :  { %11253 = vmatpush3.bf16.msra.mxu1 %v12326_v61  ;;  %v12342_v61 = vld [vmem:[%s15685_s13 + $0x180] ss:$16 sps:$4 sm:$0xff]  }
 0x4c0   :  { %11254 = vmatprep.subr.bf16.mxu1 %v12330_v35  ;;  %v12349_v35 = vld [vmem:[%s15685_s13 + $0x164] ss:$16 sps:$4 sm:$0xff]  }
 0x4c3   :  { %11255 = vmatpush3.bf16.msra.mxu1 %v12331_v38  ;;  %v12347_v38 = vld [vmem:[%s15685_s13 + $0x160] ss:$16 sps:$4 sm:$0xff]  }
 0x4c4   :  { %11256 = vmatprep.subr.bf16.mxu1 %v12335_v39  ;;  %v12354_v39 = vld [vmem:[%s15685_s13 + $0x144] ss:$16 sps:$4 sm:$0xff]  }
 0x4c7   :  { %11257 = vmatpush3.bf16.msra.mxu1 %v12336_v1  ;;  %v12352_v1 = vld [vmem:[%s15685_s13 + $0x140] ss:$16 sps:$4 sm:$0xff]  }
 0x4c8   :  { %11258 = vmatprep.subr.bf16.mxu1 %v12340_v40  ;;  %v12355_v40 = vld [vmem:[#allocation19 + $0x48] sm:$0xff]  }
 0x4cb   :  { %11259 = vmatpush3.bf16.msra.mxu1 %v12341_v41 }
 0x4cc   :  { %11260 = vmatprep.subr.bf16.mxu1 %v12345_v42  ;;  %v12356_v42 = vld [vmem:[#allocation19 + $0x8] sm:$0xff]  }
 0x4cf   :  { %11261 = vmatpush3.bf16.msra.mxu1 %v12346_v44  ;;  %v12359_v44 = vld [vmem:[%s15685_s13 + $0x124] ss:$16 sps:$4 sm:$0xff]  }
 0x4d0   :  { %11262 = vmatprep.subr.bf16.mxu1 %v12350_v46 }
 0x4d3   :  { %11263 = vmatpush3.bf16.msra.mxu1 %v12351_v48  ;;  %v12357_v48 = vld [vmem:[%s15685_s13 + $0x120] ss:$16 sps:$4 sm:$0xff]  }
 0x4d4   :  { %11264 = vmatprep.subr.bf16.mxu1 %v12355_v40  ;;  %v12484_v40 = vld [vmem:[%s15685_s13 + $0x8c] ss:$16 sps:$4 sm:$0xff]  }
 0x4d7   :  { %11265 = vmatpush3.bf16.msra.mxu1 %v12356_v42  ;;  %v12482_v42 = vld [vmem:[%s15685_s13 + $0x88] ss:$16 sps:$4 sm:$0xff]  }
 0x4d8   :  { %11266 = vmatprep.subr.bf16.mxu1 %v12360_v50  ;;  %v12496_v50 = vld [vmem:[%s15685_s13 + $0x4c] ss:$16 sps:$4 sm:$0xff]  }
 0x4f4   :  { %v4691_v60 = vpop.f32.mrf.mxu0 }
 0x4f5   :  { %v4692_v55 = vadd.f32 %v4691_v60, %v4651_v52  ;;  %v12327_v60 = vld [vmem:[%s15685_s13 + $0x1e0] ss:$16 sps:$4 sm:$0xff]  }
 0x4f6   :  { %v4693_v56 = vpop.f32.mrf.mxu0  ;;  %v12361_v52 = vld [vmem:[#allocation19] sm:$0xff]  }
 0x4f7   :  { %v4694_v58 = vadd.f32 %v4693_v56, %v4653_v54  ;;  %v4733_v59 = vadd.f32 %v13979_v21, %v4692_v55  ;;  %v12306_v21 = vld [vmem:[%s15685_s13 + $0xc4] ss:$16 sps:$4 sm:$0xff]   ;;  %11267 = vmatpush3.bf16.msra.mxu1 %v12361_v52  ;;  %v12502_v52 = vld [vmem:[%s15685_s13 + $0x2c] ss:$16 sps:$4 sm:$0xff]  }
 0x4f8   :  { %v4695_v31 = vpop.f32.mrf.mxu0  ;;  %v12334_v56 = vld [vmem:[%s15685_s13 + $0x1c4] ss:$16 sps:$4 sm:$0xff]  }
 0x4f9   :  { %v4735_v2 = vadd.f32 %v13981_v23, %v4694_v58  ;;  %v12304_v23 = vld [vmem:[%s15685_s13 + $0xc0] ss:$16 sps:$4 sm:$0xff]   ;;  %v12364_v54 = vld [vmem:[%s15685_s13 + $0x104] ss:$16 sps:$4 sm:$0xff]  }
 0x4fa   :  { %v4696_v0 = vpop.f32.mrf.mxu0  ;;  %v12332_v31 = vld [vmem:[%s15685_s13 + $0x1c0] ss:$16 sps:$4 sm:$0xff]  }
 0x4fb   :  { %v12339_v0 = vld [vmem:[%s15685_s13 + $0x1a4] ss:$16 sps:$4 sm:$0xff]   ;;  %v12362_v58 = vld [vmem:[%s15685_s13 + $0x100] ss:$16 sps:$4 sm:$0xff]  }
 0x534   :  { %v4773_v63 = vpop.f32.mrf.mxu0 }
 0x535   :  { %v4774_v4 = vadd.f32 %v4773_v63, %v4733_v59  ;;  %v12367_v59 = vld [vmem:[%s15685_s13 + $0x2e4] ss:$16 sps:$4 sm:$0xff]  }
 0x536   :  { %v4775_v5 = vpop.f32.mrf.mxu0  ;;  %7046 = vmatprep.subr.bf16.mxu1 %v12367_v59  ;;  %v12370_v63 = vld [vmem:[%s15685_s13 + $0x4e4] ss:$16 sps:$4 sm:$0xff]   ;;  %v12514_v59 = vld [vmem:[%s15685_s13 + $0x1ec] ss:$16 sps:$4 sm:$0xff]  }
 0x537   :  { %v4776_v8 = vadd.f32 %v4775_v5, %v4735_v2  ;;  %v4782_v13 = vmax.f32 %v4774_v4, 0.0  ;;  %v12368_v2 = vld [vmem:[%s15685_s13 + $0x4e0] ss:$16 sps:$4 sm:$0xff]   ;;  %v12376_v4 = vld [vmem:[%s15685_s13 + $0x4c4] ss:$16 sps:$4 sm:$0xff]  }
 0x538   :  { %v4777_v14 = vpop.f32.mrf.mxu0  ;;  %v12374_v5 = vld [vmem:[%s15685_s13 + $0x4c0] ss:$16 sps:$4 sm:$0xff]  }
 0x539   :  { %v4783_v18 = vmax.f32 %v4776_v8, 0.0  ;;  %v4851_v37 = vpack.c.bf16 %v4782_v13, %v4782_v13  ;;  %v12382_v8 = vld [vmem:[%s15685_s13 + $0x4a4] ss:$16 sps:$4 sm:$0xff]   ;;  %v12380_v13 = vld [vmem:[%s15685_s13 + $0x4a0] ss:$16 sps:$4 sm:$0xff]  }
 0x53a   :  { %v4778_v22 = vpop.f32.mrf.mxu0  ;;  %v12388_v14 = vld [vmem:[%s15685_s13 + $0x484] ss:$16 sps:$4 sm:$0xff]  }
 0x53b   :  { %v4852_v24 = vpack.c.bf16 %v4783_v18, %v4783_v18  ;;  %v12386_v18 = vld [vmem:[%s15685_s13 + $0x480] ss:$16 sps:$4 sm:$0xff]   ;;  %v12394_v22 = vld [vmem:[%s15685_s13 + $0x464] ss:$16 sps:$4 sm:$0xff]  }
 0x53d   :  { %5257 = vmatprep.mubr.bf16.mxu0 %v4852_v24  ;;  %v12392_v24 = vld [vmem:[%s15685_s13 + $0x460] ss:$16 sps:$4 sm:$0xff]  }
 0x53e   :  { %5258 = vmatmul.mubr.bf16.vlgmr.msra.gmra.mxu0 %v4851_v37  ;;  %v12398_v37 = vld [vmem:[%s15685_s13 + $0x440] ss:$16 sps:$4 sm:$0xff]  }
 0x53f   :  { %7006 = vmatpush1.bf16.msra.mxu0 %v12301_v36  ;;  %7037 = vmatprep.mubr.bf16.mxu0 %v13856_v62  ;;  %v12400_v36 = vld [vmem:[%s15685_s13 + $0x444] ss:$16 sps:$4 sm:$0xff]  }
 0x540   :  { %7007 = vmatprep.subr.bf16.mxu0 %v12306_v21  ;;  %v12406_v21 = vld [vmem:[%s15685_s13 + $0x424] ss:$16 sps:$4 sm:$0xff]  }
 0x543   :  { %7008 = vmatpush1.bf16.msra.mxu0 %v12304_v23  ;;  %v12404_v23 = vld [vmem:[%s15685_s13 + $0x420] ss:$16 sps:$4 sm:$0xff]  }
 0x544   :  { %7009 = vmatprep.subr.bf16.mxu0 %v12309_v9  ;;  %v12412_v9 = vld [vmem:[%s15685_s13 + $0x404] ss:$16 sps:$4 sm:$0xff]  }
 0x547   :  { %7010 = vmatpush1.bf16.msra.mxu0 %v12307_v25  ;;  %v12410_v25 = vld [vmem:[%s15685_s13 + $0x400] ss:$16 sps:$4 sm:$0xff]  }
 0x548   :  { %7011 = vmatprep.subr.bf16.mxu0 %v12312_v26  ;;  %v12418_v26 = vld [vmem:[%s15685_s13 + $0x5e4] ss:$16 sps:$4 sm:$0xff]  }
 0x54b   :  { %7012 = vmatpush1.bf16.msra.mxu0 %v12310_v27  ;;  %v12416_v27 = vld [vmem:[%s15685_s13 + $0x5e0] ss:$16 sps:$4 sm:$0xff]  }
 0x54c   :  { %7013 = vmatprep.subr.bf16.mxu0 %v12315_v45  ;;  %v12424_v45 = vld [vmem:[%s15685_s13 + $0x5c4] ss:$16 sps:$4 sm:$0xff]  }
 0x54f   :  { %7014 = vmatpush1.bf16.msra.mxu0 %v12313_v47  ;;  %v12422_v47 = vld [vmem:[%s15685_s13 + $0x5c0] ss:$16 sps:$4 sm:$0xff]  }
 0x550   :  { %7015 = vmatprep.subr.bf16.mxu0 %v12318_v28  ;;  %v12430_v28 = vld [vmem:[%s15685_s13 + $0x5a4] ss:$16 sps:$4 sm:$0xff]  }
 0x553   :  { %7016 = vmatpush1.bf16.msra.mxu0 %v12316_v43  ;;  %v12428_v43 = vld [vmem:[%s15685_s13 + $0x5a0] ss:$16 sps:$4 sm:$0xff]  }
 0x554   :  { %7017 = vmatprep.subr.bf16.mxu0 %v12321_v29  ;;  %v12436_v29 = vld [vmem:[%s15685_s13 + $0x584] ss:$16 sps:$4 sm:$0xff]  }
 0x557   :  { %7018 = vmatpush1.bf16.msra.mxu0 %v12319_v19  ;;  %v12434_v19 = vld [vmem:[%s15685_s13 + $0x580] ss:$16 sps:$4 sm:$0xff]  }
 0x558   :  { %7019 = vmatprep.subr.bf16.mxu0 %v12324_v30  ;;  %v12442_v30 = vld [vmem:[%s15685_s13 + $0x564] ss:$16 sps:$4 sm:$0xff]  }
 0x55b   :  { %7020 = vmatpush1.bf16.msra.mxu0 %v12322_v20  ;;  %v12440_v20 = vld [vmem:[%s15685_s13 + $0x560] ss:$16 sps:$4 sm:$0xff]  }
 0x55c   :  { %7021 = vmatprep.subr.bf16.mxu0 %v12329_v15  ;;  %v12448_v15 = vld [vmem:[%s15685_s13 + $0x544] ss:$16 sps:$4 sm:$0xff]  }
 0x55f   :  { %7022 = vmatpush2.bf16.msra.mxu0 %v12327_v60  ;;  %v12446_v60 = vld [vmem:[%s15685_s13 + $0x540] ss:$16 sps:$4 sm:$0xff]  }
 0x560   :  { %7023 = vmatprep.subr.bf16.mxu0 %v12334_v56  ;;  %v12454_v56 = vld [vmem:[%s15685_s13 + $0x524] ss:$16 sps:$4 sm:$0xff]  }
 0x563   :  { %7024 = vmatpush2.bf16.msra.mxu0 %v12332_v31  ;;  %v12452_v31 = vld [vmem:[%s15685_s13 + $0x520] ss:$16 sps:$4 sm:$0xff]  }
 0x564   :  { %7025 = vmatprep.subr.bf16.mxu0 %v12339_v0  ;;  %v12460_v0 = vld [vmem:[%s15685_s13 + $0x504] ss:$16 sps:$4 sm:$0xff]  }
 0x567   :  { %7026 = vmatpush2.bf16.msra.mxu0 %v12337_v34  ;;  %v12458_v34 = vld [vmem:[%s15685_s13 + $0x500] ss:$16 sps:$4 sm:$0xff]  }
 0x568   :  { %7027 = vmatprep.subr.bf16.mxu0 %v12344_v6  ;;  %v12466_v6 = vld [vmem:[%s15685_s13 + $0xec] ss:$16 sps:$4 sm:$0xff]  }
 0x56b   :  { %7028 = vmatpush2.bf16.msra.mxu0 %v12342_v61  ;;  %v12464_v61 = vld [vmem:[%s15685_s13 + $0xe8] ss:$16 sps:$4 sm:$0xff]  }
 0x56c   :  { %7029 = vmatprep.subr.bf16.mxu0 %v12349_v35  ;;  %v12472_v35 = vld [vmem:[%s15685_s13 + $0xcc] ss:$16 sps:$4 sm:$0xff]  }
 0x56f   :  { %7030 = vmatpush2.bf16.msra.mxu0 %v12347_v38  ;;  %v12470_v38 = vld [vmem:[%s15685_s13 + $0xc8] ss:$16 sps:$4 sm:$0xff]  }
 0x570   :  { %7031 = vmatprep.subr.bf16.mxu0 %v12354_v39  ;;  %v12478_v39 = vld [vmem:[%s15685_s13 + $0xac] ss:$16 sps:$4 sm:$0xff]  }
 0x573   :  { %7032 = vmatpush2.bf16.msra.mxu0 %v12352_v1  ;;  %v12476_v1 = vld [vmem:[%s15685_s13 + $0xa8] ss:$16 sps:$4 sm:$0xff]  }
 0x574   :  { %7033 = vmatprep.subr.bf16.mxu0 %v12359_v44  ;;  %v12490_v44 = vld [vmem:[%s15685_s13 + $0x6c] ss:$16 sps:$4 sm:$0xff]  }
 0x577   :  { %7034 = vmatpush2.bf16.msra.mxu0 %v12357_v48  ;;  %v12488_v48 = vld [vmem:[%s15685_s13 + $0x68] ss:$16 sps:$4 sm:$0xff]  }
 0x578   :  { %7035 = vmatprep.subr.bf16.mxu0 %v12364_v54  ;;  %v12500_v54 = vld [vmem:[%s15685_s13 + $0x28] ss:$16 sps:$4 sm:$0xff]  }
 0x57b   :  { %7036 = vmatpush2.bf16.msra.mxu0 %v12362_v58  ;;  %v12506_v58 = vld [vmem:[%s15685_s13 + $0x8] ss:$16 sps:$4 sm:$0xff]  }
 0x57c   :  { %7087 = vmatprep.subr.bf16.mxu0 %v12370_v63  ;;  %v12512_v63 = vld [vmem:[%s15685_s13 + $0x1e8] ss:$16 sps:$4 sm:$0xff]  }
 0x57e   :  { %v14088_v41 = vpop.f32.mrf.mxu1  ;;  %7038 = vmatmul.mubr.bf16.vlgmr.msra.gmra.mxu0 %v13862_v16 }
 0x57f   :  { %7119 = vmatprep.mubr.bf16.mxu0 %v13879_v53  ;;  %7088 = vmatpush1.bf16.msra.mxu0 %v12368_v2  ;;  %v12520_v2 = vld [vmem:[%s15685_s13 + $0x1cc] ss:$16 sps:$4 sm:$0xff]  }
 0x580   :  { %v14093_v46 = vpop.f32.mrf.mxu1  ;;  %7089 = vmatprep.subr.bf16.mxu0 %v12376_v4  ;;  %v12518_v4 = vld [vmem:[%s15685_s13 + $0x1c8] ss:$16 sps:$4 sm:$0xff]  }
 0x582   :  { %v5222_v51 = vpop.f32.mrf.mxu1 }
 0x583   :  { %7090 = vmatpush1.bf16.msra.mxu0 %v12374_v5  ;;  %v12494_v51 = vld [vmem:[%s15685_s13 + $0x48] ss:$16 sps:$4 sm:$0xff]   ;;  %v12526_v5 = vld [vmem:[%s15685_s13 + $0x1ac] ss:$16 sps:$4 sm:$0xff]  }
 0x584   :  { %v5223_v55 = vpop.f32.mrf.mxu1  ;;  %7091 = vmatprep.subr.bf16.mxu0 %v12382_v8  ;;  %v12524_v8 = vld [vmem:[%s15685_s13 + $0x1a8] ss:$16 sps:$4 sm:$0xff]  }
 0x585   :  { %v12508_v55 = vld [vmem:[%s15685_s13 + $0xc] ss:$16 sps:$4 sm:$0xff]  }
 0x587   :  { %7092 = vmatpush1.bf16.msra.mxu0 %v12380_v13  ;;  %v12532_v13 = vld [vmem:[%s15685_s13 + $0x18c] ss:$16 sps:$4 sm:$0xff]  }
 0x588   :  { %7093 = vmatprep.subr.bf16.mxu0 %v12388_v14  ;;  %v12530_v14 = vld [vmem:[%s15685_s13 + $0x188] ss:$16 sps:$4 sm:$0xff]  }
 0x58b   :  { %7094 = vmatpush1.bf16.msra.mxu0 %v12386_v18  ;;  %v4848_v18 = vld [vmem:[#allocation17] sm:$0x3] }
 0x58c   :  { %7095 = vmatprep.subr.bf16.mxu0 %v12394_v22  ;;  %v12538_v22 = vld [vmem:[%s15685_s13 + $0x16c] ss:$16 sps:$4 sm:$0xff]  }
 0x58f   :  { %7096 = vmatpush1.bf16.msra.mxu0 %v12392_v24  ;;  %v4857_v24 = vrot.slane %v4848_v18, %v13916_v7 }
 0x590   :  { %7097 = vmatprep.subr.bf16.mxu0 %v12400_v36  ;;  %v12536_v36 = vld [vmem:[%s15685_s13 + $0x168] ss:$16 sps:$4 sm:$0xff]  }
 0x593   :  { %7098 = vmatpush1.bf16.msra.mxu0 %v12398_v37  ;;  %v4861_v37 = vrot.slane %v4848_v18, %v13919_v11  ;;  %v12596_v18 = vld [vmem:[%s15685_s13 + $0x428] ss:$16 sps:$4 sm:$0xff]  }
 0x594   :  { %7099 = vmatprep.subr.bf16.mxu0 %v12406_v21  ;;  %v12544_v21 = vld [vmem:[%s15685_s13 + $0x14c] ss:$16 sps:$4 sm:$0xff]  }
 0x597   :  { %7100 = vmatpush1.bf16.msra.mxu0 %v12404_v23  ;;  %v5219_v23 = vadd.f32 %v14088_v41, %v4857_v24  ;;  %v12548_v41 = vld [vmem:[%s15685_s13 + $0x128] ss:$16 sps:$4 sm:$0xff]   ;;  %v12604_v24 = vld [vmem:[%s15685_s13 + $0x40c] ss:$16 sps:$4 sm:$0xff]  }
 0x598   :  { %7101 = vmatprep.subr.bf16.mxu0 %v12412_v9  ;;  %v12542_v9 = vld [vmem:[%s15685_s13 + $0x148] ss:$16 sps:$4 sm:$0xff]  }
 0x59b   :  { %7102 = vmatpush1.bf16.msra.mxu0 %v12410_v25 }
 0x59c   :  { %7103 = vmatprep.subr.bf16.mxu0 %v12418_v26  ;;  %v5221_v26 = vadd.f32 %v14093_v46, %v4861_v37  ;;  %v12556_v46 = vld [vmem:[%s15685_s13 + $0x10c] ss:$16 sps:$4 sm:$0xff]   ;;  %v12602_v37 = vld [vmem:[%s15685_s13 + $0x408] ss:$16 sps:$4 sm:$0xff]  }
 0x59f   :  { %7104 = vmatpush2.bf16.msra.mxu0 %v12416_v27 }
 0x5a0   :  { %7105 = vmatprep.subr.bf16.mxu0 %v12424_v45 }
 0x5a3   :  { %7106 = vmatpush2.bf16.msra.mxu0 %v12422_v47  ;;  %v12550_v47 = vld [vmem:[%s15685_s13 + $0x12c] ss:$16 sps:$4 sm:$0xff]  }
 0x5a4   :  { %7107 = vmatprep.subr.bf16.mxu0 %v12430_v28 }
 0x5a7   :  { %7108 = vmatpush2.bf16.msra.mxu0 %v12428_v43 }
 0x5a8   :  { %7109 = vmatprep.subr.bf16.mxu0 %v12436_v29 }
 0x5ab   :  { %7110 = vmatpush2.bf16.msra.mxu0 %v12434_v19 }
 0x5ac   :  { %7111 = vmatprep.subr.bf16.mxu0 %v12442_v30 }
 0x5af   :  { %7112 = vmatpush2.bf16.msra.mxu0 %v12440_v20 }
 0x5b0   :  { %7113 = vmatprep.subr.bf16.mxu0 %v12448_v15  ;;  %v12365_v15 = vld [vmem:[%s15685_s13 + $0x2e0] ss:$16 sps:$4 sm:$0xff]  }
 0x5b3   :  { %7114 = vmatpush2.bf16.msra.mxu0 %v12446_v60  ;;  %v12554_v60 = vld [vmem:[%s15685_s13 + $0x108] ss:$16 sps:$4 sm:$0xff]  }
 0x5b4   :  { %7115 = vmatprep.subr.bf16.mxu0 %v12454_v56 }
 0x5b7   :  { %7116 = vmatpush2.bf16.msra.mxu0 %v12452_v31  ;;  %v12373_v31 = vld [vmem:[%s15685_s13 + $0x2c4] ss:$16 sps:$4 sm:$0xff]  }
 0x5b8   :  { %7117 = vmatprep.subr.bf16.mxu0 %v12460_v0  ;;  %v12562_v0 = vld [vmem:[%s15685_s13 + $0x4ec] ss:$16 sps:$4 sm:$0xff]  }
 0x5bb   :  { %7118 = vmatpush2.bf16.msra.mxu0 %v12458_v34  ;;  %v12371_v34 = vld [vmem:[%s15685_s13 + $0x2c0] ss:$16 sps:$4 sm:$0xff]  }
 0x5bc   :  { %7169 = vmatprep.subr.bf16.mxu0 %v12466_v6  ;;  %v12560_v6 = vld [vmem:[%s15685_s13 + $0x4e8] ss:$16 sps:$4 sm:$0xff]  }
 0x5be   :  { %7120 = vmatmul.mubr.bf16.vlgmr.msra.gmra.mxu0 %v13889_v32 }
 0x5bf   :  { %7170 = vmatpush1.bf16.msra.mxu0 %v12464_v61  ;;  %7201 = vmatprep.mubr.bf16.mxu0 %v13856_v62  ;;  %v12379_v61 = vld [vmem:[%s15685_s13 + $0x2a4] ss:$16 sps:$4 sm:$0xff]  }
 0x5c0   :  { %7171 = vmatprep.subr.bf16.mxu0 %v12472_v35  ;;  %v12568_v35 = vld [vmem:[%s15685_s13 + $0x4cc] ss:$16 sps:$4 sm:$0xff]  }
 0x5c3   :  { %7172 = vmatpush1.bf16.msra.mxu0 %v12470_v38  ;;  %v12377_v38 = vld [vmem:[%s15685_s13 + $0x2a0] ss:$16 sps:$4 sm:$0xff]  }
 0x5c4   :  { %7173 = vmatprep.subr.bf16.mxu0 %v12478_v39  ;;  %v12566_v39 = vld [vmem:[%s15685_s13 + $0x4c8] ss:$16 sps:$4 sm:$0xff]  }
 0x5c7   :  { %7174 = vmatpush1.bf16.msra.mxu0 %v12476_v1  ;;  %v12385_v1 = vld [vmem:[%s15685_s13 + $0x284] ss:$16 sps:$4 sm:$0xff]  }
 0x5c8   :  { %7175 = vmatprep.subr.bf16.mxu0 %v12484_v40  ;;  %v12574_v40 = vld [vmem:[%s15685_s13 + $0x4ac] ss:$16 sps:$4 sm:$0xff]  }
 0x5cb   :  { %7176 = vmatpush1.bf16.msra.mxu0 %v12482_v42  ;;  %v12383_v42 = vld [vmem:[%s15685_s13 + $0x280] ss:$16 sps:$4 sm:$0xff]  }
 0x5cc   :  { %7177 = vmatprep.subr.bf16.mxu0 %v12490_v44  ;;  %v12572_v44 = vld [vmem:[%s15685_s13 + $0x4a8] ss:$16 sps:$4 sm:$0xff]  }
 0x5cf   :  { %7178 = vmatpush1.bf16.msra.mxu0 %v12488_v48  ;;  %v12391_v48 = vld [vmem:[%s15685_s13 + $0x264] ss:$16 sps:$4 sm:$0xff]  }
 0x5d0   :  { %7179 = vmatprep.subr.bf16.mxu0 %v12496_v50  ;;  %v12580_v50 = vld [vmem:[%s15685_s13 + $0x48c] ss:$16 sps:$4 sm:$0xff]  }
 0x5d3   :  { %7180 = vmatpush1.bf16.msra.mxu0 %v12494_v51  ;;  %v12389_v51 = vld [vmem:[%s15685_s13 + $0x260] ss:$16 sps:$4 sm:$0xff]  }
 0x5d4   :  { %7181 = vmatprep.subr.bf16.mxu0 %v12502_v52  ;;  %v12578_v52 = vld [vmem:[%s15685_s13 + $0x488] ss:$16 sps:$4 sm:$0xff]  }
 0x5d7   :  { %7182 = vmatpush1.bf16.msra.mxu0 %v12500_v54  ;;  %v12397_v54 = vld [vmem:[%s15685_s13 + $0x244] ss:$16 sps:$4 sm:$0xff]  }
 0x5d8   :  { %7183 = vmatprep.subr.bf16.mxu0 %v12508_v55  ;;  %v12586_v55 = vld [vmem:[%s15685_s13 + $0x46c] ss:$16 sps:$4 sm:$0xff]  }
 0x5db   :  { %7184 = vmatpush1.bf16.msra.mxu0 %v12506_v58  ;;  %v12395_v58 = vld [vmem:[%s15685_s13 + $0x240] ss:$16 sps:$4 sm:$0xff]  }
 0x5dc   :  { %7185 = vmatprep.subr.bf16.mxu0 %v12514_v59  ;;  %v12584_v59 = vld [vmem:[%s15685_s13 + $0x468] ss:$16 sps:$4 sm:$0xff]  }
 0x5df   :  { %7186 = vmatpush2.bf16.msra.mxu0 %v12512_v63  ;;  %v12403_v63 = vld [vmem:[%s15685_s13 + $0x224] ss:$16 sps:$4 sm:$0xff]  }
 0x5e0   :  { %7187 = vmatprep.subr.bf16.mxu0 %v12520_v2  ;;  %v12592_v2 = vld [vmem:[%s15685_s13 + $0x44c] ss:$16 sps:$4 sm:$0xff]  }
 0x5e3   :  { %7188 = vmatpush2.bf16.msra.mxu0 %v12518_v4  ;;  %v12401_v4 = vld [vmem:[%s15685_s13 + $0x220] ss:$16 sps:$4 sm:$0xff]  }
 0x5e4   :  { %7189 = vmatprep.subr.bf16.mxu0 %v12526_v5  ;;  %v12590_v5 = vld [vmem:[%s15685_s13 + $0x448] ss:$16 sps:$4 sm:$0xff]  }
 0x5e7   :  { %7190 = vmatpush2.bf16.msra.mxu0 %v12524_v8  ;;  %v12409_v8 = vld [vmem:[%s15685_s13 + $0x204] ss:$16 sps:$4 sm:$0xff]  }
 0x5e8   :  { %7191 = vmatprep.subr.bf16.mxu0 %v12532_v13  ;;  %v12598_v13 = vld [vmem:[%s15685_s13 + $0x42c] ss:$16 sps:$4 sm:$0xff]  }
 0x5eb   :  { %7192 = vmatpush2.bf16.msra.mxu0 %v12530_v14  ;;  %v12407_v14 = vld [vmem:[%s15685_s13 + $0x200] ss:$16 sps:$4 sm:$0xff]  }
 0x5ec   :  { %7193 = vmatprep.subr.bf16.mxu0 %v12538_v22  ;;  %v12415_v22 = vld [vmem:[%s15685_s13 + $0x3e4] ss:$16 sps:$4 sm:$0xff]  }
 0x5ef   :  { %7194 = vmatpush2.bf16.msra.mxu0 %v12536_v36  ;;  %v12413_v36 = vld [vmem:[%s15685_s13 + $0x3e0] ss:$16 sps:$4 sm:$0xff]  }
 0x5f0   :  { %7195 = vmatprep.subr.bf16.mxu0 %v12544_v21  ;;  %v12421_v21 = vld [vmem:[%s15685_s13 + $0x3c4] ss:$16 sps:$4 sm:$0xff]  }
 0x5f3   :  { %7196 = vmatpush2.bf16.msra.mxu0 %v12542_v9  ;;  %v12419_v9 = vld [vmem:[%s15685_s13 + $0x3c0] ss:$16 sps:$4 sm:$0xff]  }
 0x5f4   :  { %7197 = vmatprep.subr.bf16.mxu0 %v12550_v47  ;;  %v12614_v47 = vld [vmem:[%s15685_s13 + $0x5c8] ss:$16 sps:$4 sm:$0xff]  }
 0x5f7   :  { %7198 = vmatpush2.bf16.msra.mxu0 %v12548_v41  ;;  %v12622_v41 = vld [vmem:[%s15685_s13 + $0x5ac] ss:$16 sps:$4 sm:$0xff]  }
 0x5f8   :  { %7199 = vmatprep.subr.bf16.mxu0 %v12556_v46  ;;  %v12437_v46 = vld [vmem:[%s15685_s13 + $0x360] ss:$16 sps:$4 sm:$0xff]  }
 0x5fb   :  { %7200 = vmatpush2.bf16.msra.mxu0 %v12554_v60  ;;  %v12634_v60 = vld [vmem:[%s15685_s13 + $0x56c] ss:$16 sps:$4 sm:$0xff]  }
 0x5fc   :  { %7251 = vmatprep.subr.bf16.mxu0 %v12562_v0  ;;  %v12451_v0 = vld [vmem:[%s15685_s13 + $0x324] ss:$16 sps:$4 sm:$0xff]  }
 0x5fe   :  { %v5259_v25 = vpop.f32.mrf.mxu0  ;;  %7202 = vmatmul.mubr.bf16.vlgmr.msra.gmra.mxu0 %v13862_v16 }
 0x5ff   :  { %v5260_v27 = vadd.f32 %v5259_v25, %v5219_v23  ;;  %7252 = vmatpush1.bf16.msra.mxu0 %v12560_v6  ;;  %7283 = vmatprep.mubr.bf16.mxu0 %v13879_v53  ;;  %v12610_v23 = vld [vmem:[%s15685_s13 + $0x5ec] ss:$16 sps:$4 sm:$0xff]   ;;  %v12608_v25 = vld [vmem:[%s15685_s13 + $0x5e8] ss:$16 sps:$4 sm:$0xff]   ;;  %v12449_v6 = vld [vmem:[%s15685_s13 + $0x320] ss:$16 sps:$4 sm:$0xff]  }
 0x600   :  { %v5261_v45 = vpop.f32.mrf.mxu0  ;;  %7253 = vmatprep.subr.bf16.mxu0 %v12568_v35  ;;  %v12457_v35 = vld [vmem:[%s15685_s13 + $0x304] ss:$16 sps:$4 sm:$0xff]  }
 0x601   :  { %v5262_v28 = vadd.f32 %v5261_v45, %v5221_v26  ;;  %v5266_v43 = vmax.f32 %v5260_v27, 0.0  ;;  %v12427_v26 = vld [vmem:[%s15685_s13 + $0x3a4] ss:$16 sps:$4 sm:$0xff]   ;;  %v12616_v27 = vld [vmem:[%s15685_s13 + $0x5cc] ss:$16 sps:$4 sm:$0xff]  }
 0x602   :  { %v5263_v29 = vpop.f32.mrf.mxu0  ;;  %v12425_v45 = vld [vmem:[%s15685_s13 + $0x3a0] ss:$16 sps:$4 sm:$0xff]  }
 0x603   :  { %v5267_v19 = vmax.f32 %v5262_v28, 0.0  ;;  %v5301_v56 = vpack.c.bf16 %v5266_v43, %v5266_v43  ;;  %7254 = vmatpush1.bf16.msra.mxu0 %v12566_v39  ;;  %v12433_v28 = vld [vmem:[%s15685_s13 + $0x384] ss:$16 sps:$4 sm:$0xff]   ;;  %v12431_v43 = vld [vmem:[%s15685_s13 + $0x380] ss:$16 sps:$4 sm:$0xff]  }
 0x604   :  { %v5264_v30 = vpop.f32.mrf.mxu0  ;;  %7255 = vmatprep.subr.bf16.mxu0 %v12574_v40  ;;  %v12620_v29 = vld [vmem:[%s15685_s13 + $0x5a8] ss:$16 sps:$4 sm:$0xff]   ;;  %v12455_v39 = vld [vmem:[%s15685_s13 + $0x300] ss:$16 sps:$4 sm:$0xff]   ;;  %v12463_v40 = vld [vmem:[%s15685_s13 + $0x6e4] ss:$16 sps:$4 sm:$0xff]  }
 0x605   :  { %v5302_v20 = vpack.c.bf16 %v5267_v19, %v5267_v19  ;;  %v12439_v19 = vld [vmem:[%s15685_s13 + $0x364] ss:$16 sps:$4 sm:$0xff]   ;;  %v12628_v30 = vld [vmem:[%s15685_s13 + $0x58c] ss:$16 sps:$4 sm:$0xff]  }
 0x607   :  { %5437 = vmatprep.mubr.bf16.mxu1 %v5302_v20  ;;  %7256 = vmatpush1.bf16.msra.mxu0 %v12572_v44  ;;  %v12626_v20 = vld [vmem:[%s15685_s13 + $0x588] ss:$16 sps:$4 sm:$0xff]   ;;  %v12461_v44 = vld [vmem:[%s15685_s13 + $0x6e0] ss:$16 sps:$4 sm:$0xff]  }
 0x608   :  { %5438 = vmatmul.mubr.bf16.vlgmr.msra.gmra.mxu1 %v5301_v56  ;;  %7257 = vmatprep.subr.bf16.mxu0 %v12580_v50  ;;  %v12443_v56 = vld [vmem:[%s15685_s13 + $0x340] ss:$16 sps:$4 sm:$0xff]   ;;  %v12469_v50 = vld [vmem:[%s15685_s13 + $0x6c4] ss:$16 sps:$4 sm:$0xff]  }
 0x609   :  { %7047 = vmatpush1.bf16.msra.mxu1 %v12365_v15  ;;  %7078 = vmatprep.mubr.bf16.mxu1 %v13858_v3  ;;  %v12445_v15 = vld [vmem:[%s15685_s13 + $0x344] ss:$16 sps:$4 sm:$0xff]  }
 0x60a   :  { %7048 = vmatprep.subr.bf16.mxu1 %v12373_v31  ;;  %v12632_v31 = vld [vmem:[%s15685_s13 + $0x568] ss:$16 sps:$4 sm:$0xff]  }
 0x60b   :  { %7258 = vmatpush1.bf16.msra.mxu0 %v12578_v52  ;;  %v12475_v52 = vld [vmem:[%s15685_s13 + $0x6a4] ss:$16 sps:$4 sm:$0xff]  }
 0x60c   :  { %7259 = vmatprep.subr.bf16.mxu0 %v12586_v55  ;;  %v12481_v55 = vld [vmem:[%s15685_s13 + $0x684] ss:$16 sps:$4 sm:$0xff]  }
 0x60d   :  { %7049 = vmatpush1.bf16.msra.mxu1 %v12371_v34  ;;  %v12640_v34 = vld [vmem:[%s15685_s13 + $0x54c] ss:$16 sps:$4 sm:$0xff]  }
 0x60e   :  { %7050 = vmatprep.subr.bf16.mxu1 %v12379_v61  ;;  %v12638_v61 = vld [vmem:[%s15685_s13 + $0x548] ss:$16 sps:$4 sm:$0xff]  }
 0x60f   :  { %7260 = vmatpush1.bf16.msra.mxu0 %v12584_v59  ;;  %v12487_v59 = vld [vmem:[%s15685_s13 + $0x664] ss:$16 sps:$4 sm:$0xff]  }
 0x610   :  { %7261 = vmatprep.subr.bf16.mxu0 %v12592_v2  ;;  %v12493_v2 = vld [vmem:[%s15685_s13 + $0x644] ss:$16 sps:$4 sm:$0xff]  }
 0x611   :  { %7051 = vmatpush1.bf16.msra.mxu1 %v12377_v38  ;;  %v12646_v38 = vld [vmem:[%s15685_s13 + $0x52c] ss:$16 sps:$4 sm:$0xff]  }
 0x612   :  { %7052 = vmatprep.subr.bf16.mxu1 %v12385_v1  ;;  %v12644_v1 = vld [vmem:[%s15685_s13 + $0x528] ss:$16 sps:$4 sm:$0xff]  }
 0x613   :  { %7262 = vmatpush1.bf16.msra.mxu0 %v12590_v5  ;;  %v12499_v5 = vld [vmem:[%s15685_s13 + $0x624] ss:$16 sps:$4 sm:$0xff]  }
 0x614   :  { %7263 = vmatprep.subr.bf16.mxu0 %v12598_v13  ;;  %v12505_v13 = vld [vmem:[%s15685_s13 + $0x604] ss:$16 sps:$4 sm:$0xff]  }
 0x615   :  { %7053 = vmatpush1.bf16.msra.mxu1 %v12383_v42  ;;  %v12652_v42 = vld [vmem:[%s15685_s13 + $0x50c] ss:$16 sps:$4 sm:$0xff]  }
 0x616   :  { %7054 = vmatprep.subr.bf16.mxu1 %v12391_v48  ;;  %v12650_v48 = vld [vmem:[%s15685_s13 + $0x508] ss:$16 sps:$4 sm:$0xff]  }
 0x617   :  { %7264 = vmatpush1.bf16.msra.mxu0 %v12596_v18  ;;  %v12511_v18 = vld [vmem:[%s15685_s13 + $0x7e4] ss:$16 sps:$4 sm:$0xff]  }
 0x618   :  { %7265 = vmatprep.subr.bf16.mxu0 %v12604_v24  ;;  %v12517_v24 = vld [vmem:[%s15685_s13 + $0x7c4] ss:$16 sps:$4 sm:$0xff]  }
 0x619   :  { %7055 = vmatpush1.bf16.msra.mxu1 %v12389_v51  ;;  %v12467_v51 = vld [vmem:[%s15685_s13 + $0x6c0] ss:$16 sps:$4 sm:$0xff]  }
 0x61a   :  { %7056 = vmatprep.subr.bf16.mxu1 %v12397_v54  ;;  %v12473_v54 = vld [vmem:[%s15685_s13 + $0x6a0] ss:$16 sps:$4 sm:$0xff]  }
 0x61b   :  { %7266 = vmatpush1.bf16.msra.mxu0 %v12602_v37  ;;  %v12523_v37 = vld [vmem:[%s15685_s13 + $0x7a4] ss:$16 sps:$4 sm:$0xff]  }
 0x61c   :  { %7267 = vmatprep.subr.bf16.mxu0 %v12610_v23  ;;  %v12529_v23 = vld [vmem:[%s15685_s13 + $0x784] ss:$16 sps:$4 sm:$0xff]  }
 0x61d   :  { %7057 = vmatpush1.bf16.msra.mxu1 %v12395_v58  ;;  %v12479_v58 = vld [vmem:[%s15685_s13 + $0x680] ss:$16 sps:$4 sm:$0xff]  }
 0x61e   :  { %7058 = vmatprep.subr.bf16.mxu1 %v12403_v63  ;;  %v12485_v63 = vld [vmem:[%s15685_s13 + $0x660] ss:$16 sps:$4 sm:$0xff]  }
 0x61f   :  { %7268 = vmatpush2.bf16.msra.mxu0 %v12608_v25  ;;  %v12535_v25 = vld [vmem:[%s15685_s13 + $0x764] ss:$16 sps:$4 sm:$0xff]  }
 0x620   :  { %7269 = vmatprep.subr.bf16.mxu0 %v12616_v27  ;;  %v12541_v27 = vld [vmem:[%s15685_s13 + $0x744] ss:$16 sps:$4 sm:$0xff]  }
 0x621   :  { %7059 = vmatpush1.bf16.msra.mxu1 %v12401_v4  ;;  %v12491_v4 = vld [vmem:[%s15685_s13 + $0x640] ss:$16 sps:$4 sm:$0xff]  }
 0x622   :  { %7060 = vmatprep.subr.bf16.mxu1 %v12409_v8  ;;  %v12497_v8 = vld [vmem:[%s15685_s13 + $0x620] ss:$16 sps:$4 sm:$0xff]  }
 0x623   :  { %7270 = vmatpush2.bf16.msra.mxu0 %v12614_v47  ;;  %v12547_v47 = vld [vmem:[%s15685_s13 + $0x724] ss:$16 sps:$4 sm:$0xff]  }
 0x624   :  { %7271 = vmatprep.subr.bf16.mxu0 %v12622_v41  ;;  %v12553_v41 = vld [vmem:[%s15685_s13 + $0x704] ss:$16 sps:$4 sm:$0xff]  }
 0x625   :  { %7061 = vmatpush1.bf16.msra.mxu1 %v12407_v14  ;;  %v12503_v14 = vld [vmem:[%s15685_s13 + $0x600] ss:$16 sps:$4 sm:$0xff]  }
 0x626   :  { %7062 = vmatprep.subr.bf16.mxu1 %v12415_v22  ;;  %v12509_v22 = vld [vmem:[%s15685_s13 + $0x7e0] ss:$16 sps:$4 sm:$0xff]  }
 0x627   :  { %7272 = vmatpush2.bf16.msra.mxu0 %v12620_v29  ;;  %v12551_v29 = vld [vmem:[%s15685_s13 + $0x700] ss:$16 sps:$4 sm:$0xff]  }
 0x628   :  { %7273 = vmatprep.subr.bf16.mxu0 %v12628_v30  ;;  %v12559_v30 = vld [vmem:[%s15685_s13 + $0x2ec] ss:$16 sps:$4 sm:$0xff]  }
 0x629   :  { %7063 = vmatpush2.bf16.msra.mxu1 %v12413_v36  ;;  %v12515_v36 = vld [vmem:[%s15685_s13 + $0x7c0] ss:$16 sps:$4 sm:$0xff]  }
 0x62a   :  { %7064 = vmatprep.subr.bf16.mxu1 %v12421_v21  ;;  %v12521_v21 = vld [vmem:[%s15685_s13 + $0x7a0] ss:$16 sps:$4 sm:$0xff]  }
 0x62b   :  { %7274 = vmatpush2.bf16.msra.mxu0 %v12626_v20  ;;  %v12557_v20 = vld [vmem:[%s15685_s13 + $0x2e8] ss:$16 sps:$4 sm:$0xff]  }
 0x62c   :  { %7275 = vmatprep.subr.bf16.mxu0 %v12634_v60  ;;  %v12565_v60 = vld [vmem:[%s15685_s13 + $0x2cc] ss:$16 sps:$4 sm:$0xff]  }
 0x62d   :  { %7065 = vmatpush2.bf16.msra.mxu1 %v12419_v9  ;;  %v12527_v9 = vld [vmem:[%s15685_s13 + $0x780] ss:$16 sps:$4 sm:$0xff]  }
 0x62e   :  { %7066 = vmatprep.subr.bf16.mxu1 %v12427_v26  ;;  %v12533_v26 = vld [vmem:[%s15685_s13 + $0x760] ss:$16 sps:$4 sm:$0xff]  }
 0x62f   :  { %7276 = vmatpush2.bf16.msra.mxu0 %v12632_v31  ;;  %v12571_v31 = vld [vmem:[%s15685_s13 + $0x2ac] ss:$16 sps:$4 sm:$0xff]  }
 0x630   :  { %7277 = vmatprep.subr.bf16.mxu0 %v12640_v34 }
 0x631   :  { %7067 = vmatpush2.bf16.msra.mxu1 %v12425_v45  ;;  %v12539_v45 = vld [vmem:[%s15685_s13 + $0x740] ss:$16 sps:$4 sm:$0xff]  }
 0x632   :  { %7068 = vmatprep.subr.bf16.mxu1 %v12433_v28  ;;  %v12545_v28 = vld [vmem:[%s15685_s13 + $0x720] ss:$16 sps:$4 sm:$0xff]  }
 0x633   :  { %7278 = vmatpush2.bf16.msra.mxu0 %v12638_v61  ;;  %v12577_v61 = vld [vmem:[%s15685_s13 + $0x28c] ss:$16 sps:$4 sm:$0xff]  }
 0x634   :  { %7279 = vmatprep.subr.bf16.mxu0 %v12646_v38  ;;  %v12703_v38 = vld [vmem:[#allocation23 + $0x74] ss:$8 sps:$4 sm:$0xff]  }
 0x635   :  { %7069 = vmatpush2.bf16.msra.mxu1 %v12431_v43 }
 0x636   :  { %7070 = vmatprep.subr.bf16.mxu1 %v12439_v19 }
 0x637   :  { %7280 = vmatpush2.bf16.msra.mxu0 %v12644_v1  ;;  %v12706_v1 = vld [vmem:[#allocation23 + $0x64] ss:$8 sps:$4 sm:$0xff]  }
 0x638   :  { %7281 = vmatprep.subr.bf16.mxu0 %v12652_v42  ;;  %v12575_v42 = vld [vmem:[%s15685_s13 + $0x288] ss:$16 sps:$4 sm:$0xff]  }
 0x639   :  { %7071 = vmatpush2.bf16.msra.mxu1 %v12437_v46 }
 0x63a   :  { %7072 = vmatprep.subr.bf16.mxu1 %v12445_v15 }
 0x63b   :  { %7282 = vmatpush2.bf16.msra.mxu0 %v12650_v48  ;;  %v12583_v48 = vld [vmem:[%s15685_s13 + $0x26c] ss:$16 sps:$4 sm:$0xff]  }
 0x63c   :  { %7737 = vmatprep.subr.bf16.mxu0 %v12703_v38  ;;  %v12739_v38 = vld [vmem:[#allocation23 + $0xb4] ss:$8 sps:$4 sm:$0xff]  }
 0x63d   :  { %7073 = vmatpush2.bf16.msra.mxu1 %v12443_v56  ;;  %v12563_v56 = vld [vmem:[%s15685_s13 + $0x2c8] ss:$16 sps:$4 sm:$0xff]  }
 0x63e   :  { %7074 = vmatprep.subr.bf16.mxu1 %v12451_v0  ;;  %7284 = vmatmul.mubr.bf16.vlgmr.msra.gmra.mxu0 %v13889_v32  ;;  %v14595_v43 = vpop.f32.mrf.mxu0 }
 0x640   :  { %v14600_v19 = vpop.f32.mrf.mxu0 }
 0x641   :  { %7075 = vmatpush2.bf16.msra.mxu1 %v12449_v6  ;;  %v12569_v6 = vld [vmem:[%s15685_s13 + $0x2a8] ss:$16 sps:$4 sm:$0xff]  }
 0x642   :  { %7076 = vmatprep.subr.bf16.mxu1 %v12457_v35  ;;  %v7043_v46 = vpop.f32.mrf.mxu0  ;;  %v12701_v35 = vld [vmem:[#allocation23 + $0x70] ss:$8 sps:$4 sm:$0xff]  }
 0x643   :  { %7738 = vmatpush1.bf16.msra.mxu0 %v12701_v35  ;;  %v12631_v46 = vld [vmem:[%s15685_s13 + $0x36c] ss:$16 sps:$4 sm:$0xff]  }
 0x644   :  { %v7044_v15 = vpop.f32.mrf.mxu0  ;;  %7739 = vmatprep.subr.bf16.mxu0 %v12706_v1  ;;  %v12643_v35 = vld [vmem:[%s15685_s13 + $0x32c] ss:$16 sps:$4 sm:$0xff]  }
 0x645   :  { %7077 = vmatpush2.bf16.msra.mxu1 %v12455_v39  ;;  %v12629_v15 = vld [vmem:[%s15685_s13 + $0x368] ss:$16 sps:$4 sm:$0xff]   ;;  %v12737_v1 = vld [vmem:[#allocation23 + $0xb0] ss:$8 sps:$4 sm:$0xff]  }
 0x646   :  { %7128 = vmatprep.subr.bf16.mxu1 %v12463_v40 }
 0x648   :  { %7079 = vmatmul.mubr.bf16.vlgmr.msra.gmra.mxu1 %v13864_v17 }
 0x649   :  { %7129 = vmatpush1.bf16.msra.mxu1 %v12461_v44  ;;  %7160 = vmatprep.mubr.bf16.mxu1 %v13883_v57  ;;  %v12704_v44 = vld [vmem:[#allocation23 + $0x60] ss:$8 sps:$4 sm:$0xff]  }
 0x64a   :  { %7130 = vmatprep.subr.bf16.mxu1 %v12469_v50  ;;  %v12709_v50 = vld [vmem:[#allocation23 + $0x54] ss:$8 sps:$4 sm:$0xff]   ;;  %7740 = vmatpush1.bf16.msra.mxu0 %v12704_v44 }
 0x64b   :  { %7741 = vmatprep.subr.bf16.mxu0 %v12709_v50  ;;  %v12647_v44 = vld [vmem:[%s15685_s13 + $0x308] ss:$16 sps:$4 sm:$0xff]   ;;  %v12655_v50 = vld [vmem:[%s15685_s13 + $0x6ec] ss:$16 sps:$4 sm:$0xff]  }
 0x64d   :  { %7131 = vmatpush1.bf16.msra.mxu1 %v12467_v51  ;;  %v12581_v51 = vld [vmem:[%s15685_s13 + $0x268] ss:$16 sps:$4 sm:$0xff]  }
 0x64e   :  { %7132 = vmatprep.subr.bf16.mxu1 %v12475_v52  ;;  %v12707_v52 = vld [vmem:[#allocation23 + $0x50] ss:$8 sps:$4 sm:$0xff]  }
 0x64f   :  { %7742 = vmatpush1.bf16.msra.mxu0 %v12707_v52  ;;  %v12658_v52 = vld [vmem:[%s15685_s13 + $0x6cc] ss:$16 sps:$4 sm:$0xff]  }
 0x651   :  { %7133 = vmatpush1.bf16.msra.mxu1 %v12473_v54  ;;  %v12589_v54 = vld [vmem:[%s15685_s13 + $0x24c] ss:$16 sps:$4 sm:$0xff]  }
 0x652   :  { %7134 = vmatprep.subr.bf16.mxu1 %v12481_v55  ;;  %v12712_v55 = vld [vmem:[#allocation23 + $0x44] ss:$8 sps:$4 sm:$0xff]  }
 0x653   :  { %7743 = vmatprep.subr.bf16.mxu0 %v12712_v55  ;;  %v12745_v55 = vld [vmem:[#allocation23 + $0x94] ss:$8 sps:$4 sm:$0xff]  }
 0x655   :  { %7135 = vmatpush1.bf16.msra.mxu1 %v12479_v58  ;;  %v12587_v58 = vld [vmem:[%s15685_s13 + $0x248] ss:$16 sps:$4 sm:$0xff]  }
 0x656   :  { %7136 = vmatprep.subr.bf16.mxu1 %v12487_v59  ;;  %v12710_v59 = vld [vmem:[#allocation23 + $0x40] ss:$8 sps:$4 sm:$0xff]  }
 0x657   :  { %7744 = vmatpush1.bf16.msra.mxu0 %v12710_v59  ;;  %v12743_v59 = vld [vmem:[#allocation23 + $0x90] ss:$8 sps:$4 sm:$0xff]  }
 0x659   :  { %7137 = vmatpush1.bf16.msra.mxu1 %v12485_v63  ;;  %v12595_v63 = vld [vmem:[%s15685_s13 + $0x22c] ss:$16 sps:$4 sm:$0xff]  }
 0x65a   :  { %7138 = vmatprep.subr.bf16.mxu1 %v12493_v2  ;;  %v12715_v2 = vld [vmem:[#allocation23 + $0x34] ss:$8 sps:$4 sm:$0xff]  }
 0x65b   :  { %7745 = vmatprep.subr.bf16.mxu0 %v12715_v2 }
 0x65d   :  { %7139 = vmatpush1.bf16.msra.mxu1 %v12491_v4  ;;  %v12593_v4 = vld [vmem:[%s15685_s13 + $0x228] ss:$16 sps:$4 sm:$0xff]  }
 0x65e   :  { %7140 = vmatprep.subr.bf16.mxu1 %v12499_v5  ;;  %v12713_v5 = vld [vmem:[#allocation23 + $0x30] ss:$8 sps:$4 sm:$0xff]  }
 0x65f   :  { %7746 = vmatpush1.bf16.msra.mxu0 %v12713_v5 }
 0x661   :  { %7141 = vmatpush1.bf16.msra.mxu1 %v12497_v8  ;;  %v12601_v8 = vld [vmem:[%s15685_s13 + $0x20c] ss:$16 sps:$4 sm:$0xff]  }
 0x662   :  { %7142 = vmatprep.subr.bf16.mxu1 %v12505_v13  ;;  %v12718_v13 = vld [vmem:[#allocation23 + $0x24] ss:$8 sps:$4 sm:$0xff]  }
 0x663   :  { %7747 = vmatprep.subr.bf16.mxu0 %v12718_v13  ;;  %v12748_v13 = vld [vmem:[#allocation23 + $0x84] ss:$8 sps:$4 sm:$0xff]  }
 0x665   :  { %7143 = vmatpush1.bf16.msra.mxu1 %v12503_v14  ;;  %v12599_v14 = vld [vmem:[%s15685_s13 + $0x208] ss:$16 sps:$4 sm:$0xff]  }
 0x666   :  { %7144 = vmatprep.subr.bf16.mxu1 %v12511_v18  ;;  %v12716_v18 = vld [vmem:[#allocation23 + $0x20] ss:$8 sps:$4 sm:$0xff]  }
 0x667   :  { %7748 = vmatpush1.bf16.msra.mxu0 %v12716_v18  ;;  %v12659_v18 = vld [vmem:[%s15685_s13 + $0x6a8] ss:$16 sps:$4 sm:$0xff]  }
 0x669   :  { %7145 = vmatpush2.bf16.msra.mxu1 %v12509_v22  ;;  %v12607_v22 = vld [vmem:[%s15685_s13 + $0x3ec] ss:$16 sps:$4 sm:$0xff]  }
 0x66a   :  { %7146 = vmatprep.subr.bf16.mxu1 %v12517_v24  ;;  %v12721_v24 = vld [vmem:[#allocation23 + $0x14] ss:$8 sps:$4 sm:$0xff]  }
 0x66b   :  { %7749 = vmatprep.subr.bf16.mxu0 %v12721_v24 }
 0x66d   :  { %7147 = vmatpush2.bf16.msra.mxu1 %v12515_v36  ;;  %v12605_v36 = vld [vmem:[%s15685_s13 + $0x3e8] ss:$16 sps:$4 sm:$0xff]  }
 0x66e   :  { %7148 = vmatprep.subr.bf16.mxu1 %v12523_v37  ;;  %v12719_v37 = vld [vmem:[#allocation23 + $0x10] ss:$8 sps:$4 sm:$0xff]  }
 0x66f   :  { %7750 = vmatpush1.bf16.msra.mxu0 %v12719_v37  ;;  %v12662_v37 = vld [vmem:[%s15685_s13 + $0x688] ss:$16 sps:$4 sm:$0xff]  }
 0x671   :  { %7149 = vmatpush2.bf16.msra.mxu1 %v12521_v21  ;;  %v12613_v21 = vld [vmem:[%s15685_s13 + $0x3cc] ss:$16 sps:$4 sm:$0xff]  }
 0x672   :  { %7150 = vmatprep.subr.bf16.mxu1 %v12529_v23  ;;  %v12724_v23 = vld [vmem:[#allocation23 + $0x4] ss:$8 sps:$4 sm:$0xff]  }
 0x673   :  { %7751 = vmatprep.subr.bf16.mxu0 %v12724_v23 }
 0x675   :  { %7151 = vmatpush2.bf16.msra.mxu1 %v12527_v9  ;;  %v12611_v9 = vld [vmem:[%s15685_s13 + $0x3c8] ss:$16 sps:$4 sm:$0xff]  }
 0x676   :  { %7152 = vmatprep.subr.bf16.mxu1 %v12535_v25  ;;  %v12722_v25 = vld [vmem:[#allocation23] ss:$8 sps:$4 sm:$0xff]  }
 0x677   :  { %7752 = vmatpush1.bf16.msra.mxu0 %v12722_v25  ;;  %v12665_v25 = vld [vmem:[%s15685_s13 + $0x668] ss:$16 sps:$4 sm:$0xff]  }
 0x679   :  { %7153 = vmatpush2.bf16.msra.mxu1 %v12533_v26  ;;  %v12619_v26 = vld [vmem:[%s15685_s13 + $0x3ac] ss:$16 sps:$4 sm:$0xff]  }
 0x67a   :  { %7154 = vmatprep.subr.bf16.mxu1 %v12541_v27  ;;  %v12727_v27 = vld [vmem:[#allocation23 + $0xf4] ss:$8 sps:$4 sm:$0xff]  }
 0x67b   :  { %7753 = vmatprep.subr.bf16.mxu0 %v12727_v27 }
 0x67d   :  { %7155 = vmatpush2.bf16.msra.mxu1 %v12539_v45  ;;  %v12617_v45 = vld [vmem:[%s15685_s13 + $0x3a8] ss:$16 sps:$4 sm:$0xff]  }
 0x67e   :  { %7156 = vmatprep.subr.bf16.mxu1 %v12547_v47  ;;  %v14619_v0 = vpop.f32.mrf.mxu0  ;;  %v12725_v47 = vld [vmem:[#allocation23 + $0xf0] ss:$8 sps:$4 sm:$0xff]  }
 0x67f   :  { %7754 = vmatpush2.bf16.msra.mxu0 %v12725_v47  ;;  %v12668_v47 = vld [vmem:[%s15685_s13 + $0x648] ss:$16 sps:$4 sm:$0xff]  }
 0x680   :  { %v14621_v34 = vpop.f32.mrf.mxu0 }
 0x681   :  { %7157 = vmatpush2.bf16.msra.mxu1 %v12545_v28  ;;  %v12625_v28 = vld [vmem:[%s15685_s13 + $0x38c] ss:$16 sps:$4 sm:$0xff]  }
 0x682   :  { %7158 = vmatprep.subr.bf16.mxu1 %v12553_v41  ;;  %v7125_v39 = vpop.f32.mrf.mxu0  ;;  %v12730_v41 = vld [vmem:[#allocation23 + $0xe4] ss:$8 sps:$4 sm:$0xff]  }
 0x683   :  { %7755 = vmatprep.subr.bf16.mxu0 %v12730_v41  ;;  %v12641_v39 = vld [vmem:[%s15685_s13 + $0x328] ss:$16 sps:$4 sm:$0xff]  }
 0x684   :  { %v7126_v40 = vpop.f32.mrf.mxu0  ;;  %v12671_v41 = vld [vmem:[%s15685_s13 + $0x628] ss:$16 sps:$4 sm:$0xff]  }
 0x685   :  { %7159 = vmatpush2.bf16.msra.mxu1 %v12551_v29  ;;  %v12623_v29 = vld [vmem:[%s15685_s13 + $0x388] ss:$16 sps:$4 sm:$0xff]   ;;  %v12649_v40 = vld [vmem:[%s15685_s13 + $0x30c] ss:$16 sps:$4 sm:$0xff]  }
 0x686   :  { %7210 = vmatprep.subr.bf16.mxu1 %v12559_v30  ;;  %v12728_v30 = vld [vmem:[#allocation23 + $0xe0] ss:$8 sps:$4 sm:$0xff]  }
 0x687   :  { %7756 = vmatpush2.bf16.msra.mxu0 %v12728_v30  ;;  %v12674_v30 = vld [vmem:[%s15685_s13 + $0x608] ss:$16 sps:$4 sm:$0xff]  }
 0x688   :  { %7161 = vmatmul.mubr.bf16.vlgmr.msra.gmra.mxu1 %v13893_v33 }
 0x689   :  { %7211 = vmatpush1.bf16.msra.mxu1 %v12557_v20  ;;  %7242 = vmatprep.mubr.bf16.mxu1 %v13858_v3  ;;  %v12733_v20 = vld [vmem:[#allocation23 + $0xd4] ss:$8 sps:$4 sm:$0xff]  }
 0x68a   :  { %7212 = vmatprep.subr.bf16.mxu1 %v12565_v60  ;;  %v12731_v60 = vld [vmem:[#allocation23 + $0xd0] ss:$8 sps:$4 sm:$0xff]   ;;  %7757 = vmatprep.subr.bf16.mxu0 %v12733_v20  ;;  %v12677_v20 = vld [vmem:[%s15685_s13 + $0x7e8] ss:$16 sps:$4 sm:$0xff]  }
 0x68b   :  { %7758 = vmatpush2.bf16.msra.mxu0 %v12731_v60  ;;  %v12680_v60 = vld [vmem:[%s15685_s13 + $0x7c8] ss:$16 sps:$4 sm:$0xff]  }
 0x68d   :  { %7213 = vmatpush1.bf16.msra.mxu1 %v12563_v56  ;;  %v12637_v56 = vld [vmem:[%s15685_s13 + $0x34c] ss:$16 sps:$4 sm:$0xff]  }
 0x68e   :  { %7214 = vmatprep.subr.bf16.mxu1 %v12571_v31  ;;  %v12736_v31 = vld [vmem:[#allocation23 + $0xc4] ss:$8 sps:$4 sm:$0xff]  }
 0x68f   :  { %7759 = vmatprep.subr.bf16.mxu0 %v12736_v31  ;;  %v12683_v31 = vld [vmem:[%s15685_s13 + $0x7a8] ss:$16 sps:$4 sm:$0xff]  }
 0x691   :  { %7215 = vmatpush1.bf16.msra.mxu1 %v12569_v6  ;;  %v12635_v6 = vld [vmem:[%s15685_s13 + $0x348] ss:$16 sps:$4 sm:$0xff]  }
 0x692   :  { %7216 = vmatprep.subr.bf16.mxu1 %v12577_v61  ;;  %v12734_v61 = vld [vmem:[#allocation23 + $0xc0] ss:$8 sps:$4 sm:$0xff]  }
 0x693   :  { %7760 = vmatpush2.bf16.msra.mxu0 %v12734_v61  ;;  %v12686_v61 = vld [vmem:[%s15685_s13 + $0x788] ss:$16 sps:$4 sm:$0xff]  }
 0x694   :  { %7761 = vmatprep.subr.bf16.mxu0 %v12739_v38  ;;  %v12689_v38 = vld [vmem:[%s15685_s13 + $0x768] ss:$16 sps:$4 sm:$0xff]  }
 0x695   :  { %7217 = vmatpush1.bf16.msra.mxu1 %v12575_v42  ;;  %v12742_v42 = vld [vmem:[#allocation23 + $0xa4] ss:$8 sps:$4 sm:$0xff]  }
 0x696   :  { %7218 = vmatprep.subr.bf16.mxu1 %v12583_v48  ;;  %v12740_v48 = vld [vmem:[#allocation23 + $0xa0] ss:$8 sps:$4 sm:$0xff]  }
 0x697   :  { %7762 = vmatpush2.bf16.msra.mxu0 %v12737_v1  ;;  %v12692_v1 = vld [vmem:[%s15685_s13 + $0x748] ss:$16 sps:$4 sm:$0xff]  }
 0x698   :  { %7763 = vmatprep.subr.bf16.mxu0 %v12742_v42  ;;  %v12695_v42 = vld [vmem:[%s15685_s13 + $0x728] ss:$16 sps:$4 sm:$0xff]  }
 0x699   :  { %7219 = vmatpush1.bf16.msra.mxu1 %v12581_v51  ;;  %v12653_v51 = vld [vmem:[%s15685_s13 + $0x6e8] ss:$16 sps:$4 sm:$0xff]  }
 0x69a   :  { %7220 = vmatprep.subr.bf16.mxu1 %v12589_v54 }
 0x69b   :  { %7764 = vmatpush2.bf16.msra.mxu0 %v12740_v48  ;;  %v12698_v48 = vld [vmem:[%s15685_s13 + $0x708] ss:$16 sps:$4 sm:$0xff]  }
 0x69c   :  { %7765 = vmatprep.subr.bf16.mxu0 %v12745_v55 }
 0x69d   :  { %7221 = vmatpush1.bf16.msra.mxu1 %v12587_v58  ;;  %v12656_v58 = vld [vmem:[%s15685_s13 + $0x6c8] ss:$16 sps:$4 sm:$0xff]  }
 0x69e   :  { %7222 = vmatprep.subr.bf16.mxu1 %v12595_v63  ;;  %v10620_v63 = vld [vmem:[#allocation20] ss:$0 sm:$0xff] }
 0x69f   :  { %7766 = vmatpush2.bf16.msra.mxu0 %v12743_v59  ;;  %v12749_v59 = vld [vmem:[#allocation23 + $0x170] ss:$8 sps:$4 sm:$0xff]  }
 0x6a0   :  { %7767 = vmatprep.subr.bf16.mxu0 %v12748_v13  ;;  %v12757_v13 = vld [vmem:[#allocation23 + $0x154] ss:$8 sps:$4 sm:$0xff]  }
 0x6a1   :  { %7223 = vmatpush1.bf16.msra.mxu1 %v12593_v4  ;;  %v12661_v4 = vld [vmem:[%s15685_s13 + $0x6ac] ss:$16 sps:$4 sm:$0xff]  }
 0x6a2   :  { %7224 = vmatprep.subr.bf16.mxu1 %v12601_v8 }
 0x6a5   :  { %7225 = vmatpush1.bf16.msra.mxu1 %v12599_v14 }
 0x6a6   :  { %7226 = vmatprep.subr.bf16.mxu1 %v12607_v22  ;;  %v12746_v22 = vld [vmem:[#allocation23 + $0x80] ss:$8 sps:$4 sm:$0xff]  }
 0x6a7   :  { %7768 = vmatpush2.bf16.msra.mxu0 %v12746_v22  ;;  %v12758_v22 = vld [vmem:[#allocation23 + $0x140] ss:$8 sps:$4 sm:$0xff]  }
 0x6a9   :  { %7227 = vmatpush2.bf16.msra.mxu1 %v12605_v36  ;;  %v12664_v36 = vld [vmem:[%s15685_s13 + $0x68c] ss:$16 sps:$4 sm:$0xff]  }
 0x6aa   :  { %7228 = vmatprep.subr.bf16.mxu1 %v12613_v21  ;;  %v12667_v21 = vld [vmem:[%s15685_s13 + $0x66c] ss:$16 sps:$4 sm:$0xff]  }
 0x6ad   :  { %7229 = vmatpush2.bf16.msra.mxu1 %v12611_v9 }
 0x6ae   :  { %7230 = vmatprep.subr.bf16.mxu1 %v12619_v26  ;;  %v12670_v26 = vld [vmem:[%s15685_s13 + $0x64c] ss:$16 sps:$4 sm:$0xff]  }
 0x6b1   :  { %7231 = vmatpush2.bf16.msra.mxu1 %v12617_v45 }
 0x6b2   :  { %7232 = vmatprep.subr.bf16.mxu1 %v12625_v28  ;;  %v12673_v28 = vld [vmem:[%s15685_s13 + $0x62c] ss:$16 sps:$4 sm:$0xff]  }
 0x6b5   :  { %7233 = vmatpush2.bf16.msra.mxu1 %v12623_v29  ;;  %v12676_v29 = vld [vmem:[%s15685_s13 + $0x60c] ss:$16 sps:$4 sm:$0xff]  }
 0x6b6   :  { %7234 = vmatprep.subr.bf16.mxu1 %v12631_v46  ;;  %v12679_v46 = vld [vmem:[%s15685_s13 + $0x7ec] ss:$16 sps:$4 sm:$0xff]  }
 0x6b9   :  { %7235 = vmatpush2.bf16.msra.mxu1 %v12629_v15  ;;  %v12682_v15 = vld [vmem:[%s15685_s13 + $0x7cc] ss:$16 sps:$4 sm:$0xff]  }
 0x6ba   :  { %7236 = vmatprep.subr.bf16.mxu1 %v12637_v56  ;;  %v12685_v56 = vld [vmem:[%s15685_s13 + $0x7ac] ss:$16 sps:$4 sm:$0xff]  }
 0x6bd   :  { %7237 = vmatpush2.bf16.msra.mxu1 %v12635_v6  ;;  %v12688_v6 = vld [vmem:[%s15685_s13 + $0x78c] ss:$16 sps:$4 sm:$0xff]  }
 0x6be   :  { %7238 = vmatprep.subr.bf16.mxu1 %v12643_v35  ;;  %v14733_v23 = vpop.f32.mrf.mxu0  ;;  %v12691_v35 = vld [vmem:[%s15685_s13 + $0x76c] ss:$16 sps:$4 sm:$0xff]  }
 0x6c0   :  { %v14735_v9 = vpop.f32.mrf.mxu0 }
 0x6c1   :  { %7239 = vmatpush2.bf16.msra.mxu1 %v12641_v39  ;;  %v12694_v39 = vld [vmem:[%s15685_s13 + $0x74c] ss:$16 sps:$4 sm:$0xff]  }
 0x6c2   :  { %7240 = vmatprep.subr.bf16.mxu1 %v12649_v40  ;;  %v7207_v27 = vpop.f32.mrf.mxu0  ;;  %v12697_v40 = vld [vmem:[%s15685_s13 + $0x72c] ss:$16 sps:$4 sm:$0xff]  }
 0x6c3   :  { %v12772_v27 = vld [vmem:[#allocation23 + $0x104] ss:$8 sps:$4 sm:$0xff]  }
 0x6c4   :  { %v7208_v45 = vpop.f32.mrf.mxu0 }
 0x6c5   :  { %7241 = vmatpush2.bf16.msra.mxu1 %v12647_v44  ;;  %v12700_v44 = vld [vmem:[%s15685_s13 + $0x70c] ss:$16 sps:$4 sm:$0xff]  }
 0x6c6   :  { %7292 = vmatprep.subr.bf16.mxu1 %v12655_v50  ;;  %v12770_v45 = vld [vmem:[#allocation23 + $0x100] ss:$8 sps:$4 sm:$0xff]  }
 0x6c8   :  { %7243 = vmatmul.mubr.bf16.vlgmr.msra.gmra.mxu1 %v13864_v17  ;;  %v11268_v54 = vpop.f32.mrf.mxu1 }
 0x6c9   :  { %7293 = vmatpush1.bf16.msra.mxu1 %v12653_v51  ;;  %7324 = vmatprep.mubr.bf16.mxu1 %v13883_v57 }
 0x6ca   :  { %v11269_v2 = vpop.f32.mrf.mxu1  ;;  %7294 = vmatprep.subr.bf16.mxu1 %v12658_v52 }
 0x6cb   :  { %v11270_v5 = vadd.f32 %v11269_v2, %v11268_v54  ;;  %v12754_v2 = vld [vmem:[#allocation23 + $0x164] ss:$8 sps:$4 sm:$0xff]  }
 0x6cc   :  { %v11271_v8 = vpop.f32.mrf.mxu1 }
 0x6cd   :  { %v5440_v14 = vadd.f32 %v11270_v5, %v10620_v63  ;;  %7295 = vmatpush1.bf16.msra.mxu1 %v12656_v58  ;;  %v12751_v63 = vld [vmem:[#allocation23 + $0x174] ss:$8 sps:$4 sm:$0xff]   ;;  %v12752_v5 = vld [vmem:[#allocation23 + $0x160] ss:$8 sps:$4 sm:$0xff]  }
 0x6ce   :  { %v11272_v24 = vpop.f32.mrf.mxu1  ;;  %7296 = vmatprep.subr.bf16.mxu1 %v12661_v4 }
 0x6cf   :  { %5446 = vst.msk [vmem:[#allocation30] sm:$0x3] %vm5445_vm1, %v5440_v14  ;;  %v12755_v14 = vld [vmem:[#allocation23 + $0x150] ss:$8 sps:$4 sm:$0xff]   ;;  %v12763_v24 = vld [vmem:[#allocation23 + $0x134] ss:$8 sps:$4 sm:$0xff]  }
 0x6d1   :  { %7297 = vmatpush1.bf16.msra.mxu1 %v12659_v18  ;;  %v12760_v18 = vld [vmem:[#allocation23 + $0x144] ss:$8 sps:$4 sm:$0xff]  }
 0x6d2   :  { %7298 = vmatprep.subr.bf16.mxu1 %v12664_v36  ;;  %v12761_v36 = vld [vmem:[#allocation23 + $0x130] ss:$8 sps:$4 sm:$0xff]  }
 0x6d5   :  { %7299 = vmatpush1.bf16.msra.mxu1 %v12662_v37  ;;  %v12766_v37 = vld [vmem:[#allocation23 + $0x124] ss:$8 sps:$4 sm:$0xff]  }
 0x6d6   :  { %7300 = vmatprep.subr.bf16.mxu1 %v12667_v21  ;;  %v12764_v21 = vld [vmem:[#allocation23 + $0x120] ss:$8 sps:$4 sm:$0xff]  }
 0x6d9   :  { %7301 = vmatpush1.bf16.msra.mxu1 %v12665_v25  ;;  %v12769_v25 = vld [vmem:[#allocation23 + $0x114] ss:$8 sps:$4 sm:$0xff]  }
 0x6da   :  { %7302 = vmatprep.subr.bf16.mxu1 %v12670_v26  ;;  %v12767_v26 = vld [vmem:[#allocation23 + $0x110] ss:$8 sps:$4 sm:$0xff]  }
 0x6dd   :  { %7303 = vmatpush1.bf16.msra.mxu1 %v12668_v47  ;;  %v12775_v47 = vld [vmem:[#allocation23 + $0x1f4] ss:$8 sps:$4 sm:$0xff]  }
 0x6de   :  { %7304 = vmatprep.subr.bf16.mxu1 %v12673_v28  ;;  %v12773_v28 = vld [vmem:[#allocation23 + $0x1f0] ss:$8 sps:$4 sm:$0xff]  }
 0x6e1   :  { %7305 = vmatpush1.bf16.msra.mxu1 %v12671_v41  ;;  %v12778_v41 = vld [vmem:[#allocation23 + $0x1e4] ss:$8 sps:$4 sm:$0xff]  }
 0x6e2   :  { %7306 = vmatprep.subr.bf16.mxu1 %v12676_v29  ;;  %v12776_v29 = vld [vmem:[#allocation23 + $0x1e0] ss:$8 sps:$4 sm:$0xff]  }
 0x6e5   :  { %7307 = vmatpush1.bf16.msra.mxu1 %v12674_v30  ;;  %v12781_v30 = vld [vmem:[#allocation23 + $0x1d4] ss:$8 sps:$4 sm:$0xff]  }
 0x6e6   :  { %7308 = vmatprep.subr.bf16.mxu1 %v12679_v46  ;;  %v12779_v46 = vld [vmem:[#allocation23 + $0x1d0] ss:$8 sps:$4 sm:$0xff]  }
 0x6e9   :  { %7309 = vmatpush2.bf16.msra.mxu1 %v12677_v20  ;;  %v12784_v20 = vld [vmem:[#allocation23 + $0x1c4] ss:$8 sps:$4 sm:$0xff]  }
 0x6ea   :  { %7310 = vmatprep.subr.bf16.mxu1 %v12682_v15  ;;  %v14815_v15 = vld [vmem:[#allocation22] sm:$0xf] }
 0x6ed   :  { %7311 = vmatpush2.bf16.msra.mxu1 %v12680_v60  ;;  %v12782_v60 = vld [vmem:[#allocation23 + $0x1c0] ss:$8 sps:$4 sm:$0xff]  }
 0x6ee   :  { %7312 = vmatprep.subr.bf16.mxu1 %v12685_v56  ;;  %v12787_v56 = vld [vmem:[#allocation23 + $0x1b4] ss:$8 sps:$4 sm:$0xff]  }
 0x6f1   :  { %7313 = vmatpush2.bf16.msra.mxu1 %v12683_v31  ;;  %v5708_v31 = vrot.slane %v14815_v15, %v13916_v7 }
 0x6f2   :  { %7314 = vmatprep.subr.bf16.mxu1 %v12688_v6  ;;  %v5712_v6 = vrot.slane %v14815_v15, %v13919_v11 }
 0x6f5   :  { %7315 = vmatpush2.bf16.msra.mxu1 %v12686_v61  ;;  %v12785_v61 = vld [vmem:[#allocation23 + $0x1b0] ss:$8 sps:$4 sm:$0xff]  }
 0x6f6   :  { %7316 = vmatprep.subr.bf16.mxu1 %v12691_v35  ;;  %v12790_v35 = vld [vmem:[#allocation23 + $0x1a4] ss:$8 sps:$4 sm:$0xff]  }
 0x6f9   :  { %7317 = vmatpush2.bf16.msra.mxu1 %v12689_v38  ;;  %v7040_v38 = vadd.f32 %v14595_v43, %v5708_v31 }
 0x6fa   :  { %7318 = vmatprep.subr.bf16.mxu1 %v12694_v39  ;;  %v7042_v39 = vadd.f32 %v14600_v19, %v5712_v6 }
 0x6fd   :  { %7319 = vmatpush2.bf16.msra.mxu1 %v12692_v1  ;;  %v12788_v1 = vld [vmem:[#allocation23 + $0x1a0] ss:$8 sps:$4 sm:$0xff]  }
 0x6fe   :  { %7320 = vmatprep.subr.bf16.mxu1 %v12697_v40  ;;  %v14811_v52 = vpop.f32.mrf.mxu0 }
 0x700   :  { %v14813_v55 = vpop.f32.mrf.mxu0 }
 0x701   :  { %7321 = vmatpush2.bf16.msra.mxu1 %v12695_v42 }
 0x702   :  { %7322 = vmatprep.subr.bf16.mxu1 %v12700_v44  ;;  %v7289_v4 = vpop.f32.mrf.mxu0 }
 0x704   :  { %v7290_v8 = vpop.f32.mrf.mxu0 }
 0x705   :  { %7323 = vmatpush2.bf16.msra.mxu1 %v12698_v48 }
 0x706   :  { %7778 = vmatprep.subr.bf16.mxu1 %v12751_v63  ;;  %v12791_v63 = vld [vmem:[#allocation23 + $0x190] ss:$8 sps:$4 sm:$0xff]  }
 0x708   :  { %v14806_v50 = vpop.f32.mrf.mxu1  ;;  %7325 = vmatmul.mubr.bf16.vlgmr.msra.gmra.mxu1 %v13893_v33 }
 0x709   :  { %7779 = vmatpush1.bf16.msra.mxu1 %v12749_v59  ;;  %v7081_v40 = vadd.f32 %v14806_v50, %v7040_v38  ;;  %v12794_v50 = vld [vmem:[#allocation23 + $0x180] ss:$8 sps:$4 sm:$0xff]  }
 0x70a   :  { %v14809_v51 = vpop.f32.mrf.mxu1  ;;  %7780 = vmatprep.subr.bf16.mxu1 %v12754_v2 }
 0x70b   :  { %v7083_v42 = vadd.f32 %v14809_v51, %v7042_v39  ;;  %v7122_v44 = vadd.f32 %v14619_v0, %v7081_v40 }
 0x70c   :  { %v7084_v54 = vpop.f32.mrf.mxu1 }
 0x70d   :  { %7781 = vmatpush1.bf16.msra.mxu1 %v12752_v5  ;;  %v12793_v54 = vld [vmem:[#allocation23 + $0x194] ss:$8 sps:$4 sm:$0xff]   ;;  %v12796_v5 = vld [vmem:[#allocation23 + $0x184] ss:$8 sps:$4 sm:$0xff]  }
 0x70e   :  { %v7085_v58 = vpop.f32.mrf.mxu1  ;;  %7782 = vmatprep.subr.bf16.mxu1 %v12757_v13 }
 0x70f   :  { %v7124_v58 = vadd.f32 %v14621_v34, %v7083_v42 }
 0x711   :  { %7783 = vmatpush1.bf16.msra.mxu1 %v12755_v14 }
 0x712   :  { %7784 = vmatprep.subr.bf16.mxu1 %v12760_v18 }
 0x715   :  { %7785 = vmatpush1.bf16.msra.mxu1 %v12758_v22 }
 0x716   :  { %7786 = vmatprep.subr.bf16.mxu1 %v12763_v24  ;;  %v12799_v24 = vld [vmem:[%s15691_s19 + $0xe4] ss:$16 sps:$4 sm:$0xff]  }
 0x719   :  { %7787 = vmatpush1.bf16.msra.mxu1 %v12761_v36  ;;  %v12821_v36 = vld [vmem:[#allocation26 + $0x78] sm:$0xff]  }
 0x71a   :  { %7788 = vmatprep.subr.bf16.mxu1 %v12766_v37  ;;  %v12822_v37 = vld [vmem:[#allocation26 + $0x38] sm:$0xff]   ;;  %11274 = vmatprep.subr.bf16.mxu0 %v12821_v36 }
 0x71b   :  { %v12840_v36 = vld [vmem:[%s15691_s19 + $0x184] ss:$16 sps:$4 sm:$0xff]  }
 0x71d   :  { %7789 = vmatpush1.bf16.msra.mxu1 %v12764_v21  ;;  %v12826_v21 = vld [vmem:[#allocation26 + $0x70] sm:$0xff]  }
 0x71e   :  { %7790 = vmatprep.subr.bf16.mxu1 %v12769_v25  ;;  %v12827_v25 = vld [vmem:[#allocation26 + $0x30] sm:$0xff]  }
 0x721   :  { %7791 = vmatpush1.bf16.msra.mxu1 %v12767_v26  ;;  %v12831_v26 = vld [vmem:[#allocation26 + $0x68] sm:$0xff]  }
 0x722   :  { %7792 = vmatprep.subr.bf16.mxu1 %v12772_v27  ;;  %v12832_v27 = vld [vmem:[#allocation26 + $0x28] sm:$0xff]  }
 0x725   :  { %7793 = vmatpush1.bf16.msra.mxu1 %v12770_v45  ;;  %v12836_v45 = vld [vmem:[#allocation26 + $0x60] sm:$0xff]  }
 0x726   :  { %7794 = vmatprep.subr.bf16.mxu1 %v12775_v47  ;;  %v12837_v47 = vld [vmem:[#allocation26 + $0x20] sm:$0xff]  }
 0x729   :  { %7795 = vmatpush2.bf16.msra.mxu1 %v12773_v28  ;;  %v12841_v28 = vld [vmem:[#allocation26 + $0x58] sm:$0xff]  }
 0x72a   :  { %7796 = vmatprep.subr.bf16.mxu1 %v12778_v41  ;;  %v12842_v41 = vld [vmem:[#allocation26 + $0x18] sm:$0xff]  }
 0x72d   :  { %7797 = vmatpush2.bf16.msra.mxu1 %v12776_v29  ;;  %v12846_v29 = vld [vmem:[#allocation26 + $0x50] sm:$0xff]  }
 0x72e   :  { %7798 = vmatprep.subr.bf16.mxu1 %v12781_v30  ;;  %v12847_v30 = vld [vmem:[#allocation26 + $0x10] sm:$0xff]  }
 0x731   :  { %7799 = vmatpush2.bf16.msra.mxu1 %v12779_v46  ;;  %v5716_v46 = vrot.slane %v14815_v15, %v13930_v10 }
 0x732   :  { %7800 = vmatprep.subr.bf16.mxu1 %v12784_v20  ;;  %v5720_v20 = vrot.slane %v14815_v15, %v13933_v12  ;;  %v12805_v15 = vld [vmem:[%s15691_s19 + $0xa4] ss:$16 sps:$4 sm:$0xff]  }
 0x735   :  { %7801 = vmatpush2.bf16.msra.mxu1 %v12782_v60  ;;  %v7204_v60 = vadd.f32 %v14733_v23, %v5716_v46  ;;  %v12797_v23 = vld [vmem:[%s15691_s19 + $0xe0] ss:$16 sps:$4 sm:$0xff]   ;;  %v12856_v46 = vld [vmem:[#allocation26 + $0x40] sm:$0xff]  }
 0x736   :  { %7802 = vmatprep.subr.bf16.mxu1 %v12787_v56  ;;  %v7206_v56 = vadd.f32 %v14735_v9, %v5720_v20 }
 0x739   :  { %7803 = vmatpush2.bf16.msra.mxu1 %v12785_v61 }
 0x73a   :  { %7804 = vmatprep.subr.bf16.mxu1 %v12790_v35 }
 0x73d   :  { %7805 = vmatpush2.bf16.msra.mxu1 %v12788_v1 }
 0x73e   :  { %7806 = vmatprep.subr.bf16.mxu1 %v12793_v54 }
 0x741   :  { %7807 = vmatpush2.bf16.msra.mxu1 %v12791_v63  ;;  %v12808_v63 = vld [vmem:[%s15691_s19 + $0x84] ss:$16 sps:$4 sm:$0xff]  }
 0x742   :  { %7808 = vmatprep.subr.bf16.mxu1 %v12796_v5  ;;  %v12812_v5 = vld [vmem:[%s15691_s19 + $0x40] ss:$16 sps:$4 sm:$0xff]  }
 0x745   :  { %7809 = vmatpush2.bf16.msra.mxu1 %v12794_v50  ;;  %v12815_v50 = vld [vmem:[%s15691_s19 + $0x20] ss:$16 sps:$4 sm:$0xff]  }
 0x746   :  { %9558 = vmatprep.subr.bf16.mxu1 %v12799_v24  ;;  %v12833_v24 = vld [vmem:[%s15691_s19 + $0x1a0] ss:$16 sps:$4 sm:$0xff]  }
 0x748   :  { %v7162_v48 = vpop.f32.mrf.mxu1 }
 0x749   :  { %v7163_v59 = vadd.f32 %v7162_v48, %v7122_v44 }
 0x74a   :  { %v7164_v2 = vpop.f32.mrf.mxu1 }
 0x74b   :  { %v7165_v43 = vadd.f32 %v7164_v2, %v7124_v58  ;;  %v7333_v19 = vmax.f32 %v7163_v59, 0.0  ;;  %v12803_v59 = vld [vmem:[%s15691_s19 + $0xa0] ss:$16 sps:$4 sm:$0xff]  }
 0x74c   :  { %v7166_v4 = vpop.f32.mrf.mxu1  ;;  %v12806_v2 = vld [vmem:[%s15691_s19 + $0x80] ss:$16 sps:$4 sm:$0xff]  }
 0x74d   :  { %v7334_v8 = vmax.f32 %v7165_v43, 0.0  ;;  %v7402_v0 = vpack.c.bf16 %v7333_v19, %v7333_v19  ;;  %v12811_v43 = vld [vmem:[%s15691_s19 + $0x64] ss:$16 sps:$4 sm:$0xff]   ;;  %v12809_v19 = vld [vmem:[%s15691_s19 + $0x60] ss:$16 sps:$4 sm:$0xff]  }
 0x74e   :  { %v7167_v13 = vpop.f32.mrf.mxu1  ;;  %v12814_v4 = vld [vmem:[%s15691_s19 + $0x44] ss:$16 sps:$4 sm:$0xff]  }
 0x74f   :  { %v7403_v51 = vpack.c.bf16 %v7334_v8, %v7334_v8  ;;  %v12817_v8 = vld [vmem:[%s15691_s19 + $0x24] ss:$16 sps:$4 sm:$0xff]  }
 0x750   :  { %v12820_v13 = vld [vmem:[%s15691_s19 + $0x4] ss:$16 sps:$4 sm:$0xff]  }
 0x751   :  { %7769 = vmatprep.mubr.bf16.mxu0 %v7403_v51  ;;  %v12818_v51 = vld [vmem:[%s15691_s19] ss:$16 sps:$4 sm:$0xff]  }
 0x752   :  { %7770 = vmatmul.mubr.bf16.vlgmr.msra.gmra.mxu0 %v7402_v0  ;;  %v12825_v0 = vld [vmem:[%s15691_s19 + $0x1e4] ss:$16 sps:$4 sm:$0xff]  }
 0x753   :  { %11275 = vmatpush3.bf16.msra.mxu0 %v12822_v37  ;;  %v12838_v37 = vld [vmem:[%s15691_s19 + $0x180] ss:$16 sps:$4 sm:$0xff]  }
 0x754   :  { %11276 = vmatprep.subr.bf16.mxu0 %v12826_v21  ;;  %v12845_v21 = vld [vmem:[%s15691_s19 + $0x164] ss:$16 sps:$4 sm:$0xff]  }
 0x757   :  { %11277 = vmatpush3.bf16.msra.mxu0 %v12827_v25  ;;  %v12843_v25 = vld [vmem:[%s15691_s19 + $0x160] ss:$16 sps:$4 sm:$0xff]  }
 0x758   :  { %11278 = vmatprep.subr.bf16.mxu0 %v12831_v26  ;;  %v12850_v26 = vld [vmem:[%s15691_s19 + $0x144] ss:$16 sps:$4 sm:$0xff]  }
 0x75b   :  { %11279 = vmatpush3.bf16.msra.mxu0 %v12832_v27  ;;  %v12848_v27 = vld [vmem:[%s15691_s19 + $0x140] ss:$16 sps:$4 sm:$0xff]  }
 0x75c   :  { %11280 = vmatprep.subr.bf16.mxu0 %v12836_v45  ;;  %v12851_v45 = vld [vmem:[#allocation26 + $0x48] sm:$0xff]  }
 0x75f   :  { %11281 = vmatpush3.bf16.msra.mxu0 %v12837_v47 }
 0x760   :  { %11282 = vmatprep.subr.bf16.mxu0 %v12841_v28  ;;  %v12852_v28 = vld [vmem:[#allocation26 + $0x8] sm:$0xff]  }
 0x763   :  { %11283 = vmatpush3.bf16.msra.mxu0 %v12842_v41  ;;  %v12855_v41 = vld [vmem:[%s15691_s19 + $0x124] ss:$16 sps:$4 sm:$0xff]  }
 0x764   :  { %11284 = vmatprep.subr.bf16.mxu0 %v12846_v29 }
 0x767   :  { %11285 = vmatpush3.bf16.msra.mxu0 %v12847_v30  ;;  %v12853_v30 = vld [vmem:[%s15691_s19 + $0x120] ss:$16 sps:$4 sm:$0xff]  }
 0x768   :  { %11286 = vmatprep.subr.bf16.mxu0 %v12851_v45  ;;  %v12978_v45 = vld [vmem:[%s15691_s19 + $0x88] ss:$16 sps:$4 sm:$0xff]  }
 0x76b   :  { %11287 = vmatpush3.bf16.msra.mxu0 %v12852_v28  ;;  %v12986_v28 = vld [vmem:[%s15691_s19 + $0x6c] ss:$16 sps:$4 sm:$0xff]  }
 0x76c   :  { %11288 = vmatprep.subr.bf16.mxu0 %v12856_v46  ;;  %v12990_v46 = vld [vmem:[%s15691_s19 + $0x48] ss:$16 sps:$4 sm:$0xff]  }
 0x788   :  { %v7244_v14 = vpop.f32.mrf.mxu1 }
 0x789   :  { %v7245_v31 = vadd.f32 %v7244_v14, %v7204_v60  ;;  %v12823_v14 = vld [vmem:[%s15691_s19 + $0x1e0] ss:$16 sps:$4 sm:$0xff]   ;;  %v12857_v60 = vld [vmem:[#allocation26] sm:$0xff]  }
 0x78a   :  { %v7246_v34 = vpop.f32.mrf.mxu1  ;;  %11289 = vmatpush3.bf16.msra.mxu0 %v12857_v60  ;;  %v12996_v60 = vld [vmem:[%s15691_s19 + $0x28] ss:$16 sps:$4 sm:$0xff]  }
 0x78b   :  { %v7247_v6 = vadd.f32 %v7246_v34, %v7206_v56  ;;  %v7286_v61 = vadd.f32 %v14811_v52, %v7245_v31  ;;  %v12802_v52 = vld [vmem:[%s15691_s19 + $0xc4] ss:$16 sps:$4 sm:$0xff]  }
 0x78c   :  { %v7248_v18 = vpop.f32.mrf.mxu1  ;;  %v12830_v34 = vld [vmem:[%s15691_s19 + $0x1c4] ss:$16 sps:$4 sm:$0xff]  }
 0x78d   :  { %v7288_v38 = vadd.f32 %v14813_v55, %v7247_v6  ;;  %v12800_v55 = vld [vmem:[%s15691_s19 + $0xc0] ss:$16 sps:$4 sm:$0xff]   ;;  %v12860_v56 = vld [vmem:[%s15691_s19 + $0x104] ss:$16 sps:$4 sm:$0xff]  }
 0x78e   :  { %v7249_v22 = vpop.f32.mrf.mxu1  ;;  %v12828_v18 = vld [vmem:[%s15691_s19 + $0x1c0] ss:$16 sps:$4 sm:$0xff]  }
 0x78f   :  { %v12835_v22 = vld [vmem:[%s15691_s19 + $0x1a4] ss:$16 sps:$4 sm:$0xff]   ;;  %v12858_v6 = vld [vmem:[%s15691_s19 + $0x100] ss:$16 sps:$4 sm:$0xff]  }
 0x7c8   :  { %v7326_v35 = vpop.f32.mrf.mxu1 }
 0x7c9   :  { %v7327_v39 = vadd.f32 %v7326_v35, %v7286_v61  ;;  %v12863_v61 = vld [vmem:[%s15691_s19 + $0x2e4] ss:$16 sps:$4 sm:$0xff]  }
 0x7ca   :  { %v7328_v1 = vpop.f32.mrf.mxu1  ;;  %9599 = vmatprep.subr.bf16.mxu0 %v12863_v61  ;;  %v12866_v35 = vld [vmem:[%s15691_s19 + $0x4e4] ss:$16 sps:$4 sm:$0xff]   ;;  %v13008_v61 = vld [vmem:[%s15691_s19 + $0x1e8] ss:$16 sps:$4 sm:$0xff]  }
 0x7cb   :  { %v7329_v40 = vadd.f32 %v7328_v1, %v7288_v38  ;;  %v7335_v42 = vmax.f32 %v7327_v39, 0.0  ;;  %v12864_v38 = vld [vmem:[%s15691_s19 + $0x4e0] ss:$16 sps:$4 sm:$0xff]   ;;  %v12872_v39 = vld [vmem:[%s15691_s19 + $0x4c4] ss:$16 sps:$4 sm:$0xff]  }
 0x7cc   :  { %v7330_v44 = vpop.f32.mrf.mxu1  ;;  %v12870_v1 = vld [vmem:[%s15691_s19 + $0x4c0] ss:$16 sps:$4 sm:$0xff]  }
 0x7cd   :  { %v7336_v48 = vmax.f32 %v7329_v40, 0.0  ;;  %v7404_v9 = vpack.c.bf16 %v7335_v42, %v7335_v42  ;;  %v12878_v40 = vld [vmem:[%s15691_s19 + $0x4a4] ss:$16 sps:$4 sm:$0xff]   ;;  %v12876_v42 = vld [vmem:[%s15691_s19 + $0x4a0] ss:$16 sps:$4 sm:$0xff]  }
 0x7ce   :  { %v7331_v54 = vpop.f32.mrf.mxu1  ;;  %v12884_v44 = vld [vmem:[%s15691_s19 + $0x484] ss:$16 sps:$4 sm:$0xff]  }
 0x7cf   :  { %v7405_v58 = vpack.c.bf16 %v7336_v48, %v7336_v48  ;;  %v12882_v48 = vld [vmem:[%s15691_s19 + $0x480] ss:$16 sps:$4 sm:$0xff]   ;;  %v12890_v54 = vld [vmem:[%s15691_s19 + $0x464] ss:$16 sps:$4 sm:$0xff]  }
 0x7d1   :  { %7810 = vmatprep.mubr.bf16.mxu1 %v7405_v58  ;;  %v12888_v58 = vld [vmem:[%s15691_s19 + $0x460] ss:$16 sps:$4 sm:$0xff]  }
 0x7d2   :  { %7811 = vmatmul.mubr.bf16.vlgmr.msra.gmra.mxu1 %v7404_v9  ;;  %v12894_v9 = vld [vmem:[%s15691_s19 + $0x440] ss:$16 sps:$4 sm:$0xff]  }
 0x7d3   :  { %9559 = vmatpush1.bf16.msra.mxu1 %v12797_v23  ;;  %9590 = vmatprep.mubr.bf16.mxu1 %v13856_v62  ;;  %v12896_v23 = vld [vmem:[%s15691_s19 + $0x444] ss:$16 sps:$4 sm:$0xff]  }
 0x7d4   :  { %9560 = vmatprep.subr.bf16.mxu1 %v12802_v52  ;;  %v12902_v52 = vld [vmem:[%s15691_s19 + $0x424] ss:$16 sps:$4 sm:$0xff]  }
 0x7d7   :  { %9561 = vmatpush1.bf16.msra.mxu1 %v12800_v55  ;;  %v12900_v55 = vld [vmem:[%s15691_s19 + $0x420] ss:$16 sps:$4 sm:$0xff]  }
 0x7d8   :  { %9562 = vmatprep.subr.bf16.mxu1 %v12805_v15  ;;  %v12908_v15 = vld [vmem:[%s15691_s19 + $0x404] ss:$16 sps:$4 sm:$0xff]  }
 0x7db   :  { %9563 = vmatpush1.bf16.msra.mxu1 %v12803_v59  ;;  %v12906_v59 = vld [vmem:[%s15691_s19 + $0x400] ss:$16 sps:$4 sm:$0xff]  }
 0x7dc   :  { %9564 = vmatprep.subr.bf16.mxu1 %v12808_v63  ;;  %v12914_v63 = vld [vmem:[%s15691_s19 + $0x5e4] ss:$16 sps:$4 sm:$0xff]  }
 0x7df   :  { %9565 = vmatpush1.bf16.msra.mxu1 %v12806_v2  ;;  %v12912_v2 = vld [vmem:[%s15691_s19 + $0x5e0] ss:$16 sps:$4 sm:$0xff]  }
 0x7e0   :  { %9566 = vmatprep.subr.bf16.mxu1 %v12811_v43  ;;  %v12920_v43 = vld [vmem:[%s15691_s19 + $0x5c4] ss:$16 sps:$4 sm:$0xff]  }
 0x7e3   :  { %9567 = vmatpush1.bf16.msra.mxu1 %v12809_v19  ;;  %v12918_v19 = vld [vmem:[%s15691_s19 + $0x5c0] ss:$16 sps:$4 sm:$0xff]  }
 0x7e4   :  { %9568 = vmatprep.subr.bf16.mxu1 %v12814_v4  ;;  %v12926_v4 = vld [vmem:[%s15691_s19 + $0x5a4] ss:$16 sps:$4 sm:$0xff]  }
 0x7e7   :  { %9569 = vmatpush1.bf16.msra.mxu1 %v12812_v5  ;;  %v12924_v5 = vld [vmem:[%s15691_s19 + $0x5a0] ss:$16 sps:$4 sm:$0xff]  }
 0x7e8   :  { %9570 = vmatprep.subr.bf16.mxu1 %v12817_v8  ;;  %v12932_v8 = vld [vmem:[%s15691_s19 + $0x584] ss:$16 sps:$4 sm:$0xff]  }
 0x7eb   :  { %9571 = vmatpush1.bf16.msra.mxu1 %v12815_v50  ;;  %v12930_v50 = vld [vmem:[%s15691_s19 + $0x580] ss:$16 sps:$4 sm:$0xff]  }
 0x7ec   :  { %9572 = vmatprep.subr.bf16.mxu1 %v12820_v13  ;;  %v12938_v13 = vld [vmem:[%s15691_s19 + $0x564] ss:$16 sps:$4 sm:$0xff]  }
 0x7ef   :  { %9573 = vmatpush1.bf16.msra.mxu1 %v12818_v51  ;;  %v12936_v51 = vld [vmem:[%s15691_s19 + $0x560] ss:$16 sps:$4 sm:$0xff]  }
 0x7f0   :  { %9574 = vmatprep.subr.bf16.mxu1 %v12825_v0  ;;  %v12944_v0 = vld [vmem:[%s15691_s19 + $0x544] ss:$16 sps:$4 sm:$0xff]  }
 0x7f3   :  { %9575 = vmatpush2.bf16.msra.mxu1 %v12823_v14  ;;  %v12942_v14 = vld [vmem:[%s15691_s19 + $0x540] ss:$16 sps:$4 sm:$0xff]  }
 0x7f4   :  { %9576 = vmatprep.subr.bf16.mxu1 %v12830_v34  ;;  %v12950_v34 = vld [vmem:[%s15691_s19 + $0x524] ss:$16 sps:$4 sm:$0xff]  }
 0x7f7   :  { %9577 = vmatpush2.bf16.msra.mxu1 %v12828_v18  ;;  %v12948_v18 = vld [vmem:[%s15691_s19 + $0x520] ss:$16 sps:$4 sm:$0xff]  }
 0x7f8   :  { %9578 = vmatprep.subr.bf16.mxu1 %v12835_v22  ;;  %v12956_v22 = vld [vmem:[%s15691_s19 + $0x504] ss:$16 sps:$4 sm:$0xff]  }
 0x7fb   :  { %9579 = vmatpush2.bf16.msra.mxu1 %v12833_v24  ;;  %v12954_v24 = vld [vmem:[%s15691_s19 + $0x500] ss:$16 sps:$4 sm:$0xff]  }
 0x7fc   :  { %9580 = vmatprep.subr.bf16.mxu1 %v12840_v36  ;;  %v12962_v36 = vld [vmem:[%s15691_s19 + $0xec] ss:$16 sps:$4 sm:$0xff]  }
 0x7ff   :  { %9581 = vmatpush2.bf16.msra.mxu1 %v12838_v37  ;;  %v12960_v37 = vld [vmem:[%s15691_s19 + $0xe8] ss:$16 sps:$4 sm:$0xff]  }
 0x800   :  { %9582 = vmatprep.subr.bf16.mxu1 %v12845_v21  ;;  %v12968_v21 = vld [vmem:[%s15691_s19 + $0xcc] ss:$16 sps:$4 sm:$0xff]  }
 0x803   :  { %9583 = vmatpush2.bf16.msra.mxu1 %v12843_v25  ;;  %v12966_v25 = vld [vmem:[%s15691_s19 + $0xc8] ss:$16 sps:$4 sm:$0xff]  }
 0x804   :  { %9584 = vmatprep.subr.bf16.mxu1 %v12850_v26  ;;  %v12974_v26 = vld [vmem:[%s15691_s19 + $0xac] ss:$16 sps:$4 sm:$0xff]  }
 0x807   :  { %9585 = vmatpush2.bf16.msra.mxu1 %v12848_v27  ;;  %v12972_v27 = vld [vmem:[%s15691_s19 + $0xa8] ss:$16 sps:$4 sm:$0xff]  }
 0x808   :  { %9586 = vmatprep.subr.bf16.mxu1 %v12855_v41  ;;  %v12984_v41 = vld [vmem:[%s15691_s19 + $0x68] ss:$16 sps:$4 sm:$0xff]  }
 0x80b   :  { %9587 = vmatpush2.bf16.msra.mxu1 %v12853_v30  ;;  %v12992_v30 = vld [vmem:[%s15691_s19 + $0x4c] ss:$16 sps:$4 sm:$0xff]  }
 0x80c   :  { %9588 = vmatprep.subr.bf16.mxu1 %v12860_v56  ;;  %v13004_v56 = vld [vmem:[%s15691_s19 + $0xc] ss:$16 sps:$4 sm:$0xff]  }
 0x80f   :  { %9589 = vmatpush2.bf16.msra.mxu1 %v12858_v6  ;;  %v13010_v6 = vld [vmem:[%s15691_s19 + $0x1ec] ss:$16 sps:$4 sm:$0xff]  }
 0x810   :  { %9640 = vmatprep.subr.bf16.mxu1 %v12866_v35  ;;  %v13016_v35 = vld [vmem:[%s15691_s19 + $0x1cc] ss:$16 sps:$4 sm:$0xff]  }
 0x812   :  { %v14920_v47 = vpop.f32.mrf.mxu0  ;;  %9591 = vmatmul.mubr.bf16.vlgmr.msra.gmra.mxu1 %v13862_v16 }
 0x813   :  { %9672 = vmatprep.mubr.bf16.mxu1 %v13879_v53  ;;  %9641 = vmatpush1.bf16.msra.mxu1 %v12864_v38  ;;  %v13014_v38 = vld [vmem:[%s15691_s19 + $0x1c8] ss:$16 sps:$4 sm:$0xff]  }
 0x814   :  { %v14925_v29 = vpop.f32.mrf.mxu0  ;;  %9642 = vmatprep.subr.bf16.mxu1 %v12872_v39  ;;  %v13022_v39 = vld [vmem:[%s15691_s19 + $0x1ac] ss:$16 sps:$4 sm:$0xff]  }
 0x816   :  { %v7775_v20 = vpop.f32.mrf.mxu0 }
 0x817   :  { %9643 = vmatpush1.bf16.msra.mxu1 %v12870_v1  ;;  %v12998_v20 = vld [vmem:[%s15691_s19 + $0x2c] ss:$16 sps:$4 sm:$0xff]   ;;  %v13020_v1 = vld [vmem:[%s15691_s19 + $0x1a8] ss:$16 sps:$4 sm:$0xff]  }
 0x818   :  { %v7776_v31 = vpop.f32.mrf.mxu0  ;;  %9644 = vmatprep.subr.bf16.mxu1 %v12878_v40  ;;  %v13028_v40 = vld [vmem:[%s15691_s19 + $0x18c] ss:$16 sps:$4 sm:$0xff]  }
 0x819   :  { %v13002_v31 = vld [vmem:[%s15691_s19 + $0x8] ss:$16 sps:$4 sm:$0xff]  }
 0x81b   :  { %9645 = vmatpush1.bf16.msra.mxu1 %v12876_v42  ;;  %v13026_v42 = vld [vmem:[%s15691_s19 + $0x188] ss:$16 sps:$4 sm:$0xff]  }
 0x81c   :  { %9646 = vmatprep.subr.bf16.mxu1 %v12884_v44  ;;  %v7401_v44 = vld [vmem:[#allocation25] sm:$0x3] }
 0x81f   :  { %9647 = vmatpush1.bf16.msra.mxu1 %v12882_v48  ;;  %v13034_v48 = vld [vmem:[%s15691_s19 + $0x16c] ss:$16 sps:$4 sm:$0xff]  }
 0x820   :  { %9648 = vmatprep.subr.bf16.mxu1 %v12890_v54  ;;  %v7410_v54 = vrot.slane %v7401_v44, %v13916_v7 }
 0x823   :  { %9649 = vmatpush1.bf16.msra.mxu1 %v12888_v58  ;;  %v13032_v58 = vld [vmem:[%s15691_s19 + $0x168] ss:$16 sps:$4 sm:$0xff]  }
 0x824   :  { %9650 = vmatprep.subr.bf16.mxu1 %v12896_v23  ;;  %v7414_v23 = vrot.slane %v7401_v44, %v13919_v11  ;;  %v12909_v44 = vld [vmem:[%s15691_s19 + $0x3e0] ss:$16 sps:$4 sm:$0xff]  }
 0x827   :  { %9651 = vmatpush1.bf16.msra.mxu1 %v12894_v9  ;;  %v13040_v9 = vld [vmem:[%s15691_s19 + $0x14c] ss:$16 sps:$4 sm:$0xff]  }
 0x828   :  { %9652 = vmatprep.subr.bf16.mxu1 %v12902_v52  ;;  %v7772_v52 = vadd.f32 %v14920_v47, %v7410_v54  ;;  %v13044_v47 = vld [vmem:[%s15691_s19 + $0x128] ss:$16 sps:$4 sm:$0xff]   ;;  %v12917_v54 = vld [vmem:[%s15691_s19 + $0x3c4] ss:$16 sps:$4 sm:$0xff]  }
 0x82b   :  { %9653 = vmatpush1.bf16.msra.mxu1 %v12900_v55  ;;  %v13038_v55 = vld [vmem:[%s15691_s19 + $0x148] ss:$16 sps:$4 sm:$0xff]  }
 0x82c   :  { %9654 = vmatprep.subr.bf16.mxu1 %v12908_v15 }
 0x82f   :  { %9655 = vmatpush1.bf16.msra.mxu1 %v12906_v59  ;;  %v7774_v59 = vadd.f32 %v14925_v29, %v7414_v23  ;;  %v13052_v29 = vld [vmem:[%s15691_s19 + $0x10c] ss:$16 sps:$4 sm:$0xff]   ;;  %v12915_v23 = vld [vmem:[%s15691_s19 + $0x3c0] ss:$16 sps:$4 sm:$0xff]  }
 0x830   :  { %9656 = vmatprep.subr.bf16.mxu1 %v12914_v63 }
 0x833   :  { %9657 = vmatpush2.bf16.msra.mxu1 %v12912_v2 }
 0x834   :  { %9658 = vmatprep.subr.bf16.mxu1 %v12920_v43  ;;  %v13046_v43 = vld [vmem:[%s15691_s19 + $0x12c] ss:$16 sps:$4 sm:$0xff]  }
 0x837   :  { %9659 = vmatpush2.bf16.msra.mxu1 %v12918_v19 }
 0x838   :  { %9660 = vmatprep.subr.bf16.mxu1 %v12926_v4 }
 0x83b   :  { %9661 = vmatpush2.bf16.msra.mxu1 %v12924_v5 }
 0x83c   :  { %9662 = vmatprep.subr.bf16.mxu1 %v12932_v8 }
 0x83f   :  { %9663 = vmatpush2.bf16.msra.mxu1 %v12930_v50 }
 0x840   :  { %9664 = vmatprep.subr.bf16.mxu1 %v12938_v13 }
 0x843   :  { %9665 = vmatpush2.bf16.msra.mxu1 %v12936_v51  ;;  %v12861_v51 = vld [vmem:[%s15691_s19 + $0x2e0] ss:$16 sps:$4 sm:$0xff]  }
 0x844   :  { %9666 = vmatprep.subr.bf16.mxu1 %v12944_v0  ;;  %v13050_v0 = vld [vmem:[%s15691_s19 + $0x108] ss:$16 sps:$4 sm:$0xff]  }
 0x847   :  { %9667 = vmatpush2.bf16.msra.mxu1 %v12942_v14 }
 0x848   :  { %9668 = vmatprep.subr.bf16.mxu1 %v12950_v34  ;;  %v12869_v34 = vld [vmem:[%s15691_s19 + $0x2c4] ss:$16 sps:$4 sm:$0xff]  }
 0x84b   :  { %9669 = vmatpush2.bf16.msra.mxu1 %v12948_v18  ;;  %v13058_v18 = vld [vmem:[%s15691_s19 + $0x4ec] ss:$16 sps:$4 sm:$0xff]  }
 0x84c   :  { %9670 = vmatprep.subr.bf16.mxu1 %v12956_v22  ;;  %v12867_v22 = vld [vmem:[%s15691_s19 + $0x2c0] ss:$16 sps:$4 sm:$0xff]  }
 0x84f   :  { %9671 = vmatpush2.bf16.msra.mxu1 %v12954_v24  ;;  %v13056_v24 = vld [vmem:[%s15691_s19 + $0x4e8] ss:$16 sps:$4 sm:$0xff]  }
 0x850   :  { %9722 = vmatprep.subr.bf16.mxu1 %v12962_v36  ;;  %v12875_v36 = vld [vmem:[%s15691_s19 + $0x2a4] ss:$16 sps:$4 sm:$0xff]  }
 0x852   :  { %9673 = vmatmul.mubr.bf16.vlgmr.msra.gmra.mxu1 %v13889_v32 }
 0x853   :  { %9723 = vmatpush1.bf16.msra.mxu1 %v12960_v37  ;;  %9754 = vmatprep.mubr.bf16.mxu1 %v13856_v62  ;;  %v12980_v62 = vld [vmem:[%s15691_s19 + $0x8c] ss:$16 sps:$4 sm:$0xff]  }
 0x854   :  { %9724 = vmatprep.subr.bf16.mxu1 %v12968_v21  ;;  %v13064_v37 = vld [vmem:[%s15691_s19 + $0x4cc] ss:$16 sps:$4 sm:$0xff]   ;;  %v12873_v21 = vld [vmem:[%s15691_s19 + $0x2a0] ss:$16 sps:$4 sm:$0xff]  }
 0x857   :  { %9725 = vmatpush1.bf16.msra.mxu1 %v12966_v25  ;;  %v13062_v25 = vld [vmem:[%s15691_s19 + $0x4c8] ss:$16 sps:$4 sm:$0xff]  }
 0x858   :  { %9726 = vmatprep.subr.bf16.mxu1 %v12974_v26  ;;  %v12879_v26 = vld [vmem:[%s15691_s19 + $0x280] ss:$16 sps:$4 sm:$0xff]  }
 0x85b   :  { %9727 = vmatpush1.bf16.msra.mxu1 %v12972_v27  ;;  %v13068_v27 = vld [vmem:[%s15691_s19 + $0x4a8] ss:$16 sps:$4 sm:$0xff]  }
 0x85c   :  { %9728 = vmatprep.subr.bf16.mxu1 %v12980_v62  ;;  %v12887_v62 = vld [vmem:[%s15691_s19 + $0x264] ss:$16 sps:$4 sm:$0xff]  }
 0x85f   :  { %9729 = vmatpush1.bf16.msra.mxu1 %v12978_v45  ;;  %v13076_v45 = vld [vmem:[%s15691_s19 + $0x48c] ss:$16 sps:$4 sm:$0xff]  }
 0x860   :  { %9730 = vmatprep.subr.bf16.mxu1 %v12986_v28  ;;  %v12885_v28 = vld [vmem:[%s15691_s19 + $0x260] ss:$16 sps:$4 sm:$0xff]  }
 0x863   :  { %9731 = vmatpush1.bf16.msra.mxu1 %v12984_v41  ;;  %v13074_v41 = vld [vmem:[%s15691_s19 + $0x488] ss:$16 sps:$4 sm:$0xff]  }
 0x864   :  { %9732 = vmatprep.subr.bf16.mxu1 %v12992_v30  ;;  %v12893_v30 = vld [vmem:[%s15691_s19 + $0x244] ss:$16 sps:$4 sm:$0xff]  }
 0x867   :  { %9733 = vmatpush1.bf16.msra.mxu1 %v12990_v46  ;;  %v13082_v46 = vld [vmem:[%s15691_s19 + $0x46c] ss:$16 sps:$4 sm:$0xff]  }
 0x868   :  { %9734 = vmatprep.subr.bf16.mxu1 %v12998_v20  ;;  %v12891_v20 = vld [vmem:[%s15691_s19 + $0x240] ss:$16 sps:$4 sm:$0xff]  }
 0x86b   :  { %9735 = vmatpush1.bf16.msra.mxu1 %v12996_v60  ;;  %v13080_v60 = vld [vmem:[%s15691_s19 + $0x468] ss:$16 sps:$4 sm:$0xff]  }
 0x86c   :  { %9736 = vmatprep.subr.bf16.mxu1 %v13004_v56  ;;  %v12899_v56 = vld [vmem:[%s15691_s19 + $0x224] ss:$16 sps:$4 sm:$0xff]  }
 0x86f   :  { %9737 = vmatpush1.bf16.msra.mxu1 %v13002_v31  ;;  %v13088_v31 = vld [vmem:[%s15691_s19 + $0x44c] ss:$16 sps:$4 sm:$0xff]  }
 0x870   :  { %9738 = vmatprep.subr.bf16.mxu1 %v13010_v6  ;;  %v12897_v6 = vld [vmem:[%s15691_s19 + $0x220] ss:$16 sps:$4 sm:$0xff]  }
 0x873   :  { %9739 = vmatpush2.bf16.msra.mxu1 %v13008_v61  ;;  %v13086_v61 = vld [vmem:[%s15691_s19 + $0x448] ss:$16 sps:$4 sm:$0xff]  }
 0x874   :  { %9740 = vmatprep.subr.bf16.mxu1 %v13016_v35  ;;  %v12905_v35 = vld [vmem:[%s15691_s19 + $0x204] ss:$16 sps:$4 sm:$0xff]  }
 0x877   :  { %9741 = vmatpush2.bf16.msra.mxu1 %v13014_v38  ;;  %v13094_v38 = vld [vmem:[%s15691_s19 + $0x42c] ss:$16 sps:$4 sm:$0xff]  }
 0x878   :  { %9742 = vmatprep.subr.bf16.mxu1 %v13022_v39  ;;  %v12903_v39 = vld [vmem:[%s15691_s19 + $0x200] ss:$16 sps:$4 sm:$0xff]  }
 0x87b   :  { %9743 = vmatpush2.bf16.msra.mxu1 %v13020_v1  ;;  %v13092_v1 = vld [vmem:[%s15691_s19 + $0x428] ss:$16 sps:$4 sm:$0xff]  }
 0x87c   :  { %9744 = vmatprep.subr.bf16.mxu1 %v13028_v40  ;;  %v12911_v40 = vld [vmem:[%s15691_s19 + $0x3e4] ss:$16 sps:$4 sm:$0xff]  }
 0x87f   :  { %9745 = vmatpush2.bf16.msra.mxu1 %v13026_v42  ;;  %v13100_v42 = vld [vmem:[%s15691_s19 + $0x40c] ss:$16 sps:$4 sm:$0xff]  }
 0x880   :  { %9746 = vmatprep.subr.bf16.mxu1 %v13034_v48  ;;  %v13098_v48 = vld [vmem:[%s15691_s19 + $0x408] ss:$16 sps:$4 sm:$0xff]  }
 0x883   :  { %9747 = vmatpush2.bf16.msra.mxu1 %v13032_v58  ;;  %v13106_v58 = vld [vmem:[%s15691_s19 + $0x5ec] ss:$16 sps:$4 sm:$0xff]  }
 0x884   :  { %9748 = vmatprep.subr.bf16.mxu1 %v13040_v9  ;;  %v13104_v9 = vld [vmem:[%s15691_s19 + $0x5e8] ss:$16 sps:$4 sm:$0xff]  }
 0x887   :  { %9749 = vmatpush2.bf16.msra.mxu1 %v13038_v55  ;;  %v13112_v55 = vld [vmem:[%s15691_s19 + $0x5cc] ss:$16 sps:$4 sm:$0xff]  }
 0x888   :  { %9750 = vmatprep.subr.bf16.mxu1 %v13046_v43  ;;  %v12927_v43 = vld [vmem:[%s15691_s19 + $0x380] ss:$16 sps:$4 sm:$0xff]  }
 0x88b   :  { %9751 = vmatpush2.bf16.msra.mxu1 %v13044_v47  ;;  %v12935_v47 = vld [vmem:[%s15691_s19 + $0x364] ss:$16 sps:$4 sm:$0xff]  }
 0x88c   :  { %9752 = vmatprep.subr.bf16.mxu1 %v13052_v29  ;;  %v13130_v29 = vld [vmem:[%s15691_s19 + $0x56c] ss:$16 sps:$4 sm:$0xff]  }
 0x88f   :  { %9753 = vmatpush2.bf16.msra.mxu1 %v13050_v0  ;;  %v12947_v0 = vld [vmem:[%s15691_s19 + $0x324] ss:$16 sps:$4 sm:$0xff]  }
 0x890   :  { %9804 = vmatprep.subr.bf16.mxu1 %v13058_v18  ;;  %v13134_v18 = vld [vmem:[%s15691_s19 + $0x548] ss:$16 sps:$4 sm:$0xff]  }
 0x892   :  { %v7812_v15 = vpop.f32.mrf.mxu1  ;;  %9755 = vmatmul.mubr.bf16.vlgmr.msra.gmra.mxu1 %v13862_v16  ;;  %v12881_v16 = vld [vmem:[%s15691_s19 + $0x284] ss:$16 sps:$4 sm:$0xff]  }
 0x893   :  { %v7813_v63 = vadd.f32 %v7812_v15, %v7772_v52  ;;  %9805 = vmatpush1.bf16.msra.mxu1 %v13056_v24  ;;  %9836 = vmatprep.mubr.bf16.mxu1 %v13879_v53  ;;  %v13070_v53 = vld [vmem:[%s15691_s19 + $0x4ac] ss:$16 sps:$4 sm:$0xff]   ;;  %v12923_v52 = vld [vmem:[%s15691_s19 + $0x3a4] ss:$16 sps:$4 sm:$0xff]   ;;  %v12921_v15 = vld [vmem:[%s15691_s19 + $0x3a0] ss:$16 sps:$4 sm:$0xff]  }
 0x894   :  { %v7814_v2 = vpop.f32.mrf.mxu1  ;;  %9806 = vmatprep.subr.bf16.mxu1 %v13064_v37  ;;  %v13142_v24 = vld [vmem:[%s15691_s19 + $0x52c] ss:$16 sps:$4 sm:$0xff]   ;;  %v13140_v37 = vld [vmem:[%s15691_s19 + $0x528] ss:$16 sps:$4 sm:$0xff]  }
 0x895   :  { %v7815_v19 = vadd.f32 %v7814_v2, %v7774_v59  ;;  %v7819_v4 = vmax.f32 %v7813_v63, 0.0  ;;  %v13110_v59 = vld [vmem:[%s15691_s19 + $0x5c8] ss:$16 sps:$4 sm:$0xff]   ;;  %v12929_v63 = vld [vmem:[%s15691_s19 + $0x384] ss:$16 sps:$4 sm:$0xff]  }
 0x896   :  { %v7816_v5 = vpop.f32.mrf.mxu1  ;;  %v13118_v2 = vld [vmem:[%s15691_s19 + $0x5ac] ss:$16 sps:$4 sm:$0xff]  }
 0x897   :  { %v7820_v8 = vmax.f32 %v7815_v19, 0.0  ;;  %v7854_v14 = vpack.c.bf16 %v7819_v4, %v7819_v4  ;;  %9807 = vmatpush1.bf16.msra.mxu1 %v13062_v25  ;;  %v13116_v19 = vld [vmem:[%s15691_s19 + $0x5a8] ss:$16 sps:$4 sm:$0xff]   ;;  %v13124_v4 = vld [vmem:[%s15691_s19 + $0x58c] ss:$16 sps:$4 sm:$0xff]  }
 0x898   :  { %v7817_v50 = vpop.f32.mrf.mxu1  ;;  %9808 = vmatprep.subr.bf16.mxu1 %v13070_v53  ;;  %v12933_v5 = vld [vmem:[%s15691_s19 + $0x360] ss:$16 sps:$4 sm:$0xff]   ;;  %v13148_v25 = vld [vmem:[%s15691_s19 + $0x50c] ss:$16 sps:$4 sm:$0xff]   ;;  %v13146_v53 = vld [vmem:[%s15691_s19 + $0x508] ss:$16 sps:$4 sm:$0xff]  }
 0x899   :  { %v7855_v13 = vpack.c.bf16 %v7820_v8, %v7820_v8  ;;  %v13122_v8 = vld [vmem:[%s15691_s19 + $0x588] ss:$16 sps:$4 sm:$0xff]   ;;  %v12941_v50 = vld [vmem:[%s15691_s19 + $0x344] ss:$16 sps:$4 sm:$0xff]  }
 0x89b   :  { %7990 = vmatprep.mubr.bf16.mxu0 %v7855_v13  ;;  %9809 = vmatpush1.bf16.msra.mxu1 %v13068_v27  ;;  %v12939_v13 = vld [vmem:[%s15691_s19 + $0x340] ss:$16 sps:$4 sm:$0xff]  }
 0x89c   :  { %7991 = vmatmul.mubr.bf16.vlgmr.msra.gmra.mxu0 %v7854_v14  ;;  %9810 = vmatprep.subr.bf16.mxu1 %v13076_v45  ;;  %v13136_v14 = vld [vmem:[%s15691_s19 + $0x54c] ss:$16 sps:$4 sm:$0xff]   ;;  %v12963_v27 = vld [vmem:[%s15691_s19 + $0x6c0] ss:$16 sps:$4 sm:$0xff]  }
 0x89d   :  { %9600 = vmatpush1.bf16.msra.mxu0 %v12861_v51  ;;  %9631 = vmatprep.mubr.bf16.mxu0 %v13858_v3  ;;  %v13128_v51 = vld [vmem:[%s15691_s19 + $0x568] ss:$16 sps:$4 sm:$0xff]   ;;  %v12969_v45 = vld [vmem:[%s15691_s19 + $0x6a0] ss:$16 sps:$4 sm:$0xff]  }
 0x89e   :  { %9601 = vmatprep.subr.bf16.mxu0 %v12869_v34  ;;  %v12945_v34 = vld [vmem:[%s15691_s19 + $0x320] ss:$16 sps:$4 sm:$0xff]  }
 0x89f   :  { %9811 = vmatpush1.bf16.msra.mxu1 %v13074_v41  ;;  %v12975_v41 = vld [vmem:[%s15691_s19 + $0x680] ss:$16 sps:$4 sm:$0xff]  }
 0x8a0   :  { %9812 = vmatprep.subr.bf16.mxu1 %v13082_v46  ;;  %v12989_v46 = vld [vmem:[%s15691_s19 + $0x644] ss:$16 sps:$4 sm:$0xff]  }
 0x8a1   :  { %9602 = vmatpush1.bf16.msra.mxu0 %v12867_v22  ;;  %v12953_v22 = vld [vmem:[%s15691_s19 + $0x304] ss:$16 sps:$4 sm:$0xff]  }
 0x8a2   :  { %9603 = vmatprep.subr.bf16.mxu0 %v12875_v36  ;;  %v12951_v36 = vld [vmem:[%s15691_s19 + $0x300] ss:$16 sps:$4 sm:$0xff]  }
 0x8a3   :  { %9813 = vmatpush1.bf16.msra.mxu1 %v13080_v60  ;;  %v12995_v60 = vld [vmem:[%s15691_s19 + $0x624] ss:$16 sps:$4 sm:$0xff]  }
 0x8a4   :  { %9814 = vmatprep.subr.bf16.mxu1 %v13088_v31  ;;  %v13001_v31 = vld [vmem:[%s15691_s19 + $0x604] ss:$16 sps:$4 sm:$0xff]  }
 0x8a5   :  { %9604 = vmatpush1.bf16.msra.mxu0 %v12873_v21  ;;  %v12959_v21 = vld [vmem:[%s15691_s19 + $0x6e4] ss:$16 sps:$4 sm:$0xff]  }
 0x8a6   :  { %9605 = vmatprep.subr.bf16.mxu0 %v12881_v16  ;;  %v12957_v16 = vld [vmem:[%s15691_s19 + $0x6e0] ss:$16 sps:$4 sm:$0xff]  }
 0x8a7   :  { %9815 = vmatpush1.bf16.msra.mxu1 %v13086_v61  ;;  %v13007_v61 = vld [vmem:[%s15691_s19 + $0x7e4] ss:$16 sps:$4 sm:$0xff]  }
 0x8a8   :  { %9816 = vmatprep.subr.bf16.mxu1 %v13094_v38  ;;  %v13013_v38 = vld [vmem:[%s15691_s19 + $0x7c4] ss:$16 sps:$4 sm:$0xff]  }
 0x8a9   :  { %9606 = vmatpush1.bf16.msra.mxu0 %v12879_v26  ;;  %v12965_v26 = vld [vmem:[%s15691_s19 + $0x6c4] ss:$16 sps:$4 sm:$0xff]  }
 0x8aa   :  { %9607 = vmatprep.subr.bf16.mxu0 %v12887_v62  ;;  %v12971_v62 = vld [vmem:[%s15691_s19 + $0x6a4] ss:$16 sps:$4 sm:$0xff]  }
 0x8ab   :  { %9817 = vmatpush1.bf16.msra.mxu1 %v13092_v1  ;;  %v13019_v1 = vld [vmem:[%s15691_s19 + $0x7a4] ss:$16 sps:$4 sm:$0xff]  }
 0x8ac   :  { %9818 = vmatprep.subr.bf16.mxu1 %v13100_v42  ;;  %v13025_v42 = vld [vmem:[%s15691_s19 + $0x784] ss:$16 sps:$4 sm:$0xff]  }
 0x8ad   :  { %9608 = vmatpush1.bf16.msra.mxu0 %v12885_v28  ;;  %v12977_v28 = vld [vmem:[%s15691_s19 + $0x684] ss:$16 sps:$4 sm:$0xff]  }
 0x8ae   :  { %9609 = vmatprep.subr.bf16.mxu0 %v12893_v30  ;;  %v12981_v30 = vld [vmem:[%s15691_s19 + $0x660] ss:$16 sps:$4 sm:$0xff]  }
 0x8af   :  { %9819 = vmatpush1.bf16.msra.mxu1 %v13098_v48  ;;  %v13031_v48 = vld [vmem:[%s15691_s19 + $0x764] ss:$16 sps:$4 sm:$0xff]  }
 0x8b0   :  { %9820 = vmatprep.subr.bf16.mxu1 %v13106_v58  ;;  %v13037_v58 = vld [vmem:[%s15691_s19 + $0x744] ss:$16 sps:$4 sm:$0xff]  }
 0x8b1   :  { %9610 = vmatpush1.bf16.msra.mxu0 %v12891_v20  ;;  %v12987_v20 = vld [vmem:[%s15691_s19 + $0x640] ss:$16 sps:$4 sm:$0xff]  }
 0x8b2   :  { %9611 = vmatprep.subr.bf16.mxu0 %v12899_v56  ;;  %v12993_v56 = vld [vmem:[%s15691_s19 + $0x620] ss:$16 sps:$4 sm:$0xff]  }
 0x8b3   :  { %9821 = vmatpush2.bf16.msra.mxu1 %v13104_v9  ;;  %v13043_v9 = vld [vmem:[%s15691_s19 + $0x724] ss:$16 sps:$4 sm:$0xff]  }
 0x8b4   :  { %9822 = vmatprep.subr.bf16.mxu1 %v13112_v55  ;;  %v13049_v55 = vld [vmem:[%s15691_s19 + $0x704] ss:$16 sps:$4 sm:$0xff]  }
 0x8b5   :  { %9612 = vmatpush1.bf16.msra.mxu0 %v12897_v6  ;;  %v12999_v6 = vld [vmem:[%s15691_s19 + $0x600] ss:$16 sps:$4 sm:$0xff]  }
 0x8b6   :  { %9613 = vmatprep.subr.bf16.mxu0 %v12905_v35  ;;  %v13005_v35 = vld [vmem:[%s15691_s19 + $0x7e0] ss:$16 sps:$4 sm:$0xff]  }
 0x8b7   :  { %9823 = vmatpush2.bf16.msra.mxu1 %v13110_v59  ;;  %v13047_v59 = vld [vmem:[%s15691_s19 + $0x700] ss:$16 sps:$4 sm:$0xff]  }
 0x8b8   :  { %9824 = vmatprep.subr.bf16.mxu1 %v13118_v2  ;;  %v13055_v2 = vld [vmem:[%s15691_s19 + $0x2ec] ss:$16 sps:$4 sm:$0xff]  }
 0x8b9   :  { %9614 = vmatpush1.bf16.msra.mxu0 %v12903_v39  ;;  %v13011_v39 = vld [vmem:[%s15691_s19 + $0x7c0] ss:$16 sps:$4 sm:$0xff]  }
 0x8ba   :  { %9615 = vmatprep.subr.bf16.mxu0 %v12911_v40  ;;  %v13017_v40 = vld [vmem:[%s15691_s19 + $0x7a0] ss:$16 sps:$4 sm:$0xff]  }
 0x8bb   :  { %9825 = vmatpush2.bf16.msra.mxu1 %v13116_v19  ;;  %v13053_v19 = vld [vmem:[%s15691_s19 + $0x2e8] ss:$16 sps:$4 sm:$0xff]  }
 0x8bc   :  { %9826 = vmatprep.subr.bf16.mxu1 %v13124_v4  ;;  %v13061_v4 = vld [vmem:[%s15691_s19 + $0x2cc] ss:$16 sps:$4 sm:$0xff]  }
 0x8bd   :  { %9616 = vmatpush2.bf16.msra.mxu0 %v12909_v44  ;;  %v13023_v44 = vld [vmem:[%s15691_s19 + $0x780] ss:$16 sps:$4 sm:$0xff]  }
 0x8be   :  { %9617 = vmatprep.subr.bf16.mxu0 %v12917_v54  ;;  %v13029_v54 = vld [vmem:[%s15691_s19 + $0x760] ss:$16 sps:$4 sm:$0xff]  }
 0x8bf   :  { %9827 = vmatpush2.bf16.msra.mxu1 %v13122_v8  ;;  %v13067_v8 = vld [vmem:[%s15691_s19 + $0x2ac] ss:$16 sps:$4 sm:$0xff]  }
 0x8c0   :  { %9828 = vmatprep.subr.bf16.mxu1 %v13130_v29 }
 0x8c1   :  { %9618 = vmatpush2.bf16.msra.mxu0 %v12915_v23  ;;  %v13035_v23 = vld [vmem:[%s15691_s19 + $0x740] ss:$16 sps:$4 sm:$0xff]  }
 0x8c2   :  { %9619 = vmatprep.subr.bf16.mxu0 %v12923_v52  ;;  %v13041_v52 = vld [vmem:[%s15691_s19 + $0x720] ss:$16 sps:$4 sm:$0xff]  }
 0x8c3   :  { %9829 = vmatpush2.bf16.msra.mxu1 %v13128_v51  ;;  %v13073_v51 = vld [vmem:[%s15691_s19 + $0x28c] ss:$16 sps:$4 sm:$0xff]  }
 0x8c4   :  { %9830 = vmatprep.subr.bf16.mxu1 %v13136_v14  ;;  %v13071_v14 = vld [vmem:[%s15691_s19 + $0x288] ss:$16 sps:$4 sm:$0xff]  }
 0x8c5   :  { %9620 = vmatpush2.bf16.msra.mxu0 %v12921_v15 }
 0x8c6   :  { %9621 = vmatprep.subr.bf16.mxu0 %v12929_v63 }
 0x8c7   :  { %9831 = vmatpush2.bf16.msra.mxu1 %v13134_v18  ;;  %v13077_v18 = vld [vmem:[%s15691_s19 + $0x268] ss:$16 sps:$4 sm:$0xff]  }
 0x8c8   :  { %9832 = vmatprep.subr.bf16.mxu1 %v13142_v24  ;;  %v13083_v24 = vld [vmem:[%s15691_s19 + $0x248] ss:$16 sps:$4 sm:$0xff]  }
 0x8c9   :  { %9622 = vmatpush2.bf16.msra.mxu0 %v12927_v43 }
 0x8ca   :  { %9623 = vmatprep.subr.bf16.mxu0 %v12935_v47 }
 0x8cb   :  { %9833 = vmatpush2.bf16.msra.mxu1 %v13140_v37  ;;  %v13089_v37 = vld [vmem:[%s15691_s19 + $0x228] ss:$16 sps:$4 sm:$0xff]  }
 0x8cc   :  { %9834 = vmatprep.subr.bf16.mxu1 %v13148_v25  ;;  %v13095_v25 = vld [vmem:[%s15691_s19 + $0x208] ss:$16 sps:$4 sm:$0xff]  }
 0x8cd   :  { %9624 = vmatpush2.bf16.msra.mxu0 %v12933_v5  ;;  %v13059_v5 = vld [vmem:[%s15691_s19 + $0x2c8] ss:$16 sps:$4 sm:$0xff]  }
 0x8ce   :  { %9625 = vmatprep.subr.bf16.mxu0 %v12941_v50 }
 0x8cf   :  { %9835 = vmatpush2.bf16.msra.mxu1 %v13146_v53  ;;  %v13101_v53 = vld [vmem:[%s15691_s19 + $0x3e8] ss:$16 sps:$4 sm:$0xff]  }
 0x8d1   :  { %9626 = vmatpush2.bf16.msra.mxu0 %v12939_v13  ;;  %v13065_v13 = vld [vmem:[%s15691_s19 + $0x2a8] ss:$16 sps:$4 sm:$0xff]  }
 0x8d2   :  { %9627 = vmatprep.subr.bf16.mxu0 %v12947_v0  ;;  %9837 = vmatmul.mubr.bf16.vlgmr.msra.gmra.mxu1 %v13889_v32  ;;  %v12983_v32 = vld [vmem:[%s15691_s19 + $0x664] ss:$16 sps:$4 sm:$0xff]   ;;  %v15427_v15 = vpop.f32.mrf.mxu1 }
 0x8d4   :  { %v15432_v63 = vpop.f32.mrf.mxu1 }
 0x8d5   :  { %9628 = vmatpush2.bf16.msra.mxu0 %v12945_v34  ;;  %v13079_v34 = vld [vmem:[%s15691_s19 + $0x26c] ss:$16 sps:$4 sm:$0xff]  }
 0x8d6   :  { %9629 = vmatprep.subr.bf16.mxu0 %v12953_v22  ;;  %v9596_v43 = vpop.f32.mrf.mxu1  ;;  %v13085_v22 = vld [vmem:[%s15691_s19 + $0x24c] ss:$16 sps:$4 sm:$0xff]  }
 0x8d7   :  { %v13161_v43 = vld [vmem:[%s15691_s19 + $0x668] ss:$16 sps:$4 sm:$0xff]  }
 0x8d8   :  { %v9597_v47 = vpop.f32.mrf.mxu1 }
 0x8d9   :  { %9630 = vmatpush2.bf16.msra.mxu0 %v12951_v36  ;;  %v13091_v36 = vld [vmem:[%s15691_s19 + $0x22c] ss:$16 sps:$4 sm:$0xff]  }
 0x8da   :  { %9681 = vmatprep.subr.bf16.mxu0 %v12959_v21  ;;  %v13097_v21 = vld [vmem:[%s15691_s19 + $0x20c] ss:$16 sps:$4 sm:$0xff]  }
 0x8db   :  { %v13166_v47 = vld [vmem:[%s15691_s19 + $0x64c] ss:$16 sps:$4 sm:$0xff]  }
 0x8dc   :  { %9632 = vmatmul.mubr.bf16.vlgmr.msra.gmra.mxu0 %v13864_v17 }
 0x8dd   :  { %9682 = vmatpush1.bf16.msra.mxu0 %v12957_v16  ;;  %9713 = vmatprep.mubr.bf16.mxu0 %v13883_v57  ;;  %v13103_v16 = vld [vmem:[%s15691_s19 + $0x3ec] ss:$16 sps:$4 sm:$0xff]  }
 0x8de   :  { %9683 = vmatprep.subr.bf16.mxu0 %v12965_v26  ;;  %v13109_v26 = vld [vmem:[%s15691_s19 + $0x3cc] ss:$16 sps:$4 sm:$0xff]  }
 0x8e1   :  { %9684 = vmatpush1.bf16.msra.mxu0 %v12963_v27  ;;  %v13107_v27 = vld [vmem:[%s15691_s19 + $0x3c8] ss:$16 sps:$4 sm:$0xff]  }
 0x8e2   :  { %9685 = vmatprep.subr.bf16.mxu0 %v12971_v62  ;;  %v13115_v62 = vld [vmem:[%s15691_s19 + $0x3ac] ss:$16 sps:$4 sm:$0xff]  }
 0x8e5   :  { %9686 = vmatpush1.bf16.msra.mxu0 %v12969_v45  ;;  %v13113_v45 = vld [vmem:[%s15691_s19 + $0x3a8] ss:$16 sps:$4 sm:$0xff]  }
 0x8e6   :  { %9687 = vmatprep.subr.bf16.mxu0 %v12977_v28  ;;  %v13121_v28 = vld [vmem:[%s15691_s19 + $0x38c] ss:$16 sps:$4 sm:$0xff]  }
 0x8e9   :  { %9688 = vmatpush1.bf16.msra.mxu0 %v12975_v41  ;;  %v13119_v41 = vld [vmem:[%s15691_s19 + $0x388] ss:$16 sps:$4 sm:$0xff]  }
 0x8ea   :  { %9689 = vmatprep.subr.bf16.mxu0 %v12983_v32  ;;  %v13127_v32 = vld [vmem:[%s15691_s19 + $0x36c] ss:$16 sps:$4 sm:$0xff]  }
 0x8ed   :  { %9690 = vmatpush1.bf16.msra.mxu0 %v12981_v30  ;;  %v13125_v30 = vld [vmem:[%s15691_s19 + $0x368] ss:$16 sps:$4 sm:$0xff]  }
 0x8ee   :  { %9691 = vmatprep.subr.bf16.mxu0 %v12989_v46  ;;  %v13133_v46 = vld [vmem:[%s15691_s19 + $0x34c] ss:$16 sps:$4 sm:$0xff]  }
 0x8f1   :  { %9692 = vmatpush1.bf16.msra.mxu0 %v12987_v20  ;;  %v13131_v20 = vld [vmem:[%s15691_s19 + $0x348] ss:$16 sps:$4 sm:$0xff]  }
 0x8f2   :  { %9693 = vmatprep.subr.bf16.mxu0 %v12995_v60  ;;  %v13139_v60 = vld [vmem:[%s15691_s19 + $0x32c] ss:$16 sps:$4 sm:$0xff]  }
 0x8f5   :  { %9694 = vmatpush1.bf16.msra.mxu0 %v12993_v56  ;;  %v13137_v56 = vld [vmem:[%s15691_s19 + $0x328] ss:$16 sps:$4 sm:$0xff]  }
 0x8f6   :  { %9695 = vmatprep.subr.bf16.mxu0 %v13001_v31  ;;  %v13145_v31 = vld [vmem:[%s15691_s19 + $0x30c] ss:$16 sps:$4 sm:$0xff]  }
 0x8f9   :  { %9696 = vmatpush1.bf16.msra.mxu0 %v12999_v6  ;;  %v13143_v6 = vld [vmem:[%s15691_s19 + $0x308] ss:$16 sps:$4 sm:$0xff]  }
 0x8fa   :  { %9697 = vmatprep.subr.bf16.mxu0 %v13007_v61  ;;  %v13151_v61 = vld [vmem:[%s15691_s19 + $0x6ec] ss:$16 sps:$4 sm:$0xff]  }
 0x8fd   :  { %9698 = vmatpush2.bf16.msra.mxu0 %v13005_v35  ;;  %v13149_v35 = vld [vmem:[%s15691_s19 + $0x6e8] ss:$16 sps:$4 sm:$0xff]  }
 0x8fe   :  { %9699 = vmatprep.subr.bf16.mxu0 %v13013_v38  ;;  %v13154_v38 = vld [vmem:[%s15691_s19 + $0x6cc] ss:$16 sps:$4 sm:$0xff]  }
 0x901   :  { %9700 = vmatpush2.bf16.msra.mxu0 %v13011_v39 }
 0x902   :  { %9701 = vmatprep.subr.bf16.mxu0 %v13019_v1  ;;  %v13152_v1 = vld [vmem:[%s15691_s19 + $0x6c8] ss:$16 sps:$4 sm:$0xff]  }
 0x905   :  { %9702 = vmatpush2.bf16.msra.mxu0 %v13017_v40  ;;  %v10957_v40 = vld [vmem:[#allocation28] ss:$0 sm:$0xff] }
 0x906   :  { %9703 = vmatprep.subr.bf16.mxu0 %v13025_v42 }
 0x909   :  { %9704 = vmatpush2.bf16.msra.mxu0 %v13023_v44  ;;  %v13157_v44 = vld [vmem:[%s15691_s19 + $0x6ac] ss:$16 sps:$4 sm:$0xff]  }
 0x90a   :  { %9705 = vmatprep.subr.bf16.mxu0 %v13031_v48 }
 0x90d   :  { %9706 = vmatpush2.bf16.msra.mxu0 %v13029_v54 }
 0x90e   :  { %9707 = vmatprep.subr.bf16.mxu0 %v13037_v58 }
 0x911   :  { %9708 = vmatpush2.bf16.msra.mxu0 %v13035_v23 }
 0x912   :  { %9709 = vmatprep.subr.bf16.mxu0 %v13043_v9  ;;  %v15451_v50 = vpop.f32.mrf.mxu1 }
 0x914   :  { %v15453_v29 = vpop.f32.mrf.mxu1 }
 0x915   :  { %9710 = vmatpush2.bf16.msra.mxu0 %v13041_v52  ;;  %v13158_v52 = vld [vmem:[%s15691_s19 + $0x688] ss:$16 sps:$4 sm:$0xff]  }
 0x916   :  { %9711 = vmatprep.subr.bf16.mxu0 %v13049_v55 }
 0x919   :  { %9712 = vmatpush2.bf16.msra.mxu0 %v13047_v59  ;;  %v13163_v59 = vld [vmem:[%s15691_s19 + $0x66c] ss:$16 sps:$4 sm:$0xff]  }
 0x91a   :  { %9763 = vmatprep.subr.bf16.mxu0 %v13055_v2 }
 0x91c   :  { %9714 = vmatmul.mubr.bf16.vlgmr.msra.gmra.mxu0 %v13893_v33 }
 0x91d   :  { %9764 = vmatpush1.bf16.msra.mxu0 %v13053_v19  ;;  %9795 = vmatprep.mubr.bf16.mxu0 %v13858_v3  ;;  %v9678_v3 = vpop.f32.mrf.mxu1 }
 0x91e   :  { %9765 = vmatprep.subr.bf16.mxu0 %v13061_v4  ;;  %v13164_v4 = vld [vmem:[%s15691_s19 + $0x648] ss:$16 sps:$4 sm:$0xff]   ;;  %v13175_v3 = vld [vmem:[%s15691_s19 + $0x7ec] ss:$16 sps:$4 sm:$0xff]  }
 0x91f   :  { %v9679_v0 = vpop.f32.mrf.mxu1 }
 0x920   :  { %v13173_v0 = vld [vmem:[%s15691_s19 + $0x7e8] ss:$16 sps:$4 sm:$0xff]  }
 0x921   :  { %9766 = vmatpush1.bf16.msra.mxu0 %v13059_v5  ;;  %v13169_v5 = vld [vmem:[%s15691_s19 + $0x62c] ss:$16 sps:$4 sm:$0xff]  }
 0x922   :  { %9767 = vmatprep.subr.bf16.mxu0 %v13067_v8  ;;  %v13167_v8 = vld [vmem:[%s15691_s19 + $0x628] ss:$16 sps:$4 sm:$0xff]  }
 0x925   :  { %9768 = vmatpush1.bf16.msra.mxu0 %v13065_v13  ;;  %v13172_v13 = vld [vmem:[%s15691_s19 + $0x60c] ss:$16 sps:$4 sm:$0xff]  }
 0x926   :  { %9769 = vmatprep.subr.bf16.mxu0 %v13073_v51  ;;  %v13170_v51 = vld [vmem:[%s15691_s19 + $0x608] ss:$16 sps:$4 sm:$0xff]  }
 0x929   :  { %9770 = vmatpush1.bf16.msra.mxu0 %v13071_v14  ;;  %v13178_v14 = vld [vmem:[%s15691_s19 + $0x7cc] ss:$16 sps:$4 sm:$0xff]  }
 0x92a   :  { %9771 = vmatprep.subr.bf16.mxu0 %v13079_v34  ;;  %v13176_v34 = vld [vmem:[%s15691_s19 + $0x7c8] ss:$16 sps:$4 sm:$0xff]  }
 0x92d   :  { %9772 = vmatpush1.bf16.msra.mxu0 %v13077_v18  ;;  %v13181_v18 = vld [vmem:[%s15691_s19 + $0x7ac] ss:$16 sps:$4 sm:$0xff]  }
 0x92e   :  { %9773 = vmatprep.subr.bf16.mxu0 %v13085_v22  ;;  %v13179_v22 = vld [vmem:[%s15691_s19 + $0x7a8] ss:$16 sps:$4 sm:$0xff]  }
 0x931   :  { %9774 = vmatpush1.bf16.msra.mxu0 %v13083_v24  ;;  %v13184_v24 = vld [vmem:[%s15691_s19 + $0x78c] ss:$16 sps:$4 sm:$0xff]  }
 0x932   :  { %9775 = vmatprep.subr.bf16.mxu0 %v13091_v36  ;;  %v13182_v36 = vld [vmem:[%s15691_s19 + $0x788] ss:$16 sps:$4 sm:$0xff]  }
 0x935   :  { %9776 = vmatpush1.bf16.msra.mxu0 %v13089_v37  ;;  %v13187_v37 = vld [vmem:[%s15691_s19 + $0x76c] ss:$16 sps:$4 sm:$0xff]  }
 0x936   :  { %9777 = vmatprep.subr.bf16.mxu0 %v13097_v21  ;;  %v13185_v21 = vld [vmem:[%s15691_s19 + $0x768] ss:$16 sps:$4 sm:$0xff]  }
 0x939   :  { %9778 = vmatpush1.bf16.msra.mxu0 %v13095_v25  ;;  %v13190_v25 = vld [vmem:[%s15691_s19 + $0x74c] ss:$16 sps:$4 sm:$0xff]  }
 0x93a   :  { %9779 = vmatprep.subr.bf16.mxu0 %v13103_v16  ;;  %v13188_v16 = vld [vmem:[%s15691_s19 + $0x748] ss:$16 sps:$4 sm:$0xff]  }
 0x93d   :  { %9780 = vmatpush2.bf16.msra.mxu0 %v13101_v53  ;;  %v13193_v53 = vld [vmem:[%s15691_s19 + $0x72c] ss:$16 sps:$4 sm:$0xff]  }
 0x93e   :  { %9781 = vmatprep.subr.bf16.mxu0 %v13109_v26  ;;  %v13191_v26 = vld [vmem:[%s15691_s19 + $0x728] ss:$16 sps:$4 sm:$0xff]  }
 0x941   :  { %9782 = vmatpush2.bf16.msra.mxu0 %v13107_v27  ;;  %v15635_v27 = vld [vmem:[%s15692_s20] sm:$0xf] }
 0x942   :  { %9783 = vmatprep.subr.bf16.mxu0 %v13115_v62  ;;  %v13196_v62 = vld [vmem:[%s15691_s19 + $0x70c] ss:$16 sps:$4 sm:$0xff]  }
 0x945   :  { %9784 = vmatpush2.bf16.msra.mxu0 %v13113_v45  ;;  %v8261_v45 = vrot.slane %v15635_v27, %v13916_v7 }
 0x946   :  { %9785 = vmatprep.subr.bf16.mxu0 %v13121_v28  ;;  %v13194_v28 = vld [vmem:[%s15691_s19 + $0x708] ss:$16 sps:$4 sm:$0xff]  }
 0x949   :  { %9786 = vmatpush2.bf16.msra.mxu0 %v13119_v41  ;;  %v8265_v41 = vrot.slane %v15635_v27, %v13919_v11 }
 0x94a   :  { %9787 = vmatprep.subr.bf16.mxu0 %v13127_v32  ;;  %v9593_v32 = vadd.f32 %v15427_v15, %v8261_v45 }
 0x94d   :  { %9788 = vmatpush2.bf16.msra.mxu0 %v13125_v30  ;;  %v9595_v30 = vadd.f32 %v15432_v63, %v8265_v41 }
 0x94e   :  { %9789 = vmatprep.subr.bf16.mxu0 %v13133_v46 }
 0x951   :  { %9790 = vmatpush2.bf16.msra.mxu0 %v13131_v20 }
 0x952   :  { %9791 = vmatprep.subr.bf16.mxu0 %v13139_v60  ;;  %v15559_v9 = vpop.f32.mrf.mxu1 }
 0x954   :  { %v15564_v55 = vpop.f32.mrf.mxu1 }
 0x955   :  { %9792 = vmatpush2.bf16.msra.mxu0 %v13137_v56 }
 0x956   :  { %9793 = vmatprep.subr.bf16.mxu0 %v13145_v31  ;;  %v9760_v2 = vpop.f32.mrf.mxu1 }
 0x958   :  { %v9761_v19 = vpop.f32.mrf.mxu1 }
 0x959   :  { %9794 = vmatpush2.bf16.msra.mxu0 %v13143_v6 }
 0x95a   :  { %9845 = vmatprep.subr.bf16.mxu0 %v13151_v61 }
 0x95c   :  { %9796 = vmatmul.mubr.bf16.vlgmr.msra.gmra.mxu0 %v13864_v17  ;;  %v11290_v39 = vpop.f32.mrf.mxu0  ;;  %v13155_v17 = vld [vmem:[%s15691_s19 + $0x6a8] ss:$16 sps:$4 sm:$0xff]  }
 0x95d   :  { %9846 = vmatpush1.bf16.msra.mxu0 %v13149_v35  ;;  %9877 = vmatprep.mubr.bf16.mxu0 %v13883_v57  ;;  %v13160_v57 = vld [vmem:[%s15691_s19 + $0x68c] ss:$16 sps:$4 sm:$0xff]   ;;  %s13643_s19 = smov [#allocation30]  }
 0x95e   :  { %v11291_v42 = vpop.f32.mrf.mxu0  ;;  %9847 = vmatprep.subr.bf16.mxu0 %v13154_v38  ;;  %s9925_s20 = sshll.u32 %s13643_s19, 4  ;;  %s9926_s20 = int_to_ptr.vmem [resolvable:$true] %s9925_s20 }
 0x95f   :  { %v11292_v48 = vadd.f32 %v11291_v42, %v11290_v39  ;;  %s13537_s7 = scalar_lea.vmem %s9926_s20, 32  ;;  %p13542_p2 = scmp.lt.s32.totalorder %s9926_s20, %s9926_s20 }
 0x960   :  { %v11293_v54 = vpop.f32.mrf.mxu0  ;;  %p13538_p1 = scmp.ne.s32.totalorder %s9926_s20, %s13537_s7  ;;  %p13543_p3 = scmp.lt.s32.totalorder %s13537_s7, %s13537_s7 }
 0x961   :  { %v7993_v58 = vadd.f32 %v11292_v48, %v10957_v40  ;;  %9848 = vmatpush1.bf16.msra.mxu0 %v13152_v1 }
 0x962   :  { %v11294_v23 = vpop.f32.mrf.mxu0  ;;  %9849 = vmatprep.subr.bf16.mxu0 %v13157_v44  ;;  %p13544_p4 = por %p13543_p3, %p13542_p2 }
 0x963   :  { %7999 = vst.msk [vmem:[#allocation32] sm:$0x3] %vm7998_vm2, %v7993_v58 }
 0x964   :  { %p13545_p5 = pnand %p13544_p4, %p13538_p1 }
 0x965   :  { %9850 = vmatpush1.bf16.msra.mxu0 %v13155_v17 }
 0x966   :  { %9851 = vmatprep.subr.bf16.mxu0 %v13160_v57 }
 0x969   :  { %9852 = vmatpush1.bf16.msra.mxu0 %v13158_v52 }
 0x96a   :  { %9853 = vmatprep.subr.bf16.mxu0 %v13163_v59 }
 0x96d   :  { %9854 = vmatpush1.bf16.msra.mxu0 %v13161_v43 }
 0x96e   :  { %9855 = vmatprep.subr.bf16.mxu0 %v13166_v47 }
 0x971   :  { %9856 = vmatpush1.bf16.msra.mxu0 %v13164_v4 }
 0x972   :  { %9857 = vmatprep.subr.bf16.mxu0 %v13169_v5 }
 0x975   :  { %9858 = vmatpush1.bf16.msra.mxu0 %v13167_v8 }
 0x976   :  { %9859 = vmatprep.subr.bf16.mxu0 %v13172_v13 }
 0x979   :  { %9860 = vmatpush1.bf16.msra.mxu0 %v13170_v51 }
 0x97a   :  { %9861 = vmatprep.subr.bf16.mxu0 %v13175_v3 }
 0x97d   :  { %9862 = vmatpush2.bf16.msra.mxu0 %v13173_v0 }
 0x97e   :  { %9863 = vmatprep.subr.bf16.mxu0 %v13178_v14 }
 0x981   :  { %9864 = vmatpush2.bf16.msra.mxu0 %v13176_v34 }
 0x982   :  { %9865 = vmatprep.subr.bf16.mxu0 %v13181_v18 }
 0x985   :  { %9866 = vmatpush2.bf16.msra.mxu0 %v13179_v22 }
 0x986   :  { %9867 = vmatprep.subr.bf16.mxu0 %v13184_v24 }
 0x989   :  { %9868 = vmatpush2.bf16.msra.mxu0 %v13182_v36 }
 0x98a   :  { %9869 = vmatprep.subr.bf16.mxu0 %v13187_v37 }
 0x98d   :  { %9870 = vmatpush2.bf16.msra.mxu0 %v13185_v21 }
 0x98e   :  { %9871 = vmatprep.subr.bf16.mxu0 %v13190_v25 }
 0x991   :  { %9872 = vmatpush2.bf16.msra.mxu0 %v13188_v16 }
 0x992   :  { %9873 = vmatprep.subr.bf16.mxu0 %v13193_v53  ;;  %v9838_v56 = vpop.f32.mrf.mxu1 }
 0x994   :  { %v9840_v6 = vpop.f32.mrf.mxu1 }
 0x995   :  { %9874 = vmatpush2.bf16.msra.mxu0 %v13191_v26 }
 0x996   :  { %9875 = vmatprep.subr.bf16.mxu0 %v13196_v62  ;;  %v9842_v35 = vpop.f32.mrf.mxu1 }
 0x998   :  { %v9843_v38 = vpop.f32.mrf.mxu1 }
 0x999   :  { %9876 = vmatpush2.bf16.msra.mxu0 %v13194_v28 }
 0x99c   :  { %v9633_v46 = vpop.f32.mrf.mxu0  ;;  %9878 = vmatmul.mubr.bf16.vlgmr.msra.gmra.mxu0 %v13893_v33 }
 0x99d   :  { %v9634_v20 = vadd.f32 %v9633_v46, %v9593_v32 }
 0x99e   :  { %v9635_v60 = vpop.f32.mrf.mxu0 }
 0x99f   :  { %v9636_v7 = vadd.f32 %v9635_v60, %v9595_v30  ;;  %v9675_v39 = vadd.f32 %v15451_v50, %v9634_v20 }
 0x9a0   :  { %v9637_v31 = vpop.f32.mrf.mxu0 }
 0x9a1   :  { %v9677_v15 = vadd.f32 %v15453_v29, %v9636_v7 }
 0x9a2   :  { %v9638_v61 = vpop.f32.mrf.mxu0 }
 0x9dc   :  { %v9715_v11 = vpop.f32.mrf.mxu0 }
 0x9dd   :  { %v9716_v1 = vadd.f32 %v9715_v11, %v9675_v39 }
 0x9de   :  { %v9717_v40 = vpop.f32.mrf.mxu0 }
 0x9df   :  { %v9718_v63 = vadd.f32 %v9717_v40, %v9677_v15 }
 0x9e0   :  { %v9719_v42 = vpop.f32.mrf.mxu0 }
 0x9e1   :  { %v9890_v44 = vcombine.low %v9716_v1, %v9718_v63 }
 0x9e2   :  { %v9720_v33 = vpop.f32.mrf.mxu0 }
 0x9e3   :  { %13548 = shalt.err (!%p13545_p5)
}
 0x9e4   :  { %9928 = dma.vmem_to_hbm [thread:$0]  %s9926_s20, 32, %s15694_s22, [#allocation31]  }
 0x9e5   :  { %s13557_s0 = scalar_lea.vmem %s9916_s28, 32  ;;  %p13562_p7 = scmp.lt.s32.totalorder %s9916_s28, %s9916_s28 }
 0x9e6   :  { %p13558_p6 = scmp.ne.s32.totalorder %s9916_s28, %s13557_s0  ;;  %p13563_p8 = scmp.lt.s32.totalorder %s13557_s0, %s13557_s0 }
 0x9e8   :  { %p13564_p9 = por %p13563_p8, %p13562_p7 }
 0x9ea   :  { %p13565_p10 = pnand %p13564_p9, %p13558_p6 }
 0x9ec   :  { %13568 = shalt.err (!%p13565_p10)
}
 0x9ed   :  { %9918 = dma.vmem_to_hbm [thread:$0]  %s9916_s28, 32, %s15693_s21, [#allocation4]  }
 0x9ee   :  { %s13645_s9 = smov [#allocation32]  }
 0x9ef   :  { %s9935_s10 = sshll.u32 %s13645_s9, 4  ;;  %s9936_s10 = int_to_ptr.vmem [resolvable:$true] %s9935_s10 }
 0x9f0   :  { %s13577_s30 = scalar_lea.vmem %s9936_s10, 32  ;;  %p13582_p12 = scmp.lt.s32.totalorder %s9936_s10, %s9936_s10 }
 0x9f1   :  { %p13578_p11 = scmp.ne.s32.totalorder %s9936_s10, %s13577_s30  ;;  %p13583_p13 = scmp.lt.s32.totalorder %s13577_s30, %s13577_s30 }
 0x9f3   :  { %p13584_p0 = por %p13583_p13, %p13582_p12 }
 0x9f5   :  { %p13585_p1 = pnand %p13584_p0, %p13578_p11 }
 0x9f7   :  { %13588 = shalt.err (!%p13585_p1)
}
 0x9f8   :  { %9938 = dma.vmem_to_hbm [thread:$0]  %s9936_s10, 32, %s15695_s23, [#allocation31]   ;;  %v8269_v58 = vrot.slane %v15635_v27, %v13930_v10  ;;  %v8273_v17 = vrot.slane %v15635_v27, %v13933_v12  ;;  %v9898_v10 = vrot.slane %v9890_v44, %v13849_v49 }
 0x9fa   :  { %v9757_v23 = vadd.f32 %v15559_v9, %v8269_v58  ;;  %v9759_v57 = vadd.f32 %v15564_v55, %v8273_v17 }
 0xa1c   :  { %v9797_v50 = vpop.f32.mrf.mxu0 }
 0xa1d   :  { %v9798_v52 = vadd.f32 %v9797_v50, %v9757_v23 }
 0xa1e   :  { %v9799_v29 = vpop.f32.mrf.mxu0 }
 0xa1f   :  { %v9800_v59 = vadd.f32 %v9799_v29, %v9759_v57  ;;  %v9839_v43 = vadd.f32 %v9838_v56, %v9798_v52 }
 0xa20   :  { %v9801_v48 = vpop.f32.mrf.mxu0 }
 0xa21   :  { %v9841_v19 = vadd.f32 %v9840_v6, %v9800_v59 }
 0xa22   :  { %v9802_v54 = vpop.f32.mrf.mxu0 }
 0xa5c   :  { %v9879_v2 = vpop.f32.mrf.mxu0 }
 0xa5d   :  { %v9880_v4 = vadd.f32 %v9879_v2, %v9839_v43 }
 0xa5e   :  { %v9881_v47 = vpop.f32.mrf.mxu0 }
 0xa5f   :  { %v9882_v5 = vadd.f32 %v9881_v47, %v9841_v19 }
 0xa60   :  { %v9883_v8 = vpop.f32.mrf.mxu0 }
 0xa61   :  { %v9891_v13 = vcombine.low %v9880_v4, %v9882_v5 }
 0xa62   :  { %v9884_v51 = vpop.f32.mrf.mxu0 }
 0xa63   :  { %v9905_v3 = vrot.slane %v9891_v13, %v13849_v49 }
 0xa65   :  { %v9906_v12 = vcombine.low %v9898_v10, %v9905_v3 }
 0xa67   :  { %9908 = vst [vmem:[%s15696_s24] sm:$0xff] %v9906_v12 }
 0xa68   :  { %13615 = dma.done.wait [#allocation4], 32  }
 0xa69   :  { %13616 = vsyncadd [#allocation4], 4294967264 }
 0xa6a   :  { %13617 = dma.done.wait [#allocation31], 64  }
 0xa6b   :  { %13618 = vsyncadd [#allocation31], 4294967232 }
 0xa6c   :  { %9952 = vsyncpa [#allocation3], 1 }
 0xa6d   :  { %9953 = vsyncpa [#allocation6], 1 }
 0xa6e   :  { %9954 = vsyncpa [#allocation9], 1 }
 0xa6f   :  { %9955 = vsyncpa [#allocation12], 1 }
 0xa70   :  { %9956 = vsyncpa [#allocation15], 1 }
 0xa71   :  { %9957 = vsyncpa [#allocation18], 1 }
 0xa72   :  { %9958 = vsyncpa [#allocation21], 1 }
 0xa73   :  { %9959 = vsyncpa [#allocation24], 1 }
 0xa74   :  { %9960 = vsyncpa [#allocation27], 1 }
 0xa75   :  { %9961 = vsyncpa [#allocation4], 1 }
 0xa76   :  { %9962 = vsyncpa [#allocation31], 1 }

</bundles_post_ra>
